<compile_context>
chip_gen: v7x
topology: tpu7x:2x2x1
jax: 0.10.0
libtpu: 0.0.40
codegen_flags: <defaults>
</compile_context>

<pallas_src>
import numpy as np
import jax
import jax.numpy as jnp
from jax import lax
from jax.experimental import pallas as pl
from jax.experimental.pallas import tpu as pltpu

# ----------------------------------------------------------------------------
# Small synthetic configuration consistent with the module's forward pass.
# ----------------------------------------------------------------------------
N_SPOT = 8                         # number of spots (graph nodes / patches)
C = 8                              # `channel`
K = 3                              # convmixer `kernel_size`
PAD = (K - 1) // 2
H, W = 16, 8                       # spatial dims of each patch feature map
HW = H * W                         # 128  -> lane axis in the conv stage
DIM = (C // 8) * H * W             # 128  (feature dim after `down` + Flatten)
HEADS = 2
DIM_HEAD = 32
INNER = HEADS * DIM_HEAD           # 64
MLP_DIM = 128
DEPTH1, DEPTH2, DEPTH3 = 1, 1, 2
BN_EPS = 1e-5
LN_EPS = 1e-5

assert DIM == HW * (C // 8)
assert MLP_DIM == DIM              # required by the packed row-vector layout

# tap t = dh*K + dw  <->  spatial offset (oh, ow) = (dh-PAD, dw-PAD)
_TAPS = [(dh - PAD, dw - PAD) for dh in range(K) for dw in range(K)]
_CENTER = PAD * K + PAD


# ----------------------------------------------------------------------------
# Packed-scalar (SMEM) layout, shared by the host packer and the kernel.
# ----------------------------------------------------------------------------
def _scalar_offsets():
    blocks, o = [], 0
    for _ in range(DEPTH1):
        blk = {}
        blk["dw1_w"] = o; o += K * K * C
        blk["dw1_s"] = o; o += C
        blk["dw1_t"] = o; o += C
        blk["dw2_w"] = o; o += K * K * C
        blk["dw2_s"] = o; o += C
        blk["dw2_t"] = o; o += C
        blk["pw_w"] = o; o += C * C
        blk["pw_b"] = o; o += C
        blk["pw_s"] = o; o += C
        blk["pw_t"] = o; o += C
        blocks.append(blk)
    glob = {"down_w": o}; o += C
    glob["down_b"] = o; o += 1
    return blocks, glob, o


SCAL_BLOCKS, SCAL_GLOBAL, SCAL_LEN = _scalar_offsets()
N_IN = 7 + 4 * DEPTH2 + DEPTH3 + 1        # kernel input-ref count


# ----------------------------------------------------------------------------
# In-kernel math helpers (all f32 on the VPU/EUP).
# ----------------------------------------------------------------------------
def _gelu(x):
    # TODO(synk): nn.GELU() default is the exact erf-based GELU; erf has no
    # clean Pallas TPU lowering, so the tanh approximation is used (~1e-3 err).
    c = 0.7978845608028654  # sqrt(2/pi)
    return 0.5 * x * (1.0 + jnp.tanh(c * (x + 0.044715 * x * x * x)))


def _sigmoid(x):
    return 1.0 / (1.0 + jnp.exp(-x))


def _layernorm(x, gamma, beta, eps=LN_EPS):
    mu = jnp.mean(x, axis=-1, keepdims=True)
    var = jnp.mean((x - mu) * (x - mu), axis=-1, keepdims=True)
    return (x - mu) * lax.rsqrt(var + eps) * gamma + beta


# ----------------------------------------------------------------------------
# The fused forward kernel.
# refs = (14 inputs..., out_ref, lstm_w_vmem scratch, lstm dma sem scratch)
# ----------------------------------------------------------------------------
def fused_forward_kernel(*refs):
    in_refs = refs[:N_IN]
    o_ref = refs[N_IN]
    lstm_w_vmem = refs[N_IN + 1]
    lstm_sem = refs[N_IN + 2]

    (x_ref, ct_ref, adj_ref, mask_ref, scal_ref, vrow_ref, lstmb_ref) = in_refs[:7]
    attn_w = in_refs[7:7 + 4 * DEPTH2]
    gs_w = in_refs[7 + 4 * DEPTH2:7 + 4 * DEPTH2 + DEPTH3]
    lstm_w_hbm = in_refs[7 + 4 * DEPTH2 + DEPTH3]

    # Kick off the LSTM-weight HBM->VMEM copy now; wait only just before the
    # jknet stage so the conv / attention / GraphSAGE compute hides it.
    lstm_cp = pltpu.make_async_copy(lstm_w_hbm, lstm_w_vmem, lstm_sem.at[0])
    lstm_cp.start()

    # ---------------- layer1: convmixer blocks on (C, N, HW) ----------------
    masks = [mask_ref[t] for t in range(K * K)]     # each (N, HW), hoisted
    xs = [x_ref[c] for c in range(C)]               # per-channel (N, HW) vregs

    def dw_conv_bn_gelu(xs_in, w_off, s_off, t_off):
        # Depthwise 'same' 3x3 conv: per tap a lane roll (XLU) + mask mult +
        # SMEM-scalar FMA (VPU).  Center tap needs no roll and no mask.
        accs = [xs_in[c] * scal_ref[w_off + _CENTER * C + c] for c in range(C)]
        for t, (oh, ow) in enumerate(_TAPS):
            sft = oh * W + ow
            if sft == 0:
                continue
            shift = (-sft) % HW                     # rolled[p] = x[p + sft]
            for c in range(C):
                rolled = pltpu.roll(xs_in[c], shift, 1) * masks[t]
                accs[c] = accs[c] + rolled * scal_ref[w_off + t * C + c]
        # eval-mode BN (conv bias folded into shift) + GELU
        return [_gelu(accs[c] * scal_ref[s_off + c] + scal_ref[t_off + c])
                for c in range(C)]

    def pw_conv_gelu_bn(zs, w_off, b_off, s_off, t_off):
        # 1x1 pointwise conv (C -> C) as pure VPU scalar-FMAs on (N, HW) vregs.
        outs = []
        for co in range(C):
            acc = zs[0] * scal_ref[w_off + co]
            for ci in range(1, C):
                acc = acc + zs[ci] * scal_ref[w_off + ci * C + co]
            acc = acc + scal_ref[b_off + co]
            outs.append(_gelu(acc) * scal_ref[s_off + co] + scal_ref[t_off + co])
        return outs

    for blk in SCAL_BLOCKS:
        ys = dw_conv_bn_gelu(xs, blk["dw1_w"], blk["dw1_s"], blk["dw1_t"])
        ys = dw_conv_bn_gelu(ys, blk["dw2_w"], blk["dw2_s"], blk["dw2_t"])
        zs = [ys[c] + xs[c] for c in range(C)]      # residual: dw(x) + x
        xs = pw_conv_gelu_bn(zs, blk["pw_w"], blk["pw_b"], blk["pw_s"], blk["pw_t"])

    # -------- down: 1x1 conv C -> C//8 (=1) + Flatten, lane-dense output ----
    g = xs[0] * scal_ref[SCAL_GLOBAL["down_w"] + 0]
    for c in range(1, C):
        g = g + xs[c] * scal_ref[SCAL_GLOBAL["down_w"] + c]
    g = g + scal_ref[SCAL_GLOBAL["down_b"]]          # (N, HW) == (N, DIM)

    # ---------------- layer2: transformer attn blocks on (N, DIM) -----------
    g = g + ct_ref[...]
    scale = DIM_HEAD ** -0.5
    for d in range(DEPTH2):
        wqkv, wo, w1, w2 = attn_w[4 * d:4 * d + 4]
        r = 7 * d
        ln1_g = vrow_ref[r + 0:r + 1, :]
        ln1_b = vrow_ref[r + 1:r + 2, :]
        bo = vrow_ref[r + 2:r + 3, :]
        ln2_g = vrow_ref[r + 3:r + 4, :]
        ln2_b = vrow_ref[r + 4:r + 5, :]
        b1 = vrow_ref[r + 5:r + 6, :]
        b2 = vrow_ref[r + 6:r + 7, :]

        # PreNorm + multi-head self-attention
        y = _layernorm(g, ln1_g, ln1_b)
        qkv = jnp.dot(y.astype(jnp.bfloat16), wqkv[...],
                      preferred_element_type=jnp.float32)          # (N, 3*INNER)
        heads_out = []
        for hd in range(HEADS):
            lo = hd * DIM_HEAD
            q = qkv[:, lo:lo + DIM_HEAD].astype(jnp.bfloat16)
            k = qkv[:, INNER + lo:INNER + lo + DIM_HEAD].astype(jnp.bfloat16)
            v = qkv[:, 2 * INNER + lo:2 * INNER + lo + DIM_HEAD].astype(jnp.bfloat16)
            dots = lax.dot_general(q, k, (((1,), (1,)), ((), ())),
                                   preferred_element_type=jnp.float32) * scale
            dots = dots - jnp.max(dots, axis=-1, keepdims=True)
            e = jnp.exp(dots)
            attn = (e / jnp.sum(e, axis=-1, keepdims=True)).astype(jnp.bfloat16)
            heads_out.append(jnp.dot(attn, v, preferred_element_type=jnp.float32))
        o_cat = jnp.concatenate(heads_out, axis=1).astype(jnp.bfloat16)  # (N, INNER)
        g = g + jnp.dot(o_cat, wo[...], preferred_element_type=jnp.float32) + bo

        # PreNorm + FeedForward
        y = _layernorm(g, ln2_g, ln2_b)
        hdn = _gelu(jnp.dot(y.astype(jnp.bfloat16), w1[...],
                            preferred_element_type=jnp.float32) + b1)
        g = g + jnp.dot(hdn.astype(jnp.bfloat16), w2[...],
                        preferred_element_type=jnp.float32) + b2

    # --------------- layer3: GraphSAGE blocks (mean, gcn=True) --------------
    adj = adj_ref[...]                                   # (N, N)
    deg = jnp.sum(adj, axis=1, keepdims=True)
    # exact division (PyTorch adj.div(num_neigh)); deg clamp only guards the
    # degenerate zero-degree row (self-loops guarantee deg >= 1 here).
    norm_adj = (adj / jnp.maximum(deg, 1e-12)).astype(jnp.bfloat16)
    jk = []
    for d in range(DEPTH3):
        neigh = jnp.dot(norm_adj, g.astype(jnp.bfloat16),
                        preferred_element_type=jnp.float32)
        hgs = jnp.maximum(
            jnp.dot(neigh.astype(jnp.bfloat16), gs_w[d][...],
                    preferred_element_type=jnp.float32), 0.0)
        ss = jnp.sum(hgs * hgs, axis=1, keepdims=True)
        g = hgs * lax.rsqrt(jnp.maximum(ss, 1e-24))      # F.normalize(p=2, dim=1)
        jk.append(g)

    # ---------- jknet: 2-layer LSTM over the T=DEPTH3 stack, mean over T ----
    lstm_cp.wait()                                       # bf16 weights now in VMEM

    def lstm_layer(seq, w_ih, w_hh, bias):
        # Hoist the input-to-hidden projection of all T steps into one dot;
        # only the (N, DIM)x(DIM, 4*DIM) recurrent dot stays on the serial chain.
        xs_all = jnp.concatenate(seq, axis=0).astype(jnp.bfloat16)   # (T*N, DIM)
        gx_all = jnp.dot(xs_all, w_ih, preferred_element_type=jnp.float32) + bias
        h = jnp.zeros((N_SPOT, DIM), jnp.float32)
        cst = jnp.zeros((N_SPOT, DIM), jnp.float32)
        outs = []
        for t in range(len(seq)):
            gates = gx_all[t * N_SPOT:(t + 1) * N_SPOT] + jnp.dot(
                h.astype(jnp.bfloat16), w_hh, preferred_element_type=jnp.float32)
            i = _sigmoid(gates[:, 0 * DIM:1 * DIM])
            f = _sigmoid(gates[:, 1 * DIM:2 * DIM])
            gg = jnp.tanh(gates[:, 2 * DIM:3 * DIM])
            o = _sigmoid(gates[:, 3 * DIM:4 * DIM])
            cst = f * cst + i * gg
            h = o * jnp.tanh(cst)
            outs.append(h)
        return outs

    w_ih0 = lstm_w_vmem[0]
    w_hh0 = lstm_w_vmem[1]
    w_ih1 = lstm_w_vmem[2]
    w_hh1 = lstm_w_vmem[3]
    b0 = lstmb_ref[0:1, :]
    b1_l = lstmb_ref[1:2, :]
    seq = lstm_layer(jk, w_ih0, w_hh0, b0)
    seq = lstm_layer(seq, w_ih1, w_hh1, b1_l)            # SelectItem(0) = layer-2 outs
    o_ref[...] = sum(seq) * (1.0 / DEPTH3)               # .mean(0) over time


# ----------------------------------------------------------------------------
# Host-side parameter construction (folded BN, packed scalars / row vectors).
# ----------------------------------------------------------------------------
def _conv_tap_masks():
    """mask[t, p] = 1 if spatial neighbor at tap t of lane p is inside the image."""
    m = np.zeros((K * K, HW), np.float32)
    for dh in range(K):
        for dw in range(K):
            oh, ow = dh - PAD, dw - PAD
            for p in range(HW):
                hh, ww = divmod(p, W)
                m[dh * K + dw, p] = float(0 <= hh + oh < H and 0 <= ww + ow < W)
    return m


_MASKS_NP = _conv_tap_masks()                            # (K*K, HW)


def init_params(key):
    kit = iter(jax.random.split(key, 64))

    def nrm(shape, s):
        return jax.random.normal(next(kit), shape, jnp.float32) * s

    def bn_fold(c, conv_bias=None):
        gamma = 1.0 + nrm((c,), 0.1)
        beta = nrm((c,), 0.1)
        mean = nrm((c,), 0.1)
        var = 1.0 + jnp.abs(nrm((c,), 0.1))
        scale = gamma / jnp.sqrt(var + BN_EPS)
        shift = beta - mean * scale
        if conv_bias is not None:
            shift = shift + conv_bias * scale
        return scale, shift

    p = {}

    # ---- packed conv/BN/down scalars (SMEM) --------------------------------
    scal_parts = []
    for _ in range(DEPTH1):
        for _name in ("dw1", "dw2"):
            w = nrm((K * K, C), 0.15)                    # depthwise taps [t, c]
            b = nrm((C,), 0.05)
            s, t = bn_fold(C, conv_bias=b)
            scal_parts += [w.reshape(-1), s, t]
        pw_w = nrm((C, C), 0.2)                          # [cin, cout]
        pw_b = nrm((C,), 0.05)
        pw_s, pw_t = bn_fold(C)
        scal_parts += [pw_w.reshape(-1), pw_b, pw_s, pw_t]
    scal_parts += [nrm((C,), 0.2), nrm((1,), 0.05)]      # down_w, down_b
    p["scal"] = jnp.concatenate(scal_parts)
    assert p["scal"].shape[0] == SCAL_LEN

    # ---- packed row vectors + bf16 MXU weights (layer2) --------------------
    vrows, attn_ws = [], []
    for _ in range(DEPTH2):
        vrows += [1.0 + nrm((DIM,), 0.05), nrm((DIM,), 0.05),      # ln1 g/b
                  nrm((DIM,), 0.02),                               # bo
                  1.0 + nrm((DIM,), 0.05), nrm((DIM,), 0.05),      # ln2 g/b
                  nrm((MLP_DIM,), 0.02), nrm((DIM,), 0.02)]        # b1, b2
        attn_ws += [nrm((DIM, 3 * INNER), 0.05).astype(jnp.bfloat16),   # to_qkv^T
                    nrm((INNER, DIM), 0.05).astype(jnp.bfloat16),       # to_out^T
                    nrm((DIM, MLP_DIM), 0.05).astype(jnp.bfloat16),     # ff w1^T
                    nrm((MLP_DIM, DIM), 0.05).astype(jnp.bfloat16)]     # ff w2^T
    p["vrow"] = jnp.stack(vrows)                          # (7*DEPTH2, DIM)
    p["attn_ws"] = attn_ws

    # ---- layer3 GraphSAGE weights (weight.T, bf16) --------------------------
    p["gs_ws"] = [nrm((DIM, DIM), 0.05).astype(jnp.bfloat16) for _ in range(DEPTH3)]

    # ---- jknet: nn.LSTM(dim, dim, 2); W_ih^T / W_hh^T bf16, b_ih+b_hh f32 ---
    s = 1.0 / (DIM ** 0.5)
    lstm_ws, lstm_bs = [], []
    for _layer in range(2):
        lstm_ws += [nrm((DIM, 4 * DIM), s), nrm((DIM, 4 * DIM), s)]
        lstm_bs.append(nrm((4 * DIM,), s) + nrm((4 * DIM,), s))
    p["lstm_w"] = jnp.stack(lstm_ws).astype(jnp.bfloat16)  # (4, DIM, 4*DIM), HBM
    p["lstm_b"] = jnp.stack(lstm_bs)                        # (2, 4*DIM)
    return p


# ----------------------------------------------------------------------------
# Forward wrapper: one fused pallas_call; small params packed, big LSTM
# weights left in HBM and overlapped with compute via manual DMA.
# ----------------------------------------------------------------------------
def mixer_transformer_forward(x_nchw, ct, adj, params):
    n, c, h, w = x_nchw.shape
    # NCHW -> (C, N, H*W): channel on the leading axis, HW=128 on the lane axis.
    x_cnhw = jnp.transpose(x_nchw.reshape(n, c, h * w), (1, 0, 2)).astype(jnp.float32)
    ct2 = ct.reshape(n, DIM).astype(jnp.float32)
    masks_b = jnp.broadcast_to(jnp.asarray(_MASKS_NP)[:, None, :],
                               (K * K, n, HW)).astype(jnp.float32)

    args = [x_cnhw, ct2, adj.astype(jnp.float32), masks_b,
            params["scal"], params["vrow"], params["lstm_b"],
            *params["attn_ws"], *params["gs_ws"], params["lstm_w"]]

    vmem = lambda: pl.BlockSpec(memory_space=pltpu.MemorySpace.VMEM)
    smem = lambda: pl.BlockSpec(memory_space=pltpu.MemorySpace.SMEM)
    in_specs = ([vmem(), vmem(), vmem(), vmem(), smem(), vmem(), vmem()]
                + [vmem() for _ in range(4 * DEPTH2 + DEPTH3)]
                + [pl.BlockSpec(memory_space=pl.ANY)])   # LSTM weights stay in HBM

    return pl.pallas_call(
        fused_forward_kernel,
        out_shape=jax.ShapeDtypeStruct((n, DIM), jnp.float32),
        in_specs=in_specs,
        out_specs=pl.BlockSpec(memory_space=pltpu.MemorySpace.VMEM),
        scratch_shapes=[
            pltpu.VMEM((4, DIM, 4 * DIM), jnp.bfloat16),  # LSTM weight landing buffer
            pltpu.SemaphoreType.DMA((1,)),
        ],
    )(*args)


# ----------------------------------------------------------------------------
if __name__ == "__main__":
    key = jax.random.PRNGKey(0)
    kx, kc, ka, kp = jax.random.split(key, 4)
    x = jax.random.normal(kx, (N_SPOT, C, H, W), jnp.float32)        # NCHW like PyTorch
    ct = jax.random.normal(kc, (1, N_SPOT, DIM), jnp.float32)
    u = jax.random.uniform(ka, (N_SPOT, N_SPOT))
    adj = ((u + u.T) > 1.0).astype(jnp.float32)
    adj = jnp.maximum(adj, jnp.eye(N_SPOT, dtype=jnp.float32))       # self-loops
    params = init_params(kp)

    fwd = jax.jit(mixer_transformer_forward)
    out = fwd(x, ct, adj, params)
    out = jax.block_until_ready(out)
    assert out.shape == (N_SPOT, DIM), out.shape
    assert bool(jnp.all(jnp.isfinite(out)))
    print("KERNEL_OK")
</pallas_src>

<mosaic_0001>
module attributes {stable_mosaic.version = 11 : i64} {
  func.func @fused_forward_kernel(%arg0: memref<8x8x128xf32, #tpu.memory_space<vmem>>, %arg1: memref<8x128xf32, #tpu.memory_space<vmem>>, %arg2: memref<8x8xf32, #tpu.memory_space<vmem>>, %arg3: memref<9x8x128xf32, #tpu.memory_space<vmem>>, %arg4: memref<273xf32, #tpu.memory_space<smem>>, %arg5: memref<7x128xf32, #tpu.memory_space<vmem>>, %arg6: memref<2x512xf32, #tpu.memory_space<vmem>>, %arg7: memref<128x192xbf16, #tpu.memory_space<vmem>>, %arg8: memref<64x128xbf16, #tpu.memory_space<vmem>>, %arg9: memref<128x128xbf16, #tpu.memory_space<vmem>>, %arg10: memref<128x128xbf16, #tpu.memory_space<vmem>>, %arg11: memref<128x128xbf16, #tpu.memory_space<vmem>>, %arg12: memref<128x128xbf16, #tpu.memory_space<vmem>>, %arg13: memref<4x128x512xbf16, #tpu.memory_space<any>>, %arg14: memref<8x128xf32, #tpu.memory_space<vmem>>, %arg15: memref<4x128x512xbf16, #tpu.memory_space<vmem>>, %arg16: memref<1x!tpu.dma_semaphore, #tpu.memory_space<semaphore_mem>>) attributes {dimension_semantics = [], scalar_prefetch = 0 : i64, scratch_operands = 2 : i64, tpu.core_type = #tpu.core_type<tc>} {
    %c0_i32 = arith.constant 0 : i32
    %0 = tpu.memref_slice %arg16[%c0_i32] : memref<1x!tpu.dma_semaphore, #tpu.memory_space<semaphore_mem>> -> memref<1x!tpu.dma_semaphore, #tpu.memory_space<semaphore_mem>>
    %1 = tpu.memref_squeeze %0 : memref<1x!tpu.dma_semaphore, #tpu.memory_space<semaphore_mem>> -> memref<!tpu.dma_semaphore, #tpu.memory_space<semaphore_mem>>
    tpu.enqueue_dma source(%arg13 : memref<4x128x512xbf16, #tpu.memory_space<any>>) target(%arg15 : memref<4x128x512xbf16, #tpu.memory_space<vmem>>) target_semaphore(%1 : memref<!tpu.dma_semaphore, #tpu.memory_space<semaphore_mem>>)
    %c0 = arith.constant 0 : index
    %c0_0 = arith.constant 0 : index
    %c0_1 = arith.constant 0 : index
    %2 = vector.load %arg3[%c0, %c0_0, %c0_1] : memref<9x8x128xf32, #tpu.memory_space<vmem>>, vector<1x8x128xf32>
    %3 = vector.shape_cast %2 : vector<1x8x128xf32> to vector<8x128xf32>
    %c1 = arith.constant 1 : index
    %c0_2 = arith.constant 0 : index
    %c0_3 = arith.constant 0 : index
    %4 = vector.load %arg3[%c1, %c0_2, %c0_3] : memref<9x8x128xf32, #tpu.memory_space<vmem>>, vector<1x8x128xf32>
    %5 = vector.shape_cast %4 : vector<1x8x128xf32> to vector<8x128xf32>
    %c2 = arith.constant 2 : index
    %c0_4 = arith.constant 0 : index
    %c0_5 = arith.constant 0 : index
    %6 = vector.load %arg3[%c2, %c0_4, %c0_5] : memref<9x8x128xf32, #tpu.memory_space<vmem>>, vector<1x8x128xf32>
    %7 = vector.shape_cast %6 : vector<1x8x128xf32> to vector<8x128xf32>
    %c3 = arith.constant 3 : index
    %c0_6 = arith.constant 0 : index
    %c0_7 = arith.constant 0 : index
    %8 = vector.load %arg3[%c3, %c0_6, %c0_7] : memref<9x8x128xf32, #tpu.memory_space<vmem>>, vector<1x8x128xf32>
    %9 = vector.shape_cast %8 : vector<1x8x128xf32> to vector<8x128xf32>
    %c5 = arith.constant 5 : index
    %c0_8 = arith.constant 0 : index
    %c0_9 = arith.constant 0 : index
    %10 = vector.load %arg3[%c5, %c0_8, %c0_9] : memref<9x8x128xf32, #tpu.memory_space<vmem>>, vector<1x8x128xf32>
    %11 = vector.shape_cast %10 : vector<1x8x128xf32> to vector<8x128xf32>
    %c6 = arith.constant 6 : index
    %c0_10 = arith.constant 0 : index
    %c0_11 = arith.constant 0 : index
    %12 = vector.load %arg3[%c6, %c0_10, %c0_11] : memref<9x8x128xf32, #tpu.memory_space<vmem>>, vector<1x8x128xf32>
    %13 = vector.shape_cast %12 : vector<1x8x128xf32> to vector<8x128xf32>
    %c7 = arith.constant 7 : index
    %c0_12 = arith.constant 0 : index
    %c0_13 = arith.constant 0 : index
    %14 = vector.load %arg3[%c7, %c0_12, %c0_13] : memref<9x8x128xf32, #tpu.memory_space<vmem>>, vector<1x8x128xf32>
    %15 = vector.shape_cast %14 : vector<1x8x128xf32> to vector<8x128xf32>
    %c8 = arith.constant 8 : index
    %c0_14 = arith.constant 0 : index
    %c0_15 = arith.constant 0 : index
    %16 = vector.load %arg3[%c8, %c0_14, %c0_15] : memref<9x8x128xf32, #tpu.memory_space<vmem>>, vector<1x8x128xf32>
    %17 = vector.shape_cast %16 : vector<1x8x128xf32> to vector<8x128xf32>
    %c0_16 = arith.constant 0 : index
    %c0_17 = arith.constant 0 : index
    %c0_18 = arith.constant 0 : index
    %18 = vector.load %arg0[%c0_16, %c0_17, %c0_18] : memref<8x8x128xf32, #tpu.memory_space<vmem>>, vector<1x8x128xf32>
    %19 = vector.shape_cast %18 : vector<1x8x128xf32> to vector<8x128xf32>
    %c1_19 = arith.constant 1 : index
    %c0_20 = arith.constant 0 : index
    %c0_21 = arith.constant 0 : index
    %20 = vector.load %arg0[%c1_19, %c0_20, %c0_21] : memref<8x8x128xf32, #tpu.memory_space<vmem>>, vector<1x8x128xf32>
    %21 = vector.shape_cast %20 : vector<1x8x128xf32> to vector<8x128xf32>
    %c2_22 = arith.constant 2 : index
    %c0_23 = arith.constant 0 : index
    %c0_24 = arith.constant 0 : index
    %22 = vector.load %arg0[%c2_22, %c0_23, %c0_24] : memref<8x8x128xf32, #tpu.memory_space<vmem>>, vector<1x8x128xf32>
    %23 = vector.shape_cast %22 : vector<1x8x128xf32> to vector<8x128xf32>
    %c3_25 = arith.constant 3 : index
    %c0_26 = arith.constant 0 : index
    %c0_27 = arith.constant 0 : index
    %24 = vector.load %arg0[%c3_25, %c0_26, %c0_27] : memref<8x8x128xf32, #tpu.memory_space<vmem>>, vector<1x8x128xf32>
    %25 = vector.shape_cast %24 : vector<1x8x128xf32> to vector<8x128xf32>
    %c4 = arith.constant 4 : index
    %c0_28 = arith.constant 0 : index
    %c0_29 = arith.constant 0 : index
    %26 = vector.load %arg0[%c4, %c0_28, %c0_29] : memref<8x8x128xf32, #tpu.memory_space<vmem>>, vector<1x8x128xf32>
    %27 = vector.shape_cast %26 : vector<1x8x128xf32> to vector<8x128xf32>
    %c5_30 = arith.constant 5 : index
    %c0_31 = arith.constant 0 : index
    %c0_32 = arith.constant 0 : index
    %28 = vector.load %arg0[%c5_30, %c0_31, %c0_32] : memref<8x8x128xf32, #tpu.memory_space<vmem>>, vector<1x8x128xf32>
    %29 = vector.shape_cast %28 : vector<1x8x128xf32> to vector<8x128xf32>
    %c6_33 = arith.constant 6 : index
    %c0_34 = arith.constant 0 : index
    %c0_35 = arith.constant 0 : index
    %30 = vector.load %arg0[%c6_33, %c0_34, %c0_35] : memref<8x8x128xf32, #tpu.memory_space<vmem>>, vector<1x8x128xf32>
    %31 = vector.shape_cast %30 : vector<1x8x128xf32> to vector<8x128xf32>
    %c7_36 = arith.constant 7 : index
    %c0_37 = arith.constant 0 : index
    %c0_38 = arith.constant 0 : index
    %32 = vector.load %arg0[%c7_36, %c0_37, %c0_38] : memref<8x8x128xf32, #tpu.memory_space<vmem>>, vector<1x8x128xf32>
    %33 = vector.shape_cast %32 : vector<1x8x128xf32> to vector<8x128xf32>
    %c32 = arith.constant 32 : index
    %34 = memref.load %arg4[%c32] : memref<273xf32, #tpu.memory_space<smem>>
    %35 = vector.broadcast %34 : f32 to vector<8x128xf32>
    %36 = arith.mulf %19, %35 : vector<8x128xf32>
    %c33 = arith.constant 33 : index
    %37 = memref.load %arg4[%c33] : memref<273xf32, #tpu.memory_space<smem>>
    %38 = vector.broadcast %37 : f32 to vector<8x128xf32>
    %39 = arith.mulf %21, %38 : vector<8x128xf32>
    %c34 = arith.constant 34 : index
    %40 = memref.load %arg4[%c34] : memref<273xf32, #tpu.memory_space<smem>>
    %41 = vector.broadcast %40 : f32 to vector<8x128xf32>
    %42 = arith.mulf %23, %41 : vector<8x128xf32>
    %c35 = arith.constant 35 : index
    %43 = memref.load %arg4[%c35] : memref<273xf32, #tpu.memory_space<smem>>
    %44 = vector.broadcast %43 : f32 to vector<8x128xf32>
    %45 = arith.mulf %25, %44 : vector<8x128xf32>
    %c36 = arith.constant 36 : index
    %46 = memref.load %arg4[%c36] : memref<273xf32, #tpu.memory_space<smem>>
    %47 = vector.broadcast %46 : f32 to vector<8x128xf32>
    %48 = arith.mulf %27, %47 : vector<8x128xf32>
    %c37 = arith.constant 37 : index
    %49 = memref.load %arg4[%c37] : memref<273xf32, #tpu.memory_space<smem>>
    %50 = vector.broadcast %49 : f32 to vector<8x128xf32>
    %51 = arith.mulf %29, %50 : vector<8x128xf32>
    %c38 = arith.constant 38 : index
    %52 = memref.load %arg4[%c38] : memref<273xf32, #tpu.memory_space<smem>>
    %53 = vector.broadcast %52 : f32 to vector<8x128xf32>
    %54 = arith.mulf %31, %53 : vector<8x128xf32>
    %c39 = arith.constant 39 : index
    %55 = memref.load %arg4[%c39] : memref<273xf32, #tpu.memory_space<smem>>
    %56 = vector.broadcast %55 : f32 to vector<8x128xf32>
    %57 = arith.mulf %33, %56 : vector<8x128xf32>
    %c9_i32 = arith.constant 9 : i32
    %58 = tpu.dynamic_rotate %19 by %c9_i32 dim 1 : vector<8x128xf32>, i32 -> vector<8x128xf32>
    %59 = arith.mulf %58, %3 : vector<8x128xf32>
    %c0_39 = arith.constant 0 : index
    %60 = memref.load %arg4[%c0_39] : memref<273xf32, #tpu.memory_space<smem>>
    %61 = vector.broadcast %60 : f32 to vector<8x128xf32>
    %62 = arith.mulf %59, %61 : vector<8x128xf32>
    %63 = arith.addf %36, %62 : vector<8x128xf32>
    %c9_i32_40 = arith.constant 9 : i32
    %64 = tpu.dynamic_rotate %21 by %c9_i32_40 dim 1 : vector<8x128xf32>, i32 -> vector<8x128xf32>
    %65 = arith.mulf %64, %3 : vector<8x128xf32>
    %c1_41 = arith.constant 1 : index
    %66 = memref.load %arg4[%c1_41] : memref<273xf32, #tpu.memory_space<smem>>
    %67 = vector.broadcast %66 : f32 to vector<8x128xf32>
    %68 = arith.mulf %65, %67 : vector<8x128xf32>
    %69 = arith.addf %39, %68 : vector<8x128xf32>
    %c9_i32_42 = arith.constant 9 : i32
    %70 = tpu.dynamic_rotate %23 by %c9_i32_42 dim 1 : vector<8x128xf32>, i32 -> vector<8x128xf32>
    %71 = arith.mulf %70, %3 : vector<8x128xf32>
    %c2_43 = arith.constant 2 : index
    %72 = memref.load %arg4[%c2_43] : memref<273xf32, #tpu.memory_space<smem>>
    %73 = vector.broadcast %72 : f32 to vector<8x128xf32>
    %74 = arith.mulf %71, %73 : vector<8x128xf32>
    %75 = arith.addf %42, %74 : vector<8x128xf32>
    %c9_i32_44 = arith.constant 9 : i32
    %76 = tpu.dynamic_rotate %25 by %c9_i32_44 dim 1 : vector<8x128xf32>, i32 -> vector<8x128xf32>
    %77 = arith.mulf %76, %3 : vector<8x128xf32>
    %c3_45 = arith.constant 3 : index
    %78 = memref.load %arg4[%c3_45] : memref<273xf32, #tpu.memory_space<smem>>
    %79 = vector.broadcast %78 : f32 to vector<8x128xf32>
    %80 = arith.mulf %77, %79 : vector<8x128xf32>
    %81 = arith.addf %45, %80 : vector<8x128xf32>
    %c9_i32_46 = arith.constant 9 : i32
    %82 = tpu.dynamic_rotate %27 by %c9_i32_46 dim 1 : vector<8x128xf32>, i32 -> vector<8x128xf32>
    %83 = arith.mulf %82, %3 : vector<8x128xf32>
    %c4_47 = arith.constant 4 : index
    %84 = memref.load %arg4[%c4_47] : memref<273xf32, #tpu.memory_space<smem>>
    %85 = vector.broadcast %84 : f32 to vector<8x128xf32>
    %86 = arith.mulf %83, %85 : vector<8x128xf32>
    %87 = arith.addf %48, %86 : vector<8x128xf32>
    %c9_i32_48 = arith.constant 9 : i32
    %88 = tpu.dynamic_rotate %29 by %c9_i32_48 dim 1 : vector<8x128xf32>, i32 -> vector<8x128xf32>
    %89 = arith.mulf %88, %3 : vector<8x128xf32>
    %c5_49 = arith.constant 5 : index
    %90 = memref.load %arg4[%c5_49] : memref<273xf32, #tpu.memory_space<smem>>
    %91 = vector.broadcast %90 : f32 to vector<8x128xf32>
    %92 = arith.mulf %89, %91 : vector<8x128xf32>
    %93 = arith.addf %51, %92 : vector<8x128xf32>
    %c9_i32_50 = arith.constant 9 : i32
    %94 = tpu.dynamic_rotate %31 by %c9_i32_50 dim 1 : vector<8x128xf32>, i32 -> vector<8x128xf32>
    %95 = arith.mulf %94, %3 : vector<8x128xf32>
    %c6_51 = arith.constant 6 : index
    %96 = memref.load %arg4[%c6_51] : memref<273xf32, #tpu.memory_space<smem>>
    %97 = vector.broadcast %96 : f32 to vector<8x128xf32>
    %98 = arith.mulf %95, %97 : vector<8x128xf32>
    %99 = arith.addf %54, %98 : vector<8x128xf32>
    %c9_i32_52 = arith.constant 9 : i32
    %100 = tpu.dynamic_rotate %33 by %c9_i32_52 dim 1 : vector<8x128xf32>, i32 -> vector<8x128xf32>
    %101 = arith.mulf %100, %3 : vector<8x128xf32>
    %c7_53 = arith.constant 7 : index
    %102 = memref.load %arg4[%c7_53] : memref<273xf32, #tpu.memory_space<smem>>
    %103 = vector.broadcast %102 : f32 to vector<8x128xf32>
    %104 = arith.mulf %101, %103 : vector<8x128xf32>
    %105 = arith.addf %57, %104 : vector<8x128xf32>
    %c8_i32 = arith.constant 8 : i32
    %106 = tpu.dynamic_rotate %19 by %c8_i32 dim 1 : vector<8x128xf32>, i32 -> vector<8x128xf32>
    %107 = arith.mulf %106, %5 : vector<8x128xf32>
    %c8_54 = arith.constant 8 : index
    %108 = memref.load %arg4[%c8_54] : memref<273xf32, #tpu.memory_space<smem>>
    %109 = vector.broadcast %108 : f32 to vector<8x128xf32>
    %110 = arith.mulf %107, %109 : vector<8x128xf32>
    %111 = arith.addf %63, %110 : vector<8x128xf32>
    %c8_i32_55 = arith.constant 8 : i32
    %112 = tpu.dynamic_rotate %21 by %c8_i32_55 dim 1 : vector<8x128xf32>, i32 -> vector<8x128xf32>
    %113 = arith.mulf %112, %5 : vector<8x128xf32>
    %c9 = arith.constant 9 : index
    %114 = memref.load %arg4[%c9] : memref<273xf32, #tpu.memory_space<smem>>
    %115 = vector.broadcast %114 : f32 to vector<8x128xf32>
    %116 = arith.mulf %113, %115 : vector<8x128xf32>
    %117 = arith.addf %69, %116 : vector<8x128xf32>
    %c8_i32_56 = arith.constant 8 : i32
    %118 = tpu.dynamic_rotate %23 by %c8_i32_56 dim 1 : vector<8x128xf32>, i32 -> vector<8x128xf32>
    %119 = arith.mulf %118, %5 : vector<8x128xf32>
    %c10 = arith.constant 10 : index
    %120 = memref.load %arg4[%c10] : memref<273xf32, #tpu.memory_space<smem>>
    %121 = vector.broadcast %120 : f32 to vector<8x128xf32>
    %122 = arith.mulf %119, %121 : vector<8x128xf32>
    %123 = arith.addf %75, %122 : vector<8x128xf32>
    %c8_i32_57 = arith.constant 8 : i32
    %124 = tpu.dynamic_rotate %25 by %c8_i32_57 dim 1 : vector<8x128xf32>, i32 -> vector<8x128xf32>
    %125 = arith.mulf %124, %5 : vector<8x128xf32>
    %c11 = arith.constant 11 : index
    %126 = memref.load %arg4[%c11] : memref<273xf32, #tpu.memory_space<smem>>
    %127 = vector.broadcast %126 : f32 to vector<8x128xf32>
    %128 = arith.mulf %125, %127 : vector<8x128xf32>
    %129 = arith.addf %81, %128 : vector<8x128xf32>
    %c8_i32_58 = arith.constant 8 : i32
    %130 = tpu.dynamic_rotate %27 by %c8_i32_58 dim 1 : vector<8x128xf32>, i32 -> vector<8x128xf32>
    %131 = arith.mulf %130, %5 : vector<8x128xf32>
    %c12 = arith.constant 12 : index
    %132 = memref.load %arg4[%c12] : memref<273xf32, #tpu.memory_space<smem>>
    %133 = vector.broadcast %132 : f32 to vector<8x128xf32>
    %134 = arith.mulf %131, %133 : vector<8x128xf32>
    %135 = arith.addf %87, %134 : vector<8x128xf32>
    %c8_i32_59 = arith.constant 8 : i32
    %136 = tpu.dynamic_rotate %29 by %c8_i32_59 dim 1 : vector<8x128xf32>, i32 -> vector<8x128xf32>
    %137 = arith.mulf %136, %5 : vector<8x128xf32>
    %c13 = arith.constant 13 : index
    %138 = memref.load %arg4[%c13] : memref<273xf32, #tpu.memory_space<smem>>
    %139 = vector.broadcast %138 : f32 to vector<8x128xf32>
    %140 = arith.mulf %137, %139 : vector<8x128xf32>
    %141 = arith.addf %93, %140 : vector<8x128xf32>
    %c8_i32_60 = arith.constant 8 : i32
    %142 = tpu.dynamic_rotate %31 by %c8_i32_60 dim 1 : vector<8x128xf32>, i32 -> vector<8x128xf32>
    %143 = arith.mulf %142, %5 : vector<8x128xf32>
    %c14 = arith.constant 14 : index
    %144 = memref.load %arg4[%c14] : memref<273xf32, #tpu.memory_space<smem>>
    %145 = vector.broadcast %144 : f32 to vector<8x128xf32>
    %146 = arith.mulf %143, %145 : vector<8x128xf32>
    %147 = arith.addf %99, %146 : vector<8x128xf32>
    %c8_i32_61 = arith.constant 8 : i32
    %148 = tpu.dynamic_rotate %33 by %c8_i32_61 dim 1 : vector<8x128xf32>, i32 -> vector<8x128xf32>
    %149 = arith.mulf %148, %5 : vector<8x128xf32>
    %c15 = arith.constant 15 : index
    %150 = memref.load %arg4[%c15] : memref<273xf32, #tpu.memory_space<smem>>
    %151 = vector.broadcast %150 : f32 to vector<8x128xf32>
    %152 = arith.mulf %149, %151 : vector<8x128xf32>
    %153 = arith.addf %105, %152 : vector<8x128xf32>
    %c7_i32 = arith.constant 7 : i32
    %154 = tpu.dynamic_rotate %19 by %c7_i32 dim 1 : vector<8x128xf32>, i32 -> vector<8x128xf32>
    %155 = arith.mulf %154, %7 : vector<8x128xf32>
    %c16 = arith.constant 16 : index
    %156 = memref.load %arg4[%c16] : memref<273xf32, #tpu.memory_space<smem>>
    %157 = vector.broadcast %156 : f32 to vector<8x128xf32>
    %158 = arith.mulf %155, %157 : vector<8x128xf32>
    %159 = arith.addf %111, %158 : vector<8x128xf32>
    %c7_i32_62 = arith.constant 7 : i32
    %160 = tpu.dynamic_rotate %21 by %c7_i32_62 dim 1 : vector<8x128xf32>, i32 -> vector<8x128xf32>
    %161 = arith.mulf %160, %7 : vector<8x128xf32>
    %c17 = arith.constant 17 : index
    %162 = memref.load %arg4[%c17] : memref<273xf32, #tpu.memory_space<smem>>
    %163 = vector.broadcast %162 : f32 to vector<8x128xf32>
    %164 = arith.mulf %161, %163 : vector<8x128xf32>
    %165 = arith.addf %117, %164 : vector<8x128xf32>
    %c7_i32_63 = arith.constant 7 : i32
    %166 = tpu.dynamic_rotate %23 by %c7_i32_63 dim 1 : vector<8x128xf32>, i32 -> vector<8x128xf32>
    %167 = arith.mulf %166, %7 : vector<8x128xf32>
    %c18 = arith.constant 18 : index
    %168 = memref.load %arg4[%c18] : memref<273xf32, #tpu.memory_space<smem>>
    %169 = vector.broadcast %168 : f32 to vector<8x128xf32>
    %170 = arith.mulf %167, %169 : vector<8x128xf32>
    %171 = arith.addf %123, %170 : vector<8x128xf32>
    %c7_i32_64 = arith.constant 7 : i32
    %172 = tpu.dynamic_rotate %25 by %c7_i32_64 dim 1 : vector<8x128xf32>, i32 -> vector<8x128xf32>
    %173 = arith.mulf %172, %7 : vector<8x128xf32>
    %c19 = arith.constant 19 : index
    %174 = memref.load %arg4[%c19] : memref<273xf32, #tpu.memory_space<smem>>
    %175 = vector.broadcast %174 : f32 to vector<8x128xf32>
    %176 = arith.mulf %173, %175 : vector<8x128xf32>
    %177 = arith.addf %129, %176 : vector<8x128xf32>
    %c7_i32_65 = arith.constant 7 : i32
    %178 = tpu.dynamic_rotate %27 by %c7_i32_65 dim 1 : vector<8x128xf32>, i32 -> vector<8x128xf32>
    %179 = arith.mulf %178, %7 : vector<8x128xf32>
    %c20 = arith.constant 20 : index
    %180 = memref.load %arg4[%c20] : memref<273xf32, #tpu.memory_space<smem>>
    %181 = vector.broadcast %180 : f32 to vector<8x128xf32>
    %182 = arith.mulf %179, %181 : vector<8x128xf32>
    %183 = arith.addf %135, %182 : vector<8x128xf32>
    %c7_i32_66 = arith.constant 7 : i32
    %184 = tpu.dynamic_rotate %29 by %c7_i32_66 dim 1 : vector<8x128xf32>, i32 -> vector<8x128xf32>
    %185 = arith.mulf %184, %7 : vector<8x128xf32>
    %c21 = arith.constant 21 : index
    %186 = memref.load %arg4[%c21] : memref<273xf32, #tpu.memory_space<smem>>
    %187 = vector.broadcast %186 : f32 to vector<8x128xf32>
    %188 = arith.mulf %185, %187 : vector<8x128xf32>
    %189 = arith.addf %141, %188 : vector<8x128xf32>
    %c7_i32_67 = arith.constant 7 : i32
    %190 = tpu.dynamic_rotate %31 by %c7_i32_67 dim 1 : vector<8x128xf32>, i32 -> vector<8x128xf32>
    %191 = arith.mulf %190, %7 : vector<8x128xf32>
    %c22 = arith.constant 22 : index
    %192 = memref.load %arg4[%c22] : memref<273xf32, #tpu.memory_space<smem>>
    %193 = vector.broadcast %192 : f32 to vector<8x128xf32>
    %194 = arith.mulf %191, %193 : vector<8x128xf32>
    %195 = arith.addf %147, %194 : vector<8x128xf32>
    %c7_i32_68 = arith.constant 7 : i32
    %196 = tpu.dynamic_rotate %33 by %c7_i32_68 dim 1 : vector<8x128xf32>, i32 -> vector<8x128xf32>
    %197 = arith.mulf %196, %7 : vector<8x128xf32>
    %c23 = arith.constant 23 : index
    %198 = memref.load %arg4[%c23] : memref<273xf32, #tpu.memory_space<smem>>
    %199 = vector.broadcast %198 : f32 to vector<8x128xf32>
    %200 = arith.mulf %197, %199 : vector<8x128xf32>
    %201 = arith.addf %153, %200 : vector<8x128xf32>
    %c1_i32 = arith.constant 1 : i32
    %202 = tpu.dynamic_rotate %19 by %c1_i32 dim 1 : vector<8x128xf32>, i32 -> vector<8x128xf32>
    %203 = arith.mulf %202, %9 : vector<8x128xf32>
    %c24 = arith.constant 24 : index
    %204 = memref.load %arg4[%c24] : memref<273xf32, #tpu.memory_space<smem>>
    %205 = vector.broadcast %204 : f32 to vector<8x128xf32>
    %206 = arith.mulf %203, %205 : vector<8x128xf32>
    %207 = arith.addf %159, %206 : vector<8x128xf32>
    %c1_i32_69 = arith.constant 1 : i32
    %208 = tpu.dynamic_rotate %21 by %c1_i32_69 dim 1 : vector<8x128xf32>, i32 -> vector<8x128xf32>
    %209 = arith.mulf %208, %9 : vector<8x128xf32>
    %c25 = arith.constant 25 : index
    %210 = memref.load %arg4[%c25] : memref<273xf32, #tpu.memory_space<smem>>
    %211 = vector.broadcast %210 : f32 to vector<8x128xf32>
    %212 = arith.mulf %209, %211 : vector<8x128xf32>
    %213 = arith.addf %165, %212 : vector<8x128xf32>
    %c1_i32_70 = arith.constant 1 : i32
    %214 = tpu.dynamic_rotate %23 by %c1_i32_70 dim 1 : vector<8x128xf32>, i32 -> vector<8x128xf32>
    %215 = arith.mulf %214, %9 : vector<8x128xf32>
    %c26 = arith.constant 26 : index
    %216 = memref.load %arg4[%c26] : memref<273xf32, #tpu.memory_space<smem>>
    %217 = vector.broadcast %216 : f32 to vector<8x128xf32>
    %218 = arith.mulf %215, %217 : vector<8x128xf32>
    %219 = arith.addf %171, %218 : vector<8x128xf32>
    %c1_i32_71 = arith.constant 1 : i32
    %220 = tpu.dynamic_rotate %25 by %c1_i32_71 dim 1 : vector<8x128xf32>, i32 -> vector<8x128xf32>
    %221 = arith.mulf %220, %9 : vector<8x128xf32>
    %c27 = arith.constant 27 : index
    %222 = memref.load %arg4[%c27] : memref<273xf32, #tpu.memory_space<smem>>
    %223 = vector.broadcast %222 : f32 to vector<8x128xf32>
    %224 = arith.mulf %221, %223 : vector<8x128xf32>
    %225 = arith.addf %177, %224 : vector<8x128xf32>
    %c1_i32_72 = arith.constant 1 : i32
    %226 = tpu.dynamic_rotate %27 by %c1_i32_72 dim 1 : vector<8x128xf32>, i32 -> vector<8x128xf32>
    %227 = arith.mulf %226, %9 : vector<8x128xf32>
    %c28 = arith.constant 28 : index
    %228 = memref.load %arg4[%c28] : memref<273xf32, #tpu.memory_space<smem>>
    %229 = vector.broadcast %228 : f32 to vector<8x128xf32>
    %230 = arith.mulf %227, %229 : vector<8x128xf32>
    %231 = arith.addf %183, %230 : vector<8x128xf32>
    %c1_i32_73 = arith.constant 1 : i32
    %232 = tpu.dynamic_rotate %29 by %c1_i32_73 dim 1 : vector<8x128xf32>, i32 -> vector<8x128xf32>
    %233 = arith.mulf %232, %9 : vector<8x128xf32>
    %c29 = arith.constant 29 : index
    %234 = memref.load %arg4[%c29] : memref<273xf32, #tpu.memory_space<smem>>
    %235 = vector.broadcast %234 : f32 to vector<8x128xf32>
    %236 = arith.mulf %233, %235 : vector<8x128xf32>
    %237 = arith.addf %189, %236 : vector<8x128xf32>
    %c1_i32_74 = arith.constant 1 : i32
    %238 = tpu.dynamic_rotate %31 by %c1_i32_74 dim 1 : vector<8x128xf32>, i32 -> vector<8x128xf32>
    %239 = arith.mulf %238, %9 : vector<8x128xf32>
    %c30 = arith.constant 30 : index
    %240 = memref.load %arg4[%c30] : memref<273xf32, #tpu.memory_space<smem>>
    %241 = vector.broadcast %240 : f32 to vector<8x128xf32>
    %242 = arith.mulf %239, %241 : vector<8x128xf32>
    %243 = arith.addf %195, %242 : vector<8x128xf32>
    %c1_i32_75 = arith.constant 1 : i32
    %244 = tpu.dynamic_rotate %33 by %c1_i32_75 dim 1 : vector<8x128xf32>, i32 -> vector<8x128xf32>
    %245 = arith.mulf %244, %9 : vector<8x128xf32>
    %c31 = arith.constant 31 : index
    %246 = memref.load %arg4[%c31] : memref<273xf32, #tpu.memory_space<smem>>
    %247 = vector.broadcast %246 : f32 to vector<8x128xf32>
    %248 = arith.mulf %245, %247 : vector<8x128xf32>
    %249 = arith.addf %201, %248 : vector<8x128xf32>
    %c127_i32 = arith.constant 127 : i32
    %250 = tpu.dynamic_rotate %19 by %c127_i32 dim 1 : vector<8x128xf32>, i32 -> vector<8x128xf32>
    %251 = arith.mulf %250, %11 : vector<8x128xf32>
    %c40 = arith.constant 40 : index
    %252 = memref.load %arg4[%c40] : memref<273xf32, #tpu.memory_space<smem>>
    %253 = vector.broadcast %252 : f32 to vector<8x128xf32>
    %254 = arith.mulf %251, %253 : vector<8x128xf32>
    %255 = arith.addf %207, %254 : vector<8x128xf32>
    %c127_i32_76 = arith.constant 127 : i32
    %256 = tpu.dynamic_rotate %21 by %c127_i32_76 dim 1 : vector<8x128xf32>, i32 -> vector<8x128xf32>
    %257 = arith.mulf %256, %11 : vector<8x128xf32>
    %c41 = arith.constant 41 : index
    %258 = memref.load %arg4[%c41] : memref<273xf32, #tpu.memory_space<smem>>
    %259 = vector.broadcast %258 : f32 to vector<8x128xf32>
    %260 = arith.mulf %257, %259 : vector<8x128xf32>
    %261 = arith.addf %213, %260 : vector<8x128xf32>
    %c127_i32_77 = arith.constant 127 : i32
    %262 = tpu.dynamic_rotate %23 by %c127_i32_77 dim 1 : vector<8x128xf32>, i32 -> vector<8x128xf32>
    %263 = arith.mulf %262, %11 : vector<8x128xf32>
    %c42 = arith.constant 42 : index
    %264 = memref.load %arg4[%c42] : memref<273xf32, #tpu.memory_space<smem>>
    %265 = vector.broadcast %264 : f32 to vector<8x128xf32>
    %266 = arith.mulf %263, %265 : vector<8x128xf32>
    %267 = arith.addf %219, %266 : vector<8x128xf32>
    %c127_i32_78 = arith.constant 127 : i32
    %268 = tpu.dynamic_rotate %25 by %c127_i32_78 dim 1 : vector<8x128xf32>, i32 -> vector<8x128xf32>
    %269 = arith.mulf %268, %11 : vector<8x128xf32>
    %c43 = arith.constant 43 : index
    %270 = memref.load %arg4[%c43] : memref<273xf32, #tpu.memory_space<smem>>
    %271 = vector.broadcast %270 : f32 to vector<8x128xf32>
    %272 = arith.mulf %269, %271 : vector<8x128xf32>
    %273 = arith.addf %225, %272 : vector<8x128xf32>
    %c127_i32_79 = arith.constant 127 : i32
    %274 = tpu.dynamic_rotate %27 by %c127_i32_79 dim 1 : vector<8x128xf32>, i32 -> vector<8x128xf32>
    %275 = arith.mulf %274, %11 : vector<8x128xf32>
    %c44 = arith.constant 44 : index
    %276 = memref.load %arg4[%c44] : memref<273xf32, #tpu.memory_space<smem>>
    %277 = vector.broadcast %276 : f32 to vector<8x128xf32>
    %278 = arith.mulf %275, %277 : vector<8x128xf32>
    %279 = arith.addf %231, %278 : vector<8x128xf32>
    %c127_i32_80 = arith.constant 127 : i32
    %280 = tpu.dynamic_rotate %29 by %c127_i32_80 dim 1 : vector<8x128xf32>, i32 -> vector<8x128xf32>
    %281 = arith.mulf %280, %11 : vector<8x128xf32>
    %c45 = arith.constant 45 : index
    %282 = memref.load %arg4[%c45] : memref<273xf32, #tpu.memory_space<smem>>
    %283 = vector.broadcast %282 : f32 to vector<8x128xf32>
    %284 = arith.mulf %281, %283 : vector<8x128xf32>
    %285 = arith.addf %237, %284 : vector<8x128xf32>
    %c127_i32_81 = arith.constant 127 : i32
    %286 = tpu.dynamic_rotate %31 by %c127_i32_81 dim 1 : vector<8x128xf32>, i32 -> vector<8x128xf32>
    %287 = arith.mulf %286, %11 : vector<8x128xf32>
    %c46 = arith.constant 46 : index
    %288 = memref.load %arg4[%c46] : memref<273xf32, #tpu.memory_space<smem>>
    %289 = vector.broadcast %288 : f32 to vector<8x128xf32>
    %290 = arith.mulf %287, %289 : vector<8x128xf32>
    %291 = arith.addf %243, %290 : vector<8x128xf32>
    %c127_i32_82 = arith.constant 127 : i32
    %292 = tpu.dynamic_rotate %33 by %c127_i32_82 dim 1 : vector<8x128xf32>, i32 -> vector<8x128xf32>
    %293 = arith.mulf %292, %11 : vector<8x128xf32>
    %c47 = arith.constant 47 : index
    %294 = memref.load %arg4[%c47] : memref<273xf32, #tpu.memory_space<smem>>
    %295 = vector.broadcast %294 : f32 to vector<8x128xf32>
    %296 = arith.mulf %293, %295 : vector<8x128xf32>
    %297 = arith.addf %249, %296 : vector<8x128xf32>
    %c121_i32 = arith.constant 121 : i32
    %298 = tpu.dynamic_rotate %19 by %c121_i32 dim 1 : vector<8x128xf32>, i32 -> vector<8x128xf32>
    %299 = arith.mulf %298, %13 : vector<8x128xf32>
    %c48 = arith.constant 48 : index
    %300 = memref.load %arg4[%c48] : memref<273xf32, #tpu.memory_space<smem>>
    %301 = vector.broadcast %300 : f32 to vector<8x128xf32>
    %302 = arith.mulf %299, %301 : vector<8x128xf32>
    %303 = arith.addf %255, %302 : vector<8x128xf32>
    %c121_i32_83 = arith.constant 121 : i32
    %304 = tpu.dynamic_rotate %21 by %c121_i32_83 dim 1 : vector<8x128xf32>, i32 -> vector<8x128xf32>
    %305 = arith.mulf %304, %13 : vector<8x128xf32>
    %c49 = arith.constant 49 : index
    %306 = memref.load %arg4[%c49] : memref<273xf32, #tpu.memory_space<smem>>
    %307 = vector.broadcast %306 : f32 to vector<8x128xf32>
    %308 = arith.mulf %305, %307 : vector<8x128xf32>
    %309 = arith.addf %261, %308 : vector<8x128xf32>
    %c121_i32_84 = arith.constant 121 : i32
    %310 = tpu.dynamic_rotate %23 by %c121_i32_84 dim 1 : vector<8x128xf32>, i32 -> vector<8x128xf32>
    %311 = arith.mulf %310, %13 : vector<8x128xf32>
    %c50 = arith.constant 50 : index
    %312 = memref.load %arg4[%c50] : memref<273xf32, #tpu.memory_space<smem>>
    %313 = vector.broadcast %312 : f32 to vector<8x128xf32>
    %314 = arith.mulf %311, %313 : vector<8x128xf32>
    %315 = arith.addf %267, %314 : vector<8x128xf32>
    %c121_i32_85 = arith.constant 121 : i32
    %316 = tpu.dynamic_rotate %25 by %c121_i32_85 dim 1 : vector<8x128xf32>, i32 -> vector<8x128xf32>
    %317 = arith.mulf %316, %13 : vector<8x128xf32>
    %c51 = arith.constant 51 : index
    %318 = memref.load %arg4[%c51] : memref<273xf32, #tpu.memory_space<smem>>
    %319 = vector.broadcast %318 : f32 to vector<8x128xf32>
    %320 = arith.mulf %317, %319 : vector<8x128xf32>
    %321 = arith.addf %273, %320 : vector<8x128xf32>
    %c121_i32_86 = arith.constant 121 : i32
    %322 = tpu.dynamic_rotate %27 by %c121_i32_86 dim 1 : vector<8x128xf32>, i32 -> vector<8x128xf32>
    %323 = arith.mulf %322, %13 : vector<8x128xf32>
    %c52 = arith.constant 52 : index
    %324 = memref.load %arg4[%c52] : memref<273xf32, #tpu.memory_space<smem>>
    %325 = vector.broadcast %324 : f32 to vector<8x128xf32>
    %326 = arith.mulf %323, %325 : vector<8x128xf32>
    %327 = arith.addf %279, %326 : vector<8x128xf32>
    %c121_i32_87 = arith.constant 121 : i32
    %328 = tpu.dynamic_rotate %29 by %c121_i32_87 dim 1 : vector<8x128xf32>, i32 -> vector<8x128xf32>
    %329 = arith.mulf %328, %13 : vector<8x128xf32>
    %c53 = arith.constant 53 : index
    %330 = memref.load %arg4[%c53] : memref<273xf32, #tpu.memory_space<smem>>
    %331 = vector.broadcast %330 : f32 to vector<8x128xf32>
    %332 = arith.mulf %329, %331 : vector<8x128xf32>
    %333 = arith.addf %285, %332 : vector<8x128xf32>
    %c121_i32_88 = arith.constant 121 : i32
    %334 = tpu.dynamic_rotate %31 by %c121_i32_88 dim 1 : vector<8x128xf32>, i32 -> vector<8x128xf32>
    %335 = arith.mulf %334, %13 : vector<8x128xf32>
    %c54 = arith.constant 54 : index
    %336 = memref.load %arg4[%c54] : memref<273xf32, #tpu.memory_space<smem>>
    %337 = vector.broadcast %336 : f32 to vector<8x128xf32>
    %338 = arith.mulf %335, %337 : vector<8x128xf32>
    %339 = arith.addf %291, %338 : vector<8x128xf32>
    %c121_i32_89 = arith.constant 121 : i32
    %340 = tpu.dynamic_rotate %33 by %c121_i32_89 dim 1 : vector<8x128xf32>, i32 -> vector<8x128xf32>
    %341 = arith.mulf %340, %13 : vector<8x128xf32>
    %c55 = arith.constant 55 : index
    %342 = memref.load %arg4[%c55] : memref<273xf32, #tpu.memory_space<smem>>
    %343 = vector.broadcast %342 : f32 to vector<8x128xf32>
    %344 = arith.mulf %341, %343 : vector<8x128xf32>
    %345 = arith.addf %297, %344 : vector<8x128xf32>
    %c120_i32 = arith.constant 120 : i32
    %346 = tpu.dynamic_rotate %19 by %c120_i32 dim 1 : vector<8x128xf32>, i32 -> vector<8x128xf32>
    %347 = arith.mulf %346, %15 : vector<8x128xf32>
    %c56 = arith.constant 56 : index
    %348 = memref.load %arg4[%c56] : memref<273xf32, #tpu.memory_space<smem>>
    %349 = vector.broadcast %348 : f32 to vector<8x128xf32>
    %350 = arith.mulf %347, %349 : vector<8x128xf32>
    %351 = arith.addf %303, %350 : vector<8x128xf32>
    %c120_i32_90 = arith.constant 120 : i32
    %352 = tpu.dynamic_rotate %21 by %c120_i32_90 dim 1 : vector<8x128xf32>, i32 -> vector<8x128xf32>
    %353 = arith.mulf %352, %15 : vector<8x128xf32>
    %c57 = arith.constant 57 : index
    %354 = memref.load %arg4[%c57] : memref<273xf32, #tpu.memory_space<smem>>
    %355 = vector.broadcast %354 : f32 to vector<8x128xf32>
    %356 = arith.mulf %353, %355 : vector<8x128xf32>
    %357 = arith.addf %309, %356 : vector<8x128xf32>
    %c120_i32_91 = arith.constant 120 : i32
    %358 = tpu.dynamic_rotate %23 by %c120_i32_91 dim 1 : vector<8x128xf32>, i32 -> vector<8x128xf32>
    %359 = arith.mulf %358, %15 : vector<8x128xf32>
    %c58 = arith.constant 58 : index
    %360 = memref.load %arg4[%c58] : memref<273xf32, #tpu.memory_space<smem>>
    %361 = vector.broadcast %360 : f32 to vector<8x128xf32>
    %362 = arith.mulf %359, %361 : vector<8x128xf32>
    %363 = arith.addf %315, %362 : vector<8x128xf32>
    %c120_i32_92 = arith.constant 120 : i32
    %364 = tpu.dynamic_rotate %25 by %c120_i32_92 dim 1 : vector<8x128xf32>, i32 -> vector<8x128xf32>
    %365 = arith.mulf %364, %15 : vector<8x128xf32>
    %c59 = arith.constant 59 : index
    %366 = memref.load %arg4[%c59] : memref<273xf32, #tpu.memory_space<smem>>
    %367 = vector.broadcast %366 : f32 to vector<8x128xf32>
    %368 = arith.mulf %365, %367 : vector<8x128xf32>
    %369 = arith.addf %321, %368 : vector<8x128xf32>
    %c120_i32_93 = arith.constant 120 : i32
    %370 = tpu.dynamic_rotate %27 by %c120_i32_93 dim 1 : vector<8x128xf32>, i32 -> vector<8x128xf32>
    %371 = arith.mulf %370, %15 : vector<8x128xf32>
    %c60 = arith.constant 60 : index
    %372 = memref.load %arg4[%c60] : memref<273xf32, #tpu.memory_space<smem>>
    %373 = vector.broadcast %372 : f32 to vector<8x128xf32>
    %374 = arith.mulf %371, %373 : vector<8x128xf32>
    %375 = arith.addf %327, %374 : vector<8x128xf32>
    %c120_i32_94 = arith.constant 120 : i32
    %376 = tpu.dynamic_rotate %29 by %c120_i32_94 dim 1 : vector<8x128xf32>, i32 -> vector<8x128xf32>
    %377 = arith.mulf %376, %15 : vector<8x128xf32>
    %c61 = arith.constant 61 : index
    %378 = memref.load %arg4[%c61] : memref<273xf32, #tpu.memory_space<smem>>
    %379 = vector.broadcast %378 : f32 to vector<8x128xf32>
    %380 = arith.mulf %377, %379 : vector<8x128xf32>
    %381 = arith.addf %333, %380 : vector<8x128xf32>
    %c120_i32_95 = arith.constant 120 : i32
    %382 = tpu.dynamic_rotate %31 by %c120_i32_95 dim 1 : vector<8x128xf32>, i32 -> vector<8x128xf32>
    %383 = arith.mulf %382, %15 : vector<8x128xf32>
    %c62 = arith.constant 62 : index
    %384 = memref.load %arg4[%c62] : memref<273xf32, #tpu.memory_space<smem>>
    %385 = vector.broadcast %384 : f32 to vector<8x128xf32>
    %386 = arith.mulf %383, %385 : vector<8x128xf32>
    %387 = arith.addf %339, %386 : vector<8x128xf32>
    %c120_i32_96 = arith.constant 120 : i32
    %388 = tpu.dynamic_rotate %33 by %c120_i32_96 dim 1 : vector<8x128xf32>, i32 -> vector<8x128xf32>
    %389 = arith.mulf %388, %15 : vector<8x128xf32>
    %c63 = arith.constant 63 : index
    %390 = memref.load %arg4[%c63] : memref<273xf32, #tpu.memory_space<smem>>
    %391 = vector.broadcast %390 : f32 to vector<8x128xf32>
    %392 = arith.mulf %389, %391 : vector<8x128xf32>
    %393 = arith.addf %345, %392 : vector<8x128xf32>
    %c119_i32 = arith.constant 119 : i32
    %394 = tpu.dynamic_rotate %19 by %c119_i32 dim 1 : vector<8x128xf32>, i32 -> vector<8x128xf32>
    %395 = arith.mulf %394, %17 : vector<8x128xf32>
    %c64 = arith.constant 64 : index
    %396 = memref.load %arg4[%c64] : memref<273xf32, #tpu.memory_space<smem>>
    %397 = vector.broadcast %396 : f32 to vector<8x128xf32>
    %398 = arith.mulf %395, %397 : vector<8x128xf32>
    %399 = arith.addf %351, %398 : vector<8x128xf32>
    %c119_i32_97 = arith.constant 119 : i32
    %400 = tpu.dynamic_rotate %21 by %c119_i32_97 dim 1 : vector<8x128xf32>, i32 -> vector<8x128xf32>
    %401 = arith.mulf %400, %17 : vector<8x128xf32>
    %c65 = arith.constant 65 : index
    %402 = memref.load %arg4[%c65] : memref<273xf32, #tpu.memory_space<smem>>
    %403 = vector.broadcast %402 : f32 to vector<8x128xf32>
    %404 = arith.mulf %401, %403 : vector<8x128xf32>
    %405 = arith.addf %357, %404 : vector<8x128xf32>
    %c119_i32_98 = arith.constant 119 : i32
    %406 = tpu.dynamic_rotate %23 by %c119_i32_98 dim 1 : vector<8x128xf32>, i32 -> vector<8x128xf32>
    %407 = arith.mulf %406, %17 : vector<8x128xf32>
    %c66 = arith.constant 66 : index
    %408 = memref.load %arg4[%c66] : memref<273xf32, #tpu.memory_space<smem>>
    %409 = vector.broadcast %408 : f32 to vector<8x128xf32>
    %410 = arith.mulf %407, %409 : vector<8x128xf32>
    %411 = arith.addf %363, %410 : vector<8x128xf32>
    %c119_i32_99 = arith.constant 119 : i32
    %412 = tpu.dynamic_rotate %25 by %c119_i32_99 dim 1 : vector<8x128xf32>, i32 -> vector<8x128xf32>
    %413 = arith.mulf %412, %17 : vector<8x128xf32>
    %c67 = arith.constant 67 : index
    %414 = memref.load %arg4[%c67] : memref<273xf32, #tpu.memory_space<smem>>
    %415 = vector.broadcast %414 : f32 to vector<8x128xf32>
    %416 = arith.mulf %413, %415 : vector<8x128xf32>
    %417 = arith.addf %369, %416 : vector<8x128xf32>
    %c119_i32_100 = arith.constant 119 : i32
    %418 = tpu.dynamic_rotate %27 by %c119_i32_100 dim 1 : vector<8x128xf32>, i32 -> vector<8x128xf32>
    %419 = arith.mulf %418, %17 : vector<8x128xf32>
    %c68 = arith.constant 68 : index
    %420 = memref.load %arg4[%c68] : memref<273xf32, #tpu.memory_space<smem>>
    %421 = vector.broadcast %420 : f32 to vector<8x128xf32>
    %422 = arith.mulf %419, %421 : vector<8x128xf32>
    %423 = arith.addf %375, %422 : vector<8x128xf32>
    %c119_i32_101 = arith.constant 119 : i32
    %424 = tpu.dynamic_rotate %29 by %c119_i32_101 dim 1 : vector<8x128xf32>, i32 -> vector<8x128xf32>
    %425 = arith.mulf %424, %17 : vector<8x128xf32>
    %c69 = arith.constant 69 : index
    %426 = memref.load %arg4[%c69] : memref<273xf32, #tpu.memory_space<smem>>
    %427 = vector.broadcast %426 : f32 to vector<8x128xf32>
    %428 = arith.mulf %425, %427 : vector<8x128xf32>
    %429 = arith.addf %381, %428 : vector<8x128xf32>
    %c119_i32_102 = arith.constant 119 : i32
    %430 = tpu.dynamic_rotate %31 by %c119_i32_102 dim 1 : vector<8x128xf32>, i32 -> vector<8x128xf32>
    %431 = arith.mulf %430, %17 : vector<8x128xf32>
    %c70 = arith.constant 70 : index
    %432 = memref.load %arg4[%c70] : memref<273xf32, #tpu.memory_space<smem>>
    %433 = vector.broadcast %432 : f32 to vector<8x128xf32>
    %434 = arith.mulf %431, %433 : vector<8x128xf32>
    %435 = arith.addf %387, %434 : vector<8x128xf32>
    %c119_i32_103 = arith.constant 119 : i32
    %436 = tpu.dynamic_rotate %33 by %c119_i32_103 dim 1 : vector<8x128xf32>, i32 -> vector<8x128xf32>
    %437 = arith.mulf %436, %17 : vector<8x128xf32>
    %c71 = arith.constant 71 : index
    %438 = memref.load %arg4[%c71] : memref<273xf32, #tpu.memory_space<smem>>
    %439 = vector.broadcast %438 : f32 to vector<8x128xf32>
    %440 = arith.mulf %437, %439 : vector<8x128xf32>
    %441 = arith.addf %393, %440 : vector<8x128xf32>
    %c72 = arith.constant 72 : index
    %442 = memref.load %arg4[%c72] : memref<273xf32, #tpu.memory_space<smem>>
    %443 = vector.broadcast %442 : f32 to vector<8x128xf32>
    %444 = arith.mulf %399, %443 : vector<8x128xf32>
    %c80 = arith.constant 80 : index
    %445 = memref.load %arg4[%c80] : memref<273xf32, #tpu.memory_space<smem>>
    %446 = vector.broadcast %445 : f32 to vector<8x128xf32>
    %447 = arith.addf %444, %446 : vector<8x128xf32>
    %cst = arith.constant 5.000000e-01 : f32
    %448 = vector.broadcast %cst : f32 to vector<8x128xf32>
    %449 = arith.mulf %448, %447 : vector<8x128xf32>
    %cst_104 = arith.constant 4.471500e-02 : f32
    %450 = vector.broadcast %cst_104 : f32 to vector<8x128xf32>
    %451 = arith.mulf %450, %447 : vector<8x128xf32>
    %452 = arith.mulf %451, %447 : vector<8x128xf32>
    %453 = arith.mulf %452, %447 : vector<8x128xf32>
    %454 = arith.addf %447, %453 : vector<8x128xf32>
    %cst_105 = arith.constant 0.797884583 : f32
    %455 = vector.broadcast %cst_105 : f32 to vector<8x128xf32>
    %456 = arith.mulf %455, %454 : vector<8x128xf32>
    %457 = math.tanh %456 : vector<8x128xf32>
    %cst_106 = arith.constant 1.000000e+00 : f32
    %458 = vector.broadcast %cst_106 : f32 to vector<8x128xf32>
    %459 = arith.addf %458, %457 : vector<8x128xf32>
    %460 = arith.mulf %449, %459 : vector<8x128xf32>
    %c73 = arith.constant 73 : index
    %461 = memref.load %arg4[%c73] : memref<273xf32, #tpu.memory_space<smem>>
    %462 = vector.broadcast %461 : f32 to vector<8x128xf32>
    %463 = arith.mulf %405, %462 : vector<8x128xf32>
    %c81 = arith.constant 81 : index
    %464 = memref.load %arg4[%c81] : memref<273xf32, #tpu.memory_space<smem>>
    %465 = vector.broadcast %464 : f32 to vector<8x128xf32>
    %466 = arith.addf %463, %465 : vector<8x128xf32>
    %cst_107 = arith.constant 5.000000e-01 : f32
    %467 = vector.broadcast %cst_107 : f32 to vector<8x128xf32>
    %468 = arith.mulf %467, %466 : vector<8x128xf32>
    %cst_108 = arith.constant 4.471500e-02 : f32
    %469 = vector.broadcast %cst_108 : f32 to vector<8x128xf32>
    %470 = arith.mulf %469, %466 : vector<8x128xf32>
    %471 = arith.mulf %470, %466 : vector<8x128xf32>
    %472 = arith.mulf %471, %466 : vector<8x128xf32>
    %473 = arith.addf %466, %472 : vector<8x128xf32>
    %cst_109 = arith.constant 0.797884583 : f32
    %474 = vector.broadcast %cst_109 : f32 to vector<8x128xf32>
    %475 = arith.mulf %474, %473 : vector<8x128xf32>
    %476 = math.tanh %475 : vector<8x128xf32>
    %cst_110 = arith.constant 1.000000e+00 : f32
    %477 = vector.broadcast %cst_110 : f32 to vector<8x128xf32>
    %478 = arith.addf %477, %476 : vector<8x128xf32>
    %479 = arith.mulf %468, %478 : vector<8x128xf32>
    %c74 = arith.constant 74 : index
    %480 = memref.load %arg4[%c74] : memref<273xf32, #tpu.memory_space<smem>>
    %481 = vector.broadcast %480 : f32 to vector<8x128xf32>
    %482 = arith.mulf %411, %481 : vector<8x128xf32>
    %c82 = arith.constant 82 : index
    %483 = memref.load %arg4[%c82] : memref<273xf32, #tpu.memory_space<smem>>
    %484 = vector.broadcast %483 : f32 to vector<8x128xf32>
    %485 = arith.addf %482, %484 : vector<8x128xf32>
    %cst_111 = arith.constant 5.000000e-01 : f32
    %486 = vector.broadcast %cst_111 : f32 to vector<8x128xf32>
    %487 = arith.mulf %486, %485 : vector<8x128xf32>
    %cst_112 = arith.constant 4.471500e-02 : f32
    %488 = vector.broadcast %cst_112 : f32 to vector<8x128xf32>
    %489 = arith.mulf %488, %485 : vector<8x128xf32>
    %490 = arith.mulf %489, %485 : vector<8x128xf32>
    %491 = arith.mulf %490, %485 : vector<8x128xf32>
    %492 = arith.addf %485, %491 : vector<8x128xf32>
    %cst_113 = arith.constant 0.797884583 : f32
    %493 = vector.broadcast %cst_113 : f32 to vector<8x128xf32>
    %494 = arith.mulf %493, %492 : vector<8x128xf32>
    %495 = math.tanh %494 : vector<8x128xf32>
    %cst_114 = arith.constant 1.000000e+00 : f32
    %496 = vector.broadcast %cst_114 : f32 to vector<8x128xf32>
    %497 = arith.addf %496, %495 : vector<8x128xf32>
    %498 = arith.mulf %487, %497 : vector<8x128xf32>
    %c75 = arith.constant 75 : index
    %499 = memref.load %arg4[%c75] : memref<273xf32, #tpu.memory_space<smem>>
    %500 = vector.broadcast %499 : f32 to vector<8x128xf32>
    %501 = arith.mulf %417, %500 : vector<8x128xf32>
    %c83 = arith.constant 83 : index
    %502 = memref.load %arg4[%c83] : memref<273xf32, #tpu.memory_space<smem>>
    %503 = vector.broadcast %502 : f32 to vector<8x128xf32>
    %504 = arith.addf %501, %503 : vector<8x128xf32>
    %cst_115 = arith.constant 5.000000e-01 : f32
    %505 = vector.broadcast %cst_115 : f32 to vector<8x128xf32>
    %506 = arith.mulf %505, %504 : vector<8x128xf32>
    %cst_116 = arith.constant 4.471500e-02 : f32
    %507 = vector.broadcast %cst_116 : f32 to vector<8x128xf32>
    %508 = arith.mulf %507, %504 : vector<8x128xf32>
    %509 = arith.mulf %508, %504 : vector<8x128xf32>
    %510 = arith.mulf %509, %504 : vector<8x128xf32>
    %511 = arith.addf %504, %510 : vector<8x128xf32>
    %cst_117 = arith.constant 0.797884583 : f32
    %512 = vector.broadcast %cst_117 : f32 to vector<8x128xf32>
    %513 = arith.mulf %512, %511 : vector<8x128xf32>
    %514 = math.tanh %513 : vector<8x128xf32>
    %cst_118 = arith.constant 1.000000e+00 : f32
    %515 = vector.broadcast %cst_118 : f32 to vector<8x128xf32>
    %516 = arith.addf %515, %514 : vector<8x128xf32>
    %517 = arith.mulf %506, %516 : vector<8x128xf32>
    %c76 = arith.constant 76 : index
    %518 = memref.load %arg4[%c76] : memref<273xf32, #tpu.memory_space<smem>>
    %519 = vector.broadcast %518 : f32 to vector<8x128xf32>
    %520 = arith.mulf %423, %519 : vector<8x128xf32>
    %c84 = arith.constant 84 : index
    %521 = memref.load %arg4[%c84] : memref<273xf32, #tpu.memory_space<smem>>
    %522 = vector.broadcast %521 : f32 to vector<8x128xf32>
    %523 = arith.addf %520, %522 : vector<8x128xf32>
    %cst_119 = arith.constant 5.000000e-01 : f32
    %524 = vector.broadcast %cst_119 : f32 to vector<8x128xf32>
    %525 = arith.mulf %524, %523 : vector<8x128xf32>
    %cst_120 = arith.constant 4.471500e-02 : f32
    %526 = vector.broadcast %cst_120 : f32 to vector<8x128xf32>
    %527 = arith.mulf %526, %523 : vector<8x128xf32>
    %528 = arith.mulf %527, %523 : vector<8x128xf32>
    %529 = arith.mulf %528, %523 : vector<8x128xf32>
    %530 = arith.addf %523, %529 : vector<8x128xf32>
    %cst_121 = arith.constant 0.797884583 : f32
    %531 = vector.broadcast %cst_121 : f32 to vector<8x128xf32>
    %532 = arith.mulf %531, %530 : vector<8x128xf32>
    %533 = math.tanh %532 : vector<8x128xf32>
    %cst_122 = arith.constant 1.000000e+00 : f32
    %534 = vector.broadcast %cst_122 : f32 to vector<8x128xf32>
    %535 = arith.addf %534, %533 : vector<8x128xf32>
    %536 = arith.mulf %525, %535 : vector<8x128xf32>
    %c77 = arith.constant 77 : index
    %537 = memref.load %arg4[%c77] : memref<273xf32, #tpu.memory_space<smem>>
    %538 = vector.broadcast %537 : f32 to vector<8x128xf32>
    %539 = arith.mulf %429, %538 : vector<8x128xf32>
    %c85 = arith.constant 85 : index
    %540 = memref.load %arg4[%c85] : memref<273xf32, #tpu.memory_space<smem>>
    %541 = vector.broadcast %540 : f32 to vector<8x128xf32>
    %542 = arith.addf %539, %541 : vector<8x128xf32>
    %cst_123 = arith.constant 5.000000e-01 : f32
    %543 = vector.broadcast %cst_123 : f32 to vector<8x128xf32>
    %544 = arith.mulf %543, %542 : vector<8x128xf32>
    %cst_124 = arith.constant 4.471500e-02 : f32
    %545 = vector.broadcast %cst_124 : f32 to vector<8x128xf32>
    %546 = arith.mulf %545, %542 : vector<8x128xf32>
    %547 = arith.mulf %546, %542 : vector<8x128xf32>
    %548 = arith.mulf %547, %542 : vector<8x128xf32>
    %549 = arith.addf %542, %548 : vector<8x128xf32>
    %cst_125 = arith.constant 0.797884583 : f32
    %550 = vector.broadcast %cst_125 : f32 to vector<8x128xf32>
    %551 = arith.mulf %550, %549 : vector<8x128xf32>
    %552 = math.tanh %551 : vector<8x128xf32>
    %cst_126 = arith.constant 1.000000e+00 : f32
    %553 = vector.broadcast %cst_126 : f32 to vector<8x128xf32>
    %554 = arith.addf %553, %552 : vector<8x128xf32>
    %555 = arith.mulf %544, %554 : vector<8x128xf32>
    %c78 = arith.constant 78 : index
    %556 = memref.load %arg4[%c78] : memref<273xf32, #tpu.memory_space<smem>>
    %557 = vector.broadcast %556 : f32 to vector<8x128xf32>
    %558 = arith.mulf %435, %557 : vector<8x128xf32>
    %c86 = arith.constant 86 : index
    %559 = memref.load %arg4[%c86] : memref<273xf32, #tpu.memory_space<smem>>
    %560 = vector.broadcast %559 : f32 to vector<8x128xf32>
    %561 = arith.addf %558, %560 : vector<8x128xf32>
    %cst_127 = arith.constant 5.000000e-01 : f32
    %562 = vector.broadcast %cst_127 : f32 to vector<8x128xf32>
    %563 = arith.mulf %562, %561 : vector<8x128xf32>
    %cst_128 = arith.constant 4.471500e-02 : f32
    %564 = vector.broadcast %cst_128 : f32 to vector<8x128xf32>
    %565 = arith.mulf %564, %561 : vector<8x128xf32>
    %566 = arith.mulf %565, %561 : vector<8x128xf32>
    %567 = arith.mulf %566, %561 : vector<8x128xf32>
    %568 = arith.addf %561, %567 : vector<8x128xf32>
    %cst_129 = arith.constant 0.797884583 : f32
    %569 = vector.broadcast %cst_129 : f32 to vector<8x128xf32>
    %570 = arith.mulf %569, %568 : vector<8x128xf32>
    %571 = math.tanh %570 : vector<8x128xf32>
    %cst_130 = arith.constant 1.000000e+00 : f32
    %572 = vector.broadcast %cst_130 : f32 to vector<8x128xf32>
    %573 = arith.addf %572, %571 : vector<8x128xf32>
    %574 = arith.mulf %563, %573 : vector<8x128xf32>
    %c79 = arith.constant 79 : index
    %575 = memref.load %arg4[%c79] : memref<273xf32, #tpu.memory_space<smem>>
    %576 = vector.broadcast %575 : f32 to vector<8x128xf32>
    %577 = arith.mulf %441, %576 : vector<8x128xf32>
    %c87 = arith.constant 87 : index
    %578 = memref.load %arg4[%c87] : memref<273xf32, #tpu.memory_space<smem>>
    %579 = vector.broadcast %578 : f32 to vector<8x128xf32>
    %580 = arith.addf %577, %579 : vector<8x128xf32>
    %cst_131 = arith.constant 5.000000e-01 : f32
    %581 = vector.broadcast %cst_131 : f32 to vector<8x128xf32>
    %582 = arith.mulf %581, %580 : vector<8x128xf32>
    %cst_132 = arith.constant 4.471500e-02 : f32
    %583 = vector.broadcast %cst_132 : f32 to vector<8x128xf32>
    %584 = arith.mulf %583, %580 : vector<8x128xf32>
    %585 = arith.mulf %584, %580 : vector<8x128xf32>
    %586 = arith.mulf %585, %580 : vector<8x128xf32>
    %587 = arith.addf %580, %586 : vector<8x128xf32>
    %cst_133 = arith.constant 0.797884583 : f32
    %588 = vector.broadcast %cst_133 : f32 to vector<8x128xf32>
    %589 = arith.mulf %588, %587 : vector<8x128xf32>
    %590 = math.tanh %589 : vector<8x128xf32>
    %cst_134 = arith.constant 1.000000e+00 : f32
    %591 = vector.broadcast %cst_134 : f32 to vector<8x128xf32>
    %592 = arith.addf %591, %590 : vector<8x128xf32>
    %593 = arith.mulf %582, %592 : vector<8x128xf32>
    %c120 = arith.constant 120 : index
    %594 = memref.load %arg4[%c120] : memref<273xf32, #tpu.memory_space<smem>>
    %595 = vector.broadcast %594 : f32 to vector<8x128xf32>
    %596 = arith.mulf %460, %595 : vector<8x128xf32>
    %c121 = arith.constant 121 : index
    %597 = memref.load %arg4[%c121] : memref<273xf32, #tpu.memory_space<smem>>
    %598 = vector.broadcast %597 : f32 to vector<8x128xf32>
    %599 = arith.mulf %479, %598 : vector<8x128xf32>
    %c122 = arith.constant 122 : index
    %600 = memref.load %arg4[%c122] : memref<273xf32, #tpu.memory_space<smem>>
    %601 = vector.broadcast %600 : f32 to vector<8x128xf32>
    %602 = arith.mulf %498, %601 : vector<8x128xf32>
    %c123 = arith.constant 123 : index
    %603 = memref.load %arg4[%c123] : memref<273xf32, #tpu.memory_space<smem>>
    %604 = vector.broadcast %603 : f32 to vector<8x128xf32>
    %605 = arith.mulf %517, %604 : vector<8x128xf32>
    %c124 = arith.constant 124 : index
    %606 = memref.load %arg4[%c124] : memref<273xf32, #tpu.memory_space<smem>>
    %607 = vector.broadcast %606 : f32 to vector<8x128xf32>
    %608 = arith.mulf %536, %607 : vector<8x128xf32>
    %c125 = arith.constant 125 : index
    %609 = memref.load %arg4[%c125] : memref<273xf32, #tpu.memory_space<smem>>
    %610 = vector.broadcast %609 : f32 to vector<8x128xf32>
    %611 = arith.mulf %555, %610 : vector<8x128xf32>
    %c126 = arith.constant 126 : index
    %612 = memref.load %arg4[%c126] : memref<273xf32, #tpu.memory_space<smem>>
    %613 = vector.broadcast %612 : f32 to vector<8x128xf32>
    %614 = arith.mulf %574, %613 : vector<8x128xf32>
    %c127 = arith.constant 127 : index
    %615 = memref.load %arg4[%c127] : memref<273xf32, #tpu.memory_space<smem>>
    %616 = vector.broadcast %615 : f32 to vector<8x128xf32>
    %617 = arith.mulf %593, %616 : vector<8x128xf32>
    %c9_i32_135 = arith.constant 9 : i32
    %618 = tpu.dynamic_rotate %460 by %c9_i32_135 dim 1 : vector<8x128xf32>, i32 -> vector<8x128xf32>
    %619 = arith.mulf %618, %3 : vector<8x128xf32>
    %c88 = arith.constant 88 : index
    %620 = memref.load %arg4[%c88] : memref<273xf32, #tpu.memory_space<smem>>
    %621 = vector.broadcast %620 : f32 to vector<8x128xf32>
    %622 = arith.mulf %619, %621 : vector<8x128xf32>
    %623 = arith.addf %596, %622 : vector<8x128xf32>
    %c9_i32_136 = arith.constant 9 : i32
    %624 = tpu.dynamic_rotate %479 by %c9_i32_136 dim 1 : vector<8x128xf32>, i32 -> vector<8x128xf32>
    %625 = arith.mulf %624, %3 : vector<8x128xf32>
    %c89 = arith.constant 89 : index
    %626 = memref.load %arg4[%c89] : memref<273xf32, #tpu.memory_space<smem>>
    %627 = vector.broadcast %626 : f32 to vector<8x128xf32>
    %628 = arith.mulf %625, %627 : vector<8x128xf32>
    %629 = arith.addf %599, %628 : vector<8x128xf32>
    %c9_i32_137 = arith.constant 9 : i32
    %630 = tpu.dynamic_rotate %498 by %c9_i32_137 dim 1 : vector<8x128xf32>, i32 -> vector<8x128xf32>
    %631 = arith.mulf %630, %3 : vector<8x128xf32>
    %c90 = arith.constant 90 : index
    %632 = memref.load %arg4[%c90] : memref<273xf32, #tpu.memory_space<smem>>
    %633 = vector.broadcast %632 : f32 to vector<8x128xf32>
    %634 = arith.mulf %631, %633 : vector<8x128xf32>
    %635 = arith.addf %602, %634 : vector<8x128xf32>
    %c9_i32_138 = arith.constant 9 : i32
    %636 = tpu.dynamic_rotate %517 by %c9_i32_138 dim 1 : vector<8x128xf32>, i32 -> vector<8x128xf32>
    %637 = arith.mulf %636, %3 : vector<8x128xf32>
    %c91 = arith.constant 91 : index
    %638 = memref.load %arg4[%c91] : memref<273xf32, #tpu.memory_space<smem>>
    %639 = vector.broadcast %638 : f32 to vector<8x128xf32>
    %640 = arith.mulf %637, %639 : vector<8x128xf32>
    %641 = arith.addf %605, %640 : vector<8x128xf32>
    %c9_i32_139 = arith.constant 9 : i32
    %642 = tpu.dynamic_rotate %536 by %c9_i32_139 dim 1 : vector<8x128xf32>, i32 -> vector<8x128xf32>
    %643 = arith.mulf %642, %3 : vector<8x128xf32>
    %c92 = arith.constant 92 : index
    %644 = memref.load %arg4[%c92] : memref<273xf32, #tpu.memory_space<smem>>
    %645 = vector.broadcast %644 : f32 to vector<8x128xf32>
    %646 = arith.mulf %643, %645 : vector<8x128xf32>
    %647 = arith.addf %608, %646 : vector<8x128xf32>
    %c9_i32_140 = arith.constant 9 : i32
    %648 = tpu.dynamic_rotate %555 by %c9_i32_140 dim 1 : vector<8x128xf32>, i32 -> vector<8x128xf32>
    %649 = arith.mulf %648, %3 : vector<8x128xf32>
    %c93 = arith.constant 93 : index
    %650 = memref.load %arg4[%c93] : memref<273xf32, #tpu.memory_space<smem>>
    %651 = vector.broadcast %650 : f32 to vector<8x128xf32>
    %652 = arith.mulf %649, %651 : vector<8x128xf32>
    %653 = arith.addf %611, %652 : vector<8x128xf32>
    %c9_i32_141 = arith.constant 9 : i32
    %654 = tpu.dynamic_rotate %574 by %c9_i32_141 dim 1 : vector<8x128xf32>, i32 -> vector<8x128xf32>
    %655 = arith.mulf %654, %3 : vector<8x128xf32>
    %c94 = arith.constant 94 : index
    %656 = memref.load %arg4[%c94] : memref<273xf32, #tpu.memory_space<smem>>
    %657 = vector.broadcast %656 : f32 to vector<8x128xf32>
    %658 = arith.mulf %655, %657 : vector<8x128xf32>
    %659 = arith.addf %614, %658 : vector<8x128xf32>
    %c9_i32_142 = arith.constant 9 : i32
    %660 = tpu.dynamic_rotate %593 by %c9_i32_142 dim 1 : vector<8x128xf32>, i32 -> vector<8x128xf32>
    %661 = arith.mulf %660, %3 : vector<8x128xf32>
    %c95 = arith.constant 95 : index
    %662 = memref.load %arg4[%c95] : memref<273xf32, #tpu.memory_space<smem>>
    %663 = vector.broadcast %662 : f32 to vector<8x128xf32>
    %664 = arith.mulf %661, %663 : vector<8x128xf32>
    %665 = arith.addf %617, %664 : vector<8x128xf32>
    %c8_i32_143 = arith.constant 8 : i32
    %666 = tpu.dynamic_rotate %460 by %c8_i32_143 dim 1 : vector<8x128xf32>, i32 -> vector<8x128xf32>
    %667 = arith.mulf %666, %5 : vector<8x128xf32>
    %c96 = arith.constant 96 : index
    %668 = memref.load %arg4[%c96] : memref<273xf32, #tpu.memory_space<smem>>
    %669 = vector.broadcast %668 : f32 to vector<8x128xf32>
    %670 = arith.mulf %667, %669 : vector<8x128xf32>
    %671 = arith.addf %623, %670 : vector<8x128xf32>
    %c8_i32_144 = arith.constant 8 : i32
    %672 = tpu.dynamic_rotate %479 by %c8_i32_144 dim 1 : vector<8x128xf32>, i32 -> vector<8x128xf32>
    %673 = arith.mulf %672, %5 : vector<8x128xf32>
    %c97 = arith.constant 97 : index
    %674 = memref.load %arg4[%c97] : memref<273xf32, #tpu.memory_space<smem>>
    %675 = vector.broadcast %674 : f32 to vector<8x128xf32>
    %676 = arith.mulf %673, %675 : vector<8x128xf32>
    %677 = arith.addf %629, %676 : vector<8x128xf32>
    %c8_i32_145 = arith.constant 8 : i32
    %678 = tpu.dynamic_rotate %498 by %c8_i32_145 dim 1 : vector<8x128xf32>, i32 -> vector<8x128xf32>
    %679 = arith.mulf %678, %5 : vector<8x128xf32>
    %c98 = arith.constant 98 : index
    %680 = memref.load %arg4[%c98] : memref<273xf32, #tpu.memory_space<smem>>
    %681 = vector.broadcast %680 : f32 to vector<8x128xf32>
    %682 = arith.mulf %679, %681 : vector<8x128xf32>
    %683 = arith.addf %635, %682 : vector<8x128xf32>
    %c8_i32_146 = arith.constant 8 : i32
    %684 = tpu.dynamic_rotate %517 by %c8_i32_146 dim 1 : vector<8x128xf32>, i32 -> vector<8x128xf32>
    %685 = arith.mulf %684, %5 : vector<8x128xf32>
    %c99 = arith.constant 99 : index
    %686 = memref.load %arg4[%c99] : memref<273xf32, #tpu.memory_space<smem>>
    %687 = vector.broadcast %686 : f32 to vector<8x128xf32>
    %688 = arith.mulf %685, %687 : vector<8x128xf32>
    %689 = arith.addf %641, %688 : vector<8x128xf32>
    %c8_i32_147 = arith.constant 8 : i32
    %690 = tpu.dynamic_rotate %536 by %c8_i32_147 dim 1 : vector<8x128xf32>, i32 -> vector<8x128xf32>
    %691 = arith.mulf %690, %5 : vector<8x128xf32>
    %c100 = arith.constant 100 : index
    %692 = memref.load %arg4[%c100] : memref<273xf32, #tpu.memory_space<smem>>
    %693 = vector.broadcast %692 : f32 to vector<8x128xf32>
    %694 = arith.mulf %691, %693 : vector<8x128xf32>
    %695 = arith.addf %647, %694 : vector<8x128xf32>
    %c8_i32_148 = arith.constant 8 : i32
    %696 = tpu.dynamic_rotate %555 by %c8_i32_148 dim 1 : vector<8x128xf32>, i32 -> vector<8x128xf32>
    %697 = arith.mulf %696, %5 : vector<8x128xf32>
    %c101 = arith.constant 101 : index
    %698 = memref.load %arg4[%c101] : memref<273xf32, #tpu.memory_space<smem>>
    %699 = vector.broadcast %698 : f32 to vector<8x128xf32>
    %700 = arith.mulf %697, %699 : vector<8x128xf32>
    %701 = arith.addf %653, %700 : vector<8x128xf32>
    %c8_i32_149 = arith.constant 8 : i32
    %702 = tpu.dynamic_rotate %574 by %c8_i32_149 dim 1 : vector<8x128xf32>, i32 -> vector<8x128xf32>
    %703 = arith.mulf %702, %5 : vector<8x128xf32>
    %c102 = arith.constant 102 : index
    %704 = memref.load %arg4[%c102] : memref<273xf32, #tpu.memory_space<smem>>
    %705 = vector.broadcast %704 : f32 to vector<8x128xf32>
    %706 = arith.mulf %703, %705 : vector<8x128xf32>
    %707 = arith.addf %659, %706 : vector<8x128xf32>
    %c8_i32_150 = arith.constant 8 : i32
    %708 = tpu.dynamic_rotate %593 by %c8_i32_150 dim 1 : vector<8x128xf32>, i32 -> vector<8x128xf32>
    %709 = arith.mulf %708, %5 : vector<8x128xf32>
    %c103 = arith.constant 103 : index
    %710 = memref.load %arg4[%c103] : memref<273xf32, #tpu.memory_space<smem>>
    %711 = vector.broadcast %710 : f32 to vector<8x128xf32>
    %712 = arith.mulf %709, %711 : vector<8x128xf32>
    %713 = arith.addf %665, %712 : vector<8x128xf32>
    %c7_i32_151 = arith.constant 7 : i32
    %714 = tpu.dynamic_rotate %460 by %c7_i32_151 dim 1 : vector<8x128xf32>, i32 -> vector<8x128xf32>
    %715 = arith.mulf %714, %7 : vector<8x128xf32>
    %c104 = arith.constant 104 : index
    %716 = memref.load %arg4[%c104] : memref<273xf32, #tpu.memory_space<smem>>
    %717 = vector.broadcast %716 : f32 to vector<8x128xf32>
    %718 = arith.mulf %715, %717 : vector<8x128xf32>
    %719 = arith.addf %671, %718 : vector<8x128xf32>
    %c7_i32_152 = arith.constant 7 : i32
    %720 = tpu.dynamic_rotate %479 by %c7_i32_152 dim 1 : vector<8x128xf32>, i32 -> vector<8x128xf32>
    %721 = arith.mulf %720, %7 : vector<8x128xf32>
    %c105 = arith.constant 105 : index
    %722 = memref.load %arg4[%c105] : memref<273xf32, #tpu.memory_space<smem>>
    %723 = vector.broadcast %722 : f32 to vector<8x128xf32>
    %724 = arith.mulf %721, %723 : vector<8x128xf32>
    %725 = arith.addf %677, %724 : vector<8x128xf32>
    %c7_i32_153 = arith.constant 7 : i32
    %726 = tpu.dynamic_rotate %498 by %c7_i32_153 dim 1 : vector<8x128xf32>, i32 -> vector<8x128xf32>
    %727 = arith.mulf %726, %7 : vector<8x128xf32>
    %c106 = arith.constant 106 : index
    %728 = memref.load %arg4[%c106] : memref<273xf32, #tpu.memory_space<smem>>
    %729 = vector.broadcast %728 : f32 to vector<8x128xf32>
    %730 = arith.mulf %727, %729 : vector<8x128xf32>
    %731 = arith.addf %683, %730 : vector<8x128xf32>
    %c7_i32_154 = arith.constant 7 : i32
    %732 = tpu.dynamic_rotate %517 by %c7_i32_154 dim 1 : vector<8x128xf32>, i32 -> vector<8x128xf32>
    %733 = arith.mulf %732, %7 : vector<8x128xf32>
    %c107 = arith.constant 107 : index
    %734 = memref.load %arg4[%c107] : memref<273xf32, #tpu.memory_space<smem>>
    %735 = vector.broadcast %734 : f32 to vector<8x128xf32>
    %736 = arith.mulf %733, %735 : vector<8x128xf32>
    %737 = arith.addf %689, %736 : vector<8x128xf32>
    %c7_i32_155 = arith.constant 7 : i32
    %738 = tpu.dynamic_rotate %536 by %c7_i32_155 dim 1 : vector<8x128xf32>, i32 -> vector<8x128xf32>
    %739 = arith.mulf %738, %7 : vector<8x128xf32>
    %c108 = arith.constant 108 : index
    %740 = memref.load %arg4[%c108] : memref<273xf32, #tpu.memory_space<smem>>
    %741 = vector.broadcast %740 : f32 to vector<8x128xf32>
    %742 = arith.mulf %739, %741 : vector<8x128xf32>
    %743 = arith.addf %695, %742 : vector<8x128xf32>
    %c7_i32_156 = arith.constant 7 : i32
    %744 = tpu.dynamic_rotate %555 by %c7_i32_156 dim 1 : vector<8x128xf32>, i32 -> vector<8x128xf32>
    %745 = arith.mulf %744, %7 : vector<8x128xf32>
    %c109 = arith.constant 109 : index
    %746 = memref.load %arg4[%c109] : memref<273xf32, #tpu.memory_space<smem>>
    %747 = vector.broadcast %746 : f32 to vector<8x128xf32>
    %748 = arith.mulf %745, %747 : vector<8x128xf32>
    %749 = arith.addf %701, %748 : vector<8x128xf32>
    %c7_i32_157 = arith.constant 7 : i32
    %750 = tpu.dynamic_rotate %574 by %c7_i32_157 dim 1 : vector<8x128xf32>, i32 -> vector<8x128xf32>
    %751 = arith.mulf %750, %7 : vector<8x128xf32>
    %c110 = arith.constant 110 : index
    %752 = memref.load %arg4[%c110] : memref<273xf32, #tpu.memory_space<smem>>
    %753 = vector.broadcast %752 : f32 to vector<8x128xf32>
    %754 = arith.mulf %751, %753 : vector<8x128xf32>
    %755 = arith.addf %707, %754 : vector<8x128xf32>
    %c7_i32_158 = arith.constant 7 : i32
    %756 = tpu.dynamic_rotate %593 by %c7_i32_158 dim 1 : vector<8x128xf32>, i32 -> vector<8x128xf32>
    %757 = arith.mulf %756, %7 : vector<8x128xf32>
    %c111 = arith.constant 111 : index
    %758 = memref.load %arg4[%c111] : memref<273xf32, #tpu.memory_space<smem>>
    %759 = vector.broadcast %758 : f32 to vector<8x128xf32>
    %760 = arith.mulf %757, %759 : vector<8x128xf32>
    %761 = arith.addf %713, %760 : vector<8x128xf32>
    %c1_i32_159 = arith.constant 1 : i32
    %762 = tpu.dynamic_rotate %460 by %c1_i32_159 dim 1 : vector<8x128xf32>, i32 -> vector<8x128xf32>
    %763 = arith.mulf %762, %9 : vector<8x128xf32>
    %c112 = arith.constant 112 : index
    %764 = memref.load %arg4[%c112] : memref<273xf32, #tpu.memory_space<smem>>
    %765 = vector.broadcast %764 : f32 to vector<8x128xf32>
    %766 = arith.mulf %763, %765 : vector<8x128xf32>
    %767 = arith.addf %719, %766 : vector<8x128xf32>
    %c1_i32_160 = arith.constant 1 : i32
    %768 = tpu.dynamic_rotate %479 by %c1_i32_160 dim 1 : vector<8x128xf32>, i32 -> vector<8x128xf32>
    %769 = arith.mulf %768, %9 : vector<8x128xf32>
    %c113 = arith.constant 113 : index
    %770 = memref.load %arg4[%c113] : memref<273xf32, #tpu.memory_space<smem>>
    %771 = vector.broadcast %770 : f32 to vector<8x128xf32>
    %772 = arith.mulf %769, %771 : vector<8x128xf32>
    %773 = arith.addf %725, %772 : vector<8x128xf32>
    %c1_i32_161 = arith.constant 1 : i32
    %774 = tpu.dynamic_rotate %498 by %c1_i32_161 dim 1 : vector<8x128xf32>, i32 -> vector<8x128xf32>
    %775 = arith.mulf %774, %9 : vector<8x128xf32>
    %c114 = arith.constant 114 : index
    %776 = memref.load %arg4[%c114] : memref<273xf32, #tpu.memory_space<smem>>
    %777 = vector.broadcast %776 : f32 to vector<8x128xf32>
    %778 = arith.mulf %775, %777 : vector<8x128xf32>
    %779 = arith.addf %731, %778 : vector<8x128xf32>
    %c1_i32_162 = arith.constant 1 : i32
    %780 = tpu.dynamic_rotate %517 by %c1_i32_162 dim 1 : vector<8x128xf32>, i32 -> vector<8x128xf32>
    %781 = arith.mulf %780, %9 : vector<8x128xf32>
    %c115 = arith.constant 115 : index
    %782 = memref.load %arg4[%c115] : memref<273xf32, #tpu.memory_space<smem>>
    %783 = vector.broadcast %782 : f32 to vector<8x128xf32>
    %784 = arith.mulf %781, %783 : vector<8x128xf32>
    %785 = arith.addf %737, %784 : vector<8x128xf32>
    %c1_i32_163 = arith.constant 1 : i32
    %786 = tpu.dynamic_rotate %536 by %c1_i32_163 dim 1 : vector<8x128xf32>, i32 -> vector<8x128xf32>
    %787 = arith.mulf %786, %9 : vector<8x128xf32>
    %c116 = arith.constant 116 : index
    %788 = memref.load %arg4[%c116] : memref<273xf32, #tpu.memory_space<smem>>
    %789 = vector.broadcast %788 : f32 to vector<8x128xf32>
    %790 = arith.mulf %787, %789 : vector<8x128xf32>
    %791 = arith.addf %743, %790 : vector<8x128xf32>
    %c1_i32_164 = arith.constant 1 : i32
    %792 = tpu.dynamic_rotate %555 by %c1_i32_164 dim 1 : vector<8x128xf32>, i32 -> vector<8x128xf32>
    %793 = arith.mulf %792, %9 : vector<8x128xf32>
    %c117 = arith.constant 117 : index
    %794 = memref.load %arg4[%c117] : memref<273xf32, #tpu.memory_space<smem>>
    %795 = vector.broadcast %794 : f32 to vector<8x128xf32>
    %796 = arith.mulf %793, %795 : vector<8x128xf32>
    %797 = arith.addf %749, %796 : vector<8x128xf32>
    %c1_i32_165 = arith.constant 1 : i32
    %798 = tpu.dynamic_rotate %574 by %c1_i32_165 dim 1 : vector<8x128xf32>, i32 -> vector<8x128xf32>
    %799 = arith.mulf %798, %9 : vector<8x128xf32>
    %c118 = arith.constant 118 : index
    %800 = memref.load %arg4[%c118] : memref<273xf32, #tpu.memory_space<smem>>
    %801 = vector.broadcast %800 : f32 to vector<8x128xf32>
    %802 = arith.mulf %799, %801 : vector<8x128xf32>
    %803 = arith.addf %755, %802 : vector<8x128xf32>
    %c1_i32_166 = arith.constant 1 : i32
    %804 = tpu.dynamic_rotate %593 by %c1_i32_166 dim 1 : vector<8x128xf32>, i32 -> vector<8x128xf32>
    %805 = arith.mulf %804, %9 : vector<8x128xf32>
    %c119 = arith.constant 119 : index
    %806 = memref.load %arg4[%c119] : memref<273xf32, #tpu.memory_space<smem>>
    %807 = vector.broadcast %806 : f32 to vector<8x128xf32>
    %808 = arith.mulf %805, %807 : vector<8x128xf32>
    %809 = arith.addf %761, %808 : vector<8x128xf32>
    %c127_i32_167 = arith.constant 127 : i32
    %810 = tpu.dynamic_rotate %460 by %c127_i32_167 dim 1 : vector<8x128xf32>, i32 -> vector<8x128xf32>
    %811 = arith.mulf %810, %11 : vector<8x128xf32>
    %c128 = arith.constant 128 : index
    %812 = memref.load %arg4[%c128] : memref<273xf32, #tpu.memory_space<smem>>
    %813 = vector.broadcast %812 : f32 to vector<8x128xf32>
    %814 = arith.mulf %811, %813 : vector<8x128xf32>
    %815 = arith.addf %767, %814 : vector<8x128xf32>
    %c127_i32_168 = arith.constant 127 : i32
    %816 = tpu.dynamic_rotate %479 by %c127_i32_168 dim 1 : vector<8x128xf32>, i32 -> vector<8x128xf32>
    %817 = arith.mulf %816, %11 : vector<8x128xf32>
    %c129 = arith.constant 129 : index
    %818 = memref.load %arg4[%c129] : memref<273xf32, #tpu.memory_space<smem>>
    %819 = vector.broadcast %818 : f32 to vector<8x128xf32>
    %820 = arith.mulf %817, %819 : vector<8x128xf32>
    %821 = arith.addf %773, %820 : vector<8x128xf32>
    %c127_i32_169 = arith.constant 127 : i32
    %822 = tpu.dynamic_rotate %498 by %c127_i32_169 dim 1 : vector<8x128xf32>, i32 -> vector<8x128xf32>
    %823 = arith.mulf %822, %11 : vector<8x128xf32>
    %c130 = arith.constant 130 : index
    %824 = memref.load %arg4[%c130] : memref<273xf32, #tpu.memory_space<smem>>
    %825 = vector.broadcast %824 : f32 to vector<8x128xf32>
    %826 = arith.mulf %823, %825 : vector<8x128xf32>
    %827 = arith.addf %779, %826 : vector<8x128xf32>
    %c127_i32_170 = arith.constant 127 : i32
    %828 = tpu.dynamic_rotate %517 by %c127_i32_170 dim 1 : vector<8x128xf32>, i32 -> vector<8x128xf32>
    %829 = arith.mulf %828, %11 : vector<8x128xf32>
    %c131 = arith.constant 131 : index
    %830 = memref.load %arg4[%c131] : memref<273xf32, #tpu.memory_space<smem>>
    %831 = vector.broadcast %830 : f32 to vector<8x128xf32>
    %832 = arith.mulf %829, %831 : vector<8x128xf32>
    %833 = arith.addf %785, %832 : vector<8x128xf32>
    %c127_i32_171 = arith.constant 127 : i32
    %834 = tpu.dynamic_rotate %536 by %c127_i32_171 dim 1 : vector<8x128xf32>, i32 -> vector<8x128xf32>
    %835 = arith.mulf %834, %11 : vector<8x128xf32>
    %c132 = arith.constant 132 : index
    %836 = memref.load %arg4[%c132] : memref<273xf32, #tpu.memory_space<smem>>
    %837 = vector.broadcast %836 : f32 to vector<8x128xf32>
    %838 = arith.mulf %835, %837 : vector<8x128xf32>
    %839 = arith.addf %791, %838 : vector<8x128xf32>
    %c127_i32_172 = arith.constant 127 : i32
    %840 = tpu.dynamic_rotate %555 by %c127_i32_172 dim 1 : vector<8x128xf32>, i32 -> vector<8x128xf32>
    %841 = arith.mulf %840, %11 : vector<8x128xf32>
    %c133 = arith.constant 133 : index
    %842 = memref.load %arg4[%c133] : memref<273xf32, #tpu.memory_space<smem>>
    %843 = vector.broadcast %842 : f32 to vector<8x128xf32>
    %844 = arith.mulf %841, %843 : vector<8x128xf32>
    %845 = arith.addf %797, %844 : vector<8x128xf32>
    %c127_i32_173 = arith.constant 127 : i32
    %846 = tpu.dynamic_rotate %574 by %c127_i32_173 dim 1 : vector<8x128xf32>, i32 -> vector<8x128xf32>
    %847 = arith.mulf %846, %11 : vector<8x128xf32>
    %c134 = arith.constant 134 : index
    %848 = memref.load %arg4[%c134] : memref<273xf32, #tpu.memory_space<smem>>
    %849 = vector.broadcast %848 : f32 to vector<8x128xf32>
    %850 = arith.mulf %847, %849 : vector<8x128xf32>
    %851 = arith.addf %803, %850 : vector<8x128xf32>
    %c127_i32_174 = arith.constant 127 : i32
    %852 = tpu.dynamic_rotate %593 by %c127_i32_174 dim 1 : vector<8x128xf32>, i32 -> vector<8x128xf32>
    %853 = arith.mulf %852, %11 : vector<8x128xf32>
    %c135 = arith.constant 135 : index
    %854 = memref.load %arg4[%c135] : memref<273xf32, #tpu.memory_space<smem>>
    %855 = vector.broadcast %854 : f32 to vector<8x128xf32>
    %856 = arith.mulf %853, %855 : vector<8x128xf32>
    %857 = arith.addf %809, %856 : vector<8x128xf32>
    %c121_i32_175 = arith.constant 121 : i32
    %858 = tpu.dynamic_rotate %460 by %c121_i32_175 dim 1 : vector<8x128xf32>, i32 -> vector<8x128xf32>
    %859 = arith.mulf %858, %13 : vector<8x128xf32>
    %c136 = arith.constant 136 : index
    %860 = memref.load %arg4[%c136] : memref<273xf32, #tpu.memory_space<smem>>
    %861 = vector.broadcast %860 : f32 to vector<8x128xf32>
    %862 = arith.mulf %859, %861 : vector<8x128xf32>
    %863 = arith.addf %815, %862 : vector<8x128xf32>
    %c121_i32_176 = arith.constant 121 : i32
    %864 = tpu.dynamic_rotate %479 by %c121_i32_176 dim 1 : vector<8x128xf32>, i32 -> vector<8x128xf32>
    %865 = arith.mulf %864, %13 : vector<8x128xf32>
    %c137 = arith.constant 137 : index
    %866 = memref.load %arg4[%c137] : memref<273xf32, #tpu.memory_space<smem>>
    %867 = vector.broadcast %866 : f32 to vector<8x128xf32>
    %868 = arith.mulf %865, %867 : vector<8x128xf32>
    %869 = arith.addf %821, %868 : vector<8x128xf32>
    %c121_i32_177 = arith.constant 121 : i32
    %870 = tpu.dynamic_rotate %498 by %c121_i32_177 dim 1 : vector<8x128xf32>, i32 -> vector<8x128xf32>
    %871 = arith.mulf %870, %13 : vector<8x128xf32>
    %c138 = arith.constant 138 : index
    %872 = memref.load %arg4[%c138] : memref<273xf32, #tpu.memory_space<smem>>
    %873 = vector.broadcast %872 : f32 to vector<8x128xf32>
    %874 = arith.mulf %871, %873 : vector<8x128xf32>
    %875 = arith.addf %827, %874 : vector<8x128xf32>
    %c121_i32_178 = arith.constant 121 : i32
    %876 = tpu.dynamic_rotate %517 by %c121_i32_178 dim 1 : vector<8x128xf32>, i32 -> vector<8x128xf32>
    %877 = arith.mulf %876, %13 : vector<8x128xf32>
    %c139 = arith.constant 139 : index
    %878 = memref.load %arg4[%c139] : memref<273xf32, #tpu.memory_space<smem>>
    %879 = vector.broadcast %878 : f32 to vector<8x128xf32>
    %880 = arith.mulf %877, %879 : vector<8x128xf32>
    %881 = arith.addf %833, %880 : vector<8x128xf32>
    %c121_i32_179 = arith.constant 121 : i32
    %882 = tpu.dynamic_rotate %536 by %c121_i32_179 dim 1 : vector<8x128xf32>, i32 -> vector<8x128xf32>
    %883 = arith.mulf %882, %13 : vector<8x128xf32>
    %c140 = arith.constant 140 : index
    %884 = memref.load %arg4[%c140] : memref<273xf32, #tpu.memory_space<smem>>
    %885 = vector.broadcast %884 : f32 to vector<8x128xf32>
    %886 = arith.mulf %883, %885 : vector<8x128xf32>
    %887 = arith.addf %839, %886 : vector<8x128xf32>
    %c121_i32_180 = arith.constant 121 : i32
    %888 = tpu.dynamic_rotate %555 by %c121_i32_180 dim 1 : vector<8x128xf32>, i32 -> vector<8x128xf32>
    %889 = arith.mulf %888, %13 : vector<8x128xf32>
    %c141 = arith.constant 141 : index
    %890 = memref.load %arg4[%c141] : memref<273xf32, #tpu.memory_space<smem>>
    %891 = vector.broadcast %890 : f32 to vector<8x128xf32>
    %892 = arith.mulf %889, %891 : vector<8x128xf32>
    %893 = arith.addf %845, %892 : vector<8x128xf32>
    %c121_i32_181 = arith.constant 121 : i32
    %894 = tpu.dynamic_rotate %574 by %c121_i32_181 dim 1 : vector<8x128xf32>, i32 -> vector<8x128xf32>
    %895 = arith.mulf %894, %13 : vector<8x128xf32>
    %c142 = arith.constant 142 : index
    %896 = memref.load %arg4[%c142] : memref<273xf32, #tpu.memory_space<smem>>
    %897 = vector.broadcast %896 : f32 to vector<8x128xf32>
    %898 = arith.mulf %895, %897 : vector<8x128xf32>
    %899 = arith.addf %851, %898 : vector<8x128xf32>
    %c121_i32_182 = arith.constant 121 : i32
    %900 = tpu.dynamic_rotate %593 by %c121_i32_182 dim 1 : vector<8x128xf32>, i32 -> vector<8x128xf32>
    %901 = arith.mulf %900, %13 : vector<8x128xf32>
    %c143 = arith.constant 143 : index
    %902 = memref.load %arg4[%c143] : memref<273xf32, #tpu.memory_space<smem>>
    %903 = vector.broadcast %902 : f32 to vector<8x128xf32>
    %904 = arith.mulf %901, %903 : vector<8x128xf32>
    %905 = arith.addf %857, %904 : vector<8x128xf32>
    %c120_i32_183 = arith.constant 120 : i32
    %906 = tpu.dynamic_rotate %460 by %c120_i32_183 dim 1 : vector<8x128xf32>, i32 -> vector<8x128xf32>
    %907 = arith.mulf %906, %15 : vector<8x128xf32>
    %c144 = arith.constant 144 : index
    %908 = memref.load %arg4[%c144] : memref<273xf32, #tpu.memory_space<smem>>
    %909 = vector.broadcast %908 : f32 to vector<8x128xf32>
    %910 = arith.mulf %907, %909 : vector<8x128xf32>
    %911 = arith.addf %863, %910 : vector<8x128xf32>
    %c120_i32_184 = arith.constant 120 : i32
    %912 = tpu.dynamic_rotate %479 by %c120_i32_184 dim 1 : vector<8x128xf32>, i32 -> vector<8x128xf32>
    %913 = arith.mulf %912, %15 : vector<8x128xf32>
    %c145 = arith.constant 145 : index
    %914 = memref.load %arg4[%c145] : memref<273xf32, #tpu.memory_space<smem>>
    %915 = vector.broadcast %914 : f32 to vector<8x128xf32>
    %916 = arith.mulf %913, %915 : vector<8x128xf32>
    %917 = arith.addf %869, %916 : vector<8x128xf32>
    %c120_i32_185 = arith.constant 120 : i32
    %918 = tpu.dynamic_rotate %498 by %c120_i32_185 dim 1 : vector<8x128xf32>, i32 -> vector<8x128xf32>
    %919 = arith.mulf %918, %15 : vector<8x128xf32>
    %c146 = arith.constant 146 : index
    %920 = memref.load %arg4[%c146] : memref<273xf32, #tpu.memory_space<smem>>
    %921 = vector.broadcast %920 : f32 to vector<8x128xf32>
    %922 = arith.mulf %919, %921 : vector<8x128xf32>
    %923 = arith.addf %875, %922 : vector<8x128xf32>
    %c120_i32_186 = arith.constant 120 : i32
    %924 = tpu.dynamic_rotate %517 by %c120_i32_186 dim 1 : vector<8x128xf32>, i32 -> vector<8x128xf32>
    %925 = arith.mulf %924, %15 : vector<8x128xf32>
    %c147 = arith.constant 147 : index
    %926 = memref.load %arg4[%c147] : memref<273xf32, #tpu.memory_space<smem>>
    %927 = vector.broadcast %926 : f32 to vector<8x128xf32>
    %928 = arith.mulf %925, %927 : vector<8x128xf32>
    %929 = arith.addf %881, %928 : vector<8x128xf32>
    %c120_i32_187 = arith.constant 120 : i32
    %930 = tpu.dynamic_rotate %536 by %c120_i32_187 dim 1 : vector<8x128xf32>, i32 -> vector<8x128xf32>
    %931 = arith.mulf %930, %15 : vector<8x128xf32>
    %c148 = arith.constant 148 : index
    %932 = memref.load %arg4[%c148] : memref<273xf32, #tpu.memory_space<smem>>
    %933 = vector.broadcast %932 : f32 to vector<8x128xf32>
    %934 = arith.mulf %931, %933 : vector<8x128xf32>
    %935 = arith.addf %887, %934 : vector<8x128xf32>
    %c120_i32_188 = arith.constant 120 : i32
    %936 = tpu.dynamic_rotate %555 by %c120_i32_188 dim 1 : vector<8x128xf32>, i32 -> vector<8x128xf32>
    %937 = arith.mulf %936, %15 : vector<8x128xf32>
    %c149 = arith.constant 149 : index
    %938 = memref.load %arg4[%c149] : memref<273xf32, #tpu.memory_space<smem>>
    %939 = vector.broadcast %938 : f32 to vector<8x128xf32>
    %940 = arith.mulf %937, %939 : vector<8x128xf32>
    %941 = arith.addf %893, %940 : vector<8x128xf32>
    %c120_i32_189 = arith.constant 120 : i32
    %942 = tpu.dynamic_rotate %574 by %c120_i32_189 dim 1 : vector<8x128xf32>, i32 -> vector<8x128xf32>
    %943 = arith.mulf %942, %15 : vector<8x128xf32>
    %c150 = arith.constant 150 : index
    %944 = memref.load %arg4[%c150] : memref<273xf32, #tpu.memory_space<smem>>
    %945 = vector.broadcast %944 : f32 to vector<8x128xf32>
    %946 = arith.mulf %943, %945 : vector<8x128xf32>
    %947 = arith.addf %899, %946 : vector<8x128xf32>
    %c120_i32_190 = arith.constant 120 : i32
    %948 = tpu.dynamic_rotate %593 by %c120_i32_190 dim 1 : vector<8x128xf32>, i32 -> vector<8x128xf32>
    %949 = arith.mulf %948, %15 : vector<8x128xf32>
    %c151 = arith.constant 151 : index
    %950 = memref.load %arg4[%c151] : memref<273xf32, #tpu.memory_space<smem>>
    %951 = vector.broadcast %950 : f32 to vector<8x128xf32>
    %952 = arith.mulf %949, %951 : vector<8x128xf32>
    %953 = arith.addf %905, %952 : vector<8x128xf32>
    %c119_i32_191 = arith.constant 119 : i32
    %954 = tpu.dynamic_rotate %460 by %c119_i32_191 dim 1 : vector<8x128xf32>, i32 -> vector<8x128xf32>
    %955 = arith.mulf %954, %17 : vector<8x128xf32>
    %c152 = arith.constant 152 : index
    %956 = memref.load %arg4[%c152] : memref<273xf32, #tpu.memory_space<smem>>
    %957 = vector.broadcast %956 : f32 to vector<8x128xf32>
    %958 = arith.mulf %955, %957 : vector<8x128xf32>
    %959 = arith.addf %911, %958 : vector<8x128xf32>
    %c119_i32_192 = arith.constant 119 : i32
    %960 = tpu.dynamic_rotate %479 by %c119_i32_192 dim 1 : vector<8x128xf32>, i32 -> vector<8x128xf32>
    %961 = arith.mulf %960, %17 : vector<8x128xf32>
    %c153 = arith.constant 153 : index
    %962 = memref.load %arg4[%c153] : memref<273xf32, #tpu.memory_space<smem>>
    %963 = vector.broadcast %962 : f32 to vector<8x128xf32>
    %964 = arith.mulf %961, %963 : vector<8x128xf32>
    %965 = arith.addf %917, %964 : vector<8x128xf32>
    %c119_i32_193 = arith.constant 119 : i32
    %966 = tpu.dynamic_rotate %498 by %c119_i32_193 dim 1 : vector<8x128xf32>, i32 -> vector<8x128xf32>
    %967 = arith.mulf %966, %17 : vector<8x128xf32>
    %c154 = arith.constant 154 : index
    %968 = memref.load %arg4[%c154] : memref<273xf32, #tpu.memory_space<smem>>
    %969 = vector.broadcast %968 : f32 to vector<8x128xf32>
    %970 = arith.mulf %967, %969 : vector<8x128xf32>
    %971 = arith.addf %923, %970 : vector<8x128xf32>
    %c119_i32_194 = arith.constant 119 : i32
    %972 = tpu.dynamic_rotate %517 by %c119_i32_194 dim 1 : vector<8x128xf32>, i32 -> vector<8x128xf32>
    %973 = arith.mulf %972, %17 : vector<8x128xf32>
    %c155 = arith.constant 155 : index
    %974 = memref.load %arg4[%c155] : memref<273xf32, #tpu.memory_space<smem>>
    %975 = vector.broadcast %974 : f32 to vector<8x128xf32>
    %976 = arith.mulf %973, %975 : vector<8x128xf32>
    %977 = arith.addf %929, %976 : vector<8x128xf32>
    %c119_i32_195 = arith.constant 119 : i32
    %978 = tpu.dynamic_rotate %536 by %c119_i32_195 dim 1 : vector<8x128xf32>, i32 -> vector<8x128xf32>
    %979 = arith.mulf %978, %17 : vector<8x128xf32>
    %c156 = arith.constant 156 : index
    %980 = memref.load %arg4[%c156] : memref<273xf32, #tpu.memory_space<smem>>
    %981 = vector.broadcast %980 : f32 to vector<8x128xf32>
    %982 = arith.mulf %979, %981 : vector<8x128xf32>
    %983 = arith.addf %935, %982 : vector<8x128xf32>
    %c119_i32_196 = arith.constant 119 : i32
    %984 = tpu.dynamic_rotate %555 by %c119_i32_196 dim 1 : vector<8x128xf32>, i32 -> vector<8x128xf32>
    %985 = arith.mulf %984, %17 : vector<8x128xf32>
    %c157 = arith.constant 157 : index
    %986 = memref.load %arg4[%c157] : memref<273xf32, #tpu.memory_space<smem>>
    %987 = vector.broadcast %986 : f32 to vector<8x128xf32>
    %988 = arith.mulf %985, %987 : vector<8x128xf32>
    %989 = arith.addf %941, %988 : vector<8x128xf32>
    %c119_i32_197 = arith.constant 119 : i32
    %990 = tpu.dynamic_rotate %574 by %c119_i32_197 dim 1 : vector<8x128xf32>, i32 -> vector<8x128xf32>
    %991 = arith.mulf %990, %17 : vector<8x128xf32>
    %c158 = arith.constant 158 : index
    %992 = memref.load %arg4[%c158] : memref<273xf32, #tpu.memory_space<smem>>
    %993 = vector.broadcast %992 : f32 to vector<8x128xf32>
    %994 = arith.mulf %991, %993 : vector<8x128xf32>
    %995 = arith.addf %947, %994 : vector<8x128xf32>
    %c119_i32_198 = arith.constant 119 : i32
    %996 = tpu.dynamic_rotate %593 by %c119_i32_198 dim 1 : vector<8x128xf32>, i32 -> vector<8x128xf32>
    %997 = arith.mulf %996, %17 : vector<8x128xf32>
    %c159 = arith.constant 159 : index
    %998 = memref.load %arg4[%c159] : memref<273xf32, #tpu.memory_space<smem>>
    %999 = vector.broadcast %998 : f32 to vector<8x128xf32>
    %1000 = arith.mulf %997, %999 : vector<8x128xf32>
    %1001 = arith.addf %953, %1000 : vector<8x128xf32>
    %c160 = arith.constant 160 : index
    %1002 = memref.load %arg4[%c160] : memref<273xf32, #tpu.memory_space<smem>>
    %1003 = vector.broadcast %1002 : f32 to vector<8x128xf32>
    %1004 = arith.mulf %959, %1003 : vector<8x128xf32>
    %c168 = arith.constant 168 : index
    %1005 = memref.load %arg4[%c168] : memref<273xf32, #tpu.memory_space<smem>>
    %1006 = vector.broadcast %1005 : f32 to vector<8x128xf32>
    %1007 = arith.addf %1004, %1006 : vector<8x128xf32>
    %cst_199 = arith.constant 5.000000e-01 : f32
    %1008 = vector.broadcast %cst_199 : f32 to vector<8x128xf32>
    %1009 = arith.mulf %1008, %1007 : vector<8x128xf32>
    %cst_200 = arith.constant 4.471500e-02 : f32
    %1010 = vector.broadcast %cst_200 : f32 to vector<8x128xf32>
    %1011 = arith.mulf %1010, %1007 : vector<8x128xf32>
    %1012 = arith.mulf %1011, %1007 : vector<8x128xf32>
    %1013 = arith.mulf %1012, %1007 : vector<8x128xf32>
    %1014 = arith.addf %1007, %1013 : vector<8x128xf32>
    %cst_201 = arith.constant 0.797884583 : f32
    %1015 = vector.broadcast %cst_201 : f32 to vector<8x128xf32>
    %1016 = arith.mulf %1015, %1014 : vector<8x128xf32>
    %1017 = math.tanh %1016 : vector<8x128xf32>
    %cst_202 = arith.constant 1.000000e+00 : f32
    %1018 = vector.broadcast %cst_202 : f32 to vector<8x128xf32>
    %1019 = arith.addf %1018, %1017 : vector<8x128xf32>
    %1020 = arith.mulf %1009, %1019 : vector<8x128xf32>
    %c161 = arith.constant 161 : index
    %1021 = memref.load %arg4[%c161] : memref<273xf32, #tpu.memory_space<smem>>
    %1022 = vector.broadcast %1021 : f32 to vector<8x128xf32>
    %1023 = arith.mulf %965, %1022 : vector<8x128xf32>
    %c169 = arith.constant 169 : index
    %1024 = memref.load %arg4[%c169] : memref<273xf32, #tpu.memory_space<smem>>
    %1025 = vector.broadcast %1024 : f32 to vector<8x128xf32>
    %1026 = arith.addf %1023, %1025 : vector<8x128xf32>
    %cst_203 = arith.constant 5.000000e-01 : f32
    %1027 = vector.broadcast %cst_203 : f32 to vector<8x128xf32>
    %1028 = arith.mulf %1027, %1026 : vector<8x128xf32>
    %cst_204 = arith.constant 4.471500e-02 : f32
    %1029 = vector.broadcast %cst_204 : f32 to vector<8x128xf32>
    %1030 = arith.mulf %1029, %1026 : vector<8x128xf32>
    %1031 = arith.mulf %1030, %1026 : vector<8x128xf32>
    %1032 = arith.mulf %1031, %1026 : vector<8x128xf32>
    %1033 = arith.addf %1026, %1032 : vector<8x128xf32>
    %cst_205 = arith.constant 0.797884583 : f32
    %1034 = vector.broadcast %cst_205 : f32 to vector<8x128xf32>
    %1035 = arith.mulf %1034, %1033 : vector<8x128xf32>
    %1036 = math.tanh %1035 : vector<8x128xf32>
    %cst_206 = arith.constant 1.000000e+00 : f32
    %1037 = vector.broadcast %cst_206 : f32 to vector<8x128xf32>
    %1038 = arith.addf %1037, %1036 : vector<8x128xf32>
    %1039 = arith.mulf %1028, %1038 : vector<8x128xf32>
    %c162 = arith.constant 162 : index
    %1040 = memref.load %arg4[%c162] : memref<273xf32, #tpu.memory_space<smem>>
    %1041 = vector.broadcast %1040 : f32 to vector<8x128xf32>
    %1042 = arith.mulf %971, %1041 : vector<8x128xf32>
    %c170 = arith.constant 170 : index
    %1043 = memref.load %arg4[%c170] : memref<273xf32, #tpu.memory_space<smem>>
    %1044 = vector.broadcast %1043 : f32 to vector<8x128xf32>
    %1045 = arith.addf %1042, %1044 : vector<8x128xf32>
    %cst_207 = arith.constant 5.000000e-01 : f32
    %1046 = vector.broadcast %cst_207 : f32 to vector<8x128xf32>
    %1047 = arith.mulf %1046, %1045 : vector<8x128xf32>
    %cst_208 = arith.constant 4.471500e-02 : f32
    %1048 = vector.broadcast %cst_208 : f32 to vector<8x128xf32>
    %1049 = arith.mulf %1048, %1045 : vector<8x128xf32>
    %1050 = arith.mulf %1049, %1045 : vector<8x128xf32>
    %1051 = arith.mulf %1050, %1045 : vector<8x128xf32>
    %1052 = arith.addf %1045, %1051 : vector<8x128xf32>
    %cst_209 = arith.constant 0.797884583 : f32
    %1053 = vector.broadcast %cst_209 : f32 to vector<8x128xf32>
    %1054 = arith.mulf %1053, %1052 : vector<8x128xf32>
    %1055 = math.tanh %1054 : vector<8x128xf32>
    %cst_210 = arith.constant 1.000000e+00 : f32
    %1056 = vector.broadcast %cst_210 : f32 to vector<8x128xf32>
    %1057 = arith.addf %1056, %1055 : vector<8x128xf32>
    %1058 = arith.mulf %1047, %1057 : vector<8x128xf32>
    %c163 = arith.constant 163 : index
    %1059 = memref.load %arg4[%c163] : memref<273xf32, #tpu.memory_space<smem>>
    %1060 = vector.broadcast %1059 : f32 to vector<8x128xf32>
    %1061 = arith.mulf %977, %1060 : vector<8x128xf32>
    %c171 = arith.constant 171 : index
    %1062 = memref.load %arg4[%c171] : memref<273xf32, #tpu.memory_space<smem>>
    %1063 = vector.broadcast %1062 : f32 to vector<8x128xf32>
    %1064 = arith.addf %1061, %1063 : vector<8x128xf32>
    %cst_211 = arith.constant 5.000000e-01 : f32
    %1065 = vector.broadcast %cst_211 : f32 to vector<8x128xf32>
    %1066 = arith.mulf %1065, %1064 : vector<8x128xf32>
    %cst_212 = arith.constant 4.471500e-02 : f32
    %1067 = vector.broadcast %cst_212 : f32 to vector<8x128xf32>
    %1068 = arith.mulf %1067, %1064 : vector<8x128xf32>
    %1069 = arith.mulf %1068, %1064 : vector<8x128xf32>
    %1070 = arith.mulf %1069, %1064 : vector<8x128xf32>
    %1071 = arith.addf %1064, %1070 : vector<8x128xf32>
    %cst_213 = arith.constant 0.797884583 : f32
    %1072 = vector.broadcast %cst_213 : f32 to vector<8x128xf32>
    %1073 = arith.mulf %1072, %1071 : vector<8x128xf32>
    %1074 = math.tanh %1073 : vector<8x128xf32>
    %cst_214 = arith.constant 1.000000e+00 : f32
    %1075 = vector.broadcast %cst_214 : f32 to vector<8x128xf32>
    %1076 = arith.addf %1075, %1074 : vector<8x128xf32>
    %1077 = arith.mulf %1066, %1076 : vector<8x128xf32>
    %c164 = arith.constant 164 : index
    %1078 = memref.load %arg4[%c164] : memref<273xf32, #tpu.memory_space<smem>>
    %1079 = vector.broadcast %1078 : f32 to vector<8x128xf32>
    %1080 = arith.mulf %983, %1079 : vector<8x128xf32>
    %c172 = arith.constant 172 : index
    %1081 = memref.load %arg4[%c172] : memref<273xf32, #tpu.memory_space<smem>>
    %1082 = vector.broadcast %1081 : f32 to vector<8x128xf32>
    %1083 = arith.addf %1080, %1082 : vector<8x128xf32>
    %cst_215 = arith.constant 5.000000e-01 : f32
    %1084 = vector.broadcast %cst_215 : f32 to vector<8x128xf32>
    %1085 = arith.mulf %1084, %1083 : vector<8x128xf32>
    %cst_216 = arith.constant 4.471500e-02 : f32
    %1086 = vector.broadcast %cst_216 : f32 to vector<8x128xf32>
    %1087 = arith.mulf %1086, %1083 : vector<8x128xf32>
    %1088 = arith.mulf %1087, %1083 : vector<8x128xf32>
    %1089 = arith.mulf %1088, %1083 : vector<8x128xf32>
    %1090 = arith.addf %1083, %1089 : vector<8x128xf32>
    %cst_217 = arith.constant 0.797884583 : f32
    %1091 = vector.broadcast %cst_217 : f32 to vector<8x128xf32>
    %1092 = arith.mulf %1091, %1090 : vector<8x128xf32>
    %1093 = math.tanh %1092 : vector<8x128xf32>
    %cst_218 = arith.constant 1.000000e+00 : f32
    %1094 = vector.broadcast %cst_218 : f32 to vector<8x128xf32>
    %1095 = arith.addf %1094, %1093 : vector<8x128xf32>
    %1096 = arith.mulf %1085, %1095 : vector<8x128xf32>
    %c165 = arith.constant 165 : index
    %1097 = memref.load %arg4[%c165] : memref<273xf32, #tpu.memory_space<smem>>
    %1098 = vector.broadcast %1097 : f32 to vector<8x128xf32>
    %1099 = arith.mulf %989, %1098 : vector<8x128xf32>
    %c173 = arith.constant 173 : index
    %1100 = memref.load %arg4[%c173] : memref<273xf32, #tpu.memory_space<smem>>
    %1101 = vector.broadcast %1100 : f32 to vector<8x128xf32>
    %1102 = arith.addf %1099, %1101 : vector<8x128xf32>
    %cst_219 = arith.constant 5.000000e-01 : f32
    %1103 = vector.broadcast %cst_219 : f32 to vector<8x128xf32>
    %1104 = arith.mulf %1103, %1102 : vector<8x128xf32>
    %cst_220 = arith.constant 4.471500e-02 : f32
    %1105 = vector.broadcast %cst_220 : f32 to vector<8x128xf32>
    %1106 = arith.mulf %1105, %1102 : vector<8x128xf32>
    %1107 = arith.mulf %1106, %1102 : vector<8x128xf32>
    %1108 = arith.mulf %1107, %1102 : vector<8x128xf32>
    %1109 = arith.addf %1102, %1108 : vector<8x128xf32>
    %cst_221 = arith.constant 0.797884583 : f32
    %1110 = vector.broadcast %cst_221 : f32 to vector<8x128xf32>
    %1111 = arith.mulf %1110, %1109 : vector<8x128xf32>
    %1112 = math.tanh %1111 : vector<8x128xf32>
    %cst_222 = arith.constant 1.000000e+00 : f32
    %1113 = vector.broadcast %cst_222 : f32 to vector<8x128xf32>
    %1114 = arith.addf %1113, %1112 : vector<8x128xf32>
    %1115 = arith.mulf %1104, %1114 : vector<8x128xf32>
    %c166 = arith.constant 166 : index
    %1116 = memref.load %arg4[%c166] : memref<273xf32, #tpu.memory_space<smem>>
    %1117 = vector.broadcast %1116 : f32 to vector<8x128xf32>
    %1118 = arith.mulf %995, %1117 : vector<8x128xf32>
    %c174 = arith.constant 174 : index
    %1119 = memref.load %arg4[%c174] : memref<273xf32, #tpu.memory_space<smem>>
    %1120 = vector.broadcast %1119 : f32 to vector<8x128xf32>
    %1121 = arith.addf %1118, %1120 : vector<8x128xf32>
    %cst_223 = arith.constant 5.000000e-01 : f32
    %1122 = vector.broadcast %cst_223 : f32 to vector<8x128xf32>
    %1123 = arith.mulf %1122, %1121 : vector<8x128xf32>
    %cst_224 = arith.constant 4.471500e-02 : f32
    %1124 = vector.broadcast %cst_224 : f32 to vector<8x128xf32>
    %1125 = arith.mulf %1124, %1121 : vector<8x128xf32>
    %1126 = arith.mulf %1125, %1121 : vector<8x128xf32>
    %1127 = arith.mulf %1126, %1121 : vector<8x128xf32>
    %1128 = arith.addf %1121, %1127 : vector<8x128xf32>
    %cst_225 = arith.constant 0.797884583 : f32
    %1129 = vector.broadcast %cst_225 : f32 to vector<8x128xf32>
    %1130 = arith.mulf %1129, %1128 : vector<8x128xf32>
    %1131 = math.tanh %1130 : vector<8x128xf32>
    %cst_226 = arith.constant 1.000000e+00 : f32
    %1132 = vector.broadcast %cst_226 : f32 to vector<8x128xf32>
    %1133 = arith.addf %1132, %1131 : vector<8x128xf32>
    %1134 = arith.mulf %1123, %1133 : vector<8x128xf32>
    %c167 = arith.constant 167 : index
    %1135 = memref.load %arg4[%c167] : memref<273xf32, #tpu.memory_space<smem>>
    %1136 = vector.broadcast %1135 : f32 to vector<8x128xf32>
    %1137 = arith.mulf %1001, %1136 : vector<8x128xf32>
    %c175 = arith.constant 175 : index
    %1138 = memref.load %arg4[%c175] : memref<273xf32, #tpu.memory_space<smem>>
    %1139 = vector.broadcast %1138 : f32 to vector<8x128xf32>
    %1140 = arith.addf %1137, %1139 : vector<8x128xf32>
    %cst_227 = arith.constant 5.000000e-01 : f32
    %1141 = vector.broadcast %cst_227 : f32 to vector<8x128xf32>
    %1142 = arith.mulf %1141, %1140 : vector<8x128xf32>
    %cst_228 = arith.constant 4.471500e-02 : f32
    %1143 = vector.broadcast %cst_228 : f32 to vector<8x128xf32>
    %1144 = arith.mulf %1143, %1140 : vector<8x128xf32>
    %1145 = arith.mulf %1144, %1140 : vector<8x128xf32>
    %1146 = arith.mulf %1145, %1140 : vector<8x128xf32>
    %1147 = arith.addf %1140, %1146 : vector<8x128xf32>
    %cst_229 = arith.constant 0.797884583 : f32
    %1148 = vector.broadcast %cst_229 : f32 to vector<8x128xf32>
    %1149 = arith.mulf %1148, %1147 : vector<8x128xf32>
    %1150 = math.tanh %1149 : vector<8x128xf32>
    %cst_230 = arith.constant 1.000000e+00 : f32
    %1151 = vector.broadcast %cst_230 : f32 to vector<8x128xf32>
    %1152 = arith.addf %1151, %1150 : vector<8x128xf32>
    %1153 = arith.mulf %1142, %1152 : vector<8x128xf32>
    %1154 = arith.addf %1020, %19 : vector<8x128xf32>
    %1155 = arith.addf %1039, %21 : vector<8x128xf32>
    %1156 = arith.addf %1058, %23 : vector<8x128xf32>
    %1157 = arith.addf %1077, %25 : vector<8x128xf32>
    %1158 = arith.addf %1096, %27 : vector<8x128xf32>
    %1159 = arith.addf %1115, %29 : vector<8x128xf32>
    %1160 = arith.addf %1134, %31 : vector<8x128xf32>
    %1161 = arith.addf %1153, %33 : vector<8x128xf32>
    %c176 = arith.constant 176 : index
    %1162 = memref.load %arg4[%c176] : memref<273xf32, #tpu.memory_space<smem>>
    %1163 = vector.broadcast %1162 : f32 to vector<8x128xf32>
    %1164 = arith.mulf %1154, %1163 : vector<8x128xf32>
    %c184 = arith.constant 184 : index
    %1165 = memref.load %arg4[%c184] : memref<273xf32, #tpu.memory_space<smem>>
    %1166 = vector.broadcast %1165 : f32 to vector<8x128xf32>
    %1167 = arith.mulf %1155, %1166 : vector<8x128xf32>
    %1168 = arith.addf %1164, %1167 : vector<8x128xf32>
    %c192 = arith.constant 192 : index
    %1169 = memref.load %arg4[%c192] : memref<273xf32, #tpu.memory_space<smem>>
    %1170 = vector.broadcast %1169 : f32 to vector<8x128xf32>
    %1171 = arith.mulf %1156, %1170 : vector<8x128xf32>
    %1172 = arith.addf %1168, %1171 : vector<8x128xf32>
    %c200 = arith.constant 200 : index
    %1173 = memref.load %arg4[%c200] : memref<273xf32, #tpu.memory_space<smem>>
    %1174 = vector.broadcast %1173 : f32 to vector<8x128xf32>
    %1175 = arith.mulf %1157, %1174 : vector<8x128xf32>
    %1176 = arith.addf %1172, %1175 : vector<8x128xf32>
    %c208 = arith.constant 208 : index
    %1177 = memref.load %arg4[%c208] : memref<273xf32, #tpu.memory_space<smem>>
    %1178 = vector.broadcast %1177 : f32 to vector<8x128xf32>
    %1179 = arith.mulf %1158, %1178 : vector<8x128xf32>
    %1180 = arith.addf %1176, %1179 : vector<8x128xf32>
    %c216 = arith.constant 216 : index
    %1181 = memref.load %arg4[%c216] : memref<273xf32, #tpu.memory_space<smem>>
    %1182 = vector.broadcast %1181 : f32 to vector<8x128xf32>
    %1183 = arith.mulf %1159, %1182 : vector<8x128xf32>
    %1184 = arith.addf %1180, %1183 : vector<8x128xf32>
    %c224 = arith.constant 224 : index
    %1185 = memref.load %arg4[%c224] : memref<273xf32, #tpu.memory_space<smem>>
    %1186 = vector.broadcast %1185 : f32 to vector<8x128xf32>
    %1187 = arith.mulf %1160, %1186 : vector<8x128xf32>
    %1188 = arith.addf %1184, %1187 : vector<8x128xf32>
    %c232 = arith.constant 232 : index
    %1189 = memref.load %arg4[%c232] : memref<273xf32, #tpu.memory_space<smem>>
    %1190 = vector.broadcast %1189 : f32 to vector<8x128xf32>
    %1191 = arith.mulf %1161, %1190 : vector<8x128xf32>
    %1192 = arith.addf %1188, %1191 : vector<8x128xf32>
    %c240 = arith.constant 240 : index
    %1193 = memref.load %arg4[%c240] : memref<273xf32, #tpu.memory_space<smem>>
    %1194 = vector.broadcast %1193 : f32 to vector<8x128xf32>
    %1195 = arith.addf %1192, %1194 : vector<8x128xf32>
    %cst_231 = arith.constant 5.000000e-01 : f32
    %1196 = vector.broadcast %cst_231 : f32 to vector<8x128xf32>
    %1197 = arith.mulf %1196, %1195 : vector<8x128xf32>
    %cst_232 = arith.constant 4.471500e-02 : f32
    %1198 = vector.broadcast %cst_232 : f32 to vector<8x128xf32>
    %1199 = arith.mulf %1198, %1195 : vector<8x128xf32>
    %1200 = arith.mulf %1199, %1195 : vector<8x128xf32>
    %1201 = arith.mulf %1200, %1195 : vector<8x128xf32>
    %1202 = arith.addf %1195, %1201 : vector<8x128xf32>
    %cst_233 = arith.constant 0.797884583 : f32
    %1203 = vector.broadcast %cst_233 : f32 to vector<8x128xf32>
    %1204 = arith.mulf %1203, %1202 : vector<8x128xf32>
    %1205 = math.tanh %1204 : vector<8x128xf32>
    %cst_234 = arith.constant 1.000000e+00 : f32
    %1206 = vector.broadcast %cst_234 : f32 to vector<8x128xf32>
    %1207 = arith.addf %1206, %1205 : vector<8x128xf32>
    %1208 = arith.mulf %1197, %1207 : vector<8x128xf32>
    %c248 = arith.constant 248 : index
    %1209 = memref.load %arg4[%c248] : memref<273xf32, #tpu.memory_space<smem>>
    %1210 = vector.broadcast %1209 : f32 to vector<8x128xf32>
    %1211 = arith.mulf %1208, %1210 : vector<8x128xf32>
    %c256 = arith.constant 256 : index
    %1212 = memref.load %arg4[%c256] : memref<273xf32, #tpu.memory_space<smem>>
    %1213 = vector.broadcast %1212 : f32 to vector<8x128xf32>
    %1214 = arith.addf %1211, %1213 : vector<8x128xf32>
    %c177 = arith.constant 177 : index
    %1215 = memref.load %arg4[%c177] : memref<273xf32, #tpu.memory_space<smem>>
    %1216 = vector.broadcast %1215 : f32 to vector<8x128xf32>
    %1217 = arith.mulf %1154, %1216 : vector<8x128xf32>
    %c185 = arith.constant 185 : index
    %1218 = memref.load %arg4[%c185] : memref<273xf32, #tpu.memory_space<smem>>
    %1219 = vector.broadcast %1218 : f32 to vector<8x128xf32>
    %1220 = arith.mulf %1155, %1219 : vector<8x128xf32>
    %1221 = arith.addf %1217, %1220 : vector<8x128xf32>
    %c193 = arith.constant 193 : index
    %1222 = memref.load %arg4[%c193] : memref<273xf32, #tpu.memory_space<smem>>
    %1223 = vector.broadcast %1222 : f32 to vector<8x128xf32>
    %1224 = arith.mulf %1156, %1223 : vector<8x128xf32>
    %1225 = arith.addf %1221, %1224 : vector<8x128xf32>
    %c201 = arith.constant 201 : index
    %1226 = memref.load %arg4[%c201] : memref<273xf32, #tpu.memory_space<smem>>
    %1227 = vector.broadcast %1226 : f32 to vector<8x128xf32>
    %1228 = arith.mulf %1157, %1227 : vector<8x128xf32>
    %1229 = arith.addf %1225, %1228 : vector<8x128xf32>
    %c209 = arith.constant 209 : index
    %1230 = memref.load %arg4[%c209] : memref<273xf32, #tpu.memory_space<smem>>
    %1231 = vector.broadcast %1230 : f32 to vector<8x128xf32>
    %1232 = arith.mulf %1158, %1231 : vector<8x128xf32>
    %1233 = arith.addf %1229, %1232 : vector<8x128xf32>
    %c217 = arith.constant 217 : index
    %1234 = memref.load %arg4[%c217] : memref<273xf32, #tpu.memory_space<smem>>
    %1235 = vector.broadcast %1234 : f32 to vector<8x128xf32>
    %1236 = arith.mulf %1159, %1235 : vector<8x128xf32>
    %1237 = arith.addf %1233, %1236 : vector<8x128xf32>
    %c225 = arith.constant 225 : index
    %1238 = memref.load %arg4[%c225] : memref<273xf32, #tpu.memory_space<smem>>
    %1239 = vector.broadcast %1238 : f32 to vector<8x128xf32>
    %1240 = arith.mulf %1160, %1239 : vector<8x128xf32>
    %1241 = arith.addf %1237, %1240 : vector<8x128xf32>
    %c233 = arith.constant 233 : index
    %1242 = memref.load %arg4[%c233] : memref<273xf32, #tpu.memory_space<smem>>
    %1243 = vector.broadcast %1242 : f32 to vector<8x128xf32>
    %1244 = arith.mulf %1161, %1243 : vector<8x128xf32>
    %1245 = arith.addf %1241, %1244 : vector<8x128xf32>
    %c241 = arith.constant 241 : index
    %1246 = memref.load %arg4[%c241] : memref<273xf32, #tpu.memory_space<smem>>
    %1247 = vector.broadcast %1246 : f32 to vector<8x128xf32>
    %1248 = arith.addf %1245, %1247 : vector<8x128xf32>
    %cst_235 = arith.constant 5.000000e-01 : f32
    %1249 = vector.broadcast %cst_235 : f32 to vector<8x128xf32>
    %1250 = arith.mulf %1249, %1248 : vector<8x128xf32>
    %cst_236 = arith.constant 4.471500e-02 : f32
    %1251 = vector.broadcast %cst_236 : f32 to vector<8x128xf32>
    %1252 = arith.mulf %1251, %1248 : vector<8x128xf32>
    %1253 = arith.mulf %1252, %1248 : vector<8x128xf32>
    %1254 = arith.mulf %1253, %1248 : vector<8x128xf32>
    %1255 = arith.addf %1248, %1254 : vector<8x128xf32>
    %cst_237 = arith.constant 0.797884583 : f32
    %1256 = vector.broadcast %cst_237 : f32 to vector<8x128xf32>
    %1257 = arith.mulf %1256, %1255 : vector<8x128xf32>
    %1258 = math.tanh %1257 : vector<8x128xf32>
    %cst_238 = arith.constant 1.000000e+00 : f32
    %1259 = vector.broadcast %cst_238 : f32 to vector<8x128xf32>
    %1260 = arith.addf %1259, %1258 : vector<8x128xf32>
    %1261 = arith.mulf %1250, %1260 : vector<8x128xf32>
    %c249 = arith.constant 249 : index
    %1262 = memref.load %arg4[%c249] : memref<273xf32, #tpu.memory_space<smem>>
    %1263 = vector.broadcast %1262 : f32 to vector<8x128xf32>
    %1264 = arith.mulf %1261, %1263 : vector<8x128xf32>
    %c257 = arith.constant 257 : index
    %1265 = memref.load %arg4[%c257] : memref<273xf32, #tpu.memory_space<smem>>
    %1266 = vector.broadcast %1265 : f32 to vector<8x128xf32>
    %1267 = arith.addf %1264, %1266 : vector<8x128xf32>
    %c178 = arith.constant 178 : index
    %1268 = memref.load %arg4[%c178] : memref<273xf32, #tpu.memory_space<smem>>
    %1269 = vector.broadcast %1268 : f32 to vector<8x128xf32>
    %1270 = arith.mulf %1154, %1269 : vector<8x128xf32>
    %c186 = arith.constant 186 : index
    %1271 = memref.load %arg4[%c186] : memref<273xf32, #tpu.memory_space<smem>>
    %1272 = vector.broadcast %1271 : f32 to vector<8x128xf32>
    %1273 = arith.mulf %1155, %1272 : vector<8x128xf32>
    %1274 = arith.addf %1270, %1273 : vector<8x128xf32>
    %c194 = arith.constant 194 : index
    %1275 = memref.load %arg4[%c194] : memref<273xf32, #tpu.memory_space<smem>>
    %1276 = vector.broadcast %1275 : f32 to vector<8x128xf32>
    %1277 = arith.mulf %1156, %1276 : vector<8x128xf32>
    %1278 = arith.addf %1274, %1277 : vector<8x128xf32>
    %c202 = arith.constant 202 : index
    %1279 = memref.load %arg4[%c202] : memref<273xf32, #tpu.memory_space<smem>>
    %1280 = vector.broadcast %1279 : f32 to vector<8x128xf32>
    %1281 = arith.mulf %1157, %1280 : vector<8x128xf32>
    %1282 = arith.addf %1278, %1281 : vector<8x128xf32>
    %c210 = arith.constant 210 : index
    %1283 = memref.load %arg4[%c210] : memref<273xf32, #tpu.memory_space<smem>>
    %1284 = vector.broadcast %1283 : f32 to vector<8x128xf32>
    %1285 = arith.mulf %1158, %1284 : vector<8x128xf32>
    %1286 = arith.addf %1282, %1285 : vector<8x128xf32>
    %c218 = arith.constant 218 : index
    %1287 = memref.load %arg4[%c218] : memref<273xf32, #tpu.memory_space<smem>>
    %1288 = vector.broadcast %1287 : f32 to vector<8x128xf32>
    %1289 = arith.mulf %1159, %1288 : vector<8x128xf32>
    %1290 = arith.addf %1286, %1289 : vector<8x128xf32>
    %c226 = arith.constant 226 : index
    %1291 = memref.load %arg4[%c226] : memref<273xf32, #tpu.memory_space<smem>>
    %1292 = vector.broadcast %1291 : f32 to vector<8x128xf32>
    %1293 = arith.mulf %1160, %1292 : vector<8x128xf32>
    %1294 = arith.addf %1290, %1293 : vector<8x128xf32>
    %c234 = arith.constant 234 : index
    %1295 = memref.load %arg4[%c234] : memref<273xf32, #tpu.memory_space<smem>>
    %1296 = vector.broadcast %1295 : f32 to vector<8x128xf32>
    %1297 = arith.mulf %1161, %1296 : vector<8x128xf32>
    %1298 = arith.addf %1294, %1297 : vector<8x128xf32>
    %c242 = arith.constant 242 : index
    %1299 = memref.load %arg4[%c242] : memref<273xf32, #tpu.memory_space<smem>>
    %1300 = vector.broadcast %1299 : f32 to vector<8x128xf32>
    %1301 = arith.addf %1298, %1300 : vector<8x128xf32>
    %cst_239 = arith.constant 5.000000e-01 : f32
    %1302 = vector.broadcast %cst_239 : f32 to vector<8x128xf32>
    %1303 = arith.mulf %1302, %1301 : vector<8x128xf32>
    %cst_240 = arith.constant 4.471500e-02 : f32
    %1304 = vector.broadcast %cst_240 : f32 to vector<8x128xf32>
    %1305 = arith.mulf %1304, %1301 : vector<8x128xf32>
    %1306 = arith.mulf %1305, %1301 : vector<8x128xf32>
    %1307 = arith.mulf %1306, %1301 : vector<8x128xf32>
    %1308 = arith.addf %1301, %1307 : vector<8x128xf32>
    %cst_241 = arith.constant 0.797884583 : f32
    %1309 = vector.broadcast %cst_241 : f32 to vector<8x128xf32>
    %1310 = arith.mulf %1309, %1308 : vector<8x128xf32>
    %1311 = math.tanh %1310 : vector<8x128xf32>
    %cst_242 = arith.constant 1.000000e+00 : f32
    %1312 = vector.broadcast %cst_242 : f32 to vector<8x128xf32>
    %1313 = arith.addf %1312, %1311 : vector<8x128xf32>
    %1314 = arith.mulf %1303, %1313 : vector<8x128xf32>
    %c250 = arith.constant 250 : index
    %1315 = memref.load %arg4[%c250] : memref<273xf32, #tpu.memory_space<smem>>
    %1316 = vector.broadcast %1315 : f32 to vector<8x128xf32>
    %1317 = arith.mulf %1314, %1316 : vector<8x128xf32>
    %c258 = arith.constant 258 : index
    %1318 = memref.load %arg4[%c258] : memref<273xf32, #tpu.memory_space<smem>>
    %1319 = vector.broadcast %1318 : f32 to vector<8x128xf32>
    %1320 = arith.addf %1317, %1319 : vector<8x128xf32>
    %c179 = arith.constant 179 : index
    %1321 = memref.load %arg4[%c179] : memref<273xf32, #tpu.memory_space<smem>>
    %1322 = vector.broadcast %1321 : f32 to vector<8x128xf32>
    %1323 = arith.mulf %1154, %1322 : vector<8x128xf32>
    %c187 = arith.constant 187 : index
    %1324 = memref.load %arg4[%c187] : memref<273xf32, #tpu.memory_space<smem>>
    %1325 = vector.broadcast %1324 : f32 to vector<8x128xf32>
    %1326 = arith.mulf %1155, %1325 : vector<8x128xf32>
    %1327 = arith.addf %1323, %1326 : vector<8x128xf32>
    %c195 = arith.constant 195 : index
    %1328 = memref.load %arg4[%c195] : memref<273xf32, #tpu.memory_space<smem>>
    %1329 = vector.broadcast %1328 : f32 to vector<8x128xf32>
    %1330 = arith.mulf %1156, %1329 : vector<8x128xf32>
    %1331 = arith.addf %1327, %1330 : vector<8x128xf32>
    %c203 = arith.constant 203 : index
    %1332 = memref.load %arg4[%c203] : memref<273xf32, #tpu.memory_space<smem>>
    %1333 = vector.broadcast %1332 : f32 to vector<8x128xf32>
    %1334 = arith.mulf %1157, %1333 : vector<8x128xf32>
    %1335 = arith.addf %1331, %1334 : vector<8x128xf32>
    %c211 = arith.constant 211 : index
    %1336 = memref.load %arg4[%c211] : memref<273xf32, #tpu.memory_space<smem>>
    %1337 = vector.broadcast %1336 : f32 to vector<8x128xf32>
    %1338 = arith.mulf %1158, %1337 : vector<8x128xf32>
    %1339 = arith.addf %1335, %1338 : vector<8x128xf32>
    %c219 = arith.constant 219 : index
    %1340 = memref.load %arg4[%c219] : memref<273xf32, #tpu.memory_space<smem>>
    %1341 = vector.broadcast %1340 : f32 to vector<8x128xf32>
    %1342 = arith.mulf %1159, %1341 : vector<8x128xf32>
    %1343 = arith.addf %1339, %1342 : vector<8x128xf32>
    %c227 = arith.constant 227 : index
    %1344 = memref.load %arg4[%c227] : memref<273xf32, #tpu.memory_space<smem>>
    %1345 = vector.broadcast %1344 : f32 to vector<8x128xf32>
    %1346 = arith.mulf %1160, %1345 : vector<8x128xf32>
    %1347 = arith.addf %1343, %1346 : vector<8x128xf32>
    %c235 = arith.constant 235 : index
    %1348 = memref.load %arg4[%c235] : memref<273xf32, #tpu.memory_space<smem>>
    %1349 = vector.broadcast %1348 : f32 to vector<8x128xf32>
    %1350 = arith.mulf %1161, %1349 : vector<8x128xf32>
    %1351 = arith.addf %1347, %1350 : vector<8x128xf32>
    %c243 = arith.constant 243 : index
    %1352 = memref.load %arg4[%c243] : memref<273xf32, #tpu.memory_space<smem>>
    %1353 = vector.broadcast %1352 : f32 to vector<8x128xf32>
    %1354 = arith.addf %1351, %1353 : vector<8x128xf32>
    %cst_243 = arith.constant 5.000000e-01 : f32
    %1355 = vector.broadcast %cst_243 : f32 to vector<8x128xf32>
    %1356 = arith.mulf %1355, %1354 : vector<8x128xf32>
    %cst_244 = arith.constant 4.471500e-02 : f32
    %1357 = vector.broadcast %cst_244 : f32 to vector<8x128xf32>
    %1358 = arith.mulf %1357, %1354 : vector<8x128xf32>
    %1359 = arith.mulf %1358, %1354 : vector<8x128xf32>
    %1360 = arith.mulf %1359, %1354 : vector<8x128xf32>
    %1361 = arith.addf %1354, %1360 : vector<8x128xf32>
    %cst_245 = arith.constant 0.797884583 : f32
    %1362 = vector.broadcast %cst_245 : f32 to vector<8x128xf32>
    %1363 = arith.mulf %1362, %1361 : vector<8x128xf32>
    %1364 = math.tanh %1363 : vector<8x128xf32>
    %cst_246 = arith.constant 1.000000e+00 : f32
    %1365 = vector.broadcast %cst_246 : f32 to vector<8x128xf32>
    %1366 = arith.addf %1365, %1364 : vector<8x128xf32>
    %1367 = arith.mulf %1356, %1366 : vector<8x128xf32>
    %c251 = arith.constant 251 : index
    %1368 = memref.load %arg4[%c251] : memref<273xf32, #tpu.memory_space<smem>>
    %1369 = vector.broadcast %1368 : f32 to vector<8x128xf32>
    %1370 = arith.mulf %1367, %1369 : vector<8x128xf32>
    %c259 = arith.constant 259 : index
    %1371 = memref.load %arg4[%c259] : memref<273xf32, #tpu.memory_space<smem>>
    %1372 = vector.broadcast %1371 : f32 to vector<8x128xf32>
    %1373 = arith.addf %1370, %1372 : vector<8x128xf32>
    %c180 = arith.constant 180 : index
    %1374 = memref.load %arg4[%c180] : memref<273xf32, #tpu.memory_space<smem>>
    %1375 = vector.broadcast %1374 : f32 to vector<8x128xf32>
    %1376 = arith.mulf %1154, %1375 : vector<8x128xf32>
    %c188 = arith.constant 188 : index
    %1377 = memref.load %arg4[%c188] : memref<273xf32, #tpu.memory_space<smem>>
    %1378 = vector.broadcast %1377 : f32 to vector<8x128xf32>
    %1379 = arith.mulf %1155, %1378 : vector<8x128xf32>
    %1380 = arith.addf %1376, %1379 : vector<8x128xf32>
    %c196 = arith.constant 196 : index
    %1381 = memref.load %arg4[%c196] : memref<273xf32, #tpu.memory_space<smem>>
    %1382 = vector.broadcast %1381 : f32 to vector<8x128xf32>
    %1383 = arith.mulf %1156, %1382 : vector<8x128xf32>
    %1384 = arith.addf %1380, %1383 : vector<8x128xf32>
    %c204 = arith.constant 204 : index
    %1385 = memref.load %arg4[%c204] : memref<273xf32, #tpu.memory_space<smem>>
    %1386 = vector.broadcast %1385 : f32 to vector<8x128xf32>
    %1387 = arith.mulf %1157, %1386 : vector<8x128xf32>
    %1388 = arith.addf %1384, %1387 : vector<8x128xf32>
    %c212 = arith.constant 212 : index
    %1389 = memref.load %arg4[%c212] : memref<273xf32, #tpu.memory_space<smem>>
    %1390 = vector.broadcast %1389 : f32 to vector<8x128xf32>
    %1391 = arith.mulf %1158, %1390 : vector<8x128xf32>
    %1392 = arith.addf %1388, %1391 : vector<8x128xf32>
    %c220 = arith.constant 220 : index
    %1393 = memref.load %arg4[%c220] : memref<273xf32, #tpu.memory_space<smem>>
    %1394 = vector.broadcast %1393 : f32 to vector<8x128xf32>
    %1395 = arith.mulf %1159, %1394 : vector<8x128xf32>
    %1396 = arith.addf %1392, %1395 : vector<8x128xf32>
    %c228 = arith.constant 228 : index
    %1397 = memref.load %arg4[%c228] : memref<273xf32, #tpu.memory_space<smem>>
    %1398 = vector.broadcast %1397 : f32 to vector<8x128xf32>
    %1399 = arith.mulf %1160, %1398 : vector<8x128xf32>
    %1400 = arith.addf %1396, %1399 : vector<8x128xf32>
    %c236 = arith.constant 236 : index
    %1401 = memref.load %arg4[%c236] : memref<273xf32, #tpu.memory_space<smem>>
    %1402 = vector.broadcast %1401 : f32 to vector<8x128xf32>
    %1403 = arith.mulf %1161, %1402 : vector<8x128xf32>
    %1404 = arith.addf %1400, %1403 : vector<8x128xf32>
    %c244 = arith.constant 244 : index
    %1405 = memref.load %arg4[%c244] : memref<273xf32, #tpu.memory_space<smem>>
    %1406 = vector.broadcast %1405 : f32 to vector<8x128xf32>
    %1407 = arith.addf %1404, %1406 : vector<8x128xf32>
    %cst_247 = arith.constant 5.000000e-01 : f32
    %1408 = vector.broadcast %cst_247 : f32 to vector<8x128xf32>
    %1409 = arith.mulf %1408, %1407 : vector<8x128xf32>
    %cst_248 = arith.constant 4.471500e-02 : f32
    %1410 = vector.broadcast %cst_248 : f32 to vector<8x128xf32>
    %1411 = arith.mulf %1410, %1407 : vector<8x128xf32>
    %1412 = arith.mulf %1411, %1407 : vector<8x128xf32>
    %1413 = arith.mulf %1412, %1407 : vector<8x128xf32>
    %1414 = arith.addf %1407, %1413 : vector<8x128xf32>
    %cst_249 = arith.constant 0.797884583 : f32
    %1415 = vector.broadcast %cst_249 : f32 to vector<8x128xf32>
    %1416 = arith.mulf %1415, %1414 : vector<8x128xf32>
    %1417 = math.tanh %1416 : vector<8x128xf32>
    %cst_250 = arith.constant 1.000000e+00 : f32
    %1418 = vector.broadcast %cst_250 : f32 to vector<8x128xf32>
    %1419 = arith.addf %1418, %1417 : vector<8x128xf32>
    %1420 = arith.mulf %1409, %1419 : vector<8x128xf32>
    %c252 = arith.constant 252 : index
    %1421 = memref.load %arg4[%c252] : memref<273xf32, #tpu.memory_space<smem>>
    %1422 = vector.broadcast %1421 : f32 to vector<8x128xf32>
    %1423 = arith.mulf %1420, %1422 : vector<8x128xf32>
    %c260 = arith.constant 260 : index
    %1424 = memref.load %arg4[%c260] : memref<273xf32, #tpu.memory_space<smem>>
    %1425 = vector.broadcast %1424 : f32 to vector<8x128xf32>
    %1426 = arith.addf %1423, %1425 : vector<8x128xf32>
    %c181 = arith.constant 181 : index
    %1427 = memref.load %arg4[%c181] : memref<273xf32, #tpu.memory_space<smem>>
    %1428 = vector.broadcast %1427 : f32 to vector<8x128xf32>
    %1429 = arith.mulf %1154, %1428 : vector<8x128xf32>
    %c189 = arith.constant 189 : index
    %1430 = memref.load %arg4[%c189] : memref<273xf32, #tpu.memory_space<smem>>
    %1431 = vector.broadcast %1430 : f32 to vector<8x128xf32>
    %1432 = arith.mulf %1155, %1431 : vector<8x128xf32>
    %1433 = arith.addf %1429, %1432 : vector<8x128xf32>
    %c197 = arith.constant 197 : index
    %1434 = memref.load %arg4[%c197] : memref<273xf32, #tpu.memory_space<smem>>
    %1435 = vector.broadcast %1434 : f32 to vector<8x128xf32>
    %1436 = arith.mulf %1156, %1435 : vector<8x128xf32>
    %1437 = arith.addf %1433, %1436 : vector<8x128xf32>
    %c205 = arith.constant 205 : index
    %1438 = memref.load %arg4[%c205] : memref<273xf32, #tpu.memory_space<smem>>
    %1439 = vector.broadcast %1438 : f32 to vector<8x128xf32>
    %1440 = arith.mulf %1157, %1439 : vector<8x128xf32>
    %1441 = arith.addf %1437, %1440 : vector<8x128xf32>
    %c213 = arith.constant 213 : index
    %1442 = memref.load %arg4[%c213] : memref<273xf32, #tpu.memory_space<smem>>
    %1443 = vector.broadcast %1442 : f32 to vector<8x128xf32>
    %1444 = arith.mulf %1158, %1443 : vector<8x128xf32>
    %1445 = arith.addf %1441, %1444 : vector<8x128xf32>
    %c221 = arith.constant 221 : index
    %1446 = memref.load %arg4[%c221] : memref<273xf32, #tpu.memory_space<smem>>
    %1447 = vector.broadcast %1446 : f32 to vector<8x128xf32>
    %1448 = arith.mulf %1159, %1447 : vector<8x128xf32>
    %1449 = arith.addf %1445, %1448 : vector<8x128xf32>
    %c229 = arith.constant 229 : index
    %1450 = memref.load %arg4[%c229] : memref<273xf32, #tpu.memory_space<smem>>
    %1451 = vector.broadcast %1450 : f32 to vector<8x128xf32>
    %1452 = arith.mulf %1160, %1451 : vector<8x128xf32>
    %1453 = arith.addf %1449, %1452 : vector<8x128xf32>
    %c237 = arith.constant 237 : index
    %1454 = memref.load %arg4[%c237] : memref<273xf32, #tpu.memory_space<smem>>
    %1455 = vector.broadcast %1454 : f32 to vector<8x128xf32>
    %1456 = arith.mulf %1161, %1455 : vector<8x128xf32>
    %1457 = arith.addf %1453, %1456 : vector<8x128xf32>
    %c245 = arith.constant 245 : index
    %1458 = memref.load %arg4[%c245] : memref<273xf32, #tpu.memory_space<smem>>
    %1459 = vector.broadcast %1458 : f32 to vector<8x128xf32>
    %1460 = arith.addf %1457, %1459 : vector<8x128xf32>
    %cst_251 = arith.constant 5.000000e-01 : f32
    %1461 = vector.broadcast %cst_251 : f32 to vector<8x128xf32>
    %1462 = arith.mulf %1461, %1460 : vector<8x128xf32>
    %cst_252 = arith.constant 4.471500e-02 : f32
    %1463 = vector.broadcast %cst_252 : f32 to vector<8x128xf32>
    %1464 = arith.mulf %1463, %1460 : vector<8x128xf32>
    %1465 = arith.mulf %1464, %1460 : vector<8x128xf32>
    %1466 = arith.mulf %1465, %1460 : vector<8x128xf32>
    %1467 = arith.addf %1460, %1466 : vector<8x128xf32>
    %cst_253 = arith.constant 0.797884583 : f32
    %1468 = vector.broadcast %cst_253 : f32 to vector<8x128xf32>
    %1469 = arith.mulf %1468, %1467 : vector<8x128xf32>
    %1470 = math.tanh %1469 : vector<8x128xf32>
    %cst_254 = arith.constant 1.000000e+00 : f32
    %1471 = vector.broadcast %cst_254 : f32 to vector<8x128xf32>
    %1472 = arith.addf %1471, %1470 : vector<8x128xf32>
    %1473 = arith.mulf %1462, %1472 : vector<8x128xf32>
    %c253 = arith.constant 253 : index
    %1474 = memref.load %arg4[%c253] : memref<273xf32, #tpu.memory_space<smem>>
    %1475 = vector.broadcast %1474 : f32 to vector<8x128xf32>
    %1476 = arith.mulf %1473, %1475 : vector<8x128xf32>
    %c261 = arith.constant 261 : index
    %1477 = memref.load %arg4[%c261] : memref<273xf32, #tpu.memory_space<smem>>
    %1478 = vector.broadcast %1477 : f32 to vector<8x128xf32>
    %1479 = arith.addf %1476, %1478 : vector<8x128xf32>
    %c182 = arith.constant 182 : index
    %1480 = memref.load %arg4[%c182] : memref<273xf32, #tpu.memory_space<smem>>
    %1481 = vector.broadcast %1480 : f32 to vector<8x128xf32>
    %1482 = arith.mulf %1154, %1481 : vector<8x128xf32>
    %c190 = arith.constant 190 : index
    %1483 = memref.load %arg4[%c190] : memref<273xf32, #tpu.memory_space<smem>>
    %1484 = vector.broadcast %1483 : f32 to vector<8x128xf32>
    %1485 = arith.mulf %1155, %1484 : vector<8x128xf32>
    %1486 = arith.addf %1482, %1485 : vector<8x128xf32>
    %c198 = arith.constant 198 : index
    %1487 = memref.load %arg4[%c198] : memref<273xf32, #tpu.memory_space<smem>>
    %1488 = vector.broadcast %1487 : f32 to vector<8x128xf32>
    %1489 = arith.mulf %1156, %1488 : vector<8x128xf32>
    %1490 = arith.addf %1486, %1489 : vector<8x128xf32>
    %c206 = arith.constant 206 : index
    %1491 = memref.load %arg4[%c206] : memref<273xf32, #tpu.memory_space<smem>>
    %1492 = vector.broadcast %1491 : f32 to vector<8x128xf32>
    %1493 = arith.mulf %1157, %1492 : vector<8x128xf32>
    %1494 = arith.addf %1490, %1493 : vector<8x128xf32>
    %c214 = arith.constant 214 : index
    %1495 = memref.load %arg4[%c214] : memref<273xf32, #tpu.memory_space<smem>>
    %1496 = vector.broadcast %1495 : f32 to vector<8x128xf32>
    %1497 = arith.mulf %1158, %1496 : vector<8x128xf32>
    %1498 = arith.addf %1494, %1497 : vector<8x128xf32>
    %c222 = arith.constant 222 : index
    %1499 = memref.load %arg4[%c222] : memref<273xf32, #tpu.memory_space<smem>>
    %1500 = vector.broadcast %1499 : f32 to vector<8x128xf32>
    %1501 = arith.mulf %1159, %1500 : vector<8x128xf32>
    %1502 = arith.addf %1498, %1501 : vector<8x128xf32>
    %c230 = arith.constant 230 : index
    %1503 = memref.load %arg4[%c230] : memref<273xf32, #tpu.memory_space<smem>>
    %1504 = vector.broadcast %1503 : f32 to vector<8x128xf32>
    %1505 = arith.mulf %1160, %1504 : vector<8x128xf32>
    %1506 = arith.addf %1502, %1505 : vector<8x128xf32>
    %c238 = arith.constant 238 : index
    %1507 = memref.load %arg4[%c238] : memref<273xf32, #tpu.memory_space<smem>>
    %1508 = vector.broadcast %1507 : f32 to vector<8x128xf32>
    %1509 = arith.mulf %1161, %1508 : vector<8x128xf32>
    %1510 = arith.addf %1506, %1509 : vector<8x128xf32>
    %c246 = arith.constant 246 : index
    %1511 = memref.load %arg4[%c246] : memref<273xf32, #tpu.memory_space<smem>>
    %1512 = vector.broadcast %1511 : f32 to vector<8x128xf32>
    %1513 = arith.addf %1510, %1512 : vector<8x128xf32>
    %cst_255 = arith.constant 5.000000e-01 : f32
    %1514 = vector.broadcast %cst_255 : f32 to vector<8x128xf32>
    %1515 = arith.mulf %1514, %1513 : vector<8x128xf32>
    %cst_256 = arith.constant 4.471500e-02 : f32
    %1516 = vector.broadcast %cst_256 : f32 to vector<8x128xf32>
    %1517 = arith.mulf %1516, %1513 : vector<8x128xf32>
    %1518 = arith.mulf %1517, %1513 : vector<8x128xf32>
    %1519 = arith.mulf %1518, %1513 : vector<8x128xf32>
    %1520 = arith.addf %1513, %1519 : vector<8x128xf32>
    %cst_257 = arith.constant 0.797884583 : f32
    %1521 = vector.broadcast %cst_257 : f32 to vector<8x128xf32>
    %1522 = arith.mulf %1521, %1520 : vector<8x128xf32>
    %1523 = math.tanh %1522 : vector<8x128xf32>
    %cst_258 = arith.constant 1.000000e+00 : f32
    %1524 = vector.broadcast %cst_258 : f32 to vector<8x128xf32>
    %1525 = arith.addf %1524, %1523 : vector<8x128xf32>
    %1526 = arith.mulf %1515, %1525 : vector<8x128xf32>
    %c254 = arith.constant 254 : index
    %1527 = memref.load %arg4[%c254] : memref<273xf32, #tpu.memory_space<smem>>
    %1528 = vector.broadcast %1527 : f32 to vector<8x128xf32>
    %1529 = arith.mulf %1526, %1528 : vector<8x128xf32>
    %c262 = arith.constant 262 : index
    %1530 = memref.load %arg4[%c262] : memref<273xf32, #tpu.memory_space<smem>>
    %1531 = vector.broadcast %1530 : f32 to vector<8x128xf32>
    %1532 = arith.addf %1529, %1531 : vector<8x128xf32>
    %c183 = arith.constant 183 : index
    %1533 = memref.load %arg4[%c183] : memref<273xf32, #tpu.memory_space<smem>>
    %1534 = vector.broadcast %1533 : f32 to vector<8x128xf32>
    %1535 = arith.mulf %1154, %1534 : vector<8x128xf32>
    %c191 = arith.constant 191 : index
    %1536 = memref.load %arg4[%c191] : memref<273xf32, #tpu.memory_space<smem>>
    %1537 = vector.broadcast %1536 : f32 to vector<8x128xf32>
    %1538 = arith.mulf %1155, %1537 : vector<8x128xf32>
    %1539 = arith.addf %1535, %1538 : vector<8x128xf32>
    %c199 = arith.constant 199 : index
    %1540 = memref.load %arg4[%c199] : memref<273xf32, #tpu.memory_space<smem>>
    %1541 = vector.broadcast %1540 : f32 to vector<8x128xf32>
    %1542 = arith.mulf %1156, %1541 : vector<8x128xf32>
    %1543 = arith.addf %1539, %1542 : vector<8x128xf32>
    %c207 = arith.constant 207 : index
    %1544 = memref.load %arg4[%c207] : memref<273xf32, #tpu.memory_space<smem>>
    %1545 = vector.broadcast %1544 : f32 to vector<8x128xf32>
    %1546 = arith.mulf %1157, %1545 : vector<8x128xf32>
    %1547 = arith.addf %1543, %1546 : vector<8x128xf32>
    %c215 = arith.constant 215 : index
    %1548 = memref.load %arg4[%c215] : memref<273xf32, #tpu.memory_space<smem>>
    %1549 = vector.broadcast %1548 : f32 to vector<8x128xf32>
    %1550 = arith.mulf %1158, %1549 : vector<8x128xf32>
    %1551 = arith.addf %1547, %1550 : vector<8x128xf32>
    %c223 = arith.constant 223 : index
    %1552 = memref.load %arg4[%c223] : memref<273xf32, #tpu.memory_space<smem>>
    %1553 = vector.broadcast %1552 : f32 to vector<8x128xf32>
    %1554 = arith.mulf %1159, %1553 : vector<8x128xf32>
    %1555 = arith.addf %1551, %1554 : vector<8x128xf32>
    %c231 = arith.constant 231 : index
    %1556 = memref.load %arg4[%c231] : memref<273xf32, #tpu.memory_space<smem>>
    %1557 = vector.broadcast %1556 : f32 to vector<8x128xf32>
    %1558 = arith.mulf %1160, %1557 : vector<8x128xf32>
    %1559 = arith.addf %1555, %1558 : vector<8x128xf32>
    %c239 = arith.constant 239 : index
    %1560 = memref.load %arg4[%c239] : memref<273xf32, #tpu.memory_space<smem>>
    %1561 = vector.broadcast %1560 : f32 to vector<8x128xf32>
    %1562 = arith.mulf %1161, %1561 : vector<8x128xf32>
    %1563 = arith.addf %1559, %1562 : vector<8x128xf32>
    %c247 = arith.constant 247 : index
    %1564 = memref.load %arg4[%c247] : memref<273xf32, #tpu.memory_space<smem>>
    %1565 = vector.broadcast %1564 : f32 to vector<8x128xf32>
    %1566 = arith.addf %1563, %1565 : vector<8x128xf32>
    %cst_259 = arith.constant 5.000000e-01 : f32
    %1567 = vector.broadcast %cst_259 : f32 to vector<8x128xf32>
    %1568 = arith.mulf %1567, %1566 : vector<8x128xf32>
    %cst_260 = arith.constant 4.471500e-02 : f32
    %1569 = vector.broadcast %cst_260 : f32 to vector<8x128xf32>
    %1570 = arith.mulf %1569, %1566 : vector<8x128xf32>
    %1571 = arith.mulf %1570, %1566 : vector<8x128xf32>
    %1572 = arith.mulf %1571, %1566 : vector<8x128xf32>
    %1573 = arith.addf %1566, %1572 : vector<8x128xf32>
    %cst_261 = arith.constant 0.797884583 : f32
    %1574 = vector.broadcast %cst_261 : f32 to vector<8x128xf32>
    %1575 = arith.mulf %1574, %1573 : vector<8x128xf32>
    %1576 = math.tanh %1575 : vector<8x128xf32>
    %cst_262 = arith.constant 1.000000e+00 : f32
    %1577 = vector.broadcast %cst_262 : f32 to vector<8x128xf32>
    %1578 = arith.addf %1577, %1576 : vector<8x128xf32>
    %1579 = arith.mulf %1568, %1578 : vector<8x128xf32>
    %c255 = arith.constant 255 : index
    %1580 = memref.load %arg4[%c255] : memref<273xf32, #tpu.memory_space<smem>>
    %1581 = vector.broadcast %1580 : f32 to vector<8x128xf32>
    %1582 = arith.mulf %1579, %1581 : vector<8x128xf32>
    %c263 = arith.constant 263 : index
    %1583 = memref.load %arg4[%c263] : memref<273xf32, #tpu.memory_space<smem>>
    %1584 = vector.broadcast %1583 : f32 to vector<8x128xf32>
    %1585 = arith.addf %1582, %1584 : vector<8x128xf32>
    %c264 = arith.constant 264 : index
    %1586 = memref.load %arg4[%c264] : memref<273xf32, #tpu.memory_space<smem>>
    %1587 = vector.broadcast %1586 : f32 to vector<8x128xf32>
    %1588 = arith.mulf %1214, %1587 : vector<8x128xf32>
    %c265 = arith.constant 265 : index
    %1589 = memref.load %arg4[%c265] : memref<273xf32, #tpu.memory_space<smem>>
    %1590 = vector.broadcast %1589 : f32 to vector<8x128xf32>
    %1591 = arith.mulf %1267, %1590 : vector<8x128xf32>
    %1592 = arith.addf %1588, %1591 : vector<8x128xf32>
    %c266 = arith.constant 266 : index
    %1593 = memref.load %arg4[%c266] : memref<273xf32, #tpu.memory_space<smem>>
    %1594 = vector.broadcast %1593 : f32 to vector<8x128xf32>
    %1595 = arith.mulf %1320, %1594 : vector<8x128xf32>
    %1596 = arith.addf %1592, %1595 : vector<8x128xf32>
    %c267 = arith.constant 267 : index
    %1597 = memref.load %arg4[%c267] : memref<273xf32, #tpu.memory_space<smem>>
    %1598 = vector.broadcast %1597 : f32 to vector<8x128xf32>
    %1599 = arith.mulf %1373, %1598 : vector<8x128xf32>
    %1600 = arith.addf %1596, %1599 : vector<8x128xf32>
    %c268 = arith.constant 268 : index
    %1601 = memref.load %arg4[%c268] : memref<273xf32, #tpu.memory_space<smem>>
    %1602 = vector.broadcast %1601 : f32 to vector<8x128xf32>
    %1603 = arith.mulf %1426, %1602 : vector<8x128xf32>
    %1604 = arith.addf %1600, %1603 : vector<8x128xf32>
    %c269 = arith.constant 269 : index
    %1605 = memref.load %arg4[%c269] : memref<273xf32, #tpu.memory_space<smem>>
    %1606 = vector.broadcast %1605 : f32 to vector<8x128xf32>
    %1607 = arith.mulf %1479, %1606 : vector<8x128xf32>
    %1608 = arith.addf %1604, %1607 : vector<8x128xf32>
    %c270 = arith.constant 270 : index
    %1609 = memref.load %arg4[%c270] : memref<273xf32, #tpu.memory_space<smem>>
    %1610 = vector.broadcast %1609 : f32 to vector<8x128xf32>
    %1611 = arith.mulf %1532, %1610 : vector<8x128xf32>
    %1612 = arith.addf %1608, %1611 : vector<8x128xf32>
    %c271 = arith.constant 271 : index
    %1613 = memref.load %arg4[%c271] : memref<273xf32, #tpu.memory_space<smem>>
    %1614 = vector.broadcast %1613 : f32 to vector<8x128xf32>
    %1615 = arith.mulf %1585, %1614 : vector<8x128xf32>
    %1616 = arith.addf %1612, %1615 : vector<8x128xf32>
    %c272 = arith.constant 272 : index
    %1617 = memref.load %arg4[%c272] : memref<273xf32, #tpu.memory_space<smem>>
    %1618 = vector.broadcast %1617 : f32 to vector<8x128xf32>
    %1619 = arith.addf %1616, %1618 : vector<8x128xf32>
    %c0_263 = arith.constant 0 : index
    %c0_264 = arith.constant 0 : index
    %1620 = vector.load %arg1[%c0_263, %c0_264] : memref<8x128xf32, #tpu.memory_space<vmem>>, vector<8x128xf32>
    %1621 = arith.addf %1619, %1620 : vector<8x128xf32>
    %c0_265 = arith.constant 0 : index
    %c0_266 = arith.constant 0 : index
    %1622 = vector.load %arg5[%c0_265, %c0_266] : memref<7x128xf32, #tpu.memory_space<vmem>>, vector<1x128xf32>
    %c1_267 = arith.constant 1 : index
    %c0_268 = arith.constant 0 : index
    %1623 = vector.load %arg5[%c1_267, %c0_268] : memref<7x128xf32, #tpu.memory_space<vmem>>, vector<1x128xf32>
    %c2_269 = arith.constant 2 : index
    %c0_270 = arith.constant 0 : index
    %1624 = vector.load %arg5[%c2_269, %c0_270] : memref<7x128xf32, #tpu.memory_space<vmem>>, vector<1x128xf32>
    %c3_271 = arith.constant 3 : index
    %c0_272 = arith.constant 0 : index
    %1625 = vector.load %arg5[%c3_271, %c0_272] : memref<7x128xf32, #tpu.memory_space<vmem>>, vector<1x128xf32>
    %c4_273 = arith.constant 4 : index
    %c0_274 = arith.constant 0 : index
    %1626 = vector.load %arg5[%c4_273, %c0_274] : memref<7x128xf32, #tpu.memory_space<vmem>>, vector<1x128xf32>
    %c5_275 = arith.constant 5 : index
    %c0_276 = arith.constant 0 : index
    %1627 = vector.load %arg5[%c5_275, %c0_276] : memref<7x128xf32, #tpu.memory_space<vmem>>, vector<1x128xf32>
    %c6_277 = arith.constant 6 : index
    %c0_278 = arith.constant 0 : index
    %1628 = vector.load %arg5[%c6_277, %c0_278] : memref<7x128xf32, #tpu.memory_space<vmem>>, vector<1x128xf32>
    %cst_279 = arith.constant dense<0.000000e+00> : vector<8xf32>
    %1629 = vector.multi_reduction <add>, %1621, %cst_279 [1] : vector<8x128xf32> to vector<8xf32>
    %1630 = vector.shape_cast %1629 : vector<8xf32> to vector<8x1xf32>
    %cst_280 = arith.constant 1.280000e+02 : f32
    %1631 = vector.broadcast %cst_280 : f32 to vector<8x1xf32>
    %1632 = arith.divf %1630, %1631 : vector<8x1xf32>
    %1633 = vector.broadcast %1632 : vector<8x1xf32> to vector<8x128xf32>
    %1634 = arith.subf %1621, %1633 : vector<8x128xf32>
    %1635 = vector.broadcast %1632 : vector<8x1xf32> to vector<8x128xf32>
    %1636 = arith.subf %1621, %1635 : vector<8x128xf32>
    %1637 = arith.mulf %1634, %1636 : vector<8x128xf32>
    %cst_281 = arith.constant dense<0.000000e+00> : vector<8xf32>
    %1638 = vector.multi_reduction <add>, %1637, %cst_281 [1] : vector<8x128xf32> to vector<8xf32>
    %1639 = vector.shape_cast %1638 : vector<8xf32> to vector<8x1xf32>
    %cst_282 = arith.constant 1.280000e+02 : f32
    %1640 = vector.broadcast %cst_282 : f32 to vector<8x1xf32>
    %1641 = arith.divf %1639, %1640 : vector<8x1xf32>
    %1642 = vector.broadcast %1632 : vector<8x1xf32> to vector<8x128xf32>
    %1643 = arith.subf %1621, %1642 : vector<8x128xf32>
    %cst_283 = arith.constant 9.99999974E-6 : f32
    %1644 = vector.broadcast %cst_283 : f32 to vector<8x1xf32>
    %1645 = arith.addf %1641, %1644 : vector<8x1xf32>
    %1646 = math.rsqrt %1645 : vector<8x1xf32>
    %1647 = vector.broadcast %1646 : vector<8x1xf32> to vector<8x128xf32>
    %1648 = arith.mulf %1643, %1647 : vector<8x128xf32>
    %1649 = vector.broadcast %1622 : vector<1x128xf32> to vector<8x128xf32>
    %1650 = arith.mulf %1648, %1649 : vector<8x128xf32>
    %1651 = vector.broadcast %1623 : vector<1x128xf32> to vector<8x128xf32>
    %1652 = arith.addf %1650, %1651 : vector<8x128xf32>
    %1653 = arith.truncf %1652 : vector<8x128xf32> to vector<8x128xbf16>
    %c0_284 = arith.constant 0 : index
    %c0_285 = arith.constant 0 : index
    %1654 = vector.load %arg7[%c0_284, %c0_285] : memref<128x192xbf16, #tpu.memory_space<vmem>>, vector<128x192xbf16>
    %cst_286 = arith.constant dense<0.000000e+00> : vector<8x192xf32>
    %1655 = tpu.matmul %1653, %1654, %cst_286 {dimension_numbers = #tpu.dot_dimension_numbers<[1], [0], [0], [1], [0, 0, 1, 1], [], []>} : vector<8x128xbf16>, vector<128x192xbf16>, vector<8x192xf32> -> vector<8x192xf32>
    %1656 = vector.extract_strided_slice %1655 {offsets = [0, 0], sizes = [8, 32], strides = [1, 1]} : vector<8x192xf32> to vector<8x32xf32>
    %1657 = arith.truncf %1656 : vector<8x32xf32> to vector<8x32xbf16>
    %1658 = vector.extract_strided_slice %1655 {offsets = [0, 64], sizes = [8, 32], strides = [1, 1]} : vector<8x192xf32> to vector<8x32xf32>
    %1659 = arith.truncf %1658 : vector<8x32xf32> to vector<8x32xbf16>
    %1660 = vector.extract_strided_slice %1655 {offsets = [0, 128], sizes = [8, 32], strides = [1, 1]} : vector<8x192xf32> to vector<8x32xf32>
    %1661 = arith.truncf %1660 : vector<8x32xf32> to vector<8x32xbf16>
    %cst_287 = arith.constant dense<0.000000e+00> : vector<8x8xf32>
    %1662 = tpu.matmul %1657, %1659, %cst_287 {dimension_numbers = #tpu.dot_dimension_numbers<[1], [1], [0], [0], [0, 0, 1, 0], [], []>} : vector<8x32xbf16>, vector<8x32xbf16>, vector<8x8xf32> -> vector<8x8xf32>
    %cst_288 = arith.constant 0.176776692 : f32
    %1663 = vector.broadcast %cst_288 : f32 to vector<8x8xf32>
    %1664 = arith.mulf %1662, %1663 : vector<8x8xf32>
    %cst_289 = arith.constant dense<0xFF800000> : vector<8xf32>
    %1665 = vector.multi_reduction <maximumf>, %1664, %cst_289 [1] : vector<8x8xf32> to vector<8xf32>
    %1666 = vector.shape_cast %1665 : vector<8xf32> to vector<8x1xf32>
    %1667 = vector.broadcast %1666 : vector<8x1xf32> to vector<8x8xf32>
    %1668 = arith.subf %1664, %1667 : vector<8x8xf32>
    %1669 = math.exp %1668 : vector<8x8xf32>
    %cst_290 = arith.constant dense<0.000000e+00> : vector<8xf32>
    %1670 = vector.multi_reduction <add>, %1669, %cst_290 [1] : vector<8x8xf32> to vector<8xf32>
    %1671 = vector.shape_cast %1670 : vector<8xf32> to vector<8x1xf32>
    %1672 = vector.broadcast %1671 : vector<8x1xf32> to vector<8x8xf32>
    %1673 = arith.divf %1669, %1672 : vector<8x8xf32>
    %1674 = arith.truncf %1673 : vector<8x8xf32> to vector<8x8xbf16>
    %cst_291 = arith.constant dense<0.000000e+00> : vector<8x32xf32>
    %1675 = tpu.matmul %1674, %1661, %cst_291 {dimension_numbers = #tpu.dot_dimension_numbers<[1], [0], [0], [1], [0, 0, 1, 1], [], []>} : vector<8x8xbf16>, vector<8x32xbf16>, vector<8x32xf32> -> vector<8x32xf32>
    %1676 = vector.extract_strided_slice %1655 {offsets = [0, 32], sizes = [8, 32], strides = [1, 1]} : vector<8x192xf32> to vector<8x32xf32>
    %1677 = arith.truncf %1676 : vector<8x32xf32> to vector<8x32xbf16>
    %1678 = vector.extract_strided_slice %1655 {offsets = [0, 96], sizes = [8, 32], strides = [1, 1]} : vector<8x192xf32> to vector<8x32xf32>
    %1679 = arith.truncf %1678 : vector<8x32xf32> to vector<8x32xbf16>
    %1680 = vector.extract_strided_slice %1655 {offsets = [0, 160], sizes = [8, 32], strides = [1, 1]} : vector<8x192xf32> to vector<8x32xf32>
    %1681 = arith.truncf %1680 : vector<8x32xf32> to vector<8x32xbf16>
    %cst_292 = arith.constant dense<0.000000e+00> : vector<8x8xf32>
    %1682 = tpu.matmul %1677, %1679, %cst_292 {dimension_numbers = #tpu.dot_dimension_numbers<[1], [1], [0], [0], [0, 0, 1, 0], [], []>} : vector<8x32xbf16>, vector<8x32xbf16>, vector<8x8xf32> -> vector<8x8xf32>
    %cst_293 = arith.constant 0.176776692 : f32
    %1683 = vector.broadcast %cst_293 : f32 to vector<8x8xf32>
    %1684 = arith.mulf %1682, %1683 : vector<8x8xf32>
    %cst_294 = arith.constant dense<0xFF800000> : vector<8xf32>
    %1685 = vector.multi_reduction <maximumf>, %1684, %cst_294 [1] : vector<8x8xf32> to vector<8xf32>
    %1686 = vector.shape_cast %1685 : vector<8xf32> to vector<8x1xf32>
    %1687 = vector.broadcast %1686 : vector<8x1xf32> to vector<8x8xf32>
    %1688 = arith.subf %1684, %1687 : vector<8x8xf32>
    %1689 = math.exp %1688 : vector<8x8xf32>
    %cst_295 = arith.constant dense<0.000000e+00> : vector<8xf32>
    %1690 = vector.multi_reduction <add>, %1689, %cst_295 [1] : vector<8x8xf32> to vector<8xf32>
    %1691 = vector.shape_cast %1690 : vector<8xf32> to vector<8x1xf32>
    %1692 = vector.broadcast %1691 : vector<8x1xf32> to vector<8x8xf32>
    %1693 = arith.divf %1689, %1692 : vector<8x8xf32>
    %1694 = arith.truncf %1693 : vector<8x8xf32> to vector<8x8xbf16>
    %cst_296 = arith.constant dense<0.000000e+00> : vector<8x32xf32>
    %1695 = tpu.matmul %1694, %1681, %cst_296 {dimension_numbers = #tpu.dot_dimension_numbers<[1], [0], [0], [1], [0, 0, 1, 1], [], []>} : vector<8x8xbf16>, vector<8x32xbf16>, vector<8x32xf32> -> vector<8x32xf32>
    %1696 = tpu.concatenate %1675, %1695 in 1 : vector<8x32xf32>, vector<8x32xf32> -> vector<8x64xf32>
    %1697 = arith.truncf %1696 : vector<8x64xf32> to vector<8x64xbf16>
    %c0_297 = arith.constant 0 : index
    %c0_298 = arith.constant 0 : index
    %1698 = vector.load %arg8[%c0_297, %c0_298] : memref<64x128xbf16, #tpu.memory_space<vmem>>, vector<64x128xbf16>
    %cst_299 = arith.constant dense<0.000000e+00> : vector<8x128xf32>
    %1699 = tpu.matmul %1697, %1698, %cst_299 {dimension_numbers = #tpu.dot_dimension_numbers<[1], [0], [0], [1], [0, 0, 1, 1], [], []>} : vector<8x64xbf16>, vector<64x128xbf16>, vector<8x128xf32> -> vector<8x128xf32>
    %1700 = arith.addf %1621, %1699 : vector<8x128xf32>
    %1701 = vector.broadcast %1624 : vector<1x128xf32> to vector<8x128xf32>
    %1702 = arith.addf %1700, %1701 : vector<8x128xf32>
    %cst_300 = arith.constant dense<0.000000e+00> : vector<8xf32>
    %1703 = vector.multi_reduction <add>, %1702, %cst_300 [1] : vector<8x128xf32> to vector<8xf32>
    %1704 = vector.shape_cast %1703 : vector<8xf32> to vector<8x1xf32>
    %cst_301 = arith.constant 1.280000e+02 : f32
    %1705 = vector.broadcast %cst_301 : f32 to vector<8x1xf32>
    %1706 = arith.divf %1704, %1705 : vector<8x1xf32>
    %1707 = vector.broadcast %1706 : vector<8x1xf32> to vector<8x128xf32>
    %1708 = arith.subf %1702, %1707 : vector<8x128xf32>
    %1709 = vector.broadcast %1706 : vector<8x1xf32> to vector<8x128xf32>
    %1710 = arith.subf %1702, %1709 : vector<8x128xf32>
    %1711 = arith.mulf %1708, %1710 : vector<8x128xf32>
    %cst_302 = arith.constant dense<0.000000e+00> : vector<8xf32>
    %1712 = vector.multi_reduction <add>, %1711, %cst_302 [1] : vector<8x128xf32> to vector<8xf32>
    %1713 = vector.shape_cast %1712 : vector<8xf32> to vector<8x1xf32>
    %cst_303 = arith.constant 1.280000e+02 : f32
    %1714 = vector.broadcast %cst_303 : f32 to vector<8x1xf32>
    %1715 = arith.divf %1713, %1714 : vector<8x1xf32>
    %1716 = vector.broadcast %1706 : vector<8x1xf32> to vector<8x128xf32>
    %1717 = arith.subf %1702, %1716 : vector<8x128xf32>
    %cst_304 = arith.constant 9.99999974E-6 : f32
    %1718 = vector.broadcast %cst_304 : f32 to vector<8x1xf32>
    %1719 = arith.addf %1715, %1718 : vector<8x1xf32>
    %1720 = math.rsqrt %1719 : vector<8x1xf32>
    %1721 = vector.broadcast %1720 : vector<8x1xf32> to vector<8x128xf32>
    %1722 = arith.mulf %1717, %1721 : vector<8x128xf32>
    %1723 = vector.broadcast %1625 : vector<1x128xf32> to vector<8x128xf32>
    %1724 = arith.mulf %1722, %1723 : vector<8x128xf32>
    %1725 = vector.broadcast %1626 : vector<1x128xf32> to vector<8x128xf32>
    %1726 = arith.addf %1724, %1725 : vector<8x128xf32>
    %1727 = arith.truncf %1726 : vector<8x128xf32> to vector<8x128xbf16>
    %c0_305 = arith.constant 0 : index
    %c0_306 = arith.constant 0 : index
    %1728 = vector.load %arg9[%c0_305, %c0_306] : memref<128x128xbf16, #tpu.memory_space<vmem>>, vector<128x128xbf16>
    %cst_307 = arith.constant dense<0.000000e+00> : vector<8x128xf32>
    %1729 = tpu.matmul %1727, %1728, %cst_307 {dimension_numbers = #tpu.dot_dimension_numbers<[1], [0], [0], [1], [0, 0, 1, 1], [], []>} : vector<8x128xbf16>, vector<128x128xbf16>, vector<8x128xf32> -> vector<8x128xf32>
    %1730 = vector.broadcast %1627 : vector<1x128xf32> to vector<8x128xf32>
    %1731 = arith.addf %1729, %1730 : vector<8x128xf32>
    %cst_308 = arith.constant 5.000000e-01 : f32
    %1732 = vector.broadcast %cst_308 : f32 to vector<8x128xf32>
    %1733 = arith.mulf %1732, %1731 : vector<8x128xf32>
    %cst_309 = arith.constant 4.471500e-02 : f32
    %1734 = vector.broadcast %cst_309 : f32 to vector<8x128xf32>
    %1735 = arith.mulf %1734, %1731 : vector<8x128xf32>
    %1736 = arith.mulf %1735, %1731 : vector<8x128xf32>
    %1737 = arith.mulf %1736, %1731 : vector<8x128xf32>
    %1738 = arith.addf %1731, %1737 : vector<8x128xf32>
    %cst_310 = arith.constant 0.797884583 : f32
    %1739 = vector.broadcast %cst_310 : f32 to vector<8x128xf32>
    %1740 = arith.mulf %1739, %1738 : vector<8x128xf32>
    %1741 = math.tanh %1740 : vector<8x128xf32>
    %cst_311 = arith.constant 1.000000e+00 : f32
    %1742 = vector.broadcast %cst_311 : f32 to vector<8x128xf32>
    %1743 = arith.addf %1742, %1741 : vector<8x128xf32>
    %1744 = arith.mulf %1733, %1743 : vector<8x128xf32>
    %1745 = arith.truncf %1744 : vector<8x128xf32> to vector<8x128xbf16>
    %c0_312 = arith.constant 0 : index
    %c0_313 = arith.constant 0 : index
    %1746 = vector.load %arg10[%c0_312, %c0_313] : memref<128x128xbf16, #tpu.memory_space<vmem>>, vector<128x128xbf16>
    %cst_314 = arith.constant dense<0.000000e+00> : vector<8x128xf32>
    %1747 = tpu.matmul %1745, %1746, %cst_314 {dimension_numbers = #tpu.dot_dimension_numbers<[1], [0], [0], [1], [0, 0, 1, 1], [], []>} : vector<8x128xbf16>, vector<128x128xbf16>, vector<8x128xf32> -> vector<8x128xf32>
    %1748 = arith.addf %1702, %1747 : vector<8x128xf32>
    %1749 = vector.broadcast %1628 : vector<1x128xf32> to vector<8x128xf32>
    %1750 = arith.addf %1748, %1749 : vector<8x128xf32>
    %c0_315 = arith.constant 0 : index
    %c0_316 = arith.constant 0 : index
    %1751 = vector.load %arg2[%c0_315, %c0_316] : memref<8x8xf32, #tpu.memory_space<vmem>>, vector<8x8xf32>
    %cst_317 = arith.constant dense<0.000000e+00> : vector<8xf32>
    %1752 = vector.multi_reduction <add>, %1751, %cst_317 [1] : vector<8x8xf32> to vector<8xf32>
    %1753 = vector.shape_cast %1752 : vector<8xf32> to vector<8x1xf32>
    %cst_318 = arith.constant 9.99999996E-13 : f32
    %1754 = vector.broadcast %cst_318 : f32 to vector<8x1xf32>
    %1755 = arith.maximumf %1753, %1754 : vector<8x1xf32>
    %1756 = vector.broadcast %1755 : vector<8x1xf32> to vector<8x8xf32>
    %1757 = arith.divf %1751, %1756 : vector<8x8xf32>
    %1758 = arith.truncf %1757 : vector<8x8xf32> to vector<8x8xbf16>
    %1759 = arith.truncf %1750 : vector<8x128xf32> to vector<8x128xbf16>
    %cst_319 = arith.constant dense<0.000000e+00> : vector<8x128xf32>
    %1760 = tpu.matmul %1758, %1759, %cst_319 {dimension_numbers = #tpu.dot_dimension_numbers<[1], [0], [0], [1], [0, 0, 1, 1], [], []>} : vector<8x8xbf16>, vector<8x128xbf16>, vector<8x128xf32> -> vector<8x128xf32>
    %1761 = arith.truncf %1760 : vector<8x128xf32> to vector<8x128xbf16>
    %c0_320 = arith.constant 0 : index
    %c0_321 = arith.constant 0 : index
    %1762 = vector.load %arg11[%c0_320, %c0_321] : memref<128x128xbf16, #tpu.memory_space<vmem>>, vector<128x128xbf16>
    %cst_322 = arith.constant dense<0.000000e+00> : vector<8x128xf32>
    %1763 = tpu.matmul %1761, %1762, %cst_322 {dimension_numbers = #tpu.dot_dimension_numbers<[1], [0], [0], [1], [0, 0, 1, 1], [], []>} : vector<8x128xbf16>, vector<128x128xbf16>, vector<8x128xf32> -> vector<8x128xf32>
    %cst_323 = arith.constant 0.000000e+00 : f32
    %1764 = vector.broadcast %cst_323 : f32 to vector<8x128xf32>
    %1765 = arith.maximumf %1763, %1764 : vector<8x128xf32>
    %1766 = arith.mulf %1765, %1765 : vector<8x128xf32>
    %cst_324 = arith.constant dense<0.000000e+00> : vector<8xf32>
    %1767 = vector.multi_reduction <add>, %1766, %cst_324 [1] : vector<8x128xf32> to vector<8xf32>
    %1768 = vector.shape_cast %1767 : vector<8xf32> to vector<8x1xf32>
    %cst_325 = arith.constant 1.000000e-24 : f32
    %1769 = vector.broadcast %cst_325 : f32 to vector<8x1xf32>
    %1770 = arith.maximumf %1768, %1769 : vector<8x1xf32>
    %1771 = math.rsqrt %1770 : vector<8x1xf32>
    %1772 = vector.broadcast %1771 : vector<8x1xf32> to vector<8x128xf32>
    %1773 = arith.mulf %1765, %1772 : vector<8x128xf32>
    %1774 = arith.truncf %1773 : vector<8x128xf32> to vector<8x128xbf16>
    %cst_326 = arith.constant dense<0.000000e+00> : vector<8x128xf32>
    %1775 = tpu.matmul %1758, %1774, %cst_326 {dimension_numbers = #tpu.dot_dimension_numbers<[1], [0], [0], [1], [0, 0, 1, 1], [], []>} : vector<8x8xbf16>, vector<8x128xbf16>, vector<8x128xf32> -> vector<8x128xf32>
    %1776 = arith.truncf %1775 : vector<8x128xf32> to vector<8x128xbf16>
    %c0_327 = arith.constant 0 : index
    %c0_328 = arith.constant 0 : index
    %1777 = vector.load %arg12[%c0_327, %c0_328] : memref<128x128xbf16, #tpu.memory_space<vmem>>, vector<128x128xbf16>
    %cst_329 = arith.constant dense<0.000000e+00> : vector<8x128xf32>
    %1778 = tpu.matmul %1776, %1777, %cst_329 {dimension_numbers = #tpu.dot_dimension_numbers<[1], [0], [0], [1], [0, 0, 1, 1], [], []>} : vector<8x128xbf16>, vector<128x128xbf16>, vector<8x128xf32> -> vector<8x128xf32>
    %cst_330 = arith.constant 0.000000e+00 : f32
    %1779 = vector.broadcast %cst_330 : f32 to vector<8x128xf32>
    %1780 = arith.maximumf %1778, %1779 : vector<8x128xf32>
    %1781 = arith.mulf %1780, %1780 : vector<8x128xf32>
    %cst_331 = arith.constant dense<0.000000e+00> : vector<8xf32>
    %1782 = vector.multi_reduction <add>, %1781, %cst_331 [1] : vector<8x128xf32> to vector<8xf32>
    %1783 = vector.shape_cast %1782 : vector<8xf32> to vector<8x1xf32>
    %cst_332 = arith.constant 1.000000e-24 : f32
    %1784 = vector.broadcast %cst_332 : f32 to vector<8x1xf32>
    %1785 = arith.maximumf %1783, %1784 : vector<8x1xf32>
    %1786 = math.rsqrt %1785 : vector<8x1xf32>
    %1787 = vector.broadcast %1786 : vector<8x1xf32> to vector<8x128xf32>
    %1788 = arith.mulf %1780, %1787 : vector<8x128xf32>
    %c0_i32_333 = arith.constant 0 : i32
    %1789 = tpu.memref_slice %arg16[%c0_i32_333] : memref<1x!tpu.dma_semaphore, #tpu.memory_space<semaphore_mem>> -> memref<1x!tpu.dma_semaphore, #tpu.memory_space<semaphore_mem>>
    %1790 = tpu.memref_squeeze %1789 : memref<1x!tpu.dma_semaphore, #tpu.memory_space<semaphore_mem>> -> memref<!tpu.dma_semaphore, #tpu.memory_space<semaphore_mem>>
    tpu.wait_dma2 semaphore(%1790 : memref<!tpu.dma_semaphore, #tpu.memory_space<semaphore_mem>>) src(%arg13 : memref<4x128x512xbf16, #tpu.memory_space<any>>) dst(%arg15 : memref<4x128x512xbf16, #tpu.memory_space<vmem>>)
    %c0_334 = arith.constant 0 : index
    %c0_335 = arith.constant 0 : index
    %c0_336 = arith.constant 0 : index
    %1791 = vector.load %arg15[%c0_334, %c0_335, %c0_336] : memref<4x128x512xbf16, #tpu.memory_space<vmem>>, vector<1x128x512xbf16>
    %1792 = vector.shape_cast %1791 : vector<1x128x512xbf16> to vector<128x512xbf16>
    %c1_337 = arith.constant 1 : index
    %c0_338 = arith.constant 0 : index
    %c0_339 = arith.constant 0 : index
    %1793 = vector.load %arg15[%c1_337, %c0_338, %c0_339] : memref<4x128x512xbf16, #tpu.memory_space<vmem>>, vector<1x128x512xbf16>
    %1794 = vector.shape_cast %1793 : vector<1x128x512xbf16> to vector<128x512xbf16>
    %c2_340 = arith.constant 2 : index
    %c0_341 = arith.constant 0 : index
    %c0_342 = arith.constant 0 : index
    %1795 = vector.load %arg15[%c2_340, %c0_341, %c0_342] : memref<4x128x512xbf16, #tpu.memory_space<vmem>>, vector<1x128x512xbf16>
    %1796 = vector.shape_cast %1795 : vector<1x128x512xbf16> to vector<128x512xbf16>
    %c3_343 = arith.constant 3 : index
    %c0_344 = arith.constant 0 : index
    %c0_345 = arith.constant 0 : index
    %1797 = vector.load %arg15[%c3_343, %c0_344, %c0_345] : memref<4x128x512xbf16, #tpu.memory_space<vmem>>, vector<1x128x512xbf16>
    %1798 = vector.shape_cast %1797 : vector<1x128x512xbf16> to vector<128x512xbf16>
    %c0_346 = arith.constant 0 : index
    %c0_347 = arith.constant 0 : index
    %1799 = vector.load %arg6[%c0_346, %c0_347] : memref<2x512xf32, #tpu.memory_space<vmem>>, vector<1x512xf32>
    %c1_348 = arith.constant 1 : index
    %c0_349 = arith.constant 0 : index
    %1800 = vector.load %arg6[%c1_348, %c0_349] : memref<2x512xf32, #tpu.memory_space<vmem>>, vector<1x512xf32>
    %1801 = tpu.concatenate %1773, %1788 in 0 : vector<8x128xf32>, vector<8x128xf32> -> vector<16x128xf32>
    %1802 = arith.truncf %1801 : vector<16x128xf32> to vector<16x128xbf16>
    %cst_350 = arith.constant dense<0.000000e+00> : vector<16x512xf32>
    %1803 = tpu.matmul %1802, %1792, %cst_350 {dimension_numbers = #tpu.dot_dimension_numbers<[1], [0], [0], [1], [0, 0, 1, 1], [], []>} : vector<16x128xbf16>, vector<128x512xbf16>, vector<16x512xf32> -> vector<16x512xf32>
    %1804 = vector.broadcast %1799 : vector<1x512xf32> to vector<16x512xf32>
    %1805 = arith.addf %1803, %1804 : vector<16x512xf32>
    %cst_351 = arith.constant 0.000000e+00 : f32
    %1806 = vector.broadcast %cst_351 : f32 to vector<8x128xf32>
    %cst_352 = arith.constant 0.000000e+00 : f32
    %1807 = vector.broadcast %cst_352 : f32 to vector<8x128xf32>
    %1808 = vector.extract_strided_slice %1805 {offsets = [0, 0], sizes = [8, 512], strides = [1, 1]} : vector<16x512xf32> to vector<8x512xf32>
    %1809 = arith.truncf %1806 : vector<8x128xf32> to vector<8x128xbf16>
    %cst_353 = arith.constant dense<0.000000e+00> : vector<8x512xf32>
    %1810 = tpu.matmul %1809, %1794, %cst_353 {dimension_numbers = #tpu.dot_dimension_numbers<[1], [0], [0], [1], [0, 0, 1, 1], [], []>} : vector<8x128xbf16>, vector<128x512xbf16>, vector<8x512xf32> -> vector<8x512xf32>
    %1811 = arith.addf %1808, %1810 : vector<8x512xf32>
    %1812 = vector.extract_strided_slice %1811 {offsets = [0, 0], sizes = [8, 128], strides = [1, 1]} : vector<8x512xf32> to vector<8x128xf32>
    %cst_354 = arith.constant 0.000000e+00 : f32
    %1813 = vector.broadcast %cst_354 : f32 to vector<8x128xf32>
    %1814 = arith.subf %1813, %1812 : vector<8x128xf32>
    %1815 = math.exp %1814 : vector<8x128xf32>
    %cst_355 = arith.constant 1.000000e+00 : f32
    %1816 = vector.broadcast %cst_355 : f32 to vector<8x128xf32>
    %1817 = arith.addf %1816, %1815 : vector<8x128xf32>
    %cst_356 = arith.constant 1.000000e+00 : f32
    %1818 = vector.broadcast %cst_356 : f32 to vector<8x128xf32>
    %1819 = arith.divf %1818, %1817 : vector<8x128xf32>
    %1820 = vector.extract_strided_slice %1811 {offsets = [0, 128], sizes = [8, 128], strides = [1, 1]} : vector<8x512xf32> to vector<8x128xf32>
    %cst_357 = arith.constant 0.000000e+00 : f32
    %1821 = vector.broadcast %cst_357 : f32 to vector<8x128xf32>
    %1822 = arith.subf %1821, %1820 : vector<8x128xf32>
    %1823 = math.exp %1822 : vector<8x128xf32>
    %cst_358 = arith.constant 1.000000e+00 : f32
    %1824 = vector.broadcast %cst_358 : f32 to vector<8x128xf32>
    %1825 = arith.addf %1824, %1823 : vector<8x128xf32>
    %cst_359 = arith.constant 1.000000e+00 : f32
    %1826 = vector.broadcast %cst_359 : f32 to vector<8x128xf32>
    %1827 = arith.divf %1826, %1825 : vector<8x128xf32>
    %1828 = vector.extract_strided_slice %1811 {offsets = [0, 256], sizes = [8, 128], strides = [1, 1]} : vector<8x512xf32> to vector<8x128xf32>
    %1829 = math.tanh %1828 : vector<8x128xf32>
    %1830 = vector.extract_strided_slice %1811 {offsets = [0, 384], sizes = [8, 128], strides = [1, 1]} : vector<8x512xf32> to vector<8x128xf32>
    %cst_360 = arith.constant 0.000000e+00 : f32
    %1831 = vector.broadcast %cst_360 : f32 to vector<8x128xf32>
    %1832 = arith.subf %1831, %1830 : vector<8x128xf32>
    %1833 = math.exp %1832 : vector<8x128xf32>
    %cst_361 = arith.constant 1.000000e+00 : f32
    %1834 = vector.broadcast %cst_361 : f32 to vector<8x128xf32>
    %1835 = arith.addf %1834, %1833 : vector<8x128xf32>
    %cst_362 = arith.constant 1.000000e+00 : f32
    %1836 = vector.broadcast %cst_362 : f32 to vector<8x128xf32>
    %1837 = arith.divf %1836, %1835 : vector<8x128xf32>
    %1838 = arith.mulf %1827, %1807 : vector<8x128xf32>
    %1839 = arith.mulf %1819, %1829 : vector<8x128xf32>
    %1840 = arith.addf %1838, %1839 : vector<8x128xf32>
    %1841 = math.tanh %1840 : vector<8x128xf32>
    %1842 = arith.mulf %1837, %1841 : vector<8x128xf32>
    %1843 = vector.extract_strided_slice %1805 {offsets = [8, 0], sizes = [8, 512], strides = [1, 1]} : vector<16x512xf32> to vector<8x512xf32>
    %1844 = arith.truncf %1842 : vector<8x128xf32> to vector<8x128xbf16>
    %cst_363 = arith.constant dense<0.000000e+00> : vector<8x512xf32>
    %1845 = tpu.matmul %1844, %1794, %cst_363 {dimension_numbers = #tpu.dot_dimension_numbers<[1], [0], [0], [1], [0, 0, 1, 1], [], []>} : vector<8x128xbf16>, vector<128x512xbf16>, vector<8x512xf32> -> vector<8x512xf32>
    %1846 = arith.addf %1843, %1845 : vector<8x512xf32>
    %1847 = vector.extract_strided_slice %1846 {offsets = [0, 0], sizes = [8, 128], strides = [1, 1]} : vector<8x512xf32> to vector<8x128xf32>
    %cst_364 = arith.constant 0.000000e+00 : f32
    %1848 = vector.broadcast %cst_364 : f32 to vector<8x128xf32>
    %1849 = arith.subf %1848, %1847 : vector<8x128xf32>
    %1850 = math.exp %1849 : vector<8x128xf32>
    %cst_365 = arith.constant 1.000000e+00 : f32
    %1851 = vector.broadcast %cst_365 : f32 to vector<8x128xf32>
    %1852 = arith.addf %1851, %1850 : vector<8x128xf32>
    %cst_366 = arith.constant 1.000000e+00 : f32
    %1853 = vector.broadcast %cst_366 : f32 to vector<8x128xf32>
    %1854 = arith.divf %1853, %1852 : vector<8x128xf32>
    %1855 = vector.extract_strided_slice %1846 {offsets = [0, 128], sizes = [8, 128], strides = [1, 1]} : vector<8x512xf32> to vector<8x128xf32>
    %cst_367 = arith.constant 0.000000e+00 : f32
    %1856 = vector.broadcast %cst_367 : f32 to vector<8x128xf32>
    %1857 = arith.subf %1856, %1855 : vector<8x128xf32>
    %1858 = math.exp %1857 : vector<8x128xf32>
    %cst_368 = arith.constant 1.000000e+00 : f32
    %1859 = vector.broadcast %cst_368 : f32 to vector<8x128xf32>
    %1860 = arith.addf %1859, %1858 : vector<8x128xf32>
    %cst_369 = arith.constant 1.000000e+00 : f32
    %1861 = vector.broadcast %cst_369 : f32 to vector<8x128xf32>
    %1862 = arith.divf %1861, %1860 : vector<8x128xf32>
    %1863 = vector.extract_strided_slice %1846 {offsets = [0, 256], sizes = [8, 128], strides = [1, 1]} : vector<8x512xf32> to vector<8x128xf32>
    %1864 = math.tanh %1863 : vector<8x128xf32>
    %1865 = vector.extract_strided_slice %1846 {offsets = [0, 384], sizes = [8, 128], strides = [1, 1]} : vector<8x512xf32> to vector<8x128xf32>
    %cst_370 = arith.constant 0.000000e+00 : f32
    %1866 = vector.broadcast %cst_370 : f32 to vector<8x128xf32>
    %1867 = arith.subf %1866, %1865 : vector<8x128xf32>
    %1868 = math.exp %1867 : vector<8x128xf32>
    %cst_371 = arith.constant 1.000000e+00 : f32
    %1869 = vector.broadcast %cst_371 : f32 to vector<8x128xf32>
    %1870 = arith.addf %1869, %1868 : vector<8x128xf32>
    %cst_372 = arith.constant 1.000000e+00 : f32
    %1871 = vector.broadcast %cst_372 : f32 to vector<8x128xf32>
    %1872 = arith.divf %1871, %1870 : vector<8x128xf32>
    %1873 = arith.mulf %1862, %1840 : vector<8x128xf32>
    %1874 = arith.mulf %1854, %1864 : vector<8x128xf32>
    %1875 = arith.addf %1873, %1874 : vector<8x128xf32>
    %1876 = math.tanh %1875 : vector<8x128xf32>
    %1877 = arith.mulf %1872, %1876 : vector<8x128xf32>
    %1878 = tpu.concatenate %1842, %1877 in 0 : vector<8x128xf32>, vector<8x128xf32> -> vector<16x128xf32>
    %1879 = arith.truncf %1878 : vector<16x128xf32> to vector<16x128xbf16>
    %cst_373 = arith.constant dense<0.000000e+00> : vector<16x512xf32>
    %1880 = tpu.matmul %1879, %1796, %cst_373 {dimension_numbers = #tpu.dot_dimension_numbers<[1], [0], [0], [1], [0, 0, 1, 1], [], []>} : vector<16x128xbf16>, vector<128x512xbf16>, vector<16x512xf32> -> vector<16x512xf32>
    %1881 = vector.broadcast %1800 : vector<1x512xf32> to vector<16x512xf32>
    %1882 = arith.addf %1880, %1881 : vector<16x512xf32>
    %cst_374 = arith.constant 0.000000e+00 : f32
    %1883 = vector.broadcast %cst_374 : f32 to vector<8x128xf32>
    %cst_375 = arith.constant 0.000000e+00 : f32
    %1884 = vector.broadcast %cst_375 : f32 to vector<8x128xf32>
    %1885 = vector.extract_strided_slice %1882 {offsets = [0, 0], sizes = [8, 512], strides = [1, 1]} : vector<16x512xf32> to vector<8x512xf32>
    %1886 = arith.truncf %1883 : vector<8x128xf32> to vector<8x128xbf16>
    %cst_376 = arith.constant dense<0.000000e+00> : vector<8x512xf32>
    %1887 = tpu.matmul %1886, %1798, %cst_376 {dimension_numbers = #tpu.dot_dimension_numbers<[1], [0], [0], [1], [0, 0, 1, 1], [], []>} : vector<8x128xbf16>, vector<128x512xbf16>, vector<8x512xf32> -> vector<8x512xf32>
    %1888 = arith.addf %1885, %1887 : vector<8x512xf32>
    %1889 = vector.extract_strided_slice %1888 {offsets = [0, 0], sizes = [8, 128], strides = [1, 1]} : vector<8x512xf32> to vector<8x128xf32>
    %cst_377 = arith.constant 0.000000e+00 : f32
    %1890 = vector.broadcast %cst_377 : f32 to vector<8x128xf32>
    %1891 = arith.subf %1890, %1889 : vector<8x128xf32>
    %1892 = math.exp %1891 : vector<8x128xf32>
    %cst_378 = arith.constant 1.000000e+00 : f32
    %1893 = vector.broadcast %cst_378 : f32 to vector<8x128xf32>
    %1894 = arith.addf %1893, %1892 : vector<8x128xf32>
    %cst_379 = arith.constant 1.000000e+00 : f32
    %1895 = vector.broadcast %cst_379 : f32 to vector<8x128xf32>
    %1896 = arith.divf %1895, %1894 : vector<8x128xf32>
    %1897 = vector.extract_strided_slice %1888 {offsets = [0, 128], sizes = [8, 128], strides = [1, 1]} : vector<8x512xf32> to vector<8x128xf32>
    %cst_380 = arith.constant 0.000000e+00 : f32
    %1898 = vector.broadcast %cst_380 : f32 to vector<8x128xf32>
    %1899 = arith.subf %1898, %1897 : vector<8x128xf32>
    %1900 = math.exp %1899 : vector<8x128xf32>
    %cst_381 = arith.constant 1.000000e+00 : f32
    %1901 = vector.broadcast %cst_381 : f32 to vector<8x128xf32>
    %1902 = arith.addf %1901, %1900 : vector<8x128xf32>
    %cst_382 = arith.constant 1.000000e+00 : f32
    %1903 = vector.broadcast %cst_382 : f32 to vector<8x128xf32>
    %1904 = arith.divf %1903, %1902 : vector<8x128xf32>
    %1905 = vector.extract_strided_slice %1888 {offsets = [0, 256], sizes = [8, 128], strides = [1, 1]} : vector<8x512xf32> to vector<8x128xf32>
    %1906 = math.tanh %1905 : vector<8x128xf32>
    %1907 = vector.extract_strided_slice %1888 {offsets = [0, 384], sizes = [8, 128], strides = [1, 1]} : vector<8x512xf32> to vector<8x128xf32>
    %cst_383 = arith.constant 0.000000e+00 : f32
    %1908 = vector.broadcast %cst_383 : f32 to vector<8x128xf32>
    %1909 = arith.subf %1908, %1907 : vector<8x128xf32>
    %1910 = math.exp %1909 : vector<8x128xf32>
    %cst_384 = arith.constant 1.000000e+00 : f32
    %1911 = vector.broadcast %cst_384 : f32 to vector<8x128xf32>
    %1912 = arith.addf %1911, %1910 : vector<8x128xf32>
    %cst_385 = arith.constant 1.000000e+00 : f32
    %1913 = vector.broadcast %cst_385 : f32 to vector<8x128xf32>
    %1914 = arith.divf %1913, %1912 : vector<8x128xf32>
    %1915 = arith.mulf %1904, %1884 : vector<8x128xf32>
    %1916 = arith.mulf %1896, %1906 : vector<8x128xf32>
    %1917 = arith.addf %1915, %1916 : vector<8x128xf32>
    %1918 = math.tanh %1917 : vector<8x128xf32>
    %1919 = arith.mulf %1914, %1918 : vector<8x128xf32>
    %1920 = vector.extract_strided_slice %1882 {offsets = [8, 0], sizes = [8, 512], strides = [1, 1]} : vector<16x512xf32> to vector<8x512xf32>
    %1921 = arith.truncf %1919 : vector<8x128xf32> to vector<8x128xbf16>
    %cst_386 = arith.constant dense<0.000000e+00> : vector<8x512xf32>
    %1922 = tpu.matmul %1921, %1798, %cst_386 {dimension_numbers = #tpu.dot_dimension_numbers<[1], [0], [0], [1], [0, 0, 1, 1], [], []>} : vector<8x128xbf16>, vector<128x512xbf16>, vector<8x512xf32> -> vector<8x512xf32>
    %1923 = arith.addf %1920, %1922 : vector<8x512xf32>
    %1924 = vector.extract_strided_slice %1923 {offsets = [0, 0], sizes = [8, 128], strides = [1, 1]} : vector<8x512xf32> to vector<8x128xf32>
    %cst_387 = arith.constant 0.000000e+00 : f32
    %1925 = vector.broadcast %cst_387 : f32 to vector<8x128xf32>
    %1926 = arith.subf %1925, %1924 : vector<8x128xf32>
    %1927 = math.exp %1926 : vector<8x128xf32>
    %cst_388 = arith.constant 1.000000e+00 : f32
    %1928 = vector.broadcast %cst_388 : f32 to vector<8x128xf32>
    %1929 = arith.addf %1928, %1927 : vector<8x128xf32>
    %cst_389 = arith.constant 1.000000e+00 : f32
    %1930 = vector.broadcast %cst_389 : f32 to vector<8x128xf32>
    %1931 = arith.divf %1930, %1929 : vector<8x128xf32>
    %1932 = vector.extract_strided_slice %1923 {offsets = [0, 128], sizes = [8, 128], strides = [1, 1]} : vector<8x512xf32> to vector<8x128xf32>
    %cst_390 = arith.constant 0.000000e+00 : f32
    %1933 = vector.broadcast %cst_390 : f32 to vector<8x128xf32>
    %1934 = arith.subf %1933, %1932 : vector<8x128xf32>
    %1935 = math.exp %1934 : vector<8x128xf32>
    %cst_391 = arith.constant 1.000000e+00 : f32
    %1936 = vector.broadcast %cst_391 : f32 to vector<8x128xf32>
    %1937 = arith.addf %1936, %1935 : vector<8x128xf32>
    %cst_392 = arith.constant 1.000000e+00 : f32
    %1938 = vector.broadcast %cst_392 : f32 to vector<8x128xf32>
    %1939 = arith.divf %1938, %1937 : vector<8x128xf32>
    %1940 = vector.extract_strided_slice %1923 {offsets = [0, 256], sizes = [8, 128], strides = [1, 1]} : vector<8x512xf32> to vector<8x128xf32>
    %1941 = math.tanh %1940 : vector<8x128xf32>
    %1942 = vector.extract_strided_slice %1923 {offsets = [0, 384], sizes = [8, 128], strides = [1, 1]} : vector<8x512xf32> to vector<8x128xf32>
    %cst_393 = arith.constant 0.000000e+00 : f32
    %1943 = vector.broadcast %cst_393 : f32 to vector<8x128xf32>
    %1944 = arith.subf %1943, %1942 : vector<8x128xf32>
    %1945 = math.exp %1944 : vector<8x128xf32>
    %cst_394 = arith.constant 1.000000e+00 : f32
    %1946 = vector.broadcast %cst_394 : f32 to vector<8x128xf32>
    %1947 = arith.addf %1946, %1945 : vector<8x128xf32>
    %cst_395 = arith.constant 1.000000e+00 : f32
    %1948 = vector.broadcast %cst_395 : f32 to vector<8x128xf32>
    %1949 = arith.divf %1948, %1947 : vector<8x128xf32>
    %1950 = arith.mulf %1939, %1917 : vector<8x128xf32>
    %1951 = arith.mulf %1931, %1941 : vector<8x128xf32>
    %1952 = arith.addf %1950, %1951 : vector<8x128xf32>
    %1953 = math.tanh %1952 : vector<8x128xf32>
    %1954 = arith.mulf %1949, %1953 : vector<8x128xf32>
    %cst_396 = arith.constant 0.000000e+00 : f32
    %1955 = vector.broadcast %cst_396 : f32 to vector<8x128xf32>
    %1956 = arith.addf %1955, %1919 : vector<8x128xf32>
    %1957 = arith.addf %1956, %1954 : vector<8x128xf32>
    %cst_397 = arith.constant 5.000000e-01 : f32
    %1958 = vector.broadcast %cst_397 : f32 to vector<8x128xf32>
    %1959 = arith.mulf %1957, %1958 : vector<8x128xf32>
    %c0_398 = arith.constant 0 : index
    %c0_399 = arith.constant 0 : index
    %1960 = vector.load %arg14[%c0_398, %c0_399] : memref<8x128xf32, #tpu.memory_space<vmem>>, vector<8x128xf32>
    tpu.vector_store %arg14[%c0_398, %c0_399], %1959 {strides = array<i32>} : memref<8x128xf32, #tpu.memory_space<vmem>>, vector<8x128xf32>,
    return
  }
}

</mosaic_0001>

<bundles_post_ra>
// kernel: mixer_transformer_forward.1
= control target key start
LH: loop header
LB: loop body
LE: loop exit
PB: predicated region body
PF: predicated region fallthrough
CT: control target
= control target key end

     0   :  { %s8836_s0 = inlined_call_operand.vmem [shape: f32[8,8,128], index: 0, kind: input, shape index: {}]   ;;  %s8837_s1 = inlined_call_operand.vmem [shape: f32[8,128], index: 1, kind: input, shape index: {}]   ;;  %s8838_s2 = inlined_call_operand.vmem [shape: f32[8,8], index: 2, kind: input, shape index: {}]   ;;  %s8839_s3 = inlined_call_operand.vmem [shape: f32[9,8,128], index: 3, kind: input, shape index: {}]   ;;  %s8840_s4 = inlined_call_operand.vmem [shape: f32[273], index: 4, kind: input, shape index: {}]   ;;  %s8841_s5 = inlined_call_operand.vmem [shape: f32[7,128], index: 5, kind: input, shape index: {}]   ;;  %s8842_s6 = inlined_call_operand.vmem [shape: f32[2,512], index: 6, kind: input, shape index: {}]   ;;  %s8843_s7 = inlined_call_operand.vmem [shape: bf16[128,192], index: 7, kind: input, shape index: {}]   ;;  %s8844_s8 = inlined_call_operand.vmem [shape: bf16[64,128], index: 8, kind: input, shape index: {}]   ;;  %s8845_s9 = inlined_call_operand.vmem [shape: bf16[128,128], index: 9, kind: input, shape index: {}]   ;;  %s8846_s10 = inlined_call_operand.vmem [shape: bf16[128,128], index: 10, kind: input, shape index: {}]   ;;  %s8847_s11 = inlined_call_operand.vmem [shape: bf16[128,128], index: 11, kind: input, shape index: {}]   ;;  %s8848_s12 = inlined_call_operand.vmem [shape: bf16[128,128], index: 12, kind: input, shape index: {}]   ;;  %s8849_s13 = inlined_call_operand.vmem [shape: bf16[4,128,512], index: 13, kind: input, shape index: {}]   ;;  %s8850_s14 = inlined_call_operand.hbm [shape: f32[8,128], index: 14, kind: output, shape index: {}]  }
   0x1   :  { %9042 = sst [smem:[#allocation110_spill]] %s8836_s0 }
   0x2   :  { %9043 = sst [smem:[#allocation111_spill]] %s8837_s1 }
   0x3   :  { %9044 = sst [smem:[#allocation112_spill]] %s8838_s2 }
   0x4   :  { %9045 = sst [smem:[#allocation113_spill]] %s8839_s3 }
   0x5   :  { %9046 = sst [smem:[#allocation114_spill]] %s8841_s5 }
   0x6   :  { %9047 = sst [smem:[#allocation115_spill]] %s8842_s6 }
   0x7   :  { %9048 = sst [smem:[#allocation116_spill]] %s8843_s7 }
   0x8   :  { %9049 = sst [smem:[#allocation117_spill]] %s8844_s8 }
   0x9   :  { %9050 = sst [smem:[#allocation118_spill]] %s8845_s9 }
   0xa   :  { %9051 = sst [smem:[#allocation119_spill]] %s8846_s10 }
   0xb   :  { %9052 = sst [smem:[#allocation120_spill]] %s8847_s11 }
   0xc   :  { %9053 = sst [smem:[#allocation121_spill]] %s8848_s12 }
   0xd   :  { %9054 = sst [smem:[#allocation122_spill]] %s8850_s14 }
   0xe   :  { %19 = vsyncpa [#allocation6], 0 }
   0xf   :  { %20 = vsyncpa [#allocation5], 0  ;;  %s35_s15 = sshll.u32 %s8840_s4, 4  ;;  %s36_s15 = int_to_ptr.vmem [resolvable:$true] %s35_s15 }
  0x10   :  { %s5430_s16 = scalar_lea.vmem %s36_s15, 48  ;;  %s5434_s17 = scalar_lea.vmem %s36_s15, 64 }
  0x11   :  { %p5431_p0 = scmp.ne.s32.totalorder %s36_s15, %s5430_s16  ;;  %p5435_p1 = scmp.lt.s32.totalorder %s36_s15, %s36_s15 }
  0x12   :  { %p5436_p2 = scmp.lt.s32.totalorder %s5434_s17, %s5430_s16 }
  0x14   :  { %p5437_p3 = por %p5436_p2, %p5435_p1 }
  0x16   :  { %p5438_p4 = pnand %p5437_p3, %p5431_p0 }
  0x18   :  { %5441 = shalt.err (!%p5438_p4)
}
  0x19   :  { %s5470_s18 = smov [#allocation4]  }
  0x1a   :  { %38 = dma.vmem_to_smem %s36_s15, 48, %s5470_s18, [#allocation6]  }
  0x1b   :  { %5464 = dma.done.wait [#allocation6], 48  }
  0x1c   :  { %5465 = vsyncadd [#allocation6], 4294967248 }
  0x1d   :  { %58 = sfence }
  0x1e   :  { %v77_v0 = vld [vmem:[%s8849_s13] sm:$0xf]  ;;  %v79_v1 = vld [vmem:[%s8849_s13 + $0x10] sm:$0xf]  ;;  %v81_v2 = vld [vmem:[%s8849_s13 + $0x4] sm:$0xf] }
  0x1f   :  { %78 = vst [vmem:[#allocation2] sm:$0xf] %v77_v0  ;;  %80 = vst [vmem:[#allocation2 + $0x4] sm:$0xf] %v79_v1  ;;  %v83_v3 = vld [vmem:[%s8849_s13 + $0x14] sm:$0xf] }
  0x20   :  { %82 = vst [vmem:[#allocation2 + $0x8] sm:$0xf] %v81_v2  ;;  %v85_v4 = vld [vmem:[%s8849_s13 + $0x8] sm:$0xf]  ;;  %v87_v5 = vld [vmem:[%s8849_s13 + $0x18] sm:$0xf] }
  0x21   :  { %84 = vst [vmem:[#allocation2 + $0xc] sm:$0xf] %v83_v3  ;;  %86 = vst [vmem:[#allocation2 + $0x10] sm:$0xf] %v85_v4  ;;  %v89_v6 = vld [vmem:[%s8849_s13 + $0xc] sm:$0xf] }
  0x22   :  { %88 = vst [vmem:[#allocation2 + $0x14] sm:$0xf] %v87_v5  ;;  %v91_v7 = vld [vmem:[%s8849_s13 + $0x1c] sm:$0xff]   ;;  %v95_v8 = vld [vmem:[%s8849_s13 + $0x30] sm:$0xf]  ;;  %s8865_s30 = smov 9  }
  0x23   :  { %90 = vst [vmem:[#allocation2 + $0x18] sm:$0xf] %v89_v6  ;;  %92 = vst [vmem:[#allocation2 + $0x1c] sm:$0xff] %v91_v7   ;;  %v97_v9 = vld [vmem:[%s8849_s13 + $0x24] sm:$0xf]  ;;  %v107_v14 = vld [vmem:[%s8849_s13 + $0x3c] sm:$0xff]  }
  0x24   :  { %96 = vst [vmem:[#allocation2 + $0x24] sm:$0xf] %v95_v8  ;;  %v99_v10 = vld [vmem:[%s8849_s13 + $0x34] sm:$0xf]  ;;  %v101_v11 = vld [vmem:[%s8849_s13 + $0x28] sm:$0xf] }
  0x25   :  { %98 = vst [vmem:[#allocation2 + $0x28] sm:$0xf] %v97_v9  ;;  %100 = vst [vmem:[#allocation2 + $0x2c] sm:$0xf] %v99_v10  ;;  %v103_v12 = vld [vmem:[%s8849_s13 + $0x38] sm:$0xf] }
  0x26   :  { %102 = vst [vmem:[#allocation2 + $0x30] sm:$0xf] %v101_v11  ;;  %v105_v13 = vld [vmem:[%s8849_s13 + $0x2c] sm:$0xf]  ;;  %104 = vst [vmem:[#allocation2 + $0x34] sm:$0xf] %v103_v12 }
  0x27   :  { %106 = vst [vmem:[#allocation2 + $0x38] sm:$0xf] %v105_v13  ;;  %108 = vst [vmem:[#allocation2 + $0x3c] sm:$0xff] %v107_v14   ;;  %v111_v15 = vld [vmem:[%s8849_s13 + $0x50] sm:$0xf]  ;;  %v123_v21 = vld [vmem:[%s8849_s13 + $0x5c] sm:$0xff]  }
  0x28   :  { %v113_v16 = vld [vmem:[%s8849_s13 + $0x44] sm:$0xf]  ;;  %v115_v17 = vld [vmem:[%s8849_s13 + $0x54] sm:$0xf]  ;;  %112 = vst [vmem:[#allocation2 + $0x44] sm:$0xf] %v111_v15 }
  0x29   :  { %114 = vst [vmem:[#allocation2 + $0x48] sm:$0xf] %v113_v16  ;;  %116 = vst [vmem:[#allocation2 + $0x4c] sm:$0xf] %v115_v17  ;;  %v117_v18 = vld [vmem:[%s8849_s13 + $0x48] sm:$0xf] }
  0x2a   :  { %v119_v19 = vld [vmem:[%s8849_s13 + $0x58] sm:$0xf]  ;;  %v121_v20 = vld [vmem:[%s8849_s13 + $0x4c] sm:$0xf]  ;;  %118 = vst [vmem:[#allocation2 + $0x50] sm:$0xf] %v117_v18 }
  0x2b   :  { %120 = vst [vmem:[#allocation2 + $0x54] sm:$0xf] %v119_v19  ;;  %122 = vst [vmem:[#allocation2 + $0x58] sm:$0xf] %v121_v20  ;;  %v127_v22 = vld [vmem:[%s8849_s13 + $0x70] sm:$0xf] }
  0x2c   :  { %v129_v23 = vld [vmem:[%s8849_s13 + $0x64] sm:$0xf]  ;;  %124 = vst [vmem:[#allocation2 + $0x5c] sm:$0xff] %v123_v21   ;;  %128 = vst [vmem:[#allocation2 + $0x64] sm:$0xf] %v127_v22  ;;  %v139_v28 = vld [vmem:[%s8849_s13 + $0x7c] sm:$0xff]  }
  0x2d   :  { %130 = vst [vmem:[#allocation2 + $0x68] sm:$0xf] %v129_v23  ;;  %v131_v24 = vld [vmem:[%s8849_s13 + $0x74] sm:$0xf]  ;;  %v133_v25 = vld [vmem:[%s8849_s13 + $0x68] sm:$0xf] }
  0x2e   :  { %v135_v26 = vld [vmem:[%s8849_s13 + $0x78] sm:$0xf]  ;;  %132 = vst [vmem:[#allocation2 + $0x6c] sm:$0xf] %v131_v24  ;;  %134 = vst [vmem:[#allocation2 + $0x70] sm:$0xf] %v133_v25 }
  0x2f   :  { %136 = vst [vmem:[#allocation2 + $0x74] sm:$0xf] %v135_v26  ;;  %v137_v27 = vld [vmem:[%s8849_s13 + $0x6c] sm:$0xf]  ;;  %v143_v29 = vld [vmem:[%s8849_s13 + $0x90] sm:$0xf] }
  0x30   :  { %138 = vst [vmem:[#allocation2 + $0x78] sm:$0xf] %v137_v27  ;;  %140 = vst [vmem:[#allocation2 + $0x7c] sm:$0xff] %v139_v28   ;;  %v145_v30 = vld [vmem:[%s8849_s13 + $0x84] sm:$0xf]  ;;  %v155_v35 = vld [vmem:[%s8849_s13 + $0x9c] sm:$0xff]  }
  0x31   :  { %144 = vst [vmem:[#allocation2 + $0x84] sm:$0xf] %v143_v29  ;;  %v147_v31 = vld [vmem:[%s8849_s13 + $0x94] sm:$0xf]  ;;  %v149_v32 = vld [vmem:[%s8849_s13 + $0x88] sm:$0xf] }
  0x32   :  { %146 = vst [vmem:[#allocation2 + $0x88] sm:$0xf] %v145_v30  ;;  %148 = vst [vmem:[#allocation2 + $0x8c] sm:$0xf] %v147_v31  ;;  %v151_v33 = vld [vmem:[%s8849_s13 + $0x98] sm:$0xf] }
  0x33   :  { %150 = vst [vmem:[#allocation2 + $0x90] sm:$0xf] %v149_v32  ;;  %v153_v34 = vld [vmem:[%s8849_s13 + $0x8c] sm:$0xf]  ;;  %152 = vst [vmem:[#allocation2 + $0x94] sm:$0xf] %v151_v33 }
  0x34   :  { %154 = vst [vmem:[#allocation2 + $0x98] sm:$0xf] %v153_v34  ;;  %156 = vst [vmem:[#allocation2 + $0x9c] sm:$0xff] %v155_v35   ;;  %v159_v36 = vld [vmem:[%s8849_s13 + $0xb0] sm:$0xf]  ;;  %v171_v42 = vld [vmem:[%s8849_s13 + $0xbc] sm:$0xff]  }
  0x35   :  { %v161_v37 = vld [vmem:[%s8849_s13 + $0xa4] sm:$0xf]  ;;  %v163_v38 = vld [vmem:[%s8849_s13 + $0xb4] sm:$0xf]  ;;  %160 = vst [vmem:[#allocation2 + $0xa4] sm:$0xf] %v159_v36 }
  0x36   :  { %162 = vst [vmem:[#allocation2 + $0xa8] sm:$0xf] %v161_v37  ;;  %164 = vst [vmem:[#allocation2 + $0xac] sm:$0xf] %v163_v38  ;;  %v165_v39 = vld [vmem:[%s8849_s13 + $0xa8] sm:$0xf] }
  0x37   :  { %v167_v40 = vld [vmem:[%s8849_s13 + $0xb8] sm:$0xf]  ;;  %v169_v41 = vld [vmem:[%s8849_s13 + $0xac] sm:$0xf]  ;;  %166 = vst [vmem:[#allocation2 + $0xb0] sm:$0xf] %v165_v39 }
  0x38   :  { %168 = vst [vmem:[#allocation2 + $0xb4] sm:$0xf] %v167_v40  ;;  %170 = vst [vmem:[#allocation2 + $0xb8] sm:$0xf] %v169_v41  ;;  %v175_v43 = vld [vmem:[%s8849_s13 + $0xd0] sm:$0xf] }
  0x39   :  { %v177_v44 = vld [vmem:[%s8849_s13 + $0xc4] sm:$0xf]  ;;  %172 = vst [vmem:[#allocation2 + $0xbc] sm:$0xff] %v171_v42   ;;  %176 = vst [vmem:[#allocation2 + $0xc4] sm:$0xf] %v175_v43  ;;  %v187_v49 = vld [vmem:[%s8849_s13 + $0xdc] sm:$0xff]  }
  0x3a   :  { %178 = vst [vmem:[#allocation2 + $0xc8] sm:$0xf] %v177_v44  ;;  %v179_v45 = vld [vmem:[%s8849_s13 + $0xd4] sm:$0xf]  ;;  %v181_v46 = vld [vmem:[%s8849_s13 + $0xc8] sm:$0xf] }
  0x3b   :  { %v183_v47 = vld [vmem:[%s8849_s13 + $0xd8] sm:$0xf]  ;;  %180 = vst [vmem:[#allocation2 + $0xcc] sm:$0xf] %v179_v45  ;;  %182 = vst [vmem:[#allocation2 + $0xd0] sm:$0xf] %v181_v46 }
  0x3c   :  { %184 = vst [vmem:[#allocation2 + $0xd4] sm:$0xf] %v183_v47  ;;  %v185_v48 = vld [vmem:[%s8849_s13 + $0xcc] sm:$0xf]  ;;  %v191_v50 = vld [vmem:[%s8849_s13 + $0xf0] sm:$0xf] }
  0x3d   :  { %186 = vst [vmem:[#allocation2 + $0xd8] sm:$0xf] %v185_v48  ;;  %188 = vst [vmem:[#allocation2 + $0xdc] sm:$0xff] %v187_v49   ;;  %v193_v51 = vld [vmem:[%s8849_s13 + $0xe4] sm:$0xf]  ;;  %v203_v56 = vld [vmem:[%s8849_s13 + $0xfc] sm:$0xff]  }
  0x3e   :  { %192 = vst [vmem:[#allocation2 + $0xe4] sm:$0xf] %v191_v50  ;;  %v195_v52 = vld [vmem:[%s8849_s13 + $0xf4] sm:$0xf]  ;;  %v197_v53 = vld [vmem:[%s8849_s13 + $0xe8] sm:$0xf] }
  0x3f   :  { %194 = vst [vmem:[#allocation2 + $0xe8] sm:$0xf] %v193_v51  ;;  %196 = vst [vmem:[#allocation2 + $0xec] sm:$0xf] %v195_v52  ;;  %v199_v54 = vld [vmem:[%s8849_s13 + $0xf8] sm:$0xf] }
  0x40   :  { %198 = vst [vmem:[#allocation2 + $0xf0] sm:$0xf] %v197_v53  ;;  %v201_v55 = vld [vmem:[%s8849_s13 + $0xec] sm:$0xf]  ;;  %200 = vst [vmem:[#allocation2 + $0xf4] sm:$0xf] %v199_v54 }
  0x41   :  { %202 = vst [vmem:[#allocation2 + $0xf8] sm:$0xf] %v201_v55  ;;  %204 = vst [vmem:[#allocation2 + $0xfc] sm:$0xff] %v203_v56   ;;  %v207_v57 = vld [vmem:[%s8849_s13 + $0x110] sm:$0xf]  ;;  %v219_v63 = vld [vmem:[%s8849_s13 + $0x11c] sm:$0xff]  }
  0x42   :  { %v209_v58 = vld [vmem:[%s8849_s13 + $0x104] sm:$0xf]  ;;  %v211_v59 = vld [vmem:[%s8849_s13 + $0x114] sm:$0xf]  ;;  %208 = vst [vmem:[#allocation2 + $0x104] sm:$0xf] %v207_v57 }
  0x43   :  { %210 = vst [vmem:[#allocation2 + $0x108] sm:$0xf] %v209_v58  ;;  %212 = vst [vmem:[#allocation2 + $0x10c] sm:$0xf] %v211_v59  ;;  %v213_v60 = vld [vmem:[%s8849_s13 + $0x108] sm:$0xf] }
  0x44   :  { %v215_v61 = vld [vmem:[%s8849_s13 + $0x118] sm:$0xf]  ;;  %v217_v62 = vld [vmem:[%s8849_s13 + $0x10c] sm:$0xf]  ;;  %214 = vst [vmem:[#allocation2 + $0x110] sm:$0xf] %v213_v60 }
  0x45   :  { %216 = vst [vmem:[#allocation2 + $0x114] sm:$0xf] %v215_v61  ;;  %218 = vst [vmem:[#allocation2 + $0x118] sm:$0xf] %v217_v62  ;;  %v223_v0 = vld [vmem:[%s8849_s13 + $0x130] sm:$0xf] }
  0x46   :  { %v225_v1 = vld [vmem:[%s8849_s13 + $0x124] sm:$0xf]  ;;  %220 = vst [vmem:[#allocation2 + $0x11c] sm:$0xff] %v219_v63   ;;  %224 = vst [vmem:[#allocation2 + $0x124] sm:$0xf] %v223_v0  ;;  %v235_v6 = vld [vmem:[%s8849_s13 + $0x13c] sm:$0xff]  }
  0x47   :  { %226 = vst [vmem:[#allocation2 + $0x128] sm:$0xf] %v225_v1  ;;  %v227_v2 = vld [vmem:[%s8849_s13 + $0x134] sm:$0xf]  ;;  %v229_v3 = vld [vmem:[%s8849_s13 + $0x128] sm:$0xf] }
  0x48   :  { %v231_v4 = vld [vmem:[%s8849_s13 + $0x138] sm:$0xf]  ;;  %228 = vst [vmem:[#allocation2 + $0x12c] sm:$0xf] %v227_v2  ;;  %230 = vst [vmem:[#allocation2 + $0x130] sm:$0xf] %v229_v3 }
  0x49   :  { %232 = vst [vmem:[#allocation2 + $0x134] sm:$0xf] %v231_v4  ;;  %v233_v5 = vld [vmem:[%s8849_s13 + $0x12c] sm:$0xf]  ;;  %v239_v7 = vld [vmem:[%s8849_s13 + $0x150] sm:$0xf] }
  0x4a   :  { %234 = vst [vmem:[#allocation2 + $0x138] sm:$0xf] %v233_v5  ;;  %236 = vst [vmem:[#allocation2 + $0x13c] sm:$0xff] %v235_v6   ;;  %v241_v8 = vld [vmem:[%s8849_s13 + $0x144] sm:$0xf]  ;;  %v251_v13 = vld [vmem:[%s8849_s13 + $0x15c] sm:$0xff]  }
  0x4b   :  { %240 = vst [vmem:[#allocation2 + $0x144] sm:$0xf] %v239_v7  ;;  %v243_v9 = vld [vmem:[%s8849_s13 + $0x154] sm:$0xf]  ;;  %v245_v10 = vld [vmem:[%s8849_s13 + $0x148] sm:$0xf] }
  0x4c   :  { %242 = vst [vmem:[#allocation2 + $0x148] sm:$0xf] %v241_v8  ;;  %244 = vst [vmem:[#allocation2 + $0x14c] sm:$0xf] %v243_v9  ;;  %v247_v11 = vld [vmem:[%s8849_s13 + $0x158] sm:$0xf] }
  0x4d   :  { %246 = vst [vmem:[#allocation2 + $0x150] sm:$0xf] %v245_v10  ;;  %v249_v12 = vld [vmem:[%s8849_s13 + $0x14c] sm:$0xf]  ;;  %248 = vst [vmem:[#allocation2 + $0x154] sm:$0xf] %v247_v11 }
  0x4e   :  { %250 = vst [vmem:[#allocation2 + $0x158] sm:$0xf] %v249_v12  ;;  %252 = vst [vmem:[#allocation2 + $0x15c] sm:$0xff] %v251_v13   ;;  %v255_v14 = vld [vmem:[%s8849_s13 + $0x170] sm:$0xf]  ;;  %v267_v20 = vld [vmem:[%s8849_s13 + $0x17c] sm:$0xff]  }
  0x4f   :  { %v257_v15 = vld [vmem:[%s8849_s13 + $0x164] sm:$0xf]  ;;  %v259_v16 = vld [vmem:[%s8849_s13 + $0x174] sm:$0xf]  ;;  %256 = vst [vmem:[#allocation2 + $0x164] sm:$0xf] %v255_v14 }
  0x50   :  { %258 = vst [vmem:[#allocation2 + $0x168] sm:$0xf] %v257_v15  ;;  %260 = vst [vmem:[#allocation2 + $0x16c] sm:$0xf] %v259_v16  ;;  %v261_v17 = vld [vmem:[%s8849_s13 + $0x168] sm:$0xf] }
  0x51   :  { %v263_v18 = vld [vmem:[%s8849_s13 + $0x178] sm:$0xf]  ;;  %v265_v19 = vld [vmem:[%s8849_s13 + $0x16c] sm:$0xf]  ;;  %262 = vst [vmem:[#allocation2 + $0x170] sm:$0xf] %v261_v17 }
  0x52   :  { %264 = vst [vmem:[#allocation2 + $0x174] sm:$0xf] %v263_v18  ;;  %266 = vst [vmem:[#allocation2 + $0x178] sm:$0xf] %v265_v19  ;;  %v271_v21 = vld [vmem:[%s8849_s13 + $0x190] sm:$0xf] }
  0x53   :  { %v273_v22 = vld [vmem:[%s8849_s13 + $0x184] sm:$0xf]  ;;  %268 = vst [vmem:[#allocation2 + $0x17c] sm:$0xff] %v267_v20   ;;  %272 = vst [vmem:[#allocation2 + $0x184] sm:$0xf] %v271_v21  ;;  %v283_v27 = vld [vmem:[%s8849_s13 + $0x19c] sm:$0xff]  }
  0x54   :  { %274 = vst [vmem:[#allocation2 + $0x188] sm:$0xf] %v273_v22  ;;  %v275_v23 = vld [vmem:[%s8849_s13 + $0x194] sm:$0xf]  ;;  %v277_v24 = vld [vmem:[%s8849_s13 + $0x188] sm:$0xf] }
  0x55   :  { %v279_v25 = vld [vmem:[%s8849_s13 + $0x198] sm:$0xf]  ;;  %276 = vst [vmem:[#allocation2 + $0x18c] sm:$0xf] %v275_v23  ;;  %278 = vst [vmem:[#allocation2 + $0x190] sm:$0xf] %v277_v24 }
  0x56   :  { %280 = vst [vmem:[#allocation2 + $0x194] sm:$0xf] %v279_v25  ;;  %v281_v26 = vld [vmem:[%s8849_s13 + $0x18c] sm:$0xf]  ;;  %v287_v28 = vld [vmem:[%s8849_s13 + $0x1b0] sm:$0xf] }
  0x57   :  { %282 = vst [vmem:[#allocation2 + $0x198] sm:$0xf] %v281_v26  ;;  %284 = vst [vmem:[#allocation2 + $0x19c] sm:$0xff] %v283_v27   ;;  %v289_v29 = vld [vmem:[%s8849_s13 + $0x1a4] sm:$0xf]  ;;  %v299_v34 = vld [vmem:[%s8849_s13 + $0x1bc] sm:$0xff]  }
  0x58   :  { %288 = vst [vmem:[#allocation2 + $0x1a4] sm:$0xf] %v287_v28  ;;  %v291_v30 = vld [vmem:[%s8849_s13 + $0x1b4] sm:$0xf]  ;;  %v293_v31 = vld [vmem:[%s8849_s13 + $0x1a8] sm:$0xf] }
  0x59   :  { %290 = vst [vmem:[#allocation2 + $0x1a8] sm:$0xf] %v289_v29  ;;  %292 = vst [vmem:[#allocation2 + $0x1ac] sm:$0xf] %v291_v30  ;;  %v295_v32 = vld [vmem:[%s8849_s13 + $0x1b8] sm:$0xf] }
  0x5a   :  { %294 = vst [vmem:[#allocation2 + $0x1b0] sm:$0xf] %v293_v31  ;;  %v297_v33 = vld [vmem:[%s8849_s13 + $0x1ac] sm:$0xf]  ;;  %296 = vst [vmem:[#allocation2 + $0x1b4] sm:$0xf] %v295_v32 }
  0x5b   :  { %298 = vst [vmem:[#allocation2 + $0x1b8] sm:$0xf] %v297_v33  ;;  %300 = vst [vmem:[#allocation2 + $0x1bc] sm:$0xff] %v299_v34   ;;  %v303_v35 = vld [vmem:[%s8849_s13 + $0x1d0] sm:$0xf]  ;;  %v315_v41 = vld [vmem:[%s8849_s13 + $0x1dc] sm:$0xff]  }
  0x5c   :  { %v305_v36 = vld [vmem:[%s8849_s13 + $0x1c4] sm:$0xf]  ;;  %v307_v37 = vld [vmem:[%s8849_s13 + $0x1d4] sm:$0xf]  ;;  %304 = vst [vmem:[#allocation2 + $0x1c4] sm:$0xf] %v303_v35 }
  0x5d   :  { %306 = vst [vmem:[#allocation2 + $0x1c8] sm:$0xf] %v305_v36  ;;  %308 = vst [vmem:[#allocation2 + $0x1cc] sm:$0xf] %v307_v37  ;;  %v309_v38 = vld [vmem:[%s8849_s13 + $0x1c8] sm:$0xf] }
  0x5e   :  { %v311_v39 = vld [vmem:[%s8849_s13 + $0x1d8] sm:$0xf]  ;;  %v313_v40 = vld [vmem:[%s8849_s13 + $0x1cc] sm:$0xf]  ;;  %310 = vst [vmem:[#allocation2 + $0x1d0] sm:$0xf] %v309_v38 }
  0x5f   :  { %312 = vst [vmem:[#allocation2 + $0x1d4] sm:$0xf] %v311_v39  ;;  %314 = vst [vmem:[#allocation2 + $0x1d8] sm:$0xf] %v313_v40  ;;  %v319_v42 = vld [vmem:[%s8849_s13 + $0x1f0] sm:$0xf] }
  0x60   :  { %v321_v43 = vld [vmem:[%s8849_s13 + $0x1e4] sm:$0xf]  ;;  %316 = vst [vmem:[#allocation2 + $0x1dc] sm:$0xff] %v315_v41   ;;  %320 = vst [vmem:[#allocation2 + $0x1e4] sm:$0xf] %v319_v42  ;;  %v331_v48 = vld [vmem:[%s8849_s13 + $0x1fc] sm:$0xff]  }
  0x61   :  { %322 = vst [vmem:[#allocation2 + $0x1e8] sm:$0xf] %v321_v43  ;;  %v323_v44 = vld [vmem:[%s8849_s13 + $0x1f4] sm:$0xf]  ;;  %v325_v45 = vld [vmem:[%s8849_s13 + $0x1e8] sm:$0xf] }
  0x62   :  { %v327_v46 = vld [vmem:[%s8849_s13 + $0x1f8] sm:$0xf]  ;;  %324 = vst [vmem:[#allocation2 + $0x1ec] sm:$0xf] %v323_v44  ;;  %326 = vst [vmem:[#allocation2 + $0x1f0] sm:$0xf] %v325_v45 }
  0x63   :  { %328 = vst [vmem:[#allocation2 + $0x1f4] sm:$0xf] %v327_v46  ;;  %v329_v47 = vld [vmem:[%s8849_s13 + $0x1ec] sm:$0xf]  ;;  %v335_v49 = vld [vmem:[%s8849_s13 + $0x210] sm:$0xf] }
  0x64   :  { %330 = vst [vmem:[#allocation2 + $0x1f8] sm:$0xf] %v329_v47  ;;  %332 = vst [vmem:[#allocation2 + $0x1fc] sm:$0xff] %v331_v48   ;;  %v337_v50 = vld [vmem:[%s8849_s13 + $0x204] sm:$0xf]  ;;  %v347_v55 = vld [vmem:[%s8849_s13 + $0x21c] sm:$0xff]  }
  0x65   :  { %336 = vst [vmem:[#allocation2 + $0x204] sm:$0xf] %v335_v49  ;;  %v339_v51 = vld [vmem:[%s8849_s13 + $0x214] sm:$0xf]  ;;  %v341_v52 = vld [vmem:[%s8849_s13 + $0x208] sm:$0xf] }
  0x66   :  { %338 = vst [vmem:[#allocation2 + $0x208] sm:$0xf] %v337_v50  ;;  %340 = vst [vmem:[#allocation2 + $0x20c] sm:$0xf] %v339_v51  ;;  %v343_v53 = vld [vmem:[%s8849_s13 + $0x218] sm:$0xf] }
  0x67   :  { %342 = vst [vmem:[#allocation2 + $0x210] sm:$0xf] %v341_v52  ;;  %v345_v54 = vld [vmem:[%s8849_s13 + $0x20c] sm:$0xf]  ;;  %344 = vst [vmem:[#allocation2 + $0x214] sm:$0xf] %v343_v53 }
  0x68   :  { %346 = vst [vmem:[#allocation2 + $0x218] sm:$0xf] %v345_v54  ;;  %348 = vst [vmem:[#allocation2 + $0x21c] sm:$0xff] %v347_v55   ;;  %v351_v56 = vld [vmem:[%s8849_s13 + $0x230] sm:$0xf]  ;;  %v363_v62 = vld [vmem:[%s8849_s13 + $0x23c] sm:$0xff]  }
  0x69   :  { %v353_v57 = vld [vmem:[%s8849_s13 + $0x224] sm:$0xf]  ;;  %v355_v58 = vld [vmem:[%s8849_s13 + $0x234] sm:$0xf]  ;;  %352 = vst [vmem:[#allocation2 + $0x224] sm:$0xf] %v351_v56 }
  0x6a   :  { %354 = vst [vmem:[#allocation2 + $0x228] sm:$0xf] %v353_v57  ;;  %356 = vst [vmem:[#allocation2 + $0x22c] sm:$0xf] %v355_v58  ;;  %v357_v59 = vld [vmem:[%s8849_s13 + $0x228] sm:$0xf] }
  0x6b   :  { %v359_v60 = vld [vmem:[%s8849_s13 + $0x238] sm:$0xf]  ;;  %v361_v61 = vld [vmem:[%s8849_s13 + $0x22c] sm:$0xf]  ;;  %358 = vst [vmem:[#allocation2 + $0x230] sm:$0xf] %v357_v59 }
  0x6c   :  { %360 = vst [vmem:[#allocation2 + $0x234] sm:$0xf] %v359_v60  ;;  %362 = vst [vmem:[#allocation2 + $0x238] sm:$0xf] %v361_v61  ;;  %v367_v63 = vld [vmem:[%s8849_s13 + $0x250] sm:$0xf] }
  0x6d   :  { %v369_v0 = vld [vmem:[%s8849_s13 + $0x244] sm:$0xf]  ;;  %364 = vst [vmem:[#allocation2 + $0x23c] sm:$0xff] %v363_v62   ;;  %368 = vst [vmem:[#allocation2 + $0x244] sm:$0xf] %v367_v63  ;;  %v379_v5 = vld [vmem:[%s8849_s13 + $0x25c] sm:$0xff]  }
  0x6e   :  { %370 = vst [vmem:[#allocation2 + $0x248] sm:$0xf] %v369_v0  ;;  %v371_v1 = vld [vmem:[%s8849_s13 + $0x254] sm:$0xf]  ;;  %v373_v2 = vld [vmem:[%s8849_s13 + $0x248] sm:$0xf] }
  0x6f   :  { %v375_v3 = vld [vmem:[%s8849_s13 + $0x258] sm:$0xf]  ;;  %372 = vst [vmem:[#allocation2 + $0x24c] sm:$0xf] %v371_v1  ;;  %374 = vst [vmem:[#allocation2 + $0x250] sm:$0xf] %v373_v2 }
  0x70   :  { %376 = vst [vmem:[#allocation2 + $0x254] sm:$0xf] %v375_v3  ;;  %v377_v4 = vld [vmem:[%s8849_s13 + $0x24c] sm:$0xf]  ;;  %v383_v6 = vld [vmem:[%s8849_s13 + $0x270] sm:$0xf] }
  0x71   :  { %378 = vst [vmem:[#allocation2 + $0x258] sm:$0xf] %v377_v4  ;;  %380 = vst [vmem:[#allocation2 + $0x25c] sm:$0xff] %v379_v5   ;;  %v385_v7 = vld [vmem:[%s8849_s13 + $0x264] sm:$0xf]  ;;  %v395_v12 = vld [vmem:[%s8849_s13 + $0x27c] sm:$0xff]  }
  0x72   :  { %384 = vst [vmem:[#allocation2 + $0x264] sm:$0xf] %v383_v6  ;;  %v387_v8 = vld [vmem:[%s8849_s13 + $0x274] sm:$0xf]  ;;  %v389_v9 = vld [vmem:[%s8849_s13 + $0x268] sm:$0xf] }
  0x73   :  { %386 = vst [vmem:[#allocation2 + $0x268] sm:$0xf] %v385_v7  ;;  %388 = vst [vmem:[#allocation2 + $0x26c] sm:$0xf] %v387_v8  ;;  %v391_v10 = vld [vmem:[%s8849_s13 + $0x278] sm:$0xf] }
  0x74   :  { %390 = vst [vmem:[#allocation2 + $0x270] sm:$0xf] %v389_v9  ;;  %v393_v11 = vld [vmem:[%s8849_s13 + $0x26c] sm:$0xf]  ;;  %392 = vst [vmem:[#allocation2 + $0x274] sm:$0xf] %v391_v10 }
  0x75   :  { %394 = vst [vmem:[#allocation2 + $0x278] sm:$0xf] %v393_v11  ;;  %396 = vst [vmem:[#allocation2 + $0x27c] sm:$0xff] %v395_v12   ;;  %v399_v13 = vld [vmem:[%s8849_s13 + $0x290] sm:$0xf]  ;;  %v411_v19 = vld [vmem:[%s8849_s13 + $0x29c] sm:$0xff]  }
  0x76   :  { %v401_v14 = vld [vmem:[%s8849_s13 + $0x284] sm:$0xf]  ;;  %v403_v15 = vld [vmem:[%s8849_s13 + $0x294] sm:$0xf]  ;;  %400 = vst [vmem:[#allocation2 + $0x284] sm:$0xf] %v399_v13 }
  0x77   :  { %402 = vst [vmem:[#allocation2 + $0x288] sm:$0xf] %v401_v14  ;;  %404 = vst [vmem:[#allocation2 + $0x28c] sm:$0xf] %v403_v15  ;;  %v405_v16 = vld [vmem:[%s8849_s13 + $0x288] sm:$0xf] }
  0x78   :  { %v407_v17 = vld [vmem:[%s8849_s13 + $0x298] sm:$0xf]  ;;  %v409_v18 = vld [vmem:[%s8849_s13 + $0x28c] sm:$0xf]  ;;  %406 = vst [vmem:[#allocation2 + $0x290] sm:$0xf] %v405_v16 }
  0x79   :  { %408 = vst [vmem:[#allocation2 + $0x294] sm:$0xf] %v407_v17  ;;  %410 = vst [vmem:[#allocation2 + $0x298] sm:$0xf] %v409_v18  ;;  %v415_v20 = vld [vmem:[%s8849_s13 + $0x2b0] sm:$0xf] }
  0x7a   :  { %v417_v21 = vld [vmem:[%s8849_s13 + $0x2a4] sm:$0xf]  ;;  %412 = vst [vmem:[#allocation2 + $0x29c] sm:$0xff] %v411_v19   ;;  %416 = vst [vmem:[#allocation2 + $0x2a4] sm:$0xf] %v415_v20  ;;  %v427_v26 = vld [vmem:[%s8849_s13 + $0x2bc] sm:$0xff]  }
  0x7b   :  { %418 = vst [vmem:[#allocation2 + $0x2a8] sm:$0xf] %v417_v21  ;;  %v419_v22 = vld [vmem:[%s8849_s13 + $0x2b4] sm:$0xf]  ;;  %v421_v23 = vld [vmem:[%s8849_s13 + $0x2a8] sm:$0xf] }
  0x7c   :  { %v423_v24 = vld [vmem:[%s8849_s13 + $0x2b8] sm:$0xf]  ;;  %420 = vst [vmem:[#allocation2 + $0x2ac] sm:$0xf] %v419_v22  ;;  %422 = vst [vmem:[#allocation2 + $0x2b0] sm:$0xf] %v421_v23 }
  0x7d   :  { %424 = vst [vmem:[#allocation2 + $0x2b4] sm:$0xf] %v423_v24  ;;  %v425_v25 = vld [vmem:[%s8849_s13 + $0x2ac] sm:$0xf]  ;;  %v431_v27 = vld [vmem:[%s8849_s13 + $0x2d0] sm:$0xf] }
  0x7e   :  { %426 = vst [vmem:[#allocation2 + $0x2b8] sm:$0xf] %v425_v25  ;;  %428 = vst [vmem:[#allocation2 + $0x2bc] sm:$0xff] %v427_v26   ;;  %v433_v28 = vld [vmem:[%s8849_s13 + $0x2c4] sm:$0xf]  ;;  %v443_v33 = vld [vmem:[%s8849_s13 + $0x2dc] sm:$0xff]  }
  0x7f   :  { %432 = vst [vmem:[#allocation2 + $0x2c4] sm:$0xf] %v431_v27  ;;  %v435_v29 = vld [vmem:[%s8849_s13 + $0x2d4] sm:$0xf]  ;;  %v437_v30 = vld [vmem:[%s8849_s13 + $0x2c8] sm:$0xf] }
  0x80   :  { %434 = vst [vmem:[#allocation2 + $0x2c8] sm:$0xf] %v433_v28  ;;  %436 = vst [vmem:[#allocation2 + $0x2cc] sm:$0xf] %v435_v29  ;;  %v439_v31 = vld [vmem:[%s8849_s13 + $0x2d8] sm:$0xf] }
  0x81   :  { %438 = vst [vmem:[#allocation2 + $0x2d0] sm:$0xf] %v437_v30  ;;  %v441_v32 = vld [vmem:[%s8849_s13 + $0x2cc] sm:$0xf]  ;;  %440 = vst [vmem:[#allocation2 + $0x2d4] sm:$0xf] %v439_v31 }
  0x82   :  { %442 = vst [vmem:[#allocation2 + $0x2d8] sm:$0xf] %v441_v32  ;;  %444 = vst [vmem:[#allocation2 + $0x2dc] sm:$0xff] %v443_v33   ;;  %v447_v34 = vld [vmem:[%s8849_s13 + $0x2f0] sm:$0xf]  ;;  %v459_v40 = vld [vmem:[%s8849_s13 + $0x2fc] sm:$0xff]  }
  0x83   :  { %v449_v35 = vld [vmem:[%s8849_s13 + $0x2e4] sm:$0xf]  ;;  %v451_v36 = vld [vmem:[%s8849_s13 + $0x2f4] sm:$0xf]  ;;  %448 = vst [vmem:[#allocation2 + $0x2e4] sm:$0xf] %v447_v34 }
  0x84   :  { %450 = vst [vmem:[#allocation2 + $0x2e8] sm:$0xf] %v449_v35  ;;  %452 = vst [vmem:[#allocation2 + $0x2ec] sm:$0xf] %v451_v36  ;;  %v453_v37 = vld [vmem:[%s8849_s13 + $0x2e8] sm:$0xf] }
  0x85   :  { %v455_v38 = vld [vmem:[%s8849_s13 + $0x2f8] sm:$0xf]  ;;  %v457_v39 = vld [vmem:[%s8849_s13 + $0x2ec] sm:$0xf]  ;;  %454 = vst [vmem:[#allocation2 + $0x2f0] sm:$0xf] %v453_v37 }
  0x86   :  { %456 = vst [vmem:[#allocation2 + $0x2f4] sm:$0xf] %v455_v38  ;;  %458 = vst [vmem:[#allocation2 + $0x2f8] sm:$0xf] %v457_v39  ;;  %v463_v41 = vld [vmem:[%s8849_s13 + $0x310] sm:$0xf] }
  0x87   :  { %v465_v42 = vld [vmem:[%s8849_s13 + $0x304] sm:$0xf]  ;;  %460 = vst [vmem:[#allocation2 + $0x2fc] sm:$0xff] %v459_v40   ;;  %464 = vst [vmem:[#allocation2 + $0x304] sm:$0xf] %v463_v41  ;;  %v475_v47 = vld [vmem:[%s8849_s13 + $0x31c] sm:$0xff]  }
  0x88   :  { %466 = vst [vmem:[#allocation2 + $0x308] sm:$0xf] %v465_v42  ;;  %v467_v43 = vld [vmem:[%s8849_s13 + $0x314] sm:$0xf]  ;;  %v469_v44 = vld [vmem:[%s8849_s13 + $0x308] sm:$0xf] }
  0x89   :  { %v471_v45 = vld [vmem:[%s8849_s13 + $0x318] sm:$0xf]  ;;  %468 = vst [vmem:[#allocation2 + $0x30c] sm:$0xf] %v467_v43  ;;  %470 = vst [vmem:[#allocation2 + $0x310] sm:$0xf] %v469_v44 }
  0x8a   :  { %472 = vst [vmem:[#allocation2 + $0x314] sm:$0xf] %v471_v45  ;;  %v473_v46 = vld [vmem:[%s8849_s13 + $0x30c] sm:$0xf]  ;;  %v479_v48 = vld [vmem:[%s8849_s13 + $0x330] sm:$0xf] }
  0x8b   :  { %474 = vst [vmem:[#allocation2 + $0x318] sm:$0xf] %v473_v46  ;;  %476 = vst [vmem:[#allocation2 + $0x31c] sm:$0xff] %v475_v47   ;;  %v481_v49 = vld [vmem:[%s8849_s13 + $0x324] sm:$0xf]  ;;  %v491_v54 = vld [vmem:[%s8849_s13 + $0x33c] sm:$0xff]  }
  0x8c   :  { %480 = vst [vmem:[#allocation2 + $0x324] sm:$0xf] %v479_v48  ;;  %v483_v50 = vld [vmem:[%s8849_s13 + $0x334] sm:$0xf]  ;;  %v485_v51 = vld [vmem:[%s8849_s13 + $0x328] sm:$0xf] }
  0x8d   :  { %482 = vst [vmem:[#allocation2 + $0x328] sm:$0xf] %v481_v49  ;;  %484 = vst [vmem:[#allocation2 + $0x32c] sm:$0xf] %v483_v50  ;;  %v487_v52 = vld [vmem:[%s8849_s13 + $0x338] sm:$0xf] }
  0x8e   :  { %486 = vst [vmem:[#allocation2 + $0x330] sm:$0xf] %v485_v51  ;;  %v489_v53 = vld [vmem:[%s8849_s13 + $0x32c] sm:$0xf]  ;;  %488 = vst [vmem:[#allocation2 + $0x334] sm:$0xf] %v487_v52 }
  0x8f   :  { %490 = vst [vmem:[#allocation2 + $0x338] sm:$0xf] %v489_v53  ;;  %492 = vst [vmem:[#allocation2 + $0x33c] sm:$0xff] %v491_v54   ;;  %v495_v55 = vld [vmem:[%s8849_s13 + $0x350] sm:$0xf]  ;;  %v507_v61 = vld [vmem:[%s8849_s13 + $0x35c] sm:$0xff]  }
  0x90   :  { %v497_v56 = vld [vmem:[%s8849_s13 + $0x344] sm:$0xf]  ;;  %v499_v57 = vld [vmem:[%s8849_s13 + $0x354] sm:$0xf]  ;;  %496 = vst [vmem:[#allocation2 + $0x344] sm:$0xf] %v495_v55 }
  0x91   :  { %498 = vst [vmem:[#allocation2 + $0x348] sm:$0xf] %v497_v56  ;;  %500 = vst [vmem:[#allocation2 + $0x34c] sm:$0xf] %v499_v57  ;;  %v501_v58 = vld [vmem:[%s8849_s13 + $0x348] sm:$0xf] }
  0x92   :  { %v503_v59 = vld [vmem:[%s8849_s13 + $0x358] sm:$0xf]  ;;  %v505_v60 = vld [vmem:[%s8849_s13 + $0x34c] sm:$0xf]  ;;  %502 = vst [vmem:[#allocation2 + $0x350] sm:$0xf] %v501_v58 }
  0x93   :  { %504 = vst [vmem:[#allocation2 + $0x354] sm:$0xf] %v503_v59  ;;  %506 = vst [vmem:[#allocation2 + $0x358] sm:$0xf] %v505_v60  ;;  %v511_v62 = vld [vmem:[%s8849_s13 + $0x370] sm:$0xf] }
  0x94   :  { %v513_v63 = vld [vmem:[%s8849_s13 + $0x364] sm:$0xf]  ;;  %508 = vst [vmem:[#allocation2 + $0x35c] sm:$0xff] %v507_v61   ;;  %512 = vst [vmem:[#allocation2 + $0x364] sm:$0xf] %v511_v62  ;;  %v523_v4 = vld [vmem:[%s8849_s13 + $0x37c] sm:$0xff]  }
  0x95   :  { %514 = vst [vmem:[#allocation2 + $0x368] sm:$0xf] %v513_v63  ;;  %v515_v0 = vld [vmem:[%s8849_s13 + $0x374] sm:$0xf]  ;;  %v517_v1 = vld [vmem:[%s8849_s13 + $0x368] sm:$0xf] }
  0x96   :  { %v519_v2 = vld [vmem:[%s8849_s13 + $0x378] sm:$0xf]  ;;  %516 = vst [vmem:[#allocation2 + $0x36c] sm:$0xf] %v515_v0  ;;  %518 = vst [vmem:[#allocation2 + $0x370] sm:$0xf] %v517_v1 }
  0x97   :  { %520 = vst [vmem:[#allocation2 + $0x374] sm:$0xf] %v519_v2  ;;  %v521_v3 = vld [vmem:[%s8849_s13 + $0x36c] sm:$0xf]  ;;  %v527_v5 = vld [vmem:[%s8849_s13 + $0x390] sm:$0xf] }
  0x98   :  { %522 = vst [vmem:[#allocation2 + $0x378] sm:$0xf] %v521_v3  ;;  %524 = vst [vmem:[#allocation2 + $0x37c] sm:$0xff] %v523_v4   ;;  %v529_v6 = vld [vmem:[%s8849_s13 + $0x384] sm:$0xf]  ;;  %v539_v11 = vld [vmem:[%s8849_s13 + $0x39c] sm:$0xff]  }
  0x99   :  { %528 = vst [vmem:[#allocation2 + $0x384] sm:$0xf] %v527_v5  ;;  %v531_v7 = vld [vmem:[%s8849_s13 + $0x394] sm:$0xf]  ;;  %v533_v8 = vld [vmem:[%s8849_s13 + $0x388] sm:$0xf] }
  0x9a   :  { %530 = vst [vmem:[#allocation2 + $0x388] sm:$0xf] %v529_v6  ;;  %532 = vst [vmem:[#allocation2 + $0x38c] sm:$0xf] %v531_v7  ;;  %v535_v9 = vld [vmem:[%s8849_s13 + $0x398] sm:$0xf] }
  0x9b   :  { %534 = vst [vmem:[#allocation2 + $0x390] sm:$0xf] %v533_v8  ;;  %v537_v10 = vld [vmem:[%s8849_s13 + $0x38c] sm:$0xf]  ;;  %536 = vst [vmem:[#allocation2 + $0x394] sm:$0xf] %v535_v9 }
  0x9c   :  { %538 = vst [vmem:[#allocation2 + $0x398] sm:$0xf] %v537_v10  ;;  %540 = vst [vmem:[#allocation2 + $0x39c] sm:$0xff] %v539_v11   ;;  %v543_v12 = vld [vmem:[%s8849_s13 + $0x3b0] sm:$0xf]  ;;  %v555_v18 = vld [vmem:[%s8849_s13 + $0x3bc] sm:$0xff]  }
  0x9d   :  { %v545_v13 = vld [vmem:[%s8849_s13 + $0x3a4] sm:$0xf]  ;;  %v547_v14 = vld [vmem:[%s8849_s13 + $0x3b4] sm:$0xf]  ;;  %544 = vst [vmem:[#allocation2 + $0x3a4] sm:$0xf] %v543_v12 }
  0x9e   :  { %546 = vst [vmem:[#allocation2 + $0x3a8] sm:$0xf] %v545_v13  ;;  %548 = vst [vmem:[#allocation2 + $0x3ac] sm:$0xf] %v547_v14  ;;  %v549_v15 = vld [vmem:[%s8849_s13 + $0x3a8] sm:$0xf] }
  0x9f   :  { %v551_v16 = vld [vmem:[%s8849_s13 + $0x3b8] sm:$0xf]  ;;  %v553_v17 = vld [vmem:[%s8849_s13 + $0x3ac] sm:$0xf]  ;;  %550 = vst [vmem:[#allocation2 + $0x3b0] sm:$0xf] %v549_v15 }
  0xa0   :  { %552 = vst [vmem:[#allocation2 + $0x3b4] sm:$0xf] %v551_v16  ;;  %554 = vst [vmem:[#allocation2 + $0x3b8] sm:$0xf] %v553_v17  ;;  %v559_v19 = vld [vmem:[%s8849_s13 + $0x3d0] sm:$0xf] }
  0xa1   :  { %v561_v20 = vld [vmem:[%s8849_s13 + $0x3c4] sm:$0xf]  ;;  %556 = vst [vmem:[#allocation2 + $0x3bc] sm:$0xff] %v555_v18   ;;  %560 = vst [vmem:[#allocation2 + $0x3c4] sm:$0xf] %v559_v19  ;;  %v571_v25 = vld [vmem:[%s8849_s13 + $0x3dc] sm:$0xff]  }
  0xa2   :  { %562 = vst [vmem:[#allocation2 + $0x3c8] sm:$0xf] %v561_v20  ;;  %v563_v21 = vld [vmem:[%s8849_s13 + $0x3d4] sm:$0xf]  ;;  %v565_v22 = vld [vmem:[%s8849_s13 + $0x3c8] sm:$0xf] }
  0xa3   :  { %v567_v23 = vld [vmem:[%s8849_s13 + $0x3d8] sm:$0xf]  ;;  %564 = vst [vmem:[#allocation2 + $0x3cc] sm:$0xf] %v563_v21  ;;  %566 = vst [vmem:[#allocation2 + $0x3d0] sm:$0xf] %v565_v22 }
  0xa4   :  { %568 = vst [vmem:[#allocation2 + $0x3d4] sm:$0xf] %v567_v23  ;;  %v569_v24 = vld [vmem:[%s8849_s13 + $0x3cc] sm:$0xf]  ;;  %v575_v26 = vld [vmem:[%s8849_s13 + $0x3f0] sm:$0xf] }
  0xa5   :  { %570 = vst [vmem:[#allocation2 + $0x3d8] sm:$0xf] %v569_v24  ;;  %572 = vst [vmem:[#allocation2 + $0x3dc] sm:$0xff] %v571_v25   ;;  %v577_v27 = vld [vmem:[%s8849_s13 + $0x3e4] sm:$0xf]  ;;  %v6242_v33 = vld [vmem:[%s8836_s0 + $0x10] sm:$0xff] }
  0xa6   :  { %576 = vst [vmem:[#allocation2 + $0x3e4] sm:$0xf] %v575_v26  ;;  %v579_v28 = vld [vmem:[%s8849_s13 + $0x3f4] sm:$0xf]  ;;  %v581_v29 = vld [vmem:[%s8849_s13 + $0x3e8] sm:$0xf]  ;;  %1200 = vrot.lane.b32.xlu1 %v6242_v33, %s8865_s30 }
  0xa7   :  { %578 = vst [vmem:[#allocation2 + $0x3e8] sm:$0xf] %v577_v27  ;;  %580 = vst [vmem:[#allocation2 + $0x3ec] sm:$0xf] %v579_v28  ;;  %v583_v30 = vld [vmem:[%s8849_s13 + $0x3f8] sm:$0xf] }
  0xa8   :  { %582 = vst [vmem:[#allocation2 + $0x3f0] sm:$0xf] %v581_v29  ;;  %v585_v31 = vld [vmem:[%s8849_s13 + $0x3ec] sm:$0xf]  ;;  %v587_v32 = vld [vmem:[%s8849_s13 + $0x3fc] sm:$0xf] }
  0xa9   :  { %584 = vst [vmem:[#allocation2 + $0x3f4] sm:$0xf] %v583_v30  ;;  %586 = vst [vmem:[#allocation2 + $0x3f8] sm:$0xf] %v585_v31  ;;  %v6247_v34 = vld [vmem:[%s8836_s0] sm:$0xff]  ;;  %v6256_v35 = vld [vmem:[%s8836_s0 + $0x8] sm:$0xff] }
  0xaa   :  { %588 = vst [vmem:[#allocation2 + $0x3fc] sm:$0xf] %v587_v32  ;;  %1186 = vrot.lane.b32.xlu0 %v6247_v34, %s8865_s30 }
  0xab   :  { %1131 = vsyncadd [#allocation3], 16384  ;;  %s8863_s16 = smov 8   ;;  %v6265_v36 = vld [vmem:[%s8836_s0 + $0x18] sm:$0xff]  ;;  %s8861_s19 = smov 7   ;;  %v6278_v37 = vld [vmem:[%s8836_s0 + $0x20] sm:$0xff] }
  0xac   :  { %1242 = vrot.lane.b32.xlu1 %v6247_v34, %s8863_s16  ;;  %s8859_s4 = smov 1   ;;  %v6295_v38 = vld [vmem:[%s8836_s0 + $0x28] sm:$0xff]  ;;  %s8857_s24 = smov 127   ;;  %v6312_v39 = vld [vmem:[%s8836_s0 + $0x30] sm:$0xff]  ;;  %v6329_v40 = vld [vmem:[%s8836_s0 + $0x38] sm:$0xff]  ;;  %vm5481_vm0 = vmmov 0  }
  0xad   :  { %s8855_s27 = smov 121   ;;  %s8853_s13 = smov 120   ;;  %vm2954_vm1 = vcmask 261120   ;;  %vm3018_vm2 = vcmask 1043456   ;;  %vm3002_vm3 = vcmask 64512   ;;  %vm3212_vm4 = vcmask 523264  }
  0xae   :  { %1193 = vrot.lane.b32.xlu0 %v6256_v35, %s8865_s30  ;;  %s8851_s15 = smov 119   ;;  %s6435_s17 = sld [smem:[#allocation4 + $0x22]] }
  0xaf   :  { %s6437_s18 = sld [smem:[#allocation4 + $0x2]]  ;;  %s6439_s20 = sld [smem:[#allocation4 + $0x20]] }
  0xb0   :  { %1207 = vrot.lane.b32.xlu1 %v6265_v36, %s8865_s30  ;;  %s6441_s21 = sld [smem:[#allocation4]]  ;;  %s6445_s23 = sld [smem:[#allocation4 + $0x21]] }
  0xb1   :  { %s6443_s22 = sld [smem:[#allocation4 + $0x8]]  ;;  %s6447_s25 = sld [smem:[#allocation4 + $0x1]] }
  0xb2   :  { %1249 = vrot.lane.b32.xlu0 %v6256_v35, %s8863_s16  ;;  %s6453_s26 = sld [smem:[#allocation4 + $0x23]]  ;;  %s6457_s29 = sld [smem:[#allocation4 + $0x9]] }
  0xb3   :  { %s6455_s28 = sld [smem:[#allocation4 + $0x3]]  ;;  %s6479_s14 = sld [smem:[#allocation4 + $0x18]] }
  0xb4   :  { %1298 = vrot.lane.b32.xlu1 %v6247_v34, %s8861_s19  ;;  %s6481_s6 = sld [smem:[#allocation4 + $0xc]]  ;;  %s6483_s12 = sld [smem:[#allocation4 + $0x25]]  ;;  %v1169_v1 = vstv %s6435_s17 }
  0xb5   :  { %9055 = sst [smem:[#allocation12_spill]] %s6437_s18  ;;  %s6485_s11 = sld [smem:[#allocation4 + $0x5]]  ;;  %v1163_v2 = vstv %s6439_s20  ;;  %v1204_v5 = vstv %s6437_s18  ;;  %v6551_v6 = vmul.f32 %v6242_v33, %v1169_v1 }
  0xb6   :  { %1256 = vrot.lane.b32.xlu0 %v6242_v33, %s8863_s16  ;;  %9056 = sst [smem:[#allocation13_spill]] %s6441_s21  ;;  %s6487_s2 = sld [smem:[#allocation4 + $0x1a]]  ;;  %v1166_v3 = vstv %s6445_s23  ;;  %v1190_v9 = vstv %s6441_s21  ;;  %v6563_v10 = vmul.f32 %v1163_v2, %v6247_v34 }
  0xb7   :  { %9057 = sst [smem:[#allocation14_spill]] %s6443_s22  ;;  %s6493_s10 = sld [smem:[#allocation4 + $0x13]]  ;;  %v1246_v11 = vstv %s6443_s22  ;;  %v6572_v13 = vmul.f32 %v6256_v35, %v1166_v3  ;;  %v1197_v14 = vstv %s6447_s25 }
  0xb8   :  { %1214 = vrot.lane.b32.xlu1 %v6278_v37, %s8865_s30  ;;  %9058 = sst [smem:[#allocation15_spill]] %s6447_s25  ;;  %s6495_s9 = sld [smem:[#allocation4 + $0x29]]  ;;  %v1172_v4 = vstv %s6453_s26  ;;  %v1253_v17 = vstv %s6457_s29 }
  0xb9   :  { %9059 = sst [smem:[#allocation16_spill]] %s6455_s28  ;;  %s6497_s8 = sld [smem:[#allocation4 + $0x28]]  ;;  %v6576_v15 = vmul.f32 %v6265_v36, %v1172_v4  ;;  %v1358_v29 = vstv %s6479_s14 }
  0xba   :  { %1305 = vrot.lane.b32.xlu0 %v6256_v35, %s8861_s19  ;;  %9060 = sst [smem:[#allocation17_spill]] %s6457_s29  ;;  %s6501_s7 = sld [smem:[#allocation4 + $0x26]]  ;;  %v1178_v20 = vstv %s6483_s12 }
  0xbb   :  { %9068 = sst [smem:[#allocation25_spill]] %s6479_s14  ;;  %s6503_s1 = sld [smem:[#allocation4 + $0x6]]  ;;  %v6615_v32 = vmul.f32 %v6295_v38, %v1178_v20 }
  0xbc   :  { %1312 = vrot.lane.b32.xlu1 %v6242_v33, %s8861_s19  ;;  %9069 = sst [smem:[#allocation26_spill]] %s6481_s6  ;;  %s6499_s5 = sld [smem:[#allocation4 + $0xd]] }
  0xbd   :  { %9070 = sst [smem:[#allocation27_spill]] %s6485_s11  ;;  %s6509_s0 = sld [smem:[#allocation4 + $0x1b]] }
  0xbe   :  { %1263 = vrot.lane.b32.xlu0 %v6265_v36, %s8863_s16  ;;  %9071 = sst [smem:[#allocation28_spill]] %s6487_s2  ;;  %s6511_s3 = sld [smem:[#allocation4 + $0x14]] }
  0xbf   :  { %9072 = sst [smem:[#allocation29_spill]] %s6493_s10  ;;  %s6513_s10 = sld [smem:[#allocation4 + $0x30]] }
  0xc0   :  { %1361 = vrot.lane.b32.xlu1 %v6256_v35, %s8859_s4  ;;  %9073 = sst [smem:[#allocation30_spill]] %s6495_s9  ;;  %s6519_s9 = sld [smem:[#allocation4 + $0x7]]  ;;  %v1181_v30 = vstv %s6501_s7 }
  0xc1   :  { %9074 = sst [smem:[#allocation31_spill]] %s6497_s8  ;;  %s6515_s8 = sld [smem:[#allocation4 + $0x2a]]  ;;  %v6633_v2 = vmul.f32 %v6312_v39, %v1181_v30 }
  0xc2   :  { %1354 = vrot.lane.b32.xlu0 %v6247_v34, %s8859_s4  ;;  %9075 = sst [smem:[#allocation32_spill]] %s6499_s5  ;;  %s6517_s5 = sld [smem:[#allocation4 + $0x27]] }
  0xc3   :  { %9076 = sst [smem:[#allocation33_spill]] %s6503_s1  ;;  %s6521_s1 = sld [smem:[#allocation4 + $0x31]] }
  0xc4   :  { %1270 = vrot.lane.b32.xlu1 %v6278_v37, %s8863_s16  ;;  %9077 = sst [smem:[#allocation34_spill]] %s6509_s0  ;;  %s6523_s2 = sld [smem:[#allocation4 + $0x15]] }
  0xc5   :  { %9078 = sst [smem:[#allocation35_spill]] %s6511_s3  ;;  %s6529_s3 = sld [smem:[#allocation4 + $0xe]] }
  0xc6   :  { %1221 = vrot.lane.b32.xlu0 %v6295_v38, %s8865_s30  ;;  %9079 = sst [smem:[#allocation36_spill]] %s6513_s10  ;;  %s6531_s10 = sld [smem:[#allocation4 + $0x2b]] }
  0xc7   :  { %9080 = sst [smem:[#allocation37_spill]] %s6515_s8  ;;  %s6534_s8 = sld [smem:[#allocation4 + $0x1c]] }
  0xc8   :  { %1368 = vrot.lane.b32.xlu1 %v6242_v33, %s8859_s4  ;;  %9081 = sst [smem:[#allocation38_spill]] %s6519_s9  ;;  %s6536_s0 = sld [smem:[#allocation4 + $0x38]]  ;;  %v1184_v1 = vstv %s6517_s5 }
  0xc9   :  { %9082 = sst [smem:[#allocation39_spill]] %s6521_s1  ;;  %s6539_s1 = sld [smem:[#allocation4 + $0x32]]  ;;  %v6659_v3 = vmul.f32 %v6329_v40, %v1184_v1 }
  0xca   :  { %1319 = vrot.lane.b32.xlu0 %v6265_v36, %s8861_s19  ;;  %9083 = sst [smem:[#allocation40_spill]] %s6523_s2  ;;  %s6541_s2 = sld [smem:[#allocation4 + $0xf]] }
  0xcb   :  { %9084 = sst [smem:[#allocation41_spill]] %s6529_s3  ;;  %s6545_s9 = sld [smem:[#allocation4 + $0x39]] }
  0xcc   :  { %1417 = vrot.lane.b32.xlu1 %v6256_v35, %s8857_s24  ;;  %9085 = sst [smem:[#allocation42_spill]] %s6531_s10  ;;  %s6547_s3 = sld [smem:[#allocation4 + $0x1d]] }
  0xcd   :  { %9086 = sst [smem:[#allocation43_spill]] %s6534_s8  ;;  %s6557_s17 = sld [smem:[#allocation4 + $0x16]] }
  0xce   :  { %1410 = vrot.lane.b32.xlu0 %v6247_v34, %s8857_s24  ;;  %9087 = sst [smem:[#allocation44_spill]] %s6536_s0  ;;  %s6559_s20 = sld [smem:[#allocation4 + $0x33]] }
  0xcf   :  { %9088 = sst [smem:[#allocation45_spill]] %s6539_s1  ;;  %s6567_s23 = sld [smem:[#allocation4 + $0x2c]] }
  0xd0   :  { %1277 = vrot.lane.b32.xlu1 %v6295_v38, %s8863_s16  ;;  %9089 = sst [smem:[#allocation46_spill]] %s6541_s2  ;;  %s6569_s26 = sld [smem:[#allocation4 + $0x40]] }
  0xd1   :  { %9090 = sst [smem:[#allocation47_spill]] %s6545_s9  ;;  %s6579_s18 = sld [smem:[#allocation4 + $0x48]] }
  0xd2   :  { %1228 = vrot.lane.b32.xlu0 %v6312_v39, %s8865_s30  ;;  %9091 = sst [smem:[#allocation48_spill]] %s6547_s3  ;;  %s6581_s22 = sld [smem:[#allocation4 + $0x3a]] }
  0xd3   :  { %9092 = sst [smem:[#allocation49_spill]] %s6557_s17  ;;  %s6589_s25 = sld [smem:[#allocation4 + $0x17]] }
  0xd4   :  { %1375 = vrot.lane.b32.xlu1 %v6265_v36, %s8859_s4  ;;  %9093 = sst [smem:[#allocation50_spill]] %s6559_s20  ;;  %s6601_s12 = sld [smem:[#allocation4 + $0x41]] }
  0xd5   :  { %9094 = sst [smem:[#allocation51_spill]] %s6567_s23  ;;  %s6603_s21 = sld [smem:[#allocation4 + $0x49]] }
  0xd6   :  { %1326 = vrot.lane.b32.xlu0 %v6278_v37, %s8861_s19  ;;  %s6629_s6 = sld [smem:[#allocation4 + $0x1f]]  ;;  %s6641_s29 = sld [smem:[#allocation4 + $0x42]] }
  0xd7   :  { %s6643_s5 = sld [smem:[#allocation4 + $0x4a]]  ;;  %s6666_s7 = sld [smem:[#allocation4 + $0x43]] }
  0xd8   :  { %1466 = vrot.lane.b32.xlu1 %v6247_v34, %s8855_s27  ;;  %9095 = sst [smem:[#allocation52_spill]] %s6581_s22  ;;  %s6664_s14 = sld [smem:[#allocation4 + $0x52]] }
  0xd9   :  { %9096 = sst [smem:[#allocation53_spill]] %s6589_s25  ;;  %s6649_s25 = sld [smem:[#allocation4 + $0x35]] }
  0xda   :  { %1424 = vrot.lane.b32.xlu0 %v6242_v33, %s8857_s24  ;;  %9100 = sst [smem:[#allocation54_spill]] %s6601_s12  ;;  %s6619_s12 = sld [smem:[#allocation4 + $0x51]] }
  0xdb   :  { %9102 = sst [smem:[#allocation55_spill]] %s6603_s21  ;;  %s6674_s22 = sld [smem:[#allocation4 + $0x3c]] }
  0xdc   :  { %1235 = vrot.lane.b32.xlu1 %v6329_v40, %s8865_s30  ;;  %s6477_s30 = sld [smem:[#allocation4 + $0x19]]  ;;  %s9121_s8 = sld [smem:[#allocation54_spill]] }
  0xdd   :  { %s6684_s10 = sld [smem:[#allocation4 + $0x36]]  ;;  %s9123_s1 = sld [smem:[#allocation55_spill]] }
  0xde   :  { %1473 = vrot.lane.b32.xlu0 %v6256_v35, %s8855_s27  ;;  %s6686_s21 = sld [smem:[#allocation4 + $0x2f]]  ;;  %s6698_s17 = sld [smem:[#allocation4 + $0x53]] }
  0xdf   :  { %s6700_s3 = sld [smem:[#allocation4 + $0x44]]  ;;  %s6708_s11 = sld [smem:[#allocation4 + $0x3d]] }
  0xe0   :  { %1333 = vrot.lane.b32.xlu1 %v6295_v38, %s8861_s19  ;;  %9108 = sst [smem:[#allocation58_spill]] %s6619_s12  ;;  %s6706_s9 = sld [smem:[#allocation4 + $0x4c]] }
  0xe1   :  { %s9126_s2 = sld [smem:[#allocation58_spill]]  ;;  %s6716_s20 = sld [smem:[#allocation4 + $0x37]] }
  0xe2   :  { %1284 = vrot.lane.b32.xlu0 %v6312_v39, %s8863_s16  ;;  %9067 = sst [smem:[#allocation24_spill]] %s6477_s30  ;;  %s6714_s23 = sld [smem:[#allocation4 + $0x3e]] }
  0xe3   :  { %9122 = sst [smem:[#allocation54_spill]] %s6684_s10  ;;  %s6747_s0 = sld [smem:[#allocation4 + $0x3f]] }
  0xe4   :  { %1431 = vrot.lane.b32.xlu1 %v6265_v36, %s8857_s24  ;;  %9124 = sst [smem:[#allocation55_spill]] %s6686_s21  ;;  %s9142_s30 = sld [smem:[#allocation24_spill]] }
  0xe5   :  { %9129 = sst [smem:[#allocation13_spill]] %s6708_s11  ;;  %s9143_s28 = sld [smem:[#allocation36_spill]] }
  0xe6   :  { %1382 = vrot.lane.b32.xlu0 %v6278_v37, %s8859_s4  ;;  %9127 = sst [smem:[#allocation58_spill]] %s6706_s9  ;;  %s9144_s12 = sld [smem:[#allocation16_spill]] }
  0xe7   :  { %9131 = sst [smem:[#allocation62_spill]] %s6716_s20  ;;  %s6819_s20 = sld [smem:[#allocation4 + $0x4d]] }
  0xe8   :  { %1522 = vrot.lane.b32.xlu1 %v6247_v34, %s8853_s13  ;;  %9130 = sst [smem:[#allocation61_spill]] %s6714_s23  ;;  %s9146_s21 = sld [smem:[#allocation30_spill]] }
  0xe9   :  { %9135 = sst [smem:[#allocation14_spill]] %s6747_s0  ;;  %s9147_s10 = sld [smem:[#allocation44_spill]] }
  0xea   :  { %1480 = vrot.lane.b32.xlu0 %v6242_v33, %s8855_s27 }
  0xec   :  { %1291 = vrot.lane.b32.xlu1 %v6329_v40, %s8863_s16  ;;  %s6475_s16 = sld [smem:[#allocation4 + $0xb]] }
  0xee   :  { %1529 = vrot.lane.b32.xlu0 %v6256_v35, %s8853_s13 }
  0xf0   :  { %1389 = vrot.lane.b32.xlu1 %v6295_v38, %s8859_s4 }
  0xf2   :  { %1340 = vrot.lane.b32.xlu0 %v6312_v39, %s8861_s19  ;;  %9066 = sst [smem:[#allocation23_spill]] %s6475_s16 }
  0xf3   :  { %s6621_s16 = sld [smem:[#allocation4 + $0x3b]] }
  0xf4   :  { %1487 = vrot.lane.b32.xlu1 %v6265_v36, %s8855_s27  ;;  %s9160_s9 = sld [smem:[#allocation23_spill]] }
  0xf6   :  { %1438 = vrot.lane.b32.xlu0 %v6278_v37, %s8857_s24 }
  0xf8   :  { %1578 = vrot.lane.b32.xlu1 %v6247_v34, %s8851_s15 }
  0xfa   :  { %1536 = vrot.lane.b32.xlu0 %v6242_v33, %s8853_s13 }
  0xfc   :  { %1347 = vrot.lane.b32.xlu1 %v6329_v40, %s8861_s19  ;;  %s6473_s19 = sld [smem:[#allocation4 + $0x12]] }
  0xfe   :  { %1585 = vrot.lane.b32.xlu0 %v6256_v35, %s8851_s15 }
 0x100   :  { %1445 = vrot.lane.b32.xlu1 %v6295_v38, %s8857_s24 }
 0x102   :  { %1396 = vrot.lane.b32.xlu0 %v6312_v39, %s8859_s4  ;;  %9065 = sst [smem:[#allocation22_spill]] %s6473_s19  ;;  %s6651_s19 = sld [smem:[#allocation4 + $0x2e]] }
 0x103   :  { %s9150_s11 = sld [smem:[#allocation22_spill]] }
 0x104   :  { %1543 = vrot.lane.b32.xlu1 %v6265_v36, %s8853_s13 }
 0x106   :  { %1494 = vrot.lane.b32.xlu0 %v6278_v37, %s8855_s27 }
 0x108   :  { %1403 = vrot.lane.b32.xlu1 %v6329_v40, %s8859_s4  ;;  %s6467_s4 = sld [smem:[#allocation4 + $0x11]]  ;;  %9117 = sst [smem:[#allocation60_spill]] %s6651_s19 }
 0x109   :  { %s9154_s19 = sld [smem:[#allocation39_spill]] }
 0x10a   :  { %1592 = vrot.lane.b32.xlu0 %v6242_v33, %s8851_s15 }
 0x10c   :  { %1501 = vrot.lane.b32.xlu1 %v6295_v38, %s8855_s27 }
 0x10e   :  { %1452 = vrot.lane.b32.xlu0 %v6312_v39, %s8857_s24  ;;  %9064 = sst [smem:[#allocation21_spill]] %s6467_s4  ;;  %v1309_v23 = vstv %s6467_s4  ;;  %s6611_s4 = sld [smem:[#allocation4 + $0x1e]] }
 0x110   :  { %1599 = vrot.lane.b32.xlu1 %v6265_v36, %s8851_s15 }
 0x112   :  { %1550 = vrot.lane.b32.xlu0 %v6278_v37, %s8853_s13 }
 0x114   :  { %1508 = vrot.lane.b32.xlu1 %v6312_v39, %s8855_s27  ;;  %9106 = sst [smem:[#allocation57_spill]] %s6611_s4  ;;  %s6627_s4 = sld [smem:[#allocation4 + $0x34]] }
 0x116   :  { %1459 = vrot.lane.b32.xlu0 %v6329_v40, %s8857_s24  ;;  %s6465_s24 = sld [smem:[#allocation4 + $0x4]] }
 0x118   :  { %1606 = vrot.lane.b32.xlu1 %v6278_v37, %s8851_s15  ;;  %v6395_v41 = vpop.permute.xlu1 %1200 }
 0x11a   :  { %1557 = vrot.lane.b32.xlu0 %v6295_v38, %s8853_s13  ;;  %9113 = sst [smem:[#allocation59_spill]] %s6627_s4  ;;  %s6783_s4 = sld [smem:[#allocation4 + $0x45]] }
 0x11c   :  { %v6397_v42 = vpop.permute.xlu0 %1186  ;;  %1564 = vrot.lane.b32.xlu1 %v6312_v39, %s8853_s13  ;;  %9063 = sst [smem:[#allocation20_spill]] %s6465_s24  ;;  %s6609_s24 = sld [smem:[#allocation4 + $0x2d]] }
 0x11d   :  { %s9148_s0 = sld [smem:[#allocation20_spill]] }
 0x11e   :  { %1515 = vrot.lane.b32.xlu0 %v6329_v40, %s8855_s27  ;;  %v6403_v43 = vpop.permute.xlu1 %1242  ;;  %s6463_s27 = sld [smem:[#allocation4 + $0x24]] }
 0x120   :  { %v6405_v44 = vpop.permute.xlu0 %1193  ;;  %1571 = vrot.lane.b32.xlu1 %v6329_v40, %s8853_s13  ;;  %s6461_s13 = sld [smem:[#allocation4 + $0xa]] }
 0x122   :  { %1613 = vrot.lane.b32.xlu0 %v6295_v38, %s8851_s15  ;;  %v6411_v45 = vpop.permute.xlu1 %1207  ;;  %9104 = sst [smem:[#allocation56_spill]] %s6609_s24 }
 0x123   :  { %s6730_s24 = sld [smem:[#allocation4 + $0x54]] }
 0x124   :  { %v6413_v46 = vpop.permute.xlu0 %1249  ;;  %1627 = vrot.lane.b32.xlu1 %v6329_v40, %s8851_s15  ;;  %v1175_v12 = vstv %s6463_s27  ;;  %s6587_s27 = sld [smem:[#allocation4 + $0x50]] }
 0x125   :  { %v6592_v21 = vmul.f32 %v6278_v37, %v1175_v12 }
 0x126   :  { %1620 = vrot.lane.b32.xlu0 %v6312_v39, %s8851_s15  ;;  %v6419_v47 = vpop.permute.xlu1 %1298  ;;  %s6459_s15 = sld [smem:[#allocation4 + $0x10]]  ;;  %9062 = sst [smem:[#allocation19_spill]] %s6461_s13 }
 0x127   :  { %s6672_s13 = sld [smem:[#allocation4 + $0x4b]]  ;;  %s9145_s23 = sld [smem:[#allocation19_spill]] }
 0x128   :  { %v6421_v48 = vpop.permute.xlu0 %1256 }
 0x129   :  { %9133 = sst [smem:[#allocation15_spill]] %s6730_s24  ;;  %s9162_s24 = sld [smem:[#allocation27_spill]] }
 0x12a   :  { %v6423_v49 = vpop.permute.xlu1 %1214 }
 0x12c   :  { %v6425_v50 = vpop.permute.xlu0 %1305  ;;  %9061 = sst [smem:[#allocation18_spill]] %s6459_s15  ;;  %v1302_v18 = vstv %s6459_s15  ;;  %s9101_s15 = sld [smem:[#allocation31_spill]] }
 0x12e   :  { %v6427_v51 = vpop.permute.xlu1 %1312 }
 0x130   :  { %v6429_v52 = vpop.permute.xlu0 %1263 }
 0x132   :  { %v6431_v53 = vpop.permute.xlu1 %1361  ;;  %v1414_v37 = vstv %s9101_s15  ;;  %s9118_s15 = sld [smem:[#allocation113_spill]] }
 0x134   :  { %v6433_v54 = vpop.permute.xlu0 %1354 }
 0x136   :  { %v6449_v55 = vpop.permute.xlu1 %1270 }
 0x138   :  { %v6451_v56 = vpop.permute.xlu0 %1221  ;;  %v6656_v4 = vld [vmem:[%s9118_s15] sm:$0xff]  ;;  %v6693_v38 = vld [vmem:[%s9118_s15 + $0x8] sm:$0xff]  ;;  %v6723_v22 = vld [vmem:[%s9118_s15 + $0x10] sm:$0xff] }
 0x139   :  { %v1188_v27 = vmul.f32 %v6397_v42, %v6656_v4  ;;  %v1195_v42 = vmul.f32 %v6405_v44, %v6656_v4  ;;  %v1244_v31 = vmul.f32 %v6693_v38, %v6403_v43  ;;  %v6739_v36 = vld [vmem:[%s9118_s15 + $0x18] sm:$0xff]  ;;  %v1300_v43 = vmul.f32 %v6723_v22, %v6419_v47  ;;  %v6761_v34 = vld [vmem:[%s9118_s15 + $0x28] sm:$0xff]  ;;  %v6778_v30 = vld [vmem:[%s9118_s15 + $0x30] sm:$0xff] }
 0x13a   :  { %v6469_v57 = vpop.permute.xlu1 %1368  ;;  %v1251_v16 = vmul.f32 %v6693_v38, %v6413_v46  ;;  %v1356_v46 = vmul.f32 %v6739_v36, %v6433_v54  ;;  %v1307_v24 = vmul.f32 %v6723_v22, %v6425_v50 }
 0x13b   :  { %v1191_v44 = vmul.f32 %v1190_v9, %v1188_v27  ;;  %v1198_v19 = vmul.f32 %v1197_v14, %v1195_v42  ;;  %v1247_v14 = vmul.f32 %v1246_v11, %v1244_v31  ;;  %v1303_v11 = vmul.f32 %v1302_v18, %v1300_v43 }
 0x13c   :  { %v6471_v58 = vpop.permute.xlu0 %1319  ;;  %v1254_v9 = vmul.f32 %v1253_v17, %v1251_v16  ;;  %v1209_v17 = vmul.f32 %v6411_v45, %v6656_v4  ;;  %v1310_v31 = vmul.f32 %v1309_v23, %v1307_v24  ;;  %v1216_v23 = vmul.f32 %v6423_v49, %v6656_v4 }
 0x13d   :  { %v1192_v28 = vadd.f32 %v1191_v44, %v6563_v10  ;;  %v1202_v44 = vmul.f32 %v6395_v41, %v6656_v4  ;;  %v1199_v42 = vadd.f32 %v1198_v19, %v6572_v13  ;;  %v6799_v10 = vld [vmem:[%s9118_s15 + $0x38] sm:$0xff]  ;;  %v1363_v41 = vmul.f32 %v6739_v36, %v6431_v53 }
 0x13e   :  { %v6489_v59 = vpop.permute.xlu1 %1417  ;;  %v1359_v13 = vmul.f32 %v1358_v29, %v1356_v46  ;;  %v1258_v19 = vmul.f32 %v6693_v38, %v6421_v48  ;;  %v1314_v24 = vmul.f32 %v6723_v22, %v6427_v51  ;;  %v9153_v49 = vstv %s9145_s23  ;;  %s9158_s23 = sld [smem:[#allocation47_spill]] }
 0x13f   :  { %v1248_v50 = vadd.f32 %v1247_v14, %v1192_v28  ;;  %v1419_v28 = vmul.f32 %v6761_v34, %v6489_v59  ;;  %v1205_v48 = vmul.f32 %v1204_v5, %v1202_v44  ;;  %v1255_v29 = vadd.f32 %v1254_v9, %v1199_v42  ;;  %v6849_v44 = vld [vmem:[%s9118_s15 + $0x40] sm:$0xff] }
 0x140   :  { %v6491_v60 = vpop.permute.xlu0 %1410  ;;  %v9152_v9 = vstv %s9144_s12  ;;  %v9155_v27 = vstv %s9146_s21  ;;  %s9171_s12 = sld [smem:[#allocation33_spill]]  ;;  %s9174_s21 = sld [smem:[#allocation34_spill]] }
 0x141   :  { %v1412_v54 = vmul.f32 %v6761_v34, %v6491_v60  ;;  %v1304_v53 = vadd.f32 %v1303_v11, %v1248_v50  ;;  %v9151_v11 = vstv %s9143_s28  ;;  %v1212_v42 = vmul.f32 %v9152_v9, %v1209_v17  ;;  %s9170_s28 = sld [smem:[#allocation32_spill]] }
 0x142   :  { %v6505_v61 = vpop.permute.xlu1 %1277  ;;  %v1261_v50 = vmul.f32 %v9153_v49, %v1258_v19  ;;  %v1311_v51 = vadd.f32 %v1310_v31, %v1255_v29  ;;  %v1206_v17 = vadd.f32 %v1205_v48, %v6551_v6  ;;  %v9159_v31 = vstv %s9150_s11  ;;  %s9176_s11 = sld [smem:[#allocation37_spill]] }
 0x143   :  { %v1317_v29 = vmul.f32 %v9159_v31, %v1314_v24  ;;  %v1213_v6 = vadd.f32 %v1212_v42, %v6576_v15  ;;  %v1710_v24 = vstv %s6819_s20  ;;  %v9164_v31 = vstv %s6569_s26  ;;  %s9166_s26 = sld [smem:[#allocation26_spill]]  ;;  %s9252_s20 = smov 7  }
 0x144   :  { %v6507_v62 = vpop.permute.xlu0 %1228  ;;  %v1262_v48 = vadd.f32 %v1261_v50, %v1206_v17  ;;  %v1272_v15 = vmul.f32 %v6693_v38, %v6449_v55  ;;  %v1321_v50 = vmul.f32 %v6723_v22, %v6471_v58  ;;  %v1370_v17 = vmul.f32 %v6739_v36, %v6469_v57 }
 0x145   :  { %v1279_v55 = vmul.f32 %v6693_v38, %v6505_v61 }
 0x146   :  { %v6525_v63 = vpop.permute.xlu1 %1375 }
 0x147   :  { %v1377_v58 = vmul.f32 %v6739_v36, %v6525_v63 }
 0x148   :  { %v6527_v0 = vpop.permute.xlu0 %1326 }
 0x149   :  { %v1328_v57 = vmul.f32 %v6723_v22, %v6527_v0 }
 0x14a   :  { %v6553_v7 = vpop.permute.xlu1 %1466 }
 0x14b   :  { %v1468_v16 = vmul.f32 %v6778_v30, %v6553_v7  ;;  %v1415_v7 = vmul.f32 %v1414_v37, %v1412_v54  ;;  %v9149_v37 = vstv %s9142_s30  ;;  %s9169_s30 = sld [smem:[#allocation28_spill]] }
 0x14c   :  { %v6555_v8 = vpop.permute.xlu0 %1424  ;;  %v1366_v46 = vmul.f32 %v9149_v37, %v1363_v41  ;;  %v1422_v41 = vmul.f32 %v9155_v27, %v1419_v28  ;;  %v9157_v37 = vstv %s9148_s0  ;;  %s9168_s0 = sld [smem:[#allocation29_spill]] }
 0x14d   :  { %v1471_v54 = vmul.f32 %v9151_v11, %v1468_v16  ;;  %v1219_v19 = vmul.f32 %v9157_v37, %v1216_v23  ;;  %v1265_v11 = vmul.f32 %v6693_v38, %v6429_v52  ;;  %v1223_v23 = vmul.f32 %v6451_v56, %v6656_v4 }
 0x14e   :  { %v6597_v25 = vpop.permute.xlu1 %1235  ;;  %v1367_v28 = vadd.f32 %v1366_v46, %v1311_v51  ;;  %v9163_v52 = vstv %s9158_s23  ;;  %v1426_v61 = vmul.f32 %v6761_v34, %v6555_v8  ;;  %s9197_s23 = sld [smem:[#allocation41_spill]] }
 0x14f   :  { %v1220_v46 = vadd.f32 %v1219_v19, %v6592_v21  ;;  %v9167_v21 = vstv %s9162_s24  ;;  %v1230_v19 = vmul.f32 %v6507_v62, %v6656_v4  ;;  %v1237_v62 = vmul.f32 %v6597_v25, %v6656_v4  ;;  %s9201_s24 = sld [smem:[#allocation46_spill]] }
 0x150   :  { %v6599_v26 = vpop.permute.xlu0 %1473  ;;  %v1423_v49 = vadd.f32 %v1422_v41, %v1367_v28 }
 0x151   :  { %v1475_v5 = vmul.f32 %v6778_v30, %v6599_v26 }
 0x152   :  { %v6637_v12 = vpop.permute.xlu1 %1333 }
 0x154   :  { %v6639_v20 = vpop.permute.xlu0 %1284 }
 0x156   :  { %v6676_v40 = vpop.permute.xlu1 %1431 }
 0x158   :  { %v6678_v1 = vpop.permute.xlu0 %1382 }
 0x15a   :  { %v1523_v39 = vpop.permute.xlu1 %1522 }
 0x15b   :  { %v1524_v45 = vmul.f32 %v6799_v10, %v1523_v39  ;;  %v1360_v39 = vadd.f32 %v1359_v13, %v1304_v53  ;;  %v9156_v53 = vstv %s9147_s10  ;;  %s9175_s10 = sld [smem:[#allocation35_spill]] }
 0x15c   :  { %v6725_v35 = vpop.permute.xlu0 %1480 }
 0x15d   :  { %v1416_v13 = vadd.f32 %v1415_v7, %v1360_v39  ;;  %v1527_v16 = vmul.f32 %v9156_v53, %v1524_v45  ;;  %v9161_v39 = vstv %s9154_s19  ;;  %s9196_s19 = sld [smem:[#allocation50_spill]] }
 0x15e   :  { %v6763_v33 = vpop.permute.xlu1 %1291  ;;  %v1478_v45 = vmul.f32 %v9161_v39, %v1475_v5  ;;  %v9165_v5 = vstv %s9160_s9  ;;  %s9200_s9 = sld [smem:[#allocation43_spill]] }
 0x15f   :  { %v1472_v7 = vadd.f32 %v1471_v54, %v1416_v13  ;;  %v1318_v54 = vadd.f32 %v1317_v29, %v1262_v48  ;;  %v1268_v51 = vmul.f32 %v9165_v5, %v1265_v11  ;;  %v9172_v29 = vstv %s6579_s18  ;;  %s9177_s18 = sld [smem:[#allocation38_spill]] }
 0x160   :  { %v1530_v47 = vpop.permute.xlu0 %1529  ;;  %v1479_v41 = vadd.f32 %v1478_v45, %v1423_v49  ;;  %v9178_v45 = vstv %s9166_s26  ;;  %v1482_v5 = vmul.f32 %v6778_v30, %v6725_v35  ;;  %s9202_s26 = sld [smem:[#allocation48_spill]] }
 0x161   :  { %v1531_v26 = vmul.f32 %v6799_v10, %v1530_v47  ;;  %v1528_v53 = vadd.f32 %v1527_v16, %v1472_v7  ;;  %v1269_v7 = vadd.f32 %v1268_v51, %v1213_v6  ;;  %v9179_v6 = vstv %s9168_s0  ;;  %s9207_s0 = sld [smem:[#allocation51_spill]] }
 0x162   :  { %v6801_v18 = vpop.permute.xlu1 %1389  ;;  %v1324_v48 = vmul.f32 %v9179_v6, %v1321_v50 }
 0x163   :  { %v1534_v37 = vmul.f32 %v9163_v52, %v1531_v26  ;;  %v1226_v26 = vmul.f32 %v9167_v21, %v1223_v23  ;;  %v9180_v23 = vstv %s6587_s27  ;;  %v9182_v52 = vstv %s9170_s28  ;;  %s9190_s27 = sld [smem:[#allocation52_spill]]  ;;  %s9233_s28 = sld [smem:[#allocation54_spill]] }
 0x164   :  { %v6803_v60 = vpop.permute.xlu0 %1340 }
 0x165   :  { %v1227_v51 = vadd.f32 %v1226_v26, %v6615_v32  ;;  %v1325_v32 = vadd.f32 %v1324_v48, %v1269_v7 }
 0x166   :  { %v6832_v14 = vpop.permute.xlu1 %1487 }
 0x168   :  { %v6834_v59 = vpop.permute.xlu0 %1438 }
 0x16a   :  { %v1579_v9 = vpop.permute.xlu1 %1578 }
 0x16b   :  { %v1580_v47 = vmul.f32 %v6849_v44, %v1579_v9  ;;  %v9173_v9 = vstv %s9121_s8  ;;  %s9185_s8 = sld [smem:[#allocation45_spill]] }
 0x16c   :  { %v1537_v27 = vpop.permute.xlu0 %1536 }
 0x16d   :  { %v1583_v43 = vmul.f32 %v9164_v31, %v1580_v47  ;;  %v1275_v47 = vmul.f32 %v9178_v45, %v1272_v15  ;;  %v9183_v31 = vstv %s9171_s12  ;;  %s9235_s12 = sld [smem:[#allocation13_spill]] }
 0x16e   :  { %v6880_v42 = vpop.permute.xlu1 %1347  ;;  %v1233_v25 = vmul.f32 %v9183_v31, %v1230_v19  ;;  %v1538_v19 = vmul.f32 %v6799_v10, %v1537_v27  ;;  %v1433_v27 = vmul.f32 %v6761_v34, %v6676_v40  ;;  %v1489_v40 = vmul.f32 %v6778_v30, %v6832_v14 }
 0x16f   :  { %v1584_v13 = vadd.f32 %v1583_v43, %v1528_v53  ;;  %v1535_v43 = vadd.f32 %v1534_v37, %v1479_v41  ;;  %v9181_v53 = vstv %s9169_s30  ;;  %v1282_v37 = vmul.f32 %v9182_v52, %v1279_v55  ;;  %s9209_s30 = sld [smem:[#allocation53_spill]] }
 0x170   :  { %v1586_v56 = vpop.permute.xlu0 %1585  ;;  %v1373_v8 = vmul.f32 %v9181_v53, %v1370_v17  ;;  %v9186_v41 = vstv %s9123_s1  ;;  %v9188_v17 = vstv %s9176_s11  ;;  %v9189_v55 = vstv %s9177_s18  ;;  %s9193_s1 = sld [smem:[#allocation42_spill]]  ;;  %s9243_s18 = sld [smem:[#allocation62_spill]] }
 0x171   :  { %v1587_v16 = vmul.f32 %v6849_v44, %v1586_v56  ;;  %v1636_v11 = vmul.f32 %v9172_v29, %v1584_v13  ;;  %v9184_v56 = vstv %s9174_s21  ;;  %v1240_v29 = vmul.f32 %v9189_v55, %v1237_v62  ;;  %s9237_s21 = sld [smem:[#allocation15_spill]]  ;;  %s7082_s11 = sld [smem:[#allocation4 + $0x4e]] }
 0x172   :  { %v6905_v63 = vpop.permute.xlu1 %1445  ;;  %v1380_v15 = vmul.f32 %v9184_v56, %v1377_v58  ;;  %v1276_v35 = vadd.f32 %v1275_v47, %v1220_v46  ;;  %v9191_v58 = vstv %s9126_s2  ;;  %v1374_v45 = vadd.f32 %v1373_v8, %v1318_v54  ;;  %s9195_s2 = sld [smem:[#allocation40_spill]] }
 0x173   :  { %v1590_v28 = vmul.f32 %v9173_v9, %v1587_v16  ;;  %v6915_v0 = vadd.f32 %v9180_v23, %v1636_v11  ;;  %v9187_v16 = vstv %s9175_s10  ;;  %v1283_v6 = vadd.f32 %v1282_v37, %v1227_v51  ;;  %s7069_s10 = sld [smem:[#allocation4 + $0x47]] }
 0x174   :  { %v6907_v39 = vpop.permute.xlu0 %1396  ;;  %v1331_v21 = vmul.f32 %v9187_v16, %v1328_v57  ;;  %v1234_v57 = vadd.f32 %v1233_v25, %v6633_v2  ;;  %v9192_v23 = vstv %s9185_s8  ;;  %v1241_v48 = vadd.f32 %v1240_v29, %v6659_v3  ;;  %s7093_s8 = sld [smem:[#allocation4 + $0x56]] }
 0x175   :  { %v1591_v49 = vadd.f32 %v1590_v28, %v1535_v43  ;;  %v1641_v50 = vmul.f32 0.044715, %v6915_v0  ;;  %v1429_v43 = vmul.f32 %v9188_v17, %v1426_v61  ;;  %v1485_v61 = vmul.f32 %v9192_v23, %v1482_v5 }
 0x176   :  { %v1544_v11 = vpop.permute.xlu1 %1543  ;;  %v1332_v7 = vadd.f32 %v1331_v21, %v1276_v35  ;;  %v9194_v53 = vstv %s9190_s27  ;;  %v1335_v52 = vmul.f32 %v6723_v22, %v6637_v12  ;;  %v1286_v3 = vmul.f32 %v6693_v38, %v6639_v20  ;;  %s9249_s27 = sld [smem:[#allocation14_spill]] }
 0x177   :  { %v1651_v13 = vmul.f32 %v9186_v41, %v1591_v49  ;;  %v1642_v26 = vmul.f32 %v1641_v50, %v6915_v0  ;;  %v1381_v49 = vadd.f32 %v1380_v15, %v1325_v32  ;;  %v1430_v47 = vadd.f32 %v1429_v43, %v1374_v45 }
 0x178   :  { %v1495_v9 = vpop.permute.xlu0 %1494  ;;  %v1541_v54 = vmul.f32 %v9194_v53, %v1538_v19  ;;  %v1384_v25 = vmul.f32 %v6739_v36, %v6678_v1  ;;  %v9198_v12 = vstv %s9193_s1  ;;  %v1545_v50 = vmul.f32 %v6799_v10, %v1544_v11  ;;  %s9250_s1 = smov 8  }
 0x179   :  { %v6941_v28 = vadd.f32 %v9191_v58, %v1651_v13  ;;  %v1643_v62 = vmul.f32 %v1642_v26, %v6915_v0  ;;  %v1486_v5 = vadd.f32 %v1485_v61, %v1430_v47  ;;  %v1436_v56 = vmul.f32 %v9198_v12, %v1433_v27 }
 0x17a   :  { %v6953_v8 = vpop.permute.xlu1 %1403  ;;  %v1293_v41 = vmul.f32 %v6693_v38, %v6763_v33  ;;  %v1391_v20 = vmul.f32 %v6739_v36, %v6801_v18  ;;  %v9199_v1 = vstv %s6641_s29  ;;  %v9203_v43 = vstv %s9195_s2  ;;  %s9206_s29 = sld [smem:[#allocation49_spill]]  ;;  %s4771_s2 = sld [smem:[#allocation4 + $0x57]] }
 0x17b   :  { %v1656_v46 = vmul.f32 0.044715, %v6941_v28  ;;  %v1644_v37 = vadd.f32 %v1643_v62, %v6915_v0  ;;  %v1542_v13 = vadd.f32 %v1541_v54, %v1486_v5  ;;  %v1338_v55 = vmul.f32 %v9203_v43, %v1335_v52 }
 0x17c   :  { %v1593_v2 = vpop.permute.xlu0 %1592  ;;  %v9204_v29 = vstv %s9196_s19  ;;  %v9205_v11 = vstv %s9197_s23  ;;  %v1342_v35 = vmul.f32 %v6723_v22, %v6803_v60  ;;  %v1440_v32 = vmul.f32 %v6761_v34, %v6834_v59  ;;  %s9253_s19 = smov 1   ;;  %s9254_s23 = smov 127  }
 0x17d   :  { %v1657_v31 = vmul.f32 %v1656_v46, %v6941_v28  ;;  %v1594_v51 = vmul.f32 %v6849_v44, %v1593_v2  ;;  %v1645_v15 = vmul.f32 0.7978846, %v1644_v37  ;;  %v1492_v19 = vmul.f32 %v9204_v29, %v1489_v40 }
 0x17e   :  { %v1502_v21 = vpop.permute.xlu1 %1501  ;;  %v1289_v18 = vmul.f32 %v9205_v11, %v1286_v3  ;;  %v1437_v58 = vadd.f32 %v1436_v56, %v1381_v49  ;;  %v1349_v45 = vmul.f32 %v6723_v22, %v6880_v42  ;;  %v9208_v61 = vstv %s6621_s16  ;;  %s9215_s16 = sld [smem:[#allocation59_spill]] }
 0x17f   :  { %v1658_v14 = vmul.f32 %v1657_v31, %v6941_v28  ;;  %v1597_v16 = vmul.f32 %v9199_v1, %v1594_v51  ;;  %5282 = vtanh.f32 %v1645_v15  ;;  %v1548_v27 = vmul.f32 %v9208_v61, %v1545_v50 }
 0x180   :  { %v6976_v17 = vpop.permute.xlu0 %1452  ;;  %v9210_v62 = vstv %s9200_s9  ;;  %v9211_v47 = vstv %s9201_s24  ;;  %v9212_v53 = vstv %s9202_s26  ;;  %v9213_v59 = vstv %s6643_s5  ;;  %s7040_s5 = sld [smem:[#allocation4 + $0x46]]  ;;  %s9255_s9 = smov 121  }
 0x181   :  { %v1659_v33 = vadd.f32 %v1658_v14, %v6941_v28  ;;  %v1598_v26 = vadd.f32 %v1597_v16, %v1542_v13  ;;  %v1387_v46 = vmul.f32 %v9210_v62, %v1384_v25  ;;  %v1296_v60 = vmul.f32 %v9211_v47, %v1293_v41  ;;  %s9256_s24 = smov 120   ;;  %s9257_s26 = smov 119  }
 0x182   :  { %v1394_v54 = vmul.f32 %v9212_v53, %v1391_v20  ;;  %v1600_v52 = vpop.permute.xlu1 %1599  ;;  %v1493_v40 = vadd.f32 %v1492_v19, %v1437_v58  ;;  %v1496_v42 = vmul.f32 %v6778_v30, %v1495_v9  ;;  %v1339_v31 = vadd.f32 %v1338_v55, %v1283_v6 }
 0x183   :  { %v1660_v23 = vmul.f32 0.7978846, %v1659_v33  ;;  %v1666_v2 = vmul.f32 %v9213_v59, %v1598_v26  ;;  %v1601_v37 = vmul.f32 %v6849_v44, %v1600_v52  ;;  %v9214_v3 = vstv %s9206_s29  ;;  %s4780_s29 = sld [smem:[#allocation4 + $0x58]] }
 0x184   :  { %v1551_v49 = vpop.permute.xlu0 %1550  ;;  %v1345_v5 = vmul.f32 %v9214_v3, %v1342_v35  ;;  %v9216_v25 = vstv %s9207_s0  ;;  %v9217_v12 = vstv %s6664_s14  ;;  %v9218_v15 = vstv %s9209_s30  ;;  %s9220_s14 = sld [smem:[#allocation56_spill]]  ;;  %s4772_s0 = sld [smem:[#allocation4 + $0x78]] }
 0x185   :  { %5284 = vtanh.f32 %v1660_v23  ;;  %v1443_v51 = vmul.f32 %v9216_v25, %v1440_v32  ;;  %v7009_v56 = vadd.f32 %v9217_v12, %v1666_v2  ;;  %v1352_v14 = vmul.f32 %v9218_v15, %v1349_v45  ;;  %s4788_s30 = sld [smem:[#allocation4 + $0x60]] }
 0x186   :  { %v1549_v50 = vadd.f32 %v1548_v27, %v1493_v40  ;;  %v9219_v41 = vstv %s6666_s7  ;;  %v1552_v13 = vmul.f32 %v6799_v10, %v1551_v49  ;;  %v1290_v1 = vadd.f32 %v1289_v18, %v1234_v57  ;;  %v1509_v43 = vpop.permute.xlu1 %1508  ;;  %s9222_s7 = sld [smem:[#allocation57_spill]] }
 0x187   :  { %v1604_v20 = vmul.f32 %v9219_v41, %v1601_v37  ;;  %v1388_v9 = vadd.f32 %v1387_v46, %v1332_v7  ;;  %v1447_v6 = vmul.f32 %v6761_v34, %v6905_v63  ;;  %v1671_v16 = vmul.f32 0.044715, %v7009_v56 }
 0x188   :  { %v1460_v55 = vpop.permute.xlu0 %1459  ;;  %v1297_v29 = vadd.f32 %v1296_v60, %v1241_v48  ;;  %v1395_v19 = vadd.f32 %v1394_v54, %v1339_v31  ;;  %v9221_v33 = vstv %s9215_s16  ;;  %v1346_v32 = vadd.f32 %v1345_v5, %v1290_v1  ;;  %s4781_s16 = sld [smem:[#allocation4 + $0x59]] }
 0x189   :  { %v1499_v11 = vmul.f32 %v9221_v33, %v1496_v42  ;;  %v1605_v35 = vadd.f32 %v1604_v20, %v1549_v50  ;;  %v1444_v26 = vadd.f32 %v1443_v51, %v1388_v9  ;;  %v1398_v57 = vmul.f32 %v6739_v36, %v6907_v39  ;;  %v5283_v63 = vpop.eup %5282 }
 0x18a   :  { %v1672_v7 = vmul.f32 %v1671_v16, %v7009_v56  ;;  %v1640_v18 = vmul.f32 0.5, %v6915_v0  ;;  %v1353_v58 = vadd.f32 %v1352_v14, %v1297_v29  ;;  %v9223_v45 = vstv %s6672_s13  ;;  %v1607_v39 = vpop.permute.xlu1 %1606  ;;  %s9230_s13 = sld [smem:[#allocation58_spill]] }
 0x18b   :  { %v1681_v23 = vmul.f32 %v9223_v45, %v1605_v35  ;;  %v9224_v48 = vstv %s6674_s22  ;;  %v1647_v27 = vadd.f32 1.0, %v5283_v63  ;;  %v9225_v62 = vstv %s9220_s14  ;;  %s9231_s22 = smov 9   ;;  %s4773_s14 = sld [smem:[#allocation4 + $0x79]] }
 0x18c   :  { %v1555_v61 = vmul.f32 %v9224_v48, %v1552_v13  ;;  %v1450_v46 = vmul.f32 %v9225_v62, %v1447_v6  ;;  %v1405_v47 = vmul.f32 %v6739_v36, %v6953_v8  ;;  %v1673_v60 = vmul.f32 %v1672_v7, %v7009_v56  ;;  %v1558_v53 = vpop.permute.xlu0 %1557 }
 0x18d   :  { %v1500_v54 = vadd.f32 %v1499_v11, %v1444_v26  ;;  %v1503_v0 = vmul.f32 %v6778_v30, %v1502_v21  ;;  %v9226_v59 = vstv %s6698_s17  ;;  %v1608_v52 = vmul.f32 %v6849_v44, %v1607_v39  ;;  %s9228_s17 = sld [smem:[#allocation60_spill]] }
 0x18e   :  { %v7037_v2 = vadd.f32 %v9226_v59, %v1681_v23  ;;  %v7042_v49 = vmul.f32 %v1647_v27, %v1640_v18  ;;  %v9227_v40 = vstv %s9222_s7  ;;  %v1674_v8 = vadd.f32 %v1673_v60, %v7009_v56  ;;  %v1565_v50 = vpop.permute.xlu1 %1564  ;;  %s4782_s7 = sld [smem:[#allocation4 + $0x5a]] }
 0x18f   :  { %v1401_v36 = vmul.f32 %v9227_v40, %v1398_v57  ;;  %v1454_v42 = vmul.f32 %v6761_v34, %v6976_v17  ;;  %v5285_v37 = vpop.eup %5284  ;;  %v1655_v21 = vmul.f32 0.5, %v6941_v28  ;;  %v1556_v3 = vadd.f32 %v1555_v61, %v1500_v54 }
 0x190   :  { %v1686_v31 = vmul.f32 0.044715, %v7037_v2  ;;  %v9229_v5 = vstv %s6700_s3  ;;  %v1662_v51 = vadd.f32 1.0, %v5285_v37  ;;  %v1675_v12 = vmul.f32 0.7978846, %v1674_v8  ;;  %v1516_v41 = vpop.permute.xlu0 %1515  ;;  %1778 = vrot.lane.b32.xlu0 %v7042_v49, %s9231_s22  ;;  %s7067_s3 = sld [smem:[#allocation4 + $0x55]] }
 0x191   :  { %v1611_v25 = vmul.f32 %v9229_v5, %v1608_v52  ;;  %v1510_v15 = vmul.f32 %v6778_v30, %v1509_v43  ;;  %v1559_v14 = vmul.f32 %v6799_v10, %v1558_v53  ;;  %v9232_v17 = vstv %s6629_s6  ;;  %s9239_s6 = sld [smem:[#allocation55_spill]] }
 0x192   :  { %v1408_v28 = vmul.f32 %v9232_v17, %v1405_v47  ;;  %v9234_v20 = vstv %s6649_s25  ;;  %v1687_v1 = vmul.f32 %v1686_v31, %v7037_v2  ;;  %v7062_v6 = vmul.f32 %v1662_v51, %v1655_v21  ;;  %s9242_s25 = sld [smem:[#allocation61_spill]] }
 0x193   :  { %v1506_v13 = vmul.f32 %v9234_v20, %v1503_v0  ;;  %v1612_v9 = vadd.f32 %v1611_v25, %v1556_v3  ;;  %5286 = vtanh.f32 %v1675_v12  ;;  %v9236_v16 = vstv %s9228_s17  ;;  %s4774_s17 = sld [smem:[#allocation4 + $0x7a]] }
 0x194   :  { %v1457_v43 = vmul.f32 %v9236_v16, %v1454_v42  ;;  %v1461_v29 = vmul.f32 %v6761_v34, %v1460_v55  ;;  %v1451_v33 = vadd.f32 %v1450_v46, %v1395_v19  ;;  %v1688_v11 = vmul.f32 %v1687_v1, %v7037_v2  ;;  %v1572_v55 = vpop.permute.xlu1 %1571  ;;  %v1614_v48 = vpop.permute.xlu0 %1613  ;;  %1785 = vrot.lane.b32.xlu1 %v7062_v6, %s9231_s22 }
 0x195   :  { %v9238_v35 = vstv %s9230_s13  ;;  %v1566_v57 = vmul.f32 %v6799_v10, %v1565_v50  ;;  %v1402_v7 = vadd.f32 %v1401_v36, %v1346_v32  ;;  %v9240_v63 = vstv %s9233_s28  ;;  %s7254_s13 = sld [smem:[#allocation4 + $0x62]]  ;;  %s7263_s28 = sld [smem:[#allocation4 + $0x5b]] }
 0x196   :  { %v1696_v26 = vmul.f32 %v9238_v35, %v1612_v9  ;;  %v1513_v18 = vmul.f32 %v9240_v63, %v1510_v15  ;;  %v9241_v45 = vstv %s9235_s12  ;;  %v1517_v34 = vmul.f32 %v6778_v30, %v1516_v41  ;;  %s7265_s12 = sld [smem:[#allocation4 + $0x69]] }
 0x197   :  { %v1562_v23 = vmul.f32 %v9241_v45, %v1559_v14  ;;  %v1409_v19 = vadd.f32 %v1408_v28, %v1353_v58  ;;  %v1689_v61 = vadd.f32 %v1688_v11, %v7037_v2  ;;  %v9244_v32 = vstv %s9237_s21  ;;  %s7276_s21 = sld [smem:[#allocation4 + $0x63]] }
 0x198   :  { %v7087_v27 = vadd.f32 %v9244_v32, %v1696_v26  ;;  %v1624_v62 = vstv %s7040_s5  ;;  %v1507_v46 = vadd.f32 %v1506_v13, %v1451_v33  ;;  %v1458_v47 = vadd.f32 %v1457_v43, %v1402_v7  ;;  %v1628_v21 = vpop.permute.xlu1 %1627  ;;  %v1621_v31 = vpop.permute.xlu0 %1620  ;;  %1834 = vrot.lane.b32.xlu1 %v7042_v49, %s9250_s1  ;;  %s4789_s5 = sld [smem:[#allocation4 + $0x61]] }
 0x199   :  { %v9245_v30 = vstv %s9239_s6  ;;  %v1615_v39 = vmul.f32 %v6849_v44, %v1614_v48  ;;  %v1690_v53 = vmul.f32 0.7978846, %v1689_v61  ;;  %v9246_v58 = vstv %s9242_s25  ;;  %s7361_s6 = sld [smem:[#allocation4 + $0x66]]  ;;  %s7364_s25 = sld [smem:[#allocation4 + $0x6d]] }
 0x19a   :  { %v1464_v60 = vmul.f32 %v9245_v30, %v1461_v29  ;;  %v1701_v54 = vmul.f32 0.044715, %v7087_v27  ;;  %v1569_v0 = vmul.f32 %v9246_v58, %v1566_v57  ;;  %v1573_v59 = vmul.f32 %v6799_v10, %v1572_v55 }
 0x19b   :  { %v1514_v52 = vadd.f32 %v1513_v18, %v1458_v47  ;;  %v1563_v40 = vadd.f32 %v1562_v23, %v1507_v46  ;;  %v9247_v36 = vstv %s9243_s18  ;;  %v9248_v42 = vstv %s6783_s4  ;;  %s7110_s4 = sld [smem:[#allocation4 + $0x4f]]  ;;  %s7293_s18 = sld [smem:[#allocation4 + $0x7d]] }
 0x19c   :  { %v1520_v8 = vmul.f32 %v9247_v36, %v1517_v34  ;;  %v1618_v37 = vmul.f32 %v9248_v42, %v1615_v39  ;;  %5288 = vtanh.f32 %v1690_v53  ;;  %v1702_v3 = vmul.f32 %v1701_v54, %v7087_v27 }
 0x19d   :  { %v1629_v5 = vmul.f32 %v6849_v44, %v1628_v21  ;;  %v1622_v10 = vmul.f32 %v6849_v44, %v1621_v31  ;;  %v1465_v25 = vadd.f32 %v1464_v60, %v1409_v19  ;;  %v1713_v51 = vstv %s7067_s3  ;;  %v5287_v20 = vpop.eup %5286  ;;  %s7273_s3 = sld [smem:[#allocation4 + $0x7b]] }
 0x19e   :  { %v1619_v12 = vadd.f32 %v1618_v37, %v1563_v40  ;;  %v1631_v15 = vstv %s7069_s10  ;;  %v1703_v14 = vmul.f32 %v1702_v3, %v7087_v27  ;;  %v1570_v50 = vadd.f32 %v1569_v0, %v1514_v52  ;;  %s7282_s10 = sld [smem:[#allocation4 + $0x7c]] }
 0x19f   :  { %v9251_v41 = vstv %s9249_s27  ;;  %v1625_v28 = vmul.f32 %v1624_v62, %v1622_v10  ;;  %v1670_v13 = vmul.f32 0.5, %v7009_v56  ;;  %v1521_v1 = vadd.f32 %v1520_v8, %v1465_v25  ;;  %s7300_s27 = sld [smem:[#allocation4 + $0x7e]]  ;;  %9263 = sst [smem:[#allocation12_spill]] %s7361_s6 }
 0x1a0   :  { %v1576_v17 = vmul.f32 %v9251_v41, %v1573_v59  ;;  %v1711_v9 = vmul.f32 %v1710_v24, %v1619_v12  ;;  %v1725_v44 = vstv %s7082_s11  ;;  %v1677_v16 = vadd.f32 1.0, %v5287_v20  ;;  %s7291_s11 = sld [smem:[#allocation4 + $0x6a]]  ;;  %9264 = sst [smem:[#allocation24_spill]] %s7364_s25 }
 0x1a1   :  { %v1704_v43 = vadd.f32 %v1703_v14, %v7087_v27  ;;  %v1632_v29 = vmul.f32 %v1631_v15, %v1629_v5  ;;  %v1626_v33 = vadd.f32 %v1625_v28, %v1570_v50  ;;  %v1728_v35 = vstv %s7093_s8  ;;  %s7298_s8 = sld [smem:[#allocation4 + $0x70]] }
 0x1a2   :  { %v1714_v11 = vadd.f32 %v1713_v51, %v1711_v9  ;;  %v7121_v26 = vmul.f32 %v1677_v16, %v1670_v13  ;;  %v1577_v7 = vadd.f32 %v1576_v17, %v1521_v1  ;;  %v1740_v23 = vstv %s7110_s4  ;;  %s7305_s4 = sld [smem:[#allocation4 + $0x7f]] }
 0x1a3   :  { %v1705_v57 = vmul.f32 0.7978846, %v1704_v43  ;;  %v1726_v63 = vmul.f32 %v1725_v44, %v1626_v33  ;;  %v1685_v48 = vmul.f32 0.5, %v7037_v2  ;;  %v1743_v30 = vstv %s4771_s2  ;;  %s7308_s2 = sld [smem:[#allocation4 + $0x71]] }
 0x1a4   :  { %v1716_v18 = vmul.f32 0.044715, %v1714_v11  ;;  %v1633_v56 = vadd.f32 %v1632_v29, %v1577_v7  ;;  %1792 = vrot.lane.b32.xlu0 %v7121_v26, %s9231_s22  ;;  %v1700_v58 = vmul.f32 0.5, %v7087_v27  ;;  %v1715_v8 = vmul.f32 0.5, %v1714_v11 }
 0x1a5   :  { %5290 = vtanh.f32 %v1705_v57  ;;  %v1729_v45 = vadd.f32 %v1728_v35, %v1726_v63  ;;  %v1782_v28 = vstv %s4780_s29  ;;  %v1755_v13 = vstv %s4772_s0  ;;  %s7329_s0 = sld [smem:[#allocation4 + $0x81]]  ;;  %s7375_s29 = sld [smem:[#allocation4 + $0x90]] }
 0x1a6   :  { %v1717_v24 = vmul.f32 %v1716_v18, %v1714_v11  ;;  %v5289_v34 = vpop.eup %5288  ;;  %v1741_v32 = vmul.f32 %v1740_v23, %v1633_v56  ;;  %v1838_v9 = vstv %s4788_s30  ;;  %v1756_v16 = vmul.f32 %v1755_v13, %v7042_v49  ;;  %s7331_s30 = sld [smem:[#allocation4 + $0x5e]] }
 0x1a7   :  { %v1731_v55 = vmul.f32 0.044715, %v1729_v45  ;;  %v1692_v19 = vadd.f32 1.0, %v5289_v34  ;;  %v1730_v25 = vmul.f32 0.5, %v1729_v45  ;;  %v1789_v35 = vstv %s4781_s16  ;;  %s7333_s16 = sld [smem:[#allocation4 + $0x65]] }
 0x1a8   :  { %v1718_v61 = vmul.f32 %v1717_v24, %v1714_v11  ;;  %1841 = vrot.lane.b32.xlu0 %v7062_v6, %s9250_s1  ;;  %v1744_v53 = vadd.f32 %v1743_v30, %v1741_v32  ;;  %v1758_v7 = vstv %s4773_s14  ;;  %v1796_v56 = vstv %s4782_s7  ;;  %s7335_s14 = sld [smem:[#allocation4 + $0x6c]]  ;;  %s7338_s7 = sld [smem:[#allocation4 + $0x73]] }
 0x1a9   :  { %v1732_v62 = vmul.f32 %v1731_v55, %v1729_v45  ;;  %v7129_v46 = vmul.f32 %v1692_v19, %v1685_v48  ;;  %v1759_v23 = vmul.f32 %v1758_v7, %v7062_v6  ;;  %v1761_v55 = vstv %s4774_s17  ;;  %s7377_s17 = sld [smem:[#allocation4 + $0x91]] }
 0x1aa   :  { %v1719_v47 = vadd.f32 %v1718_v61, %v1714_v11  ;;  %v1746_v59 = vmul.f32 0.044715, %v1744_v53  ;;  %v1745_v14 = vmul.f32 0.5, %v1744_v53  ;;  %v1852_v32 = vstv %s7254_s13  ;;  %s7384_s13 = sld [smem:[#allocation4 + $0x75]] }
 0x1ab   :  { %v1733_v60 = vmul.f32 %v1732_v62, %v1729_v45  ;;  %1799 = vrot.lane.b32.xlu1 %v7129_v46, %s9231_s22  ;;  %v1950_v13 = vstv %s7298_s8  ;;  %s7370_s8 = sld [smem:[#allocation4 + $0x83]]  ;;  %9268 = sst [smem:[#allocation30_spill]] %s7375_s29 }
 0x1ac   :  { %v1720_v39 = vmul.f32 0.7978846, %v1719_v47  ;;  %1848 = vrot.lane.b32.xlu0 %v7121_v26, %s9250_s1  ;;  %v1747_v36 = vmul.f32 %v1746_v59, %v1744_v53  ;;  %9258 = sst [smem:[#allocation18_spill]] %s7331_s30  ;;  %s7391_s29 = sld [smem:[#allocation4 + $0x92]] }
 0x1ad   :  { %v1734_v2 = vadd.f32 %v1733_v60, %v1729_v45  ;;  %v1845_v45 = vstv %s4789_s5  ;;  %s7340_s5 = sld [smem:[#allocation4 + $0x82]] }
 0x1ae   :  { %5292 = vtanh.f32 %v1720_v39  ;;  %v1748_v37 = vmul.f32 %v1747_v36, %v1744_v53  ;;  %v7287_v39 = vld [vmem:[%s9118_s15] sm:$0xff] }
 0x1af   :  { %v5291_v54 = vpop.eup %5290  ;;  %1890 = vrot.lane.b32.xlu1 %v7042_v49, %s9252_s20  ;;  %v1735_v40 = vmul.f32 0.7978846, %v1734_v2  ;;  %9269 = sst [smem:[#allocation44_spill]] %s7377_s17 }
 0x1b0   :  { %v1707_v0 = vadd.f32 1.0, %v5291_v54  ;;  %1897 = vrot.lane.b32.xlu0 %v7062_v6, %s9252_s20  ;;  %v1749_v31 = vadd.f32 %v1748_v37, %v1744_v53  ;;  %9272 = sst [smem:[#allocation39_spill]] %s7384_s13  ;;  %s7398_s13 = sld [smem:[#allocation4 + $0x99]] }
 0x1b1   :  { %5294 = vtanh.f32 %v1735_v40  ;;  %9266 = sst [smem:[#allocation16_spill]] %s7370_s8 }
 0x1b2   :  { %v7140_v52 = vmul.f32 %v1707_v0, %v1700_v58  ;;  %v1750_v5 = vmul.f32 0.7978846, %v1749_v31  ;;  %v1901_v0 = vstv %s7265_s12  ;;  %s7386_s12 = sld [smem:[#allocation4 + $0x84]]  ;;  %9275 = sst [smem:[#allocation27_spill]] %s7391_s29 }
 0x1b3   :  { %9259 = sst [smem:[#allocation17_spill]] %s7340_s5  ;;  %s7405_s29 = sld [smem:[#allocation4 + $0xa8]] }
 0x1b4   :  { %1806 = vrot.lane.b32.xlu1 %v7140_v52, %s9231_s22  ;;  %1855 = vrot.lane.b32.xlu0 %v7129_v46, %s9250_s1  ;;  %5296 = vtanh.f32 %v1750_v5 }
 0x1b6   :  { %9277 = sst [smem:[#allocation29_spill]] %s7398_s13  ;;  %s7418_s13 = sld [smem:[#allocation4 + $0x76]] }
 0x1b8   :  { %v5293_v27 = vpop.eup %5292  ;;  %1904 = vrot.lane.b32.xlu1 %v7121_v26, %s9252_s20  ;;  %1946 = vrot.lane.b32.xlu0 %v7042_v49, %s9253_s19  ;;  %9273 = sst [smem:[#allocation47_spill]] %s7386_s12  ;;  %s7407_s12 = sld [smem:[#allocation4 + $0xb0]] }
 0x1b9   :  { %v1722_v42 = vadd.f32 1.0, %v5293_v27  ;;  %v1764_v27 = vstv %s7273_s3  ;;  %s7389_s3 = sld [smem:[#allocation4 + $0x8b]]  ;;  %9280 = sst [smem:[#allocation33_spill]] %s7405_s29 }
 0x1bb   :  { %v7150_v21 = vmul.f32 %v1722_v42, %v1715_v8  ;;  %v5295_v3 = vpop.eup %5294 }
 0x1bc   :  { %1953 = vrot.lane.b32.xlu1 %v7062_v6, %s9253_s19  ;;  %v1737_v10 = vadd.f32 1.0, %v5295_v3  ;;  %v1859_v3 = vstv %s7276_s21  ;;  %s7359_s21 = sld [smem:[#allocation4 + $0x5f]]  ;;  %9285 = sst [smem:[#allocation45_spill]] %s7418_s13 }
 0x1bd   :  { %1813 = vrot.lane.b32.xlu0 %v7150_v21, %s9231_s22  ;;  %s7435_s13 = sld [smem:[#allocation4 + $0x9a]] }
 0x1be   :  { %v7164_v51 = vmul.f32 %v1737_v10, %v1730_v25  ;;  %v5297_v12 = vpop.eup %5296  ;;  %v1765_v10 = vmul.f32 %v1764_v27, %v7129_v46  ;;  %9281 = sst [smem:[#allocation34_spill]] %s7407_s12  ;;  %v2013_v27 = vstv %s7329_s0  ;;  %s7439_s12 = sld [smem:[#allocation4 + $0xa2]] }
 0x1bf   :  { %v1752_v15 = vadd.f32 1.0, %v5297_v12  ;;  %v7326_v12 = vld [vmem:[%s9118_s15 + $0x8] sm:$0xff]  ;;  %9274 = sst [smem:[#allocation23_spill]] %s7389_s3  ;;  %s7403_s3 = sld [smem:[#allocation4 + $0xa1]] }
 0x1c0   :  { %1862 = vrot.lane.b32.xlu1 %v7140_v52, %s9250_s1  ;;  %s7457_s0 = sld [smem:[#allocation4 + $0x94]] }
 0x1c1   :  { %1911 = vrot.lane.b32.xlu0 %v7129_v46, %s9252_s20  ;;  %v7182_v50 = vmul.f32 %v1752_v15, %v1745_v14 }
 0x1c2   :  { %9262 = sst [smem:[#allocation31_spill]] %s7359_s21 }
 0x1c3   :  { %9289 = sst [smem:[#allocation50_spill]] %s7435_s13  ;;  %s7464_s13 = sld [smem:[#allocation4 + $0xa3]] }
 0x1c4   :  { %1960 = vrot.lane.b32.xlu1 %v7121_v26, %s9253_s19  ;;  %9290 = sst [smem:[#allocation41_spill]] %s7439_s12  ;;  %s7461_s12 = sld [smem:[#allocation4 + $0x87]] }
 0x1c5   :  { %2002 = vrot.lane.b32.xlu0 %v7042_v49, %s9254_s23  ;;  %9279 = sst [smem:[#allocation32_spill]] %s7403_s3  ;;  %s7416_s3 = sld [smem:[#allocation4 + $0x6f]] }
 0x1c6   :  { %9295 = sst [smem:[#allocation51_spill]] %s7457_s0  ;;  %s7680_s0 = sld [smem:[#allocation4 + $0xe1]] }
 0x1c8   :  { %2009 = vrot.lane.b32.xlu1 %v7062_v6, %s9254_s23 }
 0x1c9   :  { %1820 = vrot.lane.b32.xlu0 %v7164_v51, %s9231_s22  ;;  %9298 = sst [smem:[#allocation56_spill]] %s7464_s13  ;;  %s7484_s13 = sld [smem:[#allocation4 + $0xb9]] }
 0x1ca   :  { %9297 = sst [smem:[#allocation59_spill]] %s7461_s12 }
 0x1cb   :  { %9284 = sst [smem:[#allocation38_spill]] %s7416_s3  ;;  %s7480_s12 = sld [smem:[#allocation4 + $0x8f]] }
 0x1cc   :  { %1869 = vrot.lane.b32.xlu1 %v7150_v21, %s9250_s1  ;;  %s7654_s3 = sld [smem:[#allocation4 + $0xd8]]  ;;  %9389 = sst [smem:[#allocation101_spill]] %s7680_s0 }
 0x1cd   :  { %1918 = vrot.lane.b32.xlu0 %v7140_v52, %s9252_s20  ;;  %s7794_s0 = sld [smem:[#allocation4 + $0xec]] }
 0x1cf   :  { %9305 = sst [smem:[#allocation55_spill]] %s7484_s13 }
 0x1d0   :  { %1967 = vrot.lane.b32.xlu1 %v7129_v46, %s9253_s19  ;;  %s7508_s13 = sld [smem:[#allocation4 + $0xb3]] }
 0x1d1   :  { %2016 = vrot.lane.b32.xlu0 %v7121_v26, %s9254_s23  ;;  %9303 = sst [smem:[#allocation13_spill]] %s7480_s12  ;;  %s7496_s12 = sld [smem:[#allocation4 + $0x9d]] }
 0x1d2   :  { %9378 = sst [smem:[#allocation97_spill]] %s7654_s3  ;;  %s7674_s3 = sld [smem:[#allocation4 + $0xd4]] }
 0x1d4   :  { %2058 = vrot.lane.b32.xlu1 %v7042_v49, %s9255_s9 }
 0x1d5   :  { %2065 = vrot.lane.b32.xlu0 %v7062_v6, %s9255_s9 }
 0x1d6   :  { %9313 = sst [smem:[#allocation67_spill]] %s7508_s13  ;;  %s7525_s13 = sld [smem:[#allocation4 + $0xbb]] }
 0x1d7   :  { %9308 = sst [smem:[#allocation14_spill]] %s7496_s12  ;;  %s7514_s12 = sld [smem:[#allocation4 + $0x9e]] }
 0x1d8   :  { %1827 = vrot.lane.b32.xlu1 %v7182_v50, %s9231_s22  ;;  %s7261_s22 = sld [smem:[#allocation4 + $0x68]] }
 0x1d9   :  { %1876 = vrot.lane.b32.xlu0 %v7164_v51, %s9250_s1 }
 0x1dc   :  { %1925 = vrot.lane.b32.xlu1 %v7150_v21, %s9252_s20  ;;  %9317 = sst [smem:[#allocation71_spill]] %s7525_s13  ;;  %s7779_s13 = sld [smem:[#allocation4 + $0xd6]] }
 0x1dd   :  { %1974 = vrot.lane.b32.xlu0 %v7140_v52, %s9253_s19  ;;  %9315 = sst [smem:[#allocation69_spill]] %s7514_s12  ;;  %s7534_s12 = sld [smem:[#allocation4 + $0x9f]] }
 0x1de   :  { %v1894_v54 = vstv %s7261_s22  ;;  %s7349_s22 = sld [smem:[#allocation4 + $0x88]] }
 0x1e0   :  { %2023 = vrot.lane.b32.xlu1 %v7129_v46, %s9254_s23 }
 0x1e1   :  { %2072 = vrot.lane.b32.xlu0 %v7121_v26, %s9255_s9 }
 0x1e3   :  { %9321 = sst [smem:[#allocation75_spill]] %s7534_s12  ;;  %s9325_s12 = sld [smem:[#allocation39_spill]] }
 0x1e4   :  { %2114 = vrot.lane.b32.xlu1 %v7042_v49, %s9256_s24  ;;  %9260 = sst [smem:[#allocation25_spill]] %s7349_s22 }
 0x1e5   :  { %2121 = vrot.lane.b32.xlu0 %v7062_v6, %s9256_s24 }
 0x1e8   :  { %1883 = vrot.lane.b32.xlu1 %v7182_v50, %s9250_s1  ;;  %s7303_s1 = sld [smem:[#allocation4 + $0x5c]] }
 0x1e9   :  { %1932 = vrot.lane.b32.xlu0 %v7164_v51, %s9252_s20 }
 0x1ec   :  { %1981 = vrot.lane.b32.xlu1 %v7150_v21, %s9253_s19 }
 0x1ed   :  { %2030 = vrot.lane.b32.xlu0 %v7140_v52, %s9254_s23 }
 0x1f0   :  { %2079 = vrot.lane.b32.xlu1 %v7129_v46, %s9255_s9 }
 0x1f1   :  { %2128 = vrot.lane.b32.xlu0 %v7121_v26, %s9256_s24 }
 0x1f4   :  { %2170 = vrot.lane.b32.xlu1 %v7042_v49, %s9257_s26 }
 0x1f5   :  { %2177 = vrot.lane.b32.xlu0 %v7062_v6, %s9257_s26  ;;  %v1762_v6 = vmul.f32 %v1761_v55, %v7121_v26 }
 0x1f8   :  { %1939 = vrot.lane.b32.xlu1 %v7182_v50, %s9252_s20  ;;  %s7310_s20 = sld [smem:[#allocation4 + $0x5d]] }
 0x1f9   :  { %1988 = vrot.lane.b32.xlu0 %v7164_v51, %s9253_s19 }
 0x1fc   :  { %2037 = vrot.lane.b32.xlu1 %v7150_v21, %s9254_s23 }
 0x1fd   :  { %2086 = vrot.lane.b32.xlu0 %v7140_v52, %s9255_s9 }
 0x200   :  { %2135 = vrot.lane.b32.xlu1 %v7129_v46, %s9256_s24 }
 0x201   :  { %2184 = vrot.lane.b32.xlu0 %v7121_v26, %s9257_s26 }
 0x202   :  { %v1779_v41 = vpop.permute.xlu0 %1778 }
 0x203   :  { %v1780_v17 = vmul.f32 %v1779_v41, %v6656_v4 }
 0x204   :  { %1995 = vrot.lane.b32.xlu1 %v7182_v50, %s9253_s19  ;;  %s7312_s19 = sld [smem:[#allocation4 + $0x64]] }
 0x205   :  { %2044 = vrot.lane.b32.xlu0 %v7164_v51, %s9254_s23  ;;  %v1783_v1 = vmul.f32 %v1782_v28, %v1780_v17  ;;  %v7345_v28 = vld [vmem:[%s9118_s15 + $0x10] sm:$0xff] }
 0x206   :  { %v1786_v20 = vpop.permute.xlu1 %1785 }
 0x207   :  { %v1784_v29 = vadd.f32 %v1783_v1, %v1756_v16  ;;  %v1787_v49 = vmul.f32 %v1786_v20, %v6656_v4 }
 0x208   :  { %2093 = vrot.lane.b32.xlu1 %v7150_v21, %s9255_s9 }
 0x209   :  { %2142 = vrot.lane.b32.xlu0 %v7140_v52, %s9256_s24  ;;  %v1790_v63 = vmul.f32 %v1789_v35, %v1787_v49  ;;  %v1957_v49 = vstv %s7308_s2  ;;  %s7382_s2 = sld [smem:[#allocation4 + $0x6e]] }
 0x20a   :  { %v1835_v44 = vpop.permute.xlu1 %1834 }
 0x20b   :  { %v1836_v43 = vmul.f32 %v6693_v38, %v1835_v44  ;;  %v7356_v44 = vld [vmem:[%s9118_s15 + $0x18] sm:$0xff] }
 0x20c   :  { %2191 = vrot.lane.b32.xlu1 %v7129_v46, %s9257_s26  ;;  %v1908_v46 = vstv %s7291_s11  ;;  %s7366_s11 = sld [smem:[#allocation4 + $0x74]] }
 0x20d   :  { %2051 = vrot.lane.b32.xlu0 %v7182_v50, %s9254_s23  ;;  %v1839_v33 = vmul.f32 %v1838_v9, %v1836_v43  ;;  %s7314_s23 = sld [smem:[#allocation4 + $0x6b]] }
 0x20f   :  { %v7247_v11 = vadd.f32 %v1839_v33, %v1784_v29  ;;  %v1810_v33 = vstv %s7303_s1  ;;  %s7380_s1 = sld [smem:[#allocation4 + $0x67]]  ;;  %9271 = sst [smem:[#allocation22_spill]] %s7382_s2 }
 0x210   :  { %2100 = vrot.lane.b32.xlu1 %v7164_v51, %s9255_s9 }
 0x211   :  { %2149 = vrot.lane.b32.xlu0 %v7150_v21, %s9256_s24 }
 0x212   :  { %9265 = sst [smem:[#allocation36_spill]] %s7366_s11 }
 0x214   :  { %2198 = vrot.lane.b32.xlu1 %v7140_v52, %s9257_s26 }
 0x215   :  { %2107 = vrot.lane.b32.xlu0 %v7182_v50, %s9255_s9  ;;  %s7318_s9 = sld [smem:[#allocation4 + $0x72]]  ;;  %9270 = sst [smem:[#allocation20_spill]] %s7380_s1 }
 0x216   :  { %v1793_v57 = vpop.permute.xlu0 %1792 }
 0x217   :  { %v1794_v18 = vmul.f32 %v1793_v57, %v6656_v4  ;;  %v1791_v4 = vadd.f32 %v1790_v63, %v1759_v23  ;;  %v1866_v23 = vstv %s7312_s19  ;;  %s7401_s19 = sld [smem:[#allocation4 + $0xa0]] }
 0x218   :  { %2156 = vrot.lane.b32.xlu1 %v7164_v51, %s9256_s24 }
 0x219   :  { %2205 = vrot.lane.b32.xlu0 %v7150_v21, %s9257_s26  ;;  %v1797_v48 = vmul.f32 %v1796_v56, %v1794_v18  ;;  %v1767_v18 = vstv %s7282_s10  ;;  %s7396_s10 = sld [smem:[#allocation4 + $0x98]] }
 0x21a   :  { %v1842_v24 = vpop.permute.xlu0 %1841  ;;  %v1768_v55 = vmul.f32 %v1767_v18, %v7140_v52 }
 0x21b   :  { %v1843_v34 = vmul.f32 %v6693_v38, %v1842_v24  ;;  %v1798_v60 = vadd.f32 %v1797_v48, %v1762_v6 }
 0x21c   :  { %2163 = vrot.lane.b32.xlu1 %v7182_v50, %s9256_s24  ;;  %s7320_s24 = sld [smem:[#allocation4 + $0x80]] }
 0x21d   :  { %2212 = vrot.lane.b32.xlu0 %v7164_v51, %s9257_s26  ;;  %v1846_v19 = vmul.f32 %v1845_v45, %v1843_v34  ;;  %v1800_v61 = vpop.permute.xlu1 %1799  ;;  %9278 = sst [smem:[#allocation28_spill]] %s7401_s19 }
 0x21e   :  { %v1849_v62 = vpop.permute.xlu0 %1848  ;;  %v1801_v53 = vmul.f32 %v7287_v39, %v1800_v61 }
 0x21f   :  { %v1847_v47 = vadd.f32 %v1846_v19, %v1791_v4  ;;  %v1850_v30 = vmul.f32 %v6693_v38, %v1849_v62  ;;  %v1803_v38 = vstv %s7263_s28  ;;  %s7351_s28 = sld [smem:[#allocation4 + $0x89]]  ;;  %v1915_v19 = vstv %s7314_s23  ;;  %9276 = sst [smem:[#allocation26_spill]] %s7396_s10 }
 0x220   :  { %2219 = vrot.lane.b32.xlu1 %v7182_v50, %s9257_s26  ;;  %v1804_v42 = vmul.f32 %v1803_v38, %v1801_v53  ;;  %s7372_s26 = sld [smem:[#allocation4 + $0x8a]]  ;;  %s7410_s23 = sld [smem:[#allocation4 + $0xb1]]  ;;  %v7425_v38 = vld [vmem:[%s9118_s15 + $0x28] sm:$0xff] }
 0x221   :  { %v1853_v2 = vmul.f32 %v1852_v32, %v1850_v30  ;;  %v1891_v26 = vpop.permute.xlu1 %1890  ;;  %s7412_s10 = sld [smem:[#allocation4 + $0xa9]]  ;;  %s7448_s15 = sld [smem:[#allocation4 + $0xaa]] }
 0x222   :  { %v1892_v58 = vmul.f32 %v6723_v22, %v1891_v26  ;;  %v1898_v59 = vpop.permute.xlu0 %1897  ;;  %v1805_v14 = vadd.f32 %v1804_v42, %v1765_v10 }
 0x223   :  { %v1854_v40 = vadd.f32 %v1853_v2, %v1798_v60  ;;  %v1899_v36 = vmul.f32 %v6723_v22, %v1898_v59  ;;  %v2006_v2 = vstv %s7320_s24  ;;  %s7433_s24 = sld [smem:[#allocation4 + $0x93]] }
 0x224   :  { %v1895_v8 = vmul.f32 %v1894_v54, %v1892_v58 }
 0x225   :  { %v1902_v37 = vmul.f32 %v1901_v0, %v1899_v36  ;;  %9261 = sst [smem:[#allocation21_spill]] %s7351_s28 }
 0x226   :  { %v1807_v31 = vpop.permute.xlu1 %1806  ;;  %v1896_v22 = vadd.f32 %v1895_v8, %v7247_v11  ;;  %v1856_v5 = vpop.permute.xlu0 %1855  ;;  %9267 = sst [smem:[#allocation19_spill]] %s7372_s26 }
 0x227   :  { %v1903_v25 = vadd.f32 %v1902_v37, %v1847_v47  ;;  %v1857_v15 = vmul.f32 %v7326_v12, %v1856_v5  ;;  %v1808_v43 = vmul.f32 %v7287_v39, %v1807_v31  ;;  %v1964_v47 = vstv %s7318_s9  ;;  %9282 = sst [smem:[#allocation35_spill]] %s7410_s23  ;;  %s7430_s23 = sld [smem:[#allocation4 + $0x8c]] }
 0x228   :  { %9283 = sst [smem:[#allocation37_spill]] %s7412_s10  ;;  %s7428_s10 = sld [smem:[#allocation4 + $0x85]] }
 0x229   :  { %v1860_v41 = vmul.f32 %v1859_v3, %v1857_v15  ;;  %v1811_v45 = vmul.f32 %v1810_v33, %v1808_v43  ;;  %9288 = sst [smem:[#allocation40_spill]] %s7433_s24  ;;  %s7441_s9 = sld [smem:[#allocation4 + $0x77]] }
 0x22a   :  { %v1905_v17 = vpop.permute.xlu1 %1904  ;;  %v1947_v1 = vpop.permute.xlu0 %1946  ;;  %9292 = sst [smem:[#allocation46_spill]] %s7448_s15  ;;  %s7450_s24 = sld [smem:[#allocation4 + $0x86]] }
 0x22b   :  { %v1906_v20 = vmul.f32 %v7345_v28, %v1905_v17  ;;  %v1861_v9 = vadd.f32 %v1860_v41, %v1805_v14  ;;  %v1948_v16 = vmul.f32 %v7356_v44, %v1947_v1  ;;  %v1812_v62 = vadd.f32 %v1811_v45, %v1768_v55  ;;  %s7466_s15 = sld [smem:[#allocation4 + $0x8e]] }
 0x22c   :  { %v1922_v17 = vstv %s7335_s14  ;;  %s7487_s14 = sld [smem:[#allocation4 + $0xa4]]  ;;  %v1824_v45 = vstv %s7331_s30  ;;  %s7546_s30 = sld [smem:[#allocation4 + $0xae]] }
 0x22d   :  { %v1909_v29 = vmul.f32 %v1908_v46, %v1906_v20  ;;  %v1951_v11 = vmul.f32 %v1950_v13, %v1948_v16  ;;  %9287 = sst [smem:[#allocation42_spill]] %s7430_s23  ;;  %v1971_v16 = vstv %s7338_s7  ;;  %s7502_s7 = sld [smem:[#allocation4 + $0xac]] }
 0x22e   :  { %v1954_v35 = vpop.permute.xlu1 %1953  ;;  %9286 = sst [smem:[#allocation52_spill]] %s7428_s10  ;;  %s7620_s23 = sld [smem:[#allocation4 + $0xc5]] }
 0x22f   :  { %v1910_v57 = vadd.f32 %v1909_v29, %v1854_v40  ;;  %v1955_v7 = vmul.f32 %v7356_v44, %v1954_v35  ;;  %v1814_v63 = vpop.permute.xlu0 %1813  ;;  %v1952_v56 = vadd.f32 %v1951_v11, %v1896_v22  ;;  %v1817_v40 = vstv %s7310_s20  ;;  %9291 = sst [smem:[#allocation43_spill]] %s7441_s9  ;;  %s7455_s20 = sld [smem:[#allocation4 + $0x8d]] }
 0x230   :  { %v1815_v0 = vmul.f32 %v7287_v39, %v1814_v63  ;;  %9293 = sst [smem:[#allocation48_spill]] %s7450_s24  ;;  %v1770_v22 = vstv %s7293_s18  ;;  %s7459_s9 = sld [smem:[#allocation4 + $0x9b]] }
 0x231   :  { %v1958_v24 = vmul.f32 %v1957_v49, %v1955_v7  ;;  %9299 = sst [smem:[#allocation57_spill]] %s7466_s15  ;;  %v1771_v14 = vmul.f32 %v1770_v22, %v7150_v21  ;;  %s7473_s18 = sld [smem:[#allocation4 + $0xab]]  ;;  %v1773_v7 = vstv %s7300_s27 }
 0x232   :  { %v1863_v34 = vpop.permute.xlu1 %1862  ;;  %v1818_v5 = vmul.f32 %v1817_v40, %v1815_v0  ;;  %s7482_s15 = sld [smem:[#allocation4 + $0xb8]]  ;;  %9306 = sst [smem:[#allocation61_spill]] %s7487_s14  ;;  %v2227_v40 = vstv %s7401_s19 }
 0x233   :  { %v1959_v4 = vadd.f32 %v1958_v24, %v1903_v25  ;;  %v1864_v48 = vmul.f32 %v7326_v12, %v1863_v34  ;;  %v1912_v61 = vpop.permute.xlu0 %1911  ;;  %v1873_v25 = vstv %s7333_s16  ;;  %s7478_s16 = sld [smem:[#allocation4 + $0x9c]]  ;;  %s7504_s14 = sld [smem:[#allocation4 + $0xba]]  ;;  %v7537_v24 = vmul.f32 %v1773_v7, %v7164_v51 }
 0x234   :  { %v1913_v32 = vmul.f32 %v7345_v28, %v1912_v61  ;;  %v1819_v1 = vadd.f32 %v1818_v5, %v1771_v14  ;;  %9310 = sst [smem:[#allocation64_spill]] %s7502_s7  ;;  %s7532_s27 = sld [smem:[#allocation4 + $0xa6]]  ;;  %v2062_v34 = vstv %s7349_s22  ;;  %v1831_v51 = vstv %s7359_s21 }
 0x235   :  { %v1867_v6 = vmul.f32 %v1866_v23, %v1864_v48  ;;  %9294 = sst [smem:[#allocation49_spill]] %s7455_s20  ;;  %v2020_v23 = vstv %s7340_s5  ;;  %v2069_v48 = vstv %s7351_s28  ;;  %s7556_s22 = sld [smem:[#allocation4 + $0xa7]] }
 0x236   :  { %v1916_v52 = vmul.f32 %v1915_v19, %v1913_v32  ;;  %v1961_v30 = vpop.permute.xlu1 %1960  ;;  %9296 = sst [smem:[#allocation53_spill]] %s7459_s9  ;;  %s7475_s9 = sld [smem:[#allocation4 + $0x95]]  ;;  %v1880_v19 = vstv %s7361_s6  ;;  %v1929_v32 = vstv %s7364_s25 }
 0x237   :  { %v1868_v60 = vadd.f32 %v1867_v6, %v1812_v62  ;;  %v1962_v53 = vmul.f32 %v7356_v44, %v1961_v30  ;;  %v2003_v54 = vpop.permute.xlu0 %2002  ;;  %9300 = sst [smem:[#allocation60_spill]] %s7473_s18  ;;  %s7489_s18 = sld [smem:[#allocation4 + $0x96]]  ;;  %v2027_v62 = vstv %s7370_s8  ;;  %v2076_v6 = vstv %s7372_s26 }
 0x238   :  { %v7420_v26 = vadd.f32 %v1916_v52, %v1861_v9  ;;  %v2004_v58 = vmul.f32 %v7425_v38, %v2003_v54  ;;  %9304 = sst [smem:[#allocation15_spill]] %s7482_s15  ;;  %s7512_s15 = sld [smem:[#allocation4 + $0x97]]  ;;  %v1887_v30 = vstv %s7380_s1 }
 0x239   :  { %v1965_v59 = vmul.f32 %v1964_v47, %v1962_v53  ;;  %9302 = sst [smem:[#allocation54_spill]] %s7478_s16  ;;  %s7566_s21 = sld [smem:[#allocation4 + $0xc1]]  ;;  %v2125_v47 = vstv %s7377_s17  ;;  %v1985_v53 = vstv %s9325_s12 }
 0x23a   :  { %v2007_v36 = vmul.f32 %v2006_v2, %v2004_v58  ;;  %v2010_v8 = vpop.permute.xlu1 %2009  ;;  %s7498_s16 = sld [smem:[#allocation4 + $0xb2]]  ;;  %9311 = sst [smem:[#allocation65_spill]] %s7504_s14 }
 0x23b   :  { %v7443_v42 = vadd.f32 %v1965_v59, %v1910_v57  ;;  %v2011_v37 = vmul.f32 %v7425_v38, %v2010_v8  ;;  %v7446_v31 = vpop.permute.xlu0 %1820  ;;  %s7527_s14 = sld [smem:[#allocation4 + $0xb4]]  ;;  %9320 = sst [smem:[#allocation74_spill]] %s7532_s27 }
 0x23c   :  { %v7453_v3 = vadd.f32 %v2007_v36, %v1952_v56  ;;  %9301 = sst [smem:[#allocation58_spill]] %s7475_s9  ;;  %v1776_v56 = vstv %s7305_s4  ;;  %s9322_s4 = sld [smem:[#allocation30_spill]]  ;;  %v2230_v36 = vstv %s7405_s29  ;;  %v1822_v14 = vmul.f32 %v7287_v39, %v7446_v31 }
 0x23d   :  { %v2014_v10 = vmul.f32 %v2013_v27, %v2011_v37  ;;  %9307 = sst [smem:[#allocation62_spill]] %s7489_s18  ;;  %s7506_s18 = sld [smem:[#allocation4 + $0xa5]]  ;;  %v7542_v55 = vmul.f32 %v1776_v56, %v7182_v50  ;;  %v1978_v50 = vstv %s7366_s11 }
 0x23e   :  { %v1870_v15 = vpop.permute.xlu1 %1869  ;;  %9314 = sst [smem:[#allocation68_spill]] %s7512_s15  ;;  %s7529_s15 = sld [smem:[#allocation4 + $0xbc]] }
 0x23f   :  { %v7469_v41 = vadd.f32 %v2014_v10, %v1959_v4  ;;  %v1871_v46 = vmul.f32 %v7326_v12, %v1870_v15  ;;  %v1919_v20 = vpop.permute.xlu0 %1918  ;;  %9323 = sst [smem:[#allocation76_spill]] %s7546_s30  ;;  %s7558_s27 = sld [smem:[#allocation4 + $0xbd]] }
 0x240   :  { %v1920_v13 = vmul.f32 %v7345_v28, %v1919_v20  ;;  %9309 = sst [smem:[#allocation63_spill]] %s7498_s16  ;;  %s9331_s30 = sld [smem:[#allocation26_spill]] }
 0x241   :  { %v1874_v9 = vmul.f32 %v1873_v25, %v1871_v46  ;;  %9318 = sst [smem:[#allocation72_spill]] %s7527_s14  ;;  %s9334_s25 = sld [smem:[#allocation29_spill]] }
 0x242   :  { %v1923_v21 = vmul.f32 %v1922_v17, %v1920_v13  ;;  %v1968_v43 = vpop.permute.xlu1 %1967  ;;  %9327 = sst [smem:[#allocation78_spill]] %s7556_s22  ;;  %v2118_v52 = vstv %s9322_s4  ;;  %s9335_s6 = sld [smem:[#allocation32_spill]] }
 0x243   :  { %v7491_v29 = vadd.f32 %v1874_v9, %v1819_v1  ;;  %v1969_v33 = vmul.f32 %v7356_v44, %v1968_v43  ;;  %v7494_v11 = vpop.permute.xlu0 %2016  ;;  %9312 = sst [smem:[#allocation66_spill]] %s7506_s18  ;;  %s7523_s18 = sld [smem:[#allocation4 + $0xad]] }
 0x244   :  { %v7500_v49 = vadd.f32 %v1923_v21, %v1868_v60  ;;  %9319 = sst [smem:[#allocation73_spill]] %s7529_s15  ;;  %v1936_v60 = vstv %s7382_s2  ;;  %s7572_s28 = sld [smem:[#allocation4 + $0xaf]] }
 0x245   :  { %v1972_v35 = vmul.f32 %v1971_v16, %v1969_v33  ;;  %s7548_s15 = sld [smem:[#allocation4 + $0xb5]]  ;;  %9329 = sst [smem:[#allocation79_spill]] %s7558_s27 }
 0x246   :  { %v7510_v57 = vpop.permute.xlu1 %2058  ;;  %9333 = sst [smem:[#allocation81_spill]] %s7566_s21  ;;  %s7574_s11 = sld [smem:[#allocation4 + $0xc2]]  ;;  %v2174_v0 = vstv %s9331_s30 }
 0x247   :  { %v7518_v63 = vadd.f32 %v1972_v35, %v7420_v26  ;;  %v7520_v18 = vpop.permute.xlu0 %2065  ;;  %s9340_s26 = sld [smem:[#allocation37_spill]]  ;;  %s7582_s4 = sld [smem:[#allocation4 + $0xb6]]  ;;  %v2181_v27 = vstv %s9334_s25 }
 0x248   :  { %s7584_s2 = sld [smem:[#allocation4 + $0xbe]]  ;;  %v2242_v8 = vstv %s9335_s6  ;;  %s7592_s5 = sld [smem:[#allocation4 + $0xc3]] }
 0x249   :  { %9316 = sst [smem:[#allocation70_spill]] %s7523_s18  ;;  %s9330_s18 = sld [smem:[#allocation27_spill]] }
 0x24a   :  { %v7544_v4 = vpop.permute.xlu1 %1827  ;;  %9336 = sst [smem:[#allocation82_spill]] %s7572_s28  ;;  %s7608_s6 = sld [smem:[#allocation4 + $0xc8]] }
 0x24b   :  { %9324 = sst [smem:[#allocation77_spill]] %s7548_s15  ;;  %v7553_v61 = vpop.permute.xlu0 %1876  ;;  %s7564_s15 = sld [smem:[#allocation4 + $0xc0]] }
 0x24c   :  { %9338 = sst [smem:[#allocation83_spill]] %s7574_s11  ;;  %s9345_s1 = sld [smem:[#allocation50_spill]] }
 0x24d   :  { %9342 = sst [smem:[#allocation84_spill]] %s7582_s4  ;;  %v2245_v5 = vstv %s9340_s26  ;;  %s7602_s11 = sld [smem:[#allocation4 + $0xbf]] }
 0x24e   :  { %v7576_v2 = vpop.permute.xlu1 %1925  ;;  %9343 = sst [smem:[#allocation85_spill]] %s7584_s2  ;;  %s7600_s2 = sld [smem:[#allocation4 + $0xc4]] }
 0x24f   :  { %v2132_v58 = vstv %s9330_s18  ;;  %v7586_v59 = vpop.permute.xlu0 %1974  ;;  %9346 = sst [smem:[#allocation86_spill]] %s7592_s5  ;;  %s7594_s18 = sld [smem:[#allocation4 + $0xb7]] }
 0x250   :  { %9353 = sst [smem:[#allocation89_spill]] %s7608_s6  ;;  %s7610_s22 = sld [smem:[#allocation4 + $0xc9]] }
 0x251   :  { %9332 = sst [smem:[#allocation80_spill]] %s7564_s15  ;;  %s7618_s26 = sld [smem:[#allocation4 + $0xca]] }
 0x252   :  { %v7612_v17 = vpop.permute.xlu1 %2023  ;;  %v2188_v20 = vstv %s9345_s1  ;;  %9361 = sst [smem:[#allocation92_spill]] %s7620_s23  ;;  %s7628_s1 = sld [smem:[#allocation4 + $0xcb]] }
 0x253   :  { %9351 = sst [smem:[#allocation88_spill]] %s7602_s11  ;;  %v7622_v21 = vpop.permute.xlu0 %2072  ;;  %s7630_s30 = sld [smem:[#allocation4 + $0xc6]] }
 0x254   :  { %s7636_s23 = sld [smem:[#allocation4 + $0xd0]]  ;;  %s7638_s11 = sld [smem:[#allocation4 + $0xcc]] }
 0x255   :  { %9348 = sst [smem:[#allocation87_spill]] %s7594_s18  ;;  %s7644_s29 = sld [smem:[#allocation4 + $0xd1]] }
 0x256   :  { %9355 = sst [smem:[#allocation90_spill]] %s7610_s22  ;;  %s7646_s19 = sld [smem:[#allocation4 + $0xd2]]  ;;  %v7648_v22 = vpop.permute.xlu1 %2114 }
 0x257   :  { %9359 = sst [smem:[#allocation91_spill]] %s7618_s26  ;;  %s7656_s10 = sld [smem:[#allocation4 + $0xd9]]  ;;  %v7658_v33 = vpop.permute.xlu0 %2121 }
 0x258   :  { %s7666_s24 = sld [smem:[#allocation4 + $0xc7]]  ;;  %s7678_s20 = sld [smem:[#allocation4 + $0xe0]] }
 0x259   :  { %s7688_s4 = sld [smem:[#allocation4 + $0xe2]]  ;;  %s7692_s12 = sld [smem:[#allocation4 + $0xcd]] }
 0x25a   :  { %9368 = sst [smem:[#allocation93_spill]] %s7636_s23  ;;  %v7684_v7 = vpop.permute.xlu1 %1883  ;;  %s7700_s14 = sld [smem:[#allocation4 + $0xdb]] }
 0x25b   :  { %9369 = sst [smem:[#allocation94_spill]] %s7638_s11  ;;  %v7694_v9 = vpop.permute.xlu0 %1932  ;;  %s7702_s17 = sld [smem:[#allocation4 + $0xce]] }
 0x25c   :  { %9372 = sst [smem:[#allocation95_spill]] %s7644_s29  ;;  %s7663_s29 = sld [smem:[#allocation4 + $0xda]] }
 0x25d   :  { %9374 = sst [smem:[#allocation96_spill]] %s7646_s19  ;;  %s7704_s26 = sld [smem:[#allocation4 + $0xe8]] }
 0x25e   :  { %9380 = sst [smem:[#allocation98_spill]] %s7656_s10  ;;  %s7672_s10 = sld [smem:[#allocation4 + $0xd3]]  ;;  %v7720_v16 = vpop.permute.xlu1 %1981 }
 0x25f   :  { %9388 = sst [smem:[#allocation100_spill]] %s7678_s20  ;;  %s7707_s16 = sld [smem:[#allocation4 + $0xdc]]  ;;  %v7737_v43 = vpop.permute.xlu0 %2030 }
 0x260   :  { %9393 = sst [smem:[#allocation102_spill]] %s7688_s4  ;;  %s9399_s27 = sld [smem:[#allocation92_spill]] }
 0x261   :  { %9396 = sst [smem:[#allocation103_spill]] %s7700_s14  ;;  %s7713_s28 = sld [smem:[#allocation4 + $0xe9]] }
 0x262   :  { %9383 = sst [smem:[#allocation99_spill]] %s7663_s29  ;;  %s7715_s7 = sld [smem:[#allocation4 + $0xea]] }
 0x263   :  { %9398 = sst [smem:[#allocation104_spill]] %s7704_s26  ;;  %s9404_s21 = sld [smem:[#allocation95_spill]]  ;;  %v2129_v10 = vpop.permute.xlu0 %2128 }
 0x264   :  { %s7724_s9 = sld [smem:[#allocation4 + $0xe3]]  ;;  %s7726_s6 = sld [smem:[#allocation4 + $0xe4]] }
 0x265   :  { %9400 = sst [smem:[#allocation92_spill]] %s7707_s16  ;;  %s9408_s5 = sld [smem:[#allocation113_spill]] }
 0x266   :  { %s7740_s25 = sld [smem:[#allocation4 + $0xf0]]  ;;  %s7742_s22 = sld [smem:[#allocation4 + $0xf1]] }
 0x267   :  { %9401 = sst [smem:[#allocation105_spill]] %s7713_s28  ;;  %s7763_s8 = sld [smem:[#allocation4 + $0xcf]]  ;;  %v2178_v56 = vpop.permute.xlu0 %2177 }
 0x268   :  { %9402 = sst [smem:[#allocation106_spill]] %s7715_s7  ;;  %s7751_s18 = sld [smem:[#allocation4 + $0xd5]] }
 0x269   :  { %s7776_s29 = sld [smem:[#allocation4 + $0xf2]]  ;;  %s9417_s7 = sld [smem:[#allocation106_spill]] }
 0x26a   :  { %9406 = sst [smem:[#allocation95_spill]] %s7724_s9  ;;  %s7796_s20 = sld [smem:[#allocation4 + $0xdd]]  ;;  %v2574_v13 = vstv %s7726_s6 }
 0x26b   :  { %9407 = sst [smem:[#allocation107_spill]] %s7726_s6  ;;  %v7733_v37 = vld [vmem:[%s9408_s5 + $0x30] sm:$0xff]  ;;  %v7756_v46 = vld [vmem:[%s9408_s5 + $0x38] sm:$0xff]  ;;  %s7786_s15 = sld [smem:[#allocation4 + $0xeb]] }
 0x26c   :  { %v2060_v25 = vmul.f32 %v7733_v37, %v7510_v57  ;;  %9410 = sst [smem:[#allocation108_spill]] %s7740_s25  ;;  %v2067_v1 = vmul.f32 %v7733_v37, %v7520_v18  ;;  %v2116_v35 = vmul.f32 %v7756_v46, %v7648_v22  ;;  %v2123_v15 = vmul.f32 %v7756_v46, %v7658_v33  ;;  %v7767_v57 = vpop.permute.xlu1 %2079  ;;  %s7812_s23 = sld [smem:[#allocation4 + $0xde]] }
 0x26d   :  { %9411 = sst [smem:[#allocation109_spill]] %s7742_s22  ;;  %s7818_s28 = sld [smem:[#allocation4 + $0xf3]] }
 0x26e   :  { %v2063_v22 = vmul.f32 %v2062_v34, %v2060_v25  ;;  %v2070_v26 = vmul.f32 %v2069_v48, %v2067_v1  ;;  %v2119_v25 = vmul.f32 %v2118_v52, %v2116_v35  ;;  %9420 = sst [smem:[#allocation30_spill]] %s7794_s0  ;;  %v2126_v31 = vmul.f32 %v2125_v47, %v2123_v15  ;;  %v7807_v52 = vld [vmem:[%s9408_s5 + $0x40] sm:$0xff]  ;;  %s7820_s14 = sld [smem:[#allocation4 + $0xf4]] }
 0x26f   :  { %9416 = sst [smem:[#allocation25_spill]] %s7776_s29  ;;  %v2480_v48 = vstv %s9417_s7  ;;  %v2525_v1 = vstv %s7724_s9  ;;  %v1825_v47 = vmul.f32 %v1824_v45, %v1822_v14  ;;  %v2709_v45 = vstv %s7763_s8  ;;  %s7830_s19 = sld [smem:[#allocation4 + $0xd7]] }
 0x270   :  { %v2171_v54 = vpop.permute.xlu1 %2170  ;;  %v2064_v34 = vadd.f32 %v2063_v22, %v7453_v3  ;;  %v2071_v15 = vadd.f32 %v2070_v26, %v7469_v41  ;;  %v2179_v3 = vmul.f32 %v7807_v52, %v2178_v56  ;;  %v2615_v22 = vstv %s7751_s18  ;;  %s7827_s5 = sld [smem:[#allocation4 + $0xe5]]  ;;  %s9441_s11 = sld [smem:[#allocation47_spill]] }
 0x271   :  { %9418 = sst [smem:[#allocation21_spill]] %s7786_s15  ;;  %v2172_v35 = vmul.f32 %v7807_v52, %v2171_v54  ;;  %v2018_v54 = vmul.f32 %v7425_v38, %v7494_v11  ;;  %v1829_v41 = vmul.f32 %v7287_v39, %v7544_v4  ;;  %v1878_v26 = vmul.f32 %v7326_v12, %v7553_v61  ;;  %s9442_s7 = sld [smem:[#allocation23_spill]] }
 0x272   :  { %v2120_v33 = vadd.f32 %v2119_v25, %v2064_v34  ;;  %v2127_v11 = vadd.f32 %v2126_v31, %v2071_v15  ;;  %v1927_v56 = vmul.f32 %v7345_v28, %v7576_v2  ;;  %v7840_v25 = vpop.permute.xlu0 %1988  ;;  %v2664_v4 = vstv %s7779_s13  ;;  %s9443_s4 = sld [smem:[#allocation41_spill]]  ;;  %s9444_s22 = sld [smem:[#allocation38_spill]] }
 0x273   :  { %9423 = sst [smem:[#allocation44_spill]] %s7818_s28  ;;  %v2175_v18 = vmul.f32 %v2174_v0, %v2172_v35  ;;  %v2182_v0 = vmul.f32 %v2181_v27, %v2179_v3  ;;  %v1826_v61 = vadd.f32 %v1825_v47, %v7537_v24  ;;  %v2074_v31 = vmul.f32 %v7733_v37, %v7622_v21  ;;  %s9445_s6 = sld [smem:[#allocation40_spill]] }
 0x274   :  { %9424 = sst [smem:[#allocation18_spill]] %s7820_s14  ;;  %v1940_v14 = vpop.permute.xlu1 %1939  ;;  %v2529_v35 = vstv %s7786_s15  ;;  %v2021_v2 = vmul.f32 %v2020_v23, %v2018_v54  ;;  %v2619_v15 = vstv %s7796_s20  ;;  %v1832_v3 = vmul.f32 %v1831_v51, %v1829_v41  ;;  %s9447_s25 = sld [smem:[#allocation46_spill]] }
 0x275   :  { %v2176_v34 = vadd.f32 %v2175_v18, %v2120_v33  ;;  %v2183_v27 = vadd.f32 %v2182_v0, %v2127_v11  ;;  %v2578_v33 = vstv %s7794_s0  ;;  %v1881_v24 = vmul.f32 %v1880_v19, %v1878_v26  ;;  %s9450_s26 = sld [smem:[#allocation45_spill]]  ;;  %s9452_s9 = sld [smem:[#allocation52_spill]] }
 0x276   :  { %v2130_v21 = vmul.f32 %v7756_v46, %v2129_v10  ;;  %v1930_v23 = vmul.f32 %v1929_v32, %v1927_v56  ;;  %v2087_v0 = vpop.permute.xlu0 %2086  ;;  %v2668_v51 = vstv %s7812_s23  ;;  %v2077_v19 = vmul.f32 %v2076_v6, %v2074_v31  ;;  %s9455_s16 = sld [smem:[#allocation42_spill]]  ;;  %s9492_s15 = sld [smem:[#allocation64_spill]] }
 0x277   :  { %v2228_v18 = vmul.f32 %v2227_v40, %v2176_v34  ;;  %v2243_v47 = vmul.f32 %v2242_v8, %v2183_v27  ;;  %v1976_v40 = vmul.f32 %v7356_v44, %v7586_v59  ;;  %v2533_v10 = vstv %s7818_s28  ;;  %s9488_s28 = sld [smem:[#allocation62_spill]]  ;;  %s9503_s29 = sld [smem:[#allocation66_spill]] }
 0x278   :  { %v2038_v11 = vpop.permute.xlu1 %2037  ;;  %v2582_v8 = vstv %s7820_s14  ;;  %v2022_v26 = vadd.f32 %v2021_v2, %v7443_v42  ;;  %v2623_v56 = vstv %s7827_s5  ;;  %v2713_v34 = vstv %s7830_s19  ;;  %s9487_s14 = sld [smem:[#allocation61_spill]]  ;;  %s9505_s0 = sld [smem:[#allocation68_spill]] }
 0x279   :  { %v7867_v54 = vadd.f32 %v2230_v36, %v2228_v18  ;;  %v7874_v41 = vadd.f32 %v2245_v5, %v2243_v47  ;;  %v1833_v59 = vadd.f32 %v1832_v3, %v7542_v55  ;;  %v1882_v36 = vadd.f32 %v1881_v24, %v1826_v61  ;;  %s9573_s8 = sld [smem:[#allocation98_spill]]  ;;  %s9580_s13 = sld [smem:[#allocation100_spill]] }
 0x27a   :  { %v2133_v27 = vmul.f32 %v2132_v58, %v2130_v21  ;;  %v1931_v6 = vadd.f32 %v1930_v23, %v7491_v29  ;;  %v1979_v5 = vmul.f32 %v1978_v50, %v1976_v40  ;;  %v2025_v42 = vmul.f32 %v7425_v38, %v7612_v17  ;;  %v2185_v2 = vpop.permute.xlu0 %2184  ;;  %s9582_s18 = sld [smem:[#allocation101_spill]]  ;;  %s9590_s20 = sld [smem:[#allocation104_spill]] }
 0x27b   :  { %v2233_v32 = vmul.f32 0.044715, %v7867_v54  ;;  %v2248_v18 = vmul.f32 0.044715, %v7874_v41  ;;  %v2078_v47 = vadd.f32 %v2077_v19, %v2022_v26  ;;  %v1885_v55 = vmul.f32 %v7326_v12, %v7684_v7  ;;  %s9591_s23 = sld [smem:[#allocation105_spill]]  ;;  %s9597_s5 = sld [smem:[#allocation108_spill]] }
 0x27c   :  { %v2136_v39 = vpop.permute.xlu1 %2135  ;;  %v2186_v61 = vmul.f32 %v7807_v52, %v2185_v2  ;;  %v1934_v29 = vmul.f32 %v7345_v28, %v7694_v9  ;;  %v1983_v50 = vmul.f32 %v7356_v44, %v7720_v16  ;;  %v2032_v17 = vmul.f32 %v7425_v38, %v7737_v43  ;;  %s8348_s19 = sld [smem:[#allocation4 + $0x10a]] }
 0x27d   :  { %v2234_v31 = vmul.f32 %v2233_v32, %v7867_v54  ;;  %v2249_v58 = vmul.f32 %v2248_v18, %v7874_v41  ;;  %v2081_v12 = vmul.f32 %v7733_v37, %v7767_v57  ;;  %v2134_v7 = vadd.f32 %v2133_v27, %v2078_v47 }
 0x27e   :  { %v2189_v9 = vmul.f32 %v2188_v20, %v2186_v61  ;;  %v1980_v16 = vadd.f32 %v1979_v5, %v7500_v49  ;;  %v2028_v43 = vmul.f32 %v2027_v62, %v2025_v42  ;;  %v1941_v40 = vmul.f32 %v7345_v28, %v1940_v14  ;;  %v2045_v19 = vpop.permute.xlu0 %2044 }
 0x27f   :  { %v2235_v3 = vmul.f32 %v2234_v31, %v7867_v54  ;;  %v2250_v24 = vmul.f32 %v2249_v58, %v7874_v41  ;;  %v1888_v57 = vmul.f32 %v1887_v30, %v1885_v55  ;;  %v2137_v32 = vmul.f32 %v7756_v46, %v2136_v39 }
 0x280   :  { %v1996_v21 = vpop.permute.xlu1 %1995  ;;  %v2190_v27 = vadd.f32 %v2189_v9, %v2134_v7  ;;  %v1937_v20 = vmul.f32 %v1936_v60, %v1934_v29  ;;  %v1986_v49 = vmul.f32 %v1985_v53, %v1983_v50  ;;  %v9446_v18 = vstv %s9441_s11  ;;  %s9456_s11 = sld [smem:[#allocation43_spill]] }
 0x281   :  { %v2236_v23 = vadd.f32 %v2235_v3, %v7867_v54  ;;  %v2251_v26 = vadd.f32 %v2250_v24, %v7874_v41  ;;  %v2035_v62 = vmul.f32 %v9446_v18, %v2032_v17  ;;  %v9448_v42 = vstv %s9442_s7  ;;  %s9457_s7 = sld [smem:[#allocation53_spill]] }
 0x282   :  { %v2084_v28 = vmul.f32 %v9448_v42, %v2081_v12  ;;  %v1990_v30 = vmul.f32 %v7356_v44, %v7840_v25  ;;  %v9449_v31 = vstv %s9443_s4  ;;  %v2029_v39 = vadd.f32 %v2028_v43, %v7518_v63  ;;  %v2143_v58 = vpop.permute.xlu0 %2142  ;;  %s9460_s4 = sld [smem:[#allocation48_spill]] }
 0x283   :  { %v2237_v5 = vmul.f32 0.7978846, %v2236_v23  ;;  %v2252_v14 = vmul.f32 0.7978846, %v2251_v26  ;;  %v2258_v2 = vmul.f32 %v9449_v31, %v2190_v27  ;;  %v9451_v60 = vstv %s9444_s22  ;;  %s9463_s22 = sld [smem:[#allocation49_spill]] }
 0x284   :  { %v2094_v47 = vpop.permute.xlu1 %2093  ;;  %v1944_v55 = vmul.f32 %v9451_v60, %v1941_v40  ;;  %v2039_v53 = vmul.f32 %v7425_v38, %v2038_v11  ;;  %v2088_v61 = vmul.f32 %v7733_v37, %v2087_v0  ;;  %v9453_v29 = vstv %s9445_s6  ;;  %s9465_s6 = sld [smem:[#allocation51_spill]] }
 0x285   :  { %5298 = vtanh.f32 %v2237_v5  ;;  %v2140_v50 = vmul.f32 %v9453_v29, %v2137_v32  ;;  %v9454_v17 = vstv %s9447_s25  ;;  %v1889_v3 = vadd.f32 %v1888_v57, %v1833_v59  ;;  %s9466_s25 = sld [smem:[#allocation56_spill]] }
 0x286   :  { %5300 = vtanh.f32 %v2252_v14  ;;  %v7938_v25 = vadd.f32 %v9454_v17, %v2258_v2  ;;  %v1938_v12 = vadd.f32 %v1937_v20, %v1882_v36  ;;  %v1987_v7 = vadd.f32 %v1986_v49, %v1931_v6  ;;  %v2052_v36 = vpop.permute.xlu0 %2051 }
 0x287   :  { %v1997_v63 = vmul.f32 %v7356_v44, %v1996_v21  ;;  %v2036_v24 = vadd.f32 %v2035_v62, %v1980_v16  ;;  %v2085_v11 = vadd.f32 %v2084_v28, %v2029_v39  ;;  %v9458_v9 = vstv %s9450_s26  ;;  %s9467_s26 = sld [smem:[#allocation59_spill]] }
 0x288   :  { %v1993_v43 = vmul.f32 %v9458_v9, %v1990_v30  ;;  %v2263_v23 = vmul.f32 0.044715, %v7938_v25  ;;  %v2192_v0 = vpop.permute.xlu1 %2191  ;;  %v1945_v40 = vadd.f32 %v1944_v55, %v1889_v3  ;;  %v9459_v26 = vstv %s9452_s9  ;;  %s9469_s9 = sld [smem:[#allocation57_spill]] }
 0x289   :  { %v2042_v32 = vmul.f32 %v9459_v26, %v2039_v53  ;;  %v2046_v27 = vmul.f32 %v7425_v38, %v2045_v19  ;;  %v2193_v59 = vmul.f32 %v7807_v52, %v2192_v0  ;;  %v9461_v6 = vstv %s9455_s16  ;;  %s9470_s16 = sld [smem:[#allocation58_spill]] }
 0x28a   :  { %v2091_v57 = vmul.f32 %v9461_v6, %v2088_v61  ;;  %v2141_v44 = vadd.f32 %v2140_v50, %v2085_v11  ;;  %v2264_v21 = vmul.f32 %v2263_v23, %v7938_v25  ;;  %v2095_v16 = vmul.f32 %v7733_v37, %v2094_v47 }
 0x28b   :  { %v9462_v20 = vstv %s9456_s11  ;;  %v2144_v18 = vmul.f32 %v7756_v46, %v2143_v58  ;;  %v9464_v62 = vstv %s9457_s7  ;;  %v2053_v19 = vmul.f32 %v7425_v38, %v2052_v36  ;;  %v2150_v38 = vpop.permute.xlu0 %2149  ;;  %s9472_s11 = sld [smem:[#allocation60_spill]]  ;;  %s9477_s7 = sld [smem:[#allocation54_spill]] }
 0x28c   :  { %v2000_v49 = vmul.f32 %v9462_v20, %v1997_v63  ;;  %v2196_v5 = vmul.f32 %v9464_v62, %v2193_v59  ;;  %v2232_v42 = vmul.f32 0.5, %v7867_v54  ;;  %v2247_v28 = vmul.f32 0.5, %v7874_v41  ;;  %v2101_v31 = vpop.permute.xlu1 %2100 }
 0x28d   :  { %v1994_v14 = vadd.f32 %v1993_v43, %v1938_v12  ;;  %v2265_v30 = vmul.f32 %v2264_v21, %v7938_v25  ;;  %v2043_v2 = vadd.f32 %v2042_v32, %v1987_v7  ;;  %v9468_v47 = vstv %s9460_s4  ;;  %s9480_s4 = sld [smem:[#allocation34_spill]] }
 0x28e   :  { %v2049_v39 = vmul.f32 %v9468_v47, %v2046_v27  ;;  %v2197_v60 = vadd.f32 %v2196_v5, %v2141_v44  ;;  %v2102_v55 = vmul.f32 %v7733_v37, %v2101_v31  ;;  %v2092_v53 = vadd.f32 %v2091_v57, %v2036_v24 }
 0x28f   :  { %v2266_v54 = vadd.f32 %v2265_v30, %v7938_v25  ;;  %v9471_v58 = vstv %s9463_s22  ;;  %v2151_v61 = vmul.f32 %v7756_v46, %v2150_v38  ;;  %v5299_v29 = vpop.eup %5298  ;;  %v2001_v50 = vadd.f32 %v2000_v49, %v1945_v40  ;;  %v2108_v44 = vpop.permute.xlu0 %2107  ;;  %s9481_s22 = sld [smem:[#allocation35_spill]] }
 0x290   :  { %v2098_v41 = vmul.f32 %v9471_v58, %v2095_v16  ;;  %v9473_v17 = vstv %s9465_s6  ;;  %v9474_v12 = vstv %s9466_s25  ;;  %v9475_v63 = vstv %s9467_s26  ;;  %v5301_v9 = vpop.eup %5300  ;;  %v2199_v27 = vpop.permute.xlu1 %2198  ;;  %s9483_s6 = sld [smem:[#allocation13_spill]]  ;;  %s9490_s25 = sld [smem:[#allocation63_spill]] }
 0x291   :  { %v2147_v3 = vmul.f32 %v9473_v17, %v2144_v18  ;;  %v2273_v7 = vmul.f32 %v9474_v12, %v2197_v60  ;;  %v2056_v11 = vmul.f32 %v9475_v63, %v2053_v19  ;;  %v2239_v43 = vadd.f32 1.0, %v5299_v29  ;;  %s9491_s26 = sld [smem:[#allocation65_spill]] }
 0x292   :  { %v2267_v23 = vmul.f32 0.7978846, %v2266_v54  ;;  %v9476_v0 = vstv %s9469_s9  ;;  %v9478_v26 = vstv %s9470_s16  ;;  %v2254_v59 = vadd.f32 1.0, %v5301_v9  ;;  %s9484_s9 = sld [smem:[#allocation110_spill]] }
 0x293   :  { %v2105_v24 = vmul.f32 %v9476_v0, %v2102_v55  ;;  %v2154_v32 = vmul.f32 %v9478_v26, %v2151_v61  ;;  %v2050_v36 = vadd.f32 %v2049_v39, %v1994_v14  ;;  %v9479_v6 = vstv %s9472_s11  ;;  %s9485_s16 = sld [smem:[#allocation15_spill]]  ;;  %v2206_v38 = vpop.permute.xlu0 %2205 }
 0x294   :  { %v7980_v57 = vadd.f32 %v9479_v6, %v2273_v7  ;;  %v2200_v40 = vmul.f32 %v7807_v52, %v2199_v27  ;;  %v2240_v21 = vmul.f32 %v2239_v43, %v2232_v42  ;;  %5302 = vtanh.f32 %v2267_v23  ;;  %s9486_s11 = sld [smem:[#allocation55_spill]] }
 0x295   :  { %v2099_v16 = vadd.f32 %v2098_v41, %v2043_v2  ;;  %v2109_v20 = vmul.f32 %v7733_v37, %v2108_v44  ;;  %v2255_v49 = vmul.f32 %v2254_v59, %v2247_v28  ;;  %v2148_v18 = vadd.f32 %v2147_v3, %v2092_v53  ;;  %v2157_v28 = vpop.permute.xlu1 %2156 }
 0x296   :  { %v2278_v62 = vmul.f32 0.044715, %v7980_v57  ;;  %v9482_v5 = vstv %s9477_s7  ;;  %v2057_v42 = vadd.f32 %v2056_v11, %v2001_v50  ;;  %v2106_v31 = vadd.f32 %v2105_v24, %v2050_v36  ;;  %s9489_s7 = sld [smem:[#allocation14_spill]] }
 0x297   :  { %v2203_v19 = vmul.f32 %v9482_v5, %v2200_v40  ;;  %v2155_v37 = vadd.f32 %v2154_v32, %v2099_v16  ;;  %v2158_v55 = vmul.f32 %v7756_v46, %v2157_v28  ;;  %v9493_v53 = vstv %s9480_s4  ;;  %v2213_v16 = vpop.permute.xlu0 %2212  ;;  %s9508_s4 = sld [smem:[#allocation70_spill]] }
 0x298   :  { %v5358_v14 = vld [vmem:[%s9484_s9] sm:$0xff]  ;;  %v5359_v2 = vld [vmem:[%s9484_s9 + $0x8] sm:$0xff]  ;;  %v2279_v39 = vmul.f32 %v2278_v62, %v7980_v57  ;;  %v9494_v58 = vstv %s9481_s22  ;;  %v9495_v61 = vstv %s9483_s6  ;;  %v2207_v50 = vmul.f32 %v7807_v52, %v2206_v38  ;;  %s8035_s22 = sld [smem:[#allocation4 + $0xe6]]  ;;  %s9511_s6 = sld [smem:[#allocation72_spill]] }
 0x299   :  { %v7990_v30 = vadd.f32 %v5358_v14, %v2240_v21  ;;  %v7995_v47 = vadd.f32 %v5359_v2, %v2255_v49  ;;  %v2204_v60 = vadd.f32 %v2203_v19, %v2148_v18  ;;  %v2112_v29 = vmul.f32 %v9495_v61, %v2109_v20  ;;  %v2164_v26 = vpop.permute.xlu1 %2163 }
 0x29a   :  { %v9496_v17 = vstv %s9485_s16  ;;  %v9497_v12 = vstv %s9486_s11  ;;  %v2280_v63 = vmul.f32 %v2279_v39, %v7980_v57  ;;  %v9498_v11 = vstv %s9487_s14  ;;  %s9506_s14 = sld [smem:[#allocation69_spill]]  ;;  %s9513_s16 = sld [smem:[#allocation73_spill]] }
 0x29b   :  { %v2356_v54 = vmul.f32 %v9493_v53, %v7990_v30  ;;  %v2405_v41 = vmul.f32 %v9494_v58, %v7990_v30  ;;  %v2359_v3 = vmul.f32 %v9496_v17, %v7995_v47  ;;  %v2408_v7 = vmul.f32 %v9497_v12, %v7995_v47  ;;  %s9515_s11 = sld [smem:[#allocation74_spill]] }
 0x29c   :  { %v2288_v9 = vmul.f32 %v9498_v11, %v2204_v60  ;;  %v9499_v43 = vstv %s9488_s28  ;;  %v9500_v0 = vstv %s9489_s7  ;;  %v9501_v32 = vstv %s9490_s25  ;;  %s9507_s28 = sld [smem:[#allocation67_spill]]  ;;  %s9520_s25 = sld [smem:[#allocation76_spill]] }
 0x29d   :  { %v2161_v23 = vmul.f32 %v9499_v43, %v2158_v55  ;;  %v2210_v24 = vmul.f32 %v9500_v0, %v2207_v50  ;;  %v2454_v27 = vmul.f32 %v9501_v32, %v7990_v30  ;;  %v9502_v59 = vstv %s9491_s26  ;;  %v2220_v53 = vpop.permute.xlu1 %2219  ;;  %s9516_s7 = sld [smem:[#allocation75_spill]]  ;;  %s9523_s26 = sld [smem:[#allocation80_spill]] }
 0x29e   :  { %v2457_v36 = vmul.f32 %v9502_v59, %v7995_v47  ;;  %v2281_v6 = vadd.f32 %v2280_v63, %v7980_v57  ;;  %v9504_v40 = vstv %s9492_s15  ;;  %v2165_v21 = vmul.f32 %v7756_v46, %v2164_v26  ;;  %s9509_s15 = sld [smem:[#allocation71_spill]]  ;;  %v5303_v39 = vpop.eup %5302  ;;  %v5360_v59 = vld [vmem:[%s9484_s9 + $0x10] sm:$0xff] }
 0x29f   :  { %v8030_v44 = vadd.f32 %v9504_v40, %v2288_v9  ;;  %v2360_v20 = vadd.f32 %v2359_v3, %v2356_v54  ;;  %v2262_v49 = vmul.f32 0.5, %v7938_v25  ;;  %v2211_v18 = vadd.f32 %v2210_v24, %v2155_v37 }
 0x2a0   :  { %v2214_v62 = vmul.f32 %v7807_v52, %v2213_v16  ;;  %v2409_v5 = vadd.f32 %v2408_v7, %v2405_v41  ;;  %v2282_v19 = vmul.f32 0.7978846, %v2281_v6  ;;  %v2113_v28 = vadd.f32 %v2112_v29, %v2057_v42 }
 0x2a1   :  { %v2293_v14 = vmul.f32 0.044715, %v8030_v44  ;;  %v2162_v2 = vadd.f32 %v2161_v23, %v2106_v31  ;;  %v9510_v46 = vstv %s9503_s29  ;;  %v9512_v55 = vstv %s9505_s0  ;;  %s9524_s29 = sld [smem:[#allocation81_spill]]  ;;  %s9525_s0 = sld [smem:[#allocation83_spill]] }
 0x2a2   :  { %v2303_v60 = vmul.f32 %v9510_v46, %v2211_v18  ;;  %v2168_v25 = vmul.f32 %v9512_v55, %v2165_v21  ;;  %v9514_v37 = vstv %s9506_s14  ;;  %v2458_v54 = vadd.f32 %v2457_v36, %v2454_v27  ;;  %s9551_s14 = sld [smem:[#allocation90_spill]] }
 0x2a3   :  { %v2217_v38 = vmul.f32 %v9514_v37, %v2214_v62  ;;  %v2269_v58 = vadd.f32 1.0, %v5303_v39  ;;  %5304 = vtanh.f32 %v2282_v19  ;;  %v2294_v41 = vmul.f32 %v2293_v14, %v8030_v44 }
 0x2a4   :  { %v9517_v42 = vstv %s9507_s28  ;;  %v9518_v61 = vstv %s9508_s4  ;;  %v2221_v17 = vmul.f32 %v7807_v52, %v2220_v53  ;;  %v9519_v3 = vstv %s9509_s15  ;;  %s9528_s4 = sld [smem:[#allocation78_spill]]  ;;  %s9529_s15 = sld [smem:[#allocation77_spill]] }
 0x2a5   :  { %v2503_v31 = vmul.f32 %v9517_v42, %v7990_v30  ;;  %v8050_v29 = vadd.f32 %v9518_v61, %v2303_v60  ;;  %v2218_v50 = vadd.f32 %v2217_v38, %v2162_v2  ;;  %v2506_v12 = vmul.f32 %v9519_v3, %v7995_v47  ;;  %s9552_s28 = sld [smem:[#allocation91_spill]] }
 0x2a6   :  { %v2270_v7 = vmul.f32 %v2269_v58, %v2262_v49  ;;  %v2295_v63 = vmul.f32 %v2294_v41, %v8030_v44  ;;  %v9521_v11 = vstv %s9511_s6  ;;  %v9522_v43 = vstv %s9513_s16  ;;  %s9531_s6 = sld [smem:[#allocation82_spill]]  ;;  %s9533_s16 = sld [smem:[#allocation86_spill]] }
 0x2a7   :  { %v2552_v9 = vmul.f32 %v9521_v11, %v7990_v30  ;;  %v2555_v23 = vmul.f32 %v9522_v43, %v7995_v47  ;;  %v2308_v0 = vmul.f32 0.044715, %v8050_v29  ;;  %v2169_v52 = vadd.f32 %v2168_v25, %v2113_v28 }
 0x2a8   :  { %v9526_v24 = vstv %s9515_s11  ;;  %v9527_v32 = vstv %s9516_s7  ;;  %v2348_v36 = vadd.f32 %v5360_v59, %v2270_v7  ;;  %v2296_v6 = vadd.f32 %v2295_v63, %v8030_v44  ;;  %s8084_s11 = sld [smem:[#allocation4 + $0xed]]  ;;  %s9536_s7 = sld [smem:[#allocation79_spill]] }
 0x2a9   :  { %v2318_v26 = vmul.f32 %v9526_v24, %v2218_v50  ;;  %v2224_v27 = vmul.f32 %v9527_v32, %v2221_v17  ;;  %v2507_v40 = vadd.f32 %v2506_v12, %v2503_v31  ;;  %v2556_v21 = vadd.f32 %v2555_v23, %v2552_v9 }
 0x2aa   :  { %v2309_v16 = vmul.f32 %v2308_v0, %v8050_v29  ;;  %v9530_v49 = vstv %s9520_s25  ;;  %v2672_v19 = vstv %s8035_s22  ;;  %v2297_v14 = vmul.f32 0.7978846, %v2296_v6  ;;  %s9539_s25 = sld [smem:[#allocation84_spill]]  ;;  %s9599_s22 = sld [smem:[#allocation25_spill]] }
 0x2ab   :  { %v8075_v18 = vadd.f32 %v9530_v49, %v2318_v26  ;;  %v2225_v62 = vadd.f32 %v2224_v27, %v2169_v52  ;;  %v9532_v28 = vstv %s9523_s26  ;;  %v9534_v39 = vstv %s9524_s29  ;;  %s9542_s26 = sld [smem:[#allocation85_spill]]  ;;  %s8118_s29 = sld [smem:[#allocation4 + $0xdf]] }
 0x2ac   :  { %v2363_v2 = vmul.f32 %v9532_v28, %v2348_v36  ;;  %v2412_v46 = vmul.f32 %v9534_v39, %v2348_v36  ;;  %v9535_v60 = vstv %s9525_s0  ;;  %v2310_v25 = vmul.f32 %v2309_v16, %v8050_v29  ;;  %s9550_s0 = sld [smem:[#allocation89_spill]] }
 0x2ad   :  { %v2461_v55 = vmul.f32 %v9535_v60, %v2348_v36  ;;  %v2323_v37 = vmul.f32 0.044715, %v8075_v18  ;;  %v9537_v38 = vstv %s9528_s4  ;;  %v9538_v58 = vstv %s9529_s15  ;;  %v5305_v11 = vpop.eup %5304  ;;  %s8123_s4 = sld [smem:[#allocation4 + $0xf5]]  ;;  %s8125_s15 = sld [smem:[#allocation4 + $0xee]] }
 0x2ae   :  { %v2333_v53 = vmul.f32 %v9537_v38, %v2225_v62  ;;  %v2601_v41 = vmul.f32 %v9538_v58, %v7990_v30  ;;  %5306 = vtanh.f32 %v2297_v14  ;;  %v2364_v42 = vadd.f32 %v2363_v2, %v2360_v20 }
 0x2af   :  { %v2413_v31 = vadd.f32 %v2412_v46, %v2409_v5  ;;  %v2462_v61 = vadd.f32 %v2461_v55, %v2458_v54  ;;  %v2311_v50 = vadd.f32 %v2310_v25, %v8050_v29  ;;  %v2324_v17 = vmul.f32 %v2323_v37, %v8075_v18  ;;  %v5361_v46 = vld [vmem:[%s9484_s9 + $0x18] sm:$0xff] }
 0x2b0   :  { %v9540_v3 = vstv %s9531_s6  ;;  %v9541_v7 = vstv %s9533_s16  ;;  %v2277_v9 = vmul.f32 0.5, %v7980_v57  ;;  %v9543_v43 = vstv %s7600_s2  ;;  %s9548_s2 = sld [smem:[#allocation87_spill]]  ;;  %s8369_s16 = sld [smem:[#allocation4 + $0xff]] }
 0x2b1   :  { %v8097_v12 = vadd.f32 %v9540_v3, %v2333_v53  ;;  %v2510_v63 = vmul.f32 %v9541_v7, %v2348_v36  ;;  %v2559_v23 = vmul.f32 %v9543_v43, %v2348_v36  ;;  %v9544_v0 = vstv %s9536_s7  ;;  %s9553_s7 = sld [smem:[#allocation94_spill]]  ;;  %s8359_s6 = sld [smem:[#allocation4 + $0x10b]] }
 0x2b2   :  { %v2604_v20 = vmul.f32 %v9544_v0, %v7995_v47  ;;  %v9545_v5 = vstv %s9399_s27  ;;  %v2284_v52 = vadd.f32 1.0, %v5305_v11  ;;  %v2312_v24 = vmul.f32 0.7978846, %v2311_v50  ;;  %s9549_s27 = sld [smem:[#allocation88_spill]] }
 0x2b3   :  { %v2608_v54 = vmul.f32 %v9545_v5, %v2348_v36  ;;  %v2325_v26 = vmul.f32 %v2324_v17, %v8075_v18  ;;  %v9546_v32 = vstv %s9539_s25  ;;  %v2338_v59 = vmul.f32 0.044715, %v8097_v12  ;;  %s8132_s25 = sld [smem:[#allocation4 + $0xe7]] }
 0x2b4   :  { %v2650_v27 = vmul.f32 %v9546_v32, %v7990_v30  ;;  %v2511_v6 = vadd.f32 %v2510_v63, %v2507_v40  ;;  %v2560_v16 = vadd.f32 %v2559_v23, %v2556_v21  ;;  %v2605_v57 = vadd.f32 %v2604_v20, %v2601_v41 }
 0x2b5   :  { %v2285_v49 = vmul.f32 %v2284_v52, %v2277_v9  ;;  %5308 = vtanh.f32 %v2312_v24  ;;  %v2326_v62 = vadd.f32 %v2325_v26, %v8075_v18  ;;  %v9547_v14 = vstv %s9542_s26  ;;  %s9574_s26 = sld [smem:[#allocation99_spill]] }
 0x2b6   :  { %v2653_v28 = vmul.f32 %v9547_v14, %v7995_v47  ;;  %v2292_v2 = vmul.f32 0.5, %v8030_v44  ;;  %v2339_v39 = vmul.f32 %v2338_v59, %v8097_v12  ;;  %v2609_v40 = vadd.f32 %v2608_v54, %v2605_v57 }
 0x2b7   :  { %v2627_v21 = vstv %s8084_s11  ;;  %v2349_v60 = vadd.f32 %v5361_v46, %v2285_v49  ;;  %v2327_v55 = vmul.f32 0.7978846, %v2326_v62  ;;  %v9554_v25 = vstv %s7630_s30  ;;  %s9565_s30 = sld [smem:[#allocation93_spill]]  ;;  %s8296_s11 = sld [smem:[#allocation4 + $0xf8]] }
 0x2b8   :  { %v2654_v44 = vadd.f32 %v2653_v28, %v2650_v27  ;;  %v2657_v37 = vmul.f32 %v9554_v25, %v2348_v36  ;;  %v2340_v38 = vmul.f32 %v2339_v39, %v8097_v12  ;;  %v9555_v53 = vstv %s9548_s2  ;;  %v5307_v0 = vpop.eup %5306  ;;  %s8317_s2 = sld [smem:[#allocation4 + $0xfb]] }
 0x2b9   :  { %v2699_v58 = vmul.f32 %v9555_v53, %v7990_v30  ;;  %v9556_v41 = vstv %s9549_s27  ;;  %v9557_v17 = vstv %s7666_s24  ;;  %5310 = vtanh.f32 %v2327_v55  ;;  %s9576_s27 = sld [smem:[#allocation92_spill]]  ;;  %s4955_s24 = sld [smem:[#allocation4 + $0x10f]] }
 0x2ba   :  { %v2702_v50 = vmul.f32 %v9556_v41, %v7995_v47  ;;  %v2706_v3 = vmul.f32 %v9557_v17, %v2348_v36  ;;  %v9558_v7 = vstv %s9550_s0  ;;  %v9559_v11 = vstv %s9551_s14  ;;  %s9584_s0 = sld [smem:[#allocation102_spill]]  ;;  %s8334_s14 = sld [smem:[#allocation4 + $0x109]] }
 0x2bb   :  { %v2367_v63 = vmul.f32 %v9558_v7, %v2349_v60  ;;  %v2416_v9 = vmul.f32 %v9559_v11, %v2349_v60  ;;  %v9560_v43 = vstv %s9552_s28  ;;  %v2341_v20 = vadd.f32 %v2340_v38, %v8097_v12  ;;  %s8356_s28 = sld [smem:[#allocation4 + $0x105]] }
 0x2bc   :  { %v2465_v23 = vmul.f32 %v9560_v43, %v2349_v60  ;;  %v9561_v5 = vstv %s7628_s1  ;;  %v9562_v52 = vstv %s9553_s7  ;;  %v9563_v24 = vstv %s7692_s12  ;;  %s9566_s1 = sld [smem:[#allocation96_spill]]  ;;  %s8371_s7 = sld [smem:[#allocation4 + $0x10d]] }
 0x2bd   :  { %v2514_v54 = vmul.f32 %v9561_v5, %v2349_v60  ;;  %v2563_v30 = vmul.f32 %v9562_v52, %v2349_v60  ;;  %v2612_v47 = vmul.f32 %v9563_v24, %v2349_v60  ;;  %v2299_v36 = vadd.f32 1.0, %v5307_v0  ;;  %v5363_v52 = vld [vmem:[%s9484_s9 + $0x28] sm:$0xff]  ;;  %s9605_s12 = sld [smem:[#allocation111_spill]] }
 0x2be   :  { %v2368_v26 = vadd.f32 %v2367_v63, %v2364_v42  ;;  %v2417_v32 = vadd.f32 %v2416_v9, %v2413_v31  ;;  %v2466_v27 = vadd.f32 %v2465_v23, %v2462_v61  ;;  %v2342_v59 = vmul.f32 0.7978846, %v2341_v20 }
 0x2bf   :  { %v2515_v57 = vadd.f32 %v2514_v54, %v2511_v6  ;;  %v2564_v49 = vadd.f32 %v2563_v30, %v2560_v16  ;;  %v2613_v62 = vadd.f32 %v2612_v47, %v2609_v40  ;;  %v2300_v14 = vmul.f32 %v2299_v36, %v2292_v2  ;;  %v5309_v61 = vpop.eup %5308  ;;  %v5362_v6 = vld [vmem:[%s9484_s9 + $0x20] sm:$0xff] }
 0x2c0   :  { %v2658_v28 = vadd.f32 %v2657_v37, %v2654_v44  ;;  %v9564_v39 = vstv %s7702_s17  ;;  %v2703_v55 = vadd.f32 %v2702_v50, %v2699_v58  ;;  %5312 = vtanh.f32 %v2342_v59  ;;  %s9572_s17 = sld [smem:[#allocation97_spill]] }
 0x2c1   :  { %v2661_v46 = vmul.f32 %v9564_v39, %v2349_v60  ;;  %v2631_v25 = vstv %s8123_s4  ;;  %v2676_v42 = vstv %s8125_s15  ;;  %v2717_v31 = vstv %s8118_s29  ;;  %s8298_s4 = sld [smem:[#allocation4 + $0xf9]]  ;;  %s8304_s15 = sld [smem:[#allocation4 + $0x100]] }
 0x2c2   :  { %v2350_v16 = vadd.f32 %v5362_v6, %v2300_v14  ;;  %v2707_v40 = vadd.f32 %v2706_v3, %v2703_v55  ;;  %v2721_v44 = vstv %s8132_s25  ;;  %v2307_v37 = vmul.f32 0.5, %v8050_v29  ;;  %s8244_s25 = sld [smem:[#allocation4 + $0xef]] }
 0x2c3   :  { %v2662_v2 = vadd.f32 %v2661_v46, %v2658_v28  ;;  %v2314_v38 = vadd.f32 1.0, %v5309_v61  ;;  %v2322_v53 = vmul.f32 0.5, %v8075_v18  ;;  %v2710_v58 = vmul.f32 %v2709_v45, %v2349_v60  ;;  %v5311_v18 = vpop.eup %5310 }
 0x2c4   :  { %v9567_v41 = vstv %s9565_s30  ;;  %v9568_v17 = vstv %s9404_s21  ;;  %v9569_v63 = vstv %s9566_s1  ;;  %v9570_v9 = vstv %s7672_s10  ;;  %s9575_s21 = sld [smem:[#allocation103_spill]]  ;;  %s8319_s10 = sld [smem:[#allocation4 + $0xfc]] }
 0x2c5   :  { %v2371_v50 = vmul.f32 %v9567_v41, %v2350_v16  ;;  %v2420_v7 = vmul.f32 %v9568_v17, %v2350_v16  ;;  %v2469_v11 = vmul.f32 %v9569_v63, %v2350_v16  ;;  %v2518_v43 = vmul.f32 %v9570_v9, %v2350_v16  ;;  %s8373_s30 = sld [smem:[#allocation4 + $0x107]]  ;;  %s8376_s1 = sld [smem:[#allocation4 + $0x10e]] }
 0x2c6   :  { %v2315_v23 = vmul.f32 %v2314_v38, %v2307_v37  ;;  %v9571_v0 = vstv %s7674_s3  ;;  %v2616_v3 = vmul.f32 %v2615_v22, %v2350_v16  ;;  %v2665_v29 = vmul.f32 %v2664_v4, %v2350_v16  ;;  %s8195_s3 = sld [smem:[#allocation4 + $0xf6]] }
 0x2c7   :  { %v2567_v20 = vmul.f32 %v9571_v0, %v2350_v16  ;;  %v2372_v45 = vadd.f32 %v2371_v50, %v2368_v26  ;;  %v2421_v60 = vadd.f32 %v2420_v7, %v2417_v32  ;;  %v2470_v5 = vadd.f32 %v2469_v11, %v2466_v27 }
 0x2c8   :  { %v2519_v54 = vadd.f32 %v2518_v43, %v2515_v57  ;;  %v2351_v30 = vadd.f32 %v5363_v52, %v2315_v23  ;;  %v2329_v22 = vadd.f32 1.0, %v5311_v18  ;;  %v2617_v4 = vadd.f32 %v2616_v3, %v2613_v62 }
 0x2c9   :  { %v2568_v24 = vadd.f32 %v2567_v20, %v2564_v49  ;;  %v2337_v47 = vmul.f32 0.5, %v8097_v12  ;;  %v2666_v36 = vadd.f32 %v2665_v29, %v2662_v2  ;;  %v2711_v26 = vadd.f32 %v2710_v58, %v2707_v40 }
 0x2ca   :  { %v2714_v32 = vmul.f32 %v2713_v34, %v2350_v16  ;;  %v2330_v27 = vmul.f32 %v2329_v22, %v2322_v53  ;;  %v9577_v59 = vstv %s9572_s17  ;;  %v9578_v14 = vstv %s9573_s8  ;;  %v5313_v6 = vpop.eup %5312  ;;  %v5364_v16 = vld [vmem:[%s9484_s9 + $0x30] sm:$0xff]  ;;  %s8246_s17 = sld [smem:[#allocation4 + $0xf7]]  ;;  %s8307_s8 = sld [smem:[#allocation4 + $0xfa]] }
 0x2cb   :  { %v2375_v57 = vmul.f32 %v9577_v59, %v2351_v30  ;;  %v2424_v28 = vmul.f32 %v9578_v14, %v2351_v30  ;;  %v9579_v39 = vstv %s9574_s26  ;;  %v9581_v55 = vstv %s9575_s21  ;;  %s8311_s26 = sld [smem:[#allocation4 + $0x101]]  ;;  %s8313_s21 = sld [smem:[#allocation4 + $0x102]] }
 0x2cc   :  { %v2473_v46 = vmul.f32 %v9579_v39, %v2351_v30  ;;  %v2522_v49 = vmul.f32 %v9581_v55, %v2351_v30  ;;  %v9583_v62 = vstv %s9576_s27  ;;  %v2620_v61 = vmul.f32 %v2619_v15, %v2351_v30  ;;  %s8322_s27 = sld [smem:[#allocation4 + $0x103]] }
 0x2cd   :  { %v2571_v12 = vmul.f32 %v9583_v62, %v2351_v30  ;;  %v2669_v34 = vmul.f32 %v2668_v51, %v2351_v30  ;;  %v2352_v2 = vadd.f32 %v5364_v16, %v2330_v27  ;;  %v2376_v40 = vadd.f32 %v2375_v57, %v2372_v45 }
 0x2ce   :  { %v2425_v37 = vadd.f32 %v2424_v28, %v2421_v60  ;;  %v2474_v38 = vadd.f32 %v2473_v46, %v2470_v5  ;;  %v2344_v53 = vadd.f32 1.0, %v5313_v6  ;;  %v2523_v58 = vadd.f32 %v2522_v49, %v2519_v54 }
 0x2cf   :  { %v2572_v41 = vadd.f32 %v2571_v12, %v2568_v24  ;;  %v2621_v50 = vadd.f32 %v2620_v61, %v2617_v4  ;;  %v9587_v17 = vstv %s9580_s13  ;;  %v9588_v15 = vstv %s9582_s18  ;;  %s8324_s13 = sld [smem:[#allocation4 + $0x104]]  ;;  %s8329_s18 = sld [smem:[#allocation4 + $0xfe]] }
 0x2d0   :  { %v2379_v7 = vmul.f32 %v9587_v17, %v2352_v2  ;;  %v2428_v51 = vmul.f32 %v9588_v15, %v2352_v2  ;;  %v9589_v63 = vstv %s9584_s0  ;;  %v2526_v9 = vmul.f32 %v2525_v1, %v2352_v2  ;;  %v5365_v1 = vld [vmem:[%s9484_s9 + $0x38] sm:$0xff]  ;;  %s9598_s9 = sld [smem:[#allocation109_spill]]  ;;  %s8332_s0 = sld [smem:[#allocation4 + $0x108]] }
 0x2d1   :  { %v2477_v11 = vmul.f32 %v9589_v63, %v2352_v2  ;;  %v2345_v43 = vmul.f32 %v2344_v53, %v2337_v47  ;;  %v2575_v23 = vmul.f32 %v2574_v13, %v2352_v2  ;;  %v2624_v0 = vmul.f32 %v2623_v56, %v2352_v2 }
 0x2d2   :  { %v2670_v20 = vadd.f32 %v2669_v34, %v2666_v36  ;;  %v2380_v3 = vadd.f32 %v2379_v7, %v2376_v40  ;;  %v2429_v29 = vadd.f32 %v2428_v51, %v2425_v37  ;;  %v2527_v45 = vadd.f32 %v2526_v9, %v2523_v58 }
 0x2d3   :  { %v2478_v18 = vadd.f32 %v2477_v11, %v2474_v38  ;;  %v2353_v60 = vadd.f32 %v5365_v1, %v2345_v43  ;;  %v2576_v13 = vadd.f32 %v2575_v23, %v2572_v41  ;;  %v2625_v5 = vadd.f32 %v2624_v0, %v2621_v50 }
 0x2d4   :  { %v2673_v56 = vmul.f32 %v2672_v19, %v2352_v2  ;;  %v2680_v54 = vstv %s8195_s3  ;;  %v2715_v52 = vadd.f32 %v2714_v32, %v2711_v26  ;;  %v2718_v22 = vmul.f32 %v2717_v31, %v2351_v30  ;;  %s8327_s3 = sld [smem:[#allocation4 + $0xfd]] }
 0x2d5   :  { %v2722_v24 = vmul.f32 %v2721_v44, %v2352_v2  ;;  %v9595_v4 = vstv %s9590_s20  ;;  %v9596_v36 = vstv %s9591_s23  ;;  %v2481_v59 = vmul.f32 %v2480_v48, %v2353_v60  ;;  %s8364_s20 = sld [smem:[#allocation4 + $0x106]]  ;;  %s8366_s23 = sld [smem:[#allocation4 + $0x10c]] }
 0x2d6   :  { %v2383_v47 = vmul.f32 %v9595_v4, %v2353_v60  ;;  %v2432_v27 = vmul.f32 %v9596_v36, %v2353_v60  ;;  %v2530_v57 = vmul.f32 %v2529_v35, %v2353_v60  ;;  %v2579_v14 = vmul.f32 %v2578_v33, %v2353_v60 }
 0x2d7   :  { %v2628_v19 = vmul.f32 %v2627_v21, %v2353_v60  ;;  %v2674_v26 = vadd.f32 %v2673_v56, %v2670_v20  ;;  %v2677_v31 = vmul.f32 %v2676_v42, %v2353_v60  ;;  %v2482_v48 = vadd.f32 %v2481_v59, %v2478_v18 }
 0x2d8   :  { %v2384_v44 = vadd.f32 %v2383_v47, %v2380_v3  ;;  %v2433_v30 = vadd.f32 %v2432_v27, %v2429_v29  ;;  %v2531_v32 = vadd.f32 %v2530_v57, %v2527_v45  ;;  %v2580_v35 = vadd.f32 %v2579_v14, %v2576_v13 }
 0x2d9   :  { %v2629_v28 = vadd.f32 %v2628_v19, %v2625_v5  ;;  %v2678_v33 = vadd.f32 %v2677_v31, %v2674_v26  ;;  %v2719_v39 = vadd.f32 %v2718_v22, %v2715_v52  ;;  %v9602_v46 = vstv %s9597_s5  ;;  %s4956_s5 = sld [smem:[#allocation4 + $0x110]] }
 0x2da   :  { %v8250_v21 = vadd.f32 %v9602_v46, %v2384_v44  ;;  %v9603_v55 = vstv %s9598_s9  ;;  %v9604_v42 = vstv %s9599_s22  ;;  %v8262_v12 = vadd.f32 %v2533_v10, %v2531_v32  ;;  %s9611_s22 = sld [smem:[#allocation112_spill]] }
 0x2db   :  { %v8254_v49 = vadd.f32 %v9603_v55, %v2433_v30  ;;  %v8258_v62 = vadd.f32 %v9604_v42, %v2482_v48  ;;  %v8266_v61 = vadd.f32 %v2582_v8, %v2580_v35  ;;  %v8270_v34 = vadd.f32 %v2631_v25, %v2629_v28 }
 0x2dc   :  { %v2723_v6 = vadd.f32 %v2722_v24, %v2719_v39  ;;  %v2389_v16 = vmul.f32 0.044715, %v8250_v21  ;;  %v2536_v37 = vmul.f32 0.044715, %v8262_v12  ;;  %v8276_v38 = vadd.f32 %v2680_v54, %v2678_v33 }
 0x2dd   :  { %v2438_v2 = vmul.f32 0.044715, %v8254_v49  ;;  %v2487_v40 = vmul.f32 0.044715, %v8258_v62  ;;  %v2585_v53 = vmul.f32 0.044715, %v8266_v61  ;;  %v2725_v50 = vstv %s8244_s25 }
 0x2de   :  { %v2390_v10 = vmul.f32 %v2389_v16, %v8250_v21  ;;  %v2537_v58 = vmul.f32 %v2536_v37, %v8262_v12  ;;  %v2634_v41 = vmul.f32 0.044715, %v8270_v34  ;;  %v2729_v51 = vstv %s8246_s17  ;;  %s9606_s17 = sld [smem:[#allocation116_spill]] }
 0x2df   :  { %v2439_v8 = vmul.f32 %v2438_v2, %v8254_v49  ;;  %v2488_v25 = vmul.f32 %v2487_v40, %v8258_v62  ;;  %v2586_v15 = vmul.f32 %v2585_v53, %v8266_v61  ;;  %v2683_v43 = vmul.f32 0.044715, %v8276_v38 }
 0x2e0   :  { %v2391_v17 = vmul.f32 %v2390_v10, %v8250_v21  ;;  %v2538_v11 = vmul.f32 %v2537_v58, %v8262_v12  ;;  %v2635_v9 = vmul.f32 %v2634_v41, %v8270_v34  ;;  %v2726_v3 = vmul.f32 %v2725_v50, %v2353_v60 }
 0x2e1   :  { %v2440_v7 = vmul.f32 %v2439_v8, %v8254_v49  ;;  %v2489_v63 = vmul.f32 %v2488_v25, %v8258_v62  ;;  %v2587_v20 = vmul.f32 %v2586_v15, %v8266_v61  ;;  %v2684_v1 = vmul.f32 %v2683_v43, %v8276_v38 }
 0x2e2   :  { %v2392_v23 = vadd.f32 %v2391_v17, %v8250_v21  ;;  %v2539_v18 = vadd.f32 %v2538_v11, %v8262_v12  ;;  %v2636_v45 = vmul.f32 %v2635_v9, %v8270_v34  ;;  %v2727_v54 = vadd.f32 %v2726_v3, %v2723_v6 }
 0x2e3   :  { %v2441_v0 = vadd.f32 %v2440_v7, %v8254_v49  ;;  %v2490_v29 = vadd.f32 %v2489_v63, %v8258_v62  ;;  %v2588_v56 = vadd.f32 %v2587_v20, %v8266_v61  ;;  %v2685_v24 = vmul.f32 %v2684_v1, %v8276_v38 }
 0x2e4   :  { %v2393_v13 = vmul.f32 0.7978846, %v2392_v23  ;;  %v2540_v52 = vmul.f32 0.7978846, %v2539_v18  ;;  %v2637_v22 = vadd.f32 %v2636_v45, %v8270_v34  ;;  %v8315_v47 = vadd.f32 %v2729_v51, %v2727_v54 }
 0x2e5   :  { %v2442_v5 = vmul.f32 0.7978846, %v2441_v0  ;;  %v2491_v60 = vmul.f32 0.7978846, %v2490_v29  ;;  %v2589_v4 = vmul.f32 0.7978846, %v2588_v56  ;;  %v2686_v27 = vadd.f32 %v2685_v24, %v8276_v38 }
 0x2e6   :  { %5314 = vtanh.f32 %v2393_v13  ;;  %v2638_v36 = vmul.f32 0.7978846, %v2637_v22  ;;  %v2732_v59 = vmul.f32 0.044715, %v8315_v47  ;;  %v2398_v26 = vstv %s8296_s11 }
 0x2e7   :  { %5316 = vtanh.f32 %v2442_v5  ;;  %v2687_v57 = vmul.f32 0.7978846, %v2686_v27  ;;  %v2401_v31 = vstv %s8304_s15  ;;  %v2447_v44 = vstv %s8298_s4  ;;  %s9607_s15 = sld [smem:[#allocation114_spill]]  ;;  %s9610_s4 = sld [smem:[#allocation119_spill]] }
 0x2e8   :  { %5318 = vtanh.f32 %v2491_v60  ;;  %v2733_v14 = vmul.f32 %v2732_v59, %v8315_v47  ;;  %v2450_v48 = vstv %s8311_s26  ;;  %v2496_v32 = vstv %s8307_s8 }
 0x2e9   :  { %5320 = vtanh.f32 %v2540_v52  ;;  %v2499_v35 = vstv %s8313_s21  ;;  %v2545_v28 = vstv %s8317_s2  ;;  %v2548_v39 = vstv %s8322_s27  ;;  %s5483_s21 = smov 96   ;;  %s5484_s2 = smov 32  }
 0x2ea   :  { %5322 = vtanh.f32 %v2589_v4  ;;  %v2734_v19 = vmul.f32 %v2733_v14, %v8315_v47  ;;  %v2594_v46 = vstv %s8319_s10  ;;  %v2597_v55 = vstv %s8324_s13  ;;  %s9608_s13 = sld [smem:[#allocation117_spill]] }
 0x2eb   :  { %5324 = vtanh.f32 %v2638_v36  ;;  %v2388_v16 = vmul.f32 0.5, %v8250_v21  ;;  %v2643_v40 = vstv %s8327_s3  ;;  %v2692_v37 = vstv %s8329_s18 }
 0x2ec   :  { %5326 = vtanh.f32 %v2687_v57  ;;  %v2735_v30 = vadd.f32 %v2734_v19, %v8315_v47  ;;  %v2437_v8 = vmul.f32 0.5, %v8254_v49  ;;  %v2747_v25 = vstv %s8332_s0 }
 0x2ed   :  { %v2486_v50 = vmul.f32 0.5, %v8258_v62  ;;  %v2750_v7 = vstv %s8334_s14  ;;  %v2535_v51 = vmul.f32 0.5, %v8262_v12  ;;  %v2584_v49 = vmul.f32 0.5, %v8266_v61 }
 0x2ee   :  { %v2736_v42 = vmul.f32 0.7978846, %v2735_v30  ;;  %v2633_v0 = vmul.f32 0.5, %v8270_v34  ;;  %v2682_v12 = vmul.f32 0.5, %v8276_v38  ;;  %v2754_v56 = vstv %s8348_s19 }
 0x2ef   :  { %v2646_v36 = vstv %s8356_s28  ;;  %v2758_v27 = vstv %s8359_s6 }
 0x2f0   :  { %v5315_v33 = vpop.eup %5314  ;;  %5328 = vtanh.f32 %v2736_v42 }
 0x2f1   :  { %v5317_v6 = vpop.eup %5316  ;;  %v2395_v2 = vadd.f32 1.0, %v5315_v33 }
 0x2f2   :  { %v5319_v10 = vpop.eup %5318  ;;  %v2444_v53 = vadd.f32 1.0, %v5317_v6  ;;  %v2744_v6 = vstv %s8373_s30  ;;  %s9613_s30 = sld [smem:[#allocation121_spill]] }
 0x2f3   :  { %v5321_v58 = vpop.eup %5320  ;;  %v2396_v41 = vmul.f32 %v2395_v2, %v2388_v16  ;;  %v2493_v17 = vadd.f32 1.0, %v5319_v10 }
 0x2f4   :  { %v5323_v21 = vpop.eup %5322  ;;  %v2445_v15 = vmul.f32 %v2444_v53, %v2437_v8  ;;  %v2542_v63 = vadd.f32 1.0, %v5321_v58  ;;  %v2774_v53 = vstv %s4955_s24 }
 0x2f5   :  { %v5325_v11 = vpop.eup %5324  ;;  %v2399_v9 = vmul.f32 %v2398_v26, %v2396_v41  ;;  %v2494_v43 = vmul.f32 %v2493_v17, %v2486_v50  ;;  %v2591_v23 = vadd.f32 1.0, %v5323_v21  ;;  %v2778_v50 = vstv %s4956_s5 }
 0x2f6   :  { %v5327_v62 = vpop.eup %5326  ;;  %v2448_v20 = vmul.f32 %v2447_v44, %v2445_v15  ;;  %v2543_v3 = vmul.f32 %v2542_v63, %v2535_v51  ;;  %v2640_v29 = vadd.f32 1.0, %v5325_v11  ;;  %v2731_v44 = vmul.f32 0.5, %v8315_v47  ;;  %v5222_v51 = vld [vmem:[%s9606_s17 + $0x4] ss:$8 sps:$4 sm:$0xff]   ;;  %v5224_v63 = vld [vmem:[%s9606_s17] ss:$8 sps:$4 sm:$0xff]  }
 0x2f7   :  { %v2402_v61 = vadd.f32 %v2401_v31, %v2399_v9  ;;  %v2497_v18 = vmul.f32 %v2496_v32, %v2494_v43  ;;  %v2592_v45 = vmul.f32 %v2591_v23, %v2584_v49  ;;  %v2689_v1 = vadd.f32 1.0, %v5327_v62  ;;  %v5225_v49 = vld [vmem:[%s9606_s17 + $0x14] ss:$8 sps:$4 sm:$0xff]   ;;  %2908 = vmatprep.subr.bf16.mxu0 %v5222_v51  ;;  %v5227_v11 = vld [vmem:[%s9606_s17 + $0x10] ss:$8 sps:$4 sm:$0xff]  }
 0x2f8   :  { %v2451_v34 = vadd.f32 %v2450_v48, %v2448_v20  ;;  %v2546_v13 = vmul.f32 %v2545_v28, %v2543_v3  ;;  %v2641_v5 = vmul.f32 %v2640_v29, %v2633_v0  ;;  %v2695_v31 = vstv %s8364_s20  ;;  %2909 = vmatpush1.bf16.msra.mxu0 %v5224_v63  ;;  %v5228_v9 = vld [vmem:[%s9606_s17 + $0x24] ss:$8 sps:$4 sm:$0xff]   ;;  %v5230_v20 = vld [vmem:[%s9606_s17 + $0x20] ss:$8 sps:$4 sm:$0xff]   ;;  %v5231_v3 = vld [vmem:[%s9606_s17 + $0x34] ss:$8 sps:$4 sm:$0xff]  }
 0x2f9   :  { %v2500_v54 = vadd.f32 %v2499_v35, %v2497_v18  ;;  %v2595_v60 = vmul.f32 %v2594_v46, %v2592_v45  ;;  %v2690_v38 = vmul.f32 %v2689_v1, %v2682_v12  ;;  %v2748_v52 = vmul.f32 %v2747_v25, %v2402_v61  ;;  %2910 = vmatprep.subr.bf16.mxu0 %v5225_v49  ;;  %v5233_v29 = vld [vmem:[%s9606_s17 + $0x30] ss:$8 sps:$4 sm:$0xff]   ;;  %v5234_v12 = vld [vmem:[%s9606_s17 + $0x44] ss:$8 sps:$4 sm:$0xff]   ;;  %v5236_v18 = vld [vmem:[%s9606_s17 + $0x40] ss:$8 sps:$4 sm:$0xff]  }
 0x2fa   :  { %v2549_v22 = vadd.f32 %v2548_v39, %v2546_v13  ;;  %v2644_v24 = vmul.f32 %v2643_v40, %v2641_v5  ;;  %v2751_v4 = vmul.f32 %v2750_v7, %v2451_v34  ;;  %v5329_v59 = vpop.eup %5328  ;;  %v2762_v48 = vstv %s8366_s23  ;;  %v2780_v7 = vld [vmem:[%s9605_s12] sm:$0xff]  ;;  %v5237_v45 = vld [vmem:[%s9606_s17 + $0x54] ss:$8 sps:$4 sm:$0xff]   ;;  %v5239_v1 = vld [vmem:[%s9606_s17 + $0x50] ss:$8 sps:$4 sm:$0xff]  }
 0x2fb   :  { %v2598_v57 = vadd.f32 %v2597_v55, %v2595_v60  ;;  %v2693_v14 = vmul.f32 %v2692_v37, %v2690_v38  ;;  %v2755_v26 = vmul.f32 %v2754_v56, %v2500_v54  ;;  %v2738_v30 = vadd.f32 1.0, %v5329_v59  ;;  %v5240_v34 = vld [vmem:[%s9606_s17 + $0x64] ss:$8 sps:$4 sm:$0xff]   ;;  %v5242_v13 = vld [vmem:[%s9606_s17 + $0x60] ss:$8 sps:$4 sm:$0xff]  }
 0x2fc   :  { %v2752_v19 = vadd.f32 %v2751_v4, %v2748_v52  ;;  %v2647_v32 = vadd.f32 %v2646_v36, %v2644_v24  ;;  %v2741_v35 = vstv %s8369_s16  ;;  %v2759_v33 = vmul.f32 %v2758_v27, %v2549_v22  ;;  %2911 = vmatpush1.bf16.msra.mxu0 %v5227_v11  ;;  %v5243_v5 = vld [vmem:[%s9606_s17 + $0x74] ss:$8 sps:$4 sm:$0xff]   ;;  %v5245_v56 = vld [vmem:[%s9606_s17 + $0x70] ss:$8 sps:$4 sm:$0xff]   ;;  %v4957_v22 = vld [vmem:[%s9607_s15] ss:$0 sm:$0xff] }
 0x2fd   :  { %v2739_v39 = vmul.f32 %v2738_v30, %v2731_v44  ;;  %v2766_v46 = vstv %s8371_s7  ;;  %v2696_v42 = vadd.f32 %v2695_v31, %v2693_v14  ;;  %v2763_v16 = vmul.f32 %v2762_v48, %v2598_v57  ;;  %2912 = vmatprep.subr.bf16.mxu0 %v5228_v9  ;;  %v4958_v4 = vld [vmem:[%s9607_s15 + $0x1] ss:$0 sm:$0xff]  ;;  %s5482_s17 = smov 64   ;;  %s9609_s7 = sld [smem:[#allocation118_spill]] }
 0x2fe   :  { %v2756_v28 = vadd.f32 %v2755_v26, %v2752_v19  ;;  %v2770_v40 = vstv %s8376_s1  ;;  %v2767_v10 = vmul.f32 %v2766_v46, %v2647_v32  ;;  %v5479_v61 = vmov 0  }
 0x2ff   :  { %v2742_v2 = vmul.f32 %v2741_v35, %v2739_v39  ;;  %v2771_v25 = vmul.f32 %v2770_v40, %v2696_v42  ;;  %2940 = vmatprep.mubr.bf16.mxu0 %v5479_v61  ;;  %v5480_v57 = vmov 0.0  }
 0x300   :  { %v2760_v55 = vadd.f32 %v2759_v33, %v2756_v28  ;;  %2913 = vmatpush1.bf16.msra.mxu0 %v5230_v20  ;;  %5078 = vmatprep.subr.bf16.mxu1 %v5480_v57 }
 0x301   :  { %v2745_v8 = vadd.f32 %v2744_v6, %v2742_v2  ;;  %2914 = vmatprep.subr.bf16.mxu0 %v5231_v3  ;;  %5080 = vmatprep.mubr.msk.bf16.mxu1 %vm5481_vm0, %v5480_v57 }
 0x302   :  { %v2764_v37 = vadd.f32 %v2763_v16, %v2760_v55 }
 0x303   :  { %v2775_v41 = vmul.f32 %v2774_v53, %v2745_v8 }
 0x304   :  { %v2768_v47 = vadd.f32 %v2767_v10, %v2764_v37  ;;  %2915 = vmatpush1.bf16.msra.mxu0 %v5233_v29 }
 0x305   :  { %2916 = vmatprep.subr.bf16.mxu0 %v5234_v12 }
 0x306   :  { %v2772_v58 = vadd.f32 %v2771_v25, %v2768_v47 }
 0x308   :  { %v2776_v17 = vadd.f32 %v2775_v41, %v2772_v58  ;;  %2917 = vmatpush1.bf16.msra.mxu0 %v5236_v18 }
 0x309   :  { %2918 = vmatprep.subr.bf16.mxu0 %v5237_v45 }
 0x30a   :  { %v2779_v21 = vadd.f32 %v2778_v50, %v2776_v17 }
 0x30c   :  { %v8390_v15 = vadd.f32 %v2780_v7, %v2779_v21  ;;  %2919 = vmatpush1.bf16.msra.mxu0 %v5239_v1 }
 0x30d   :  { %2920 = vmatprep.subr.bf16.mxu0 %v5240_v34 }
 0x30e   :  { %2789 = vadd.xlane.f32.xlu0 %v8390_v15 }
 0x310   :  { %2921 = vmatpush1.bf16.msra.mxu0 %v5242_v13  ;;  %v5246_v13 = vld [vmem:[%s9608_s13] sm:$0xff]  }
 0x311   :  { %2922 = vmatprep.subr.bf16.mxu0 %v5243_v5  ;;  %v5247_v5 = vld [vmem:[%s9608_s13 + $0x8] sm:$0xff]  }
 0x314   :  { %2923 = vmatpush1.bf16.msra.mxu0 %v5245_v56  ;;  %v5248_v56 = vld [vmem:[%s9608_s13 + $0x10] sm:$0xff]  }
 0x315   :  { %5102 = vmatprep.subr.bf16.mxu0 %v5480_v57 }
 0x39b   :  { %v2790_v43 = vpop.xlane.xlu0 %2789 }
 0x39c   :  { %v2792_v23 = vmul.f32 0.0078125, %v2790_v43 }
 0x39e   :  { %v2793_v0 = vsub.f32 %v8390_v15, %v2792_v23 }
 0x3a0   :  { %v2794_v62 = vmul.f32 %v2793_v0, %v2793_v0 }
 0x3a2   :  { %2795 = vadd.xlane.f32.xlu1 %v2794_v62 }
 0x42f   :  { %v2796_v54 = vpop.xlane.xlu1 %2795 }
 0x430   :  { %v2797_v60 = vmul.f32 0.0078125, %v2796_v54  ;;  %v5249_v54 = vld [vmem:[%s9608_s13 + $0x18] sm:$0xff]  }
 0x432   :  { %v2798_v38 = vadd.f32 1e-05, %v2797_v60 }
 0x434   :  { %5330 = vrsqrt.f32 %v2798_v38 }
 0x43e   :  { %v5331_v52 = vpop.eup %5330 }
 0x43f   :  { %v2800_v24 = vmul.f32 %v5331_v52, %v2793_v0 }
 0x441   :  { %v2805_v36 = vmul.f32 %v4957_v22, %v2800_v24 }
 0x443   :  { %v2810_v27 = vadd.f32 %v4958_v4, %v2805_v36 }
 0x445   :  { %v2811_v59 = vpack.c.bf16 %v2810_v27, %v2810_v27  ;;  %v4984_v27 = vld [vmem:[%s9607_s15 + $0x2] ss:$0 sm:$0xff] }
 0x447   :  { %2941 = vmatmul.mubr.bf16.vlgmr.msra.gmra.mrb[0].mxu0 %v2811_v59 }
 0x448   :  { %5110 = vmatprep.mubr.msk.bf16.mxu0 %vm5481_vm0, %v5480_v57  ;;  %5103 = vmatpush3.bf16.msra.mxu0 %v5246_v13 }
 0x449   :  { %5104 = vmatprep.subr.bf16.mxu0 %v5480_v57 }
 0x44c   :  { %5105 = vmatpush3.bf16.msra.mxu0 %v5247_v5 }
 0x44d   :  { %5106 = vmatprep.subr.bf16.mxu0 %v5480_v57 }
 0x450   :  { %5107 = vmatpush3.bf16.msra.mxu0 %v5248_v56 }
 0x451   :  { %5108 = vmatprep.subr.bf16.mxu0 %v5480_v57 }
 0x454   :  { %5109 = vmatpush3.bf16.msra.mxu0 %v5249_v54 }
 0x455   :  { %5134 = vmatprep.subr.bf16.mxu0 %v5480_v57 }
 0x51a   :  { %v2942_v14 = vpop.f32.mrb[0].mxu0 }
 0x51b   :  { %v2949_v19 = vpack.c.bf16 %v2942_v14, %v2942_v14  ;;  %v2944_v26 = vpop.f32.mrb[1].mxu0 }
 0x51c   :  { %v2946_v31 = vpop.f32.mrb[2].mxu0  ;;  %v2950_v32 = vpack.c.bf16 %v2944_v26, %v2944_v26 }
 0x51d   :  { %2952 = vrot.lane.b32.xlu0 %v2949_v19, %s5482_s17  ;;  %v2947_v44 = vpop.f32.mrb[3].mxu0 }
 0x51e   :  { %v3020_v35 = vsel %vm3018_vm2, %v2950_v32, 0 }
 0x521   :  { %3062 = vrot.lane.b32.xlu0 %v2949_v19, %s5483_s21 }
 0x58f   :  { %v2953_v30 = vpop.permute.xlu0 %2952 }
 0x590   :  { %v2959_v48 = vsel %vm2954_vm1, %v2953_v30, 0  ;;  %v5250_v30 = vld [vmem:[%s9609_s7] sm:$0xff]  }
 0x591   :  { %5079 = vmatpush3.bf16.xpose.msra.mxu1 %v2959_v48  ;;  %v5251_v48 = vld [vmem:[%s9609_s7 + $0x8] sm:$0xff]  }
 0x592   :  { %5084 = vmatprep.subr.bf16.mxu1 %v5480_v57 }
 0x593   :  { %v3063_v41 = vpop.permute.xlu0 %3062 }
 0x598   :  { %5081 = vmatmul.mubr.msk.bf16.vlgmr.msra.gmra.mrb[0].mxu1 %vm2954_vm1, %v2949_v19 }
 0x599   :  { %5085 = vmatpush3.bf16.msra.mxu1 %v3020_v35  ;;  %5086 = vmatprep.mubr.msk.bf16.mxu1 %vm5481_vm0, %v5480_v57 }
 0x59a   :  { %5090 = vmatprep.subr.bf16.mxu1 %v5480_v57 }
 0x66b   :  { %v2995_v28 = vpop.f32.mrb[0].mxu1 }
 0x66c   :  { %v3001_v33 = vmul.f32 0.17677669, %v2995_v28  ;;  %v5082_v39 = vpop.f32.mrb[1].mxu1 }
 0x66d   :  { %v2998_v46 = vpop.f32.mrb[2].mxu1  ;;  %v5253_v39 = vld [vmem:[%s9609_s7 + $0x18] sm:$0xff]  }
 0x66e   :  { %v5083_v42 = vpop.f32.mrb[3].mxu1  ;;  %v3003_v6 = vsel %vm3002_vm3, %v3001_v33, -inf  ;;  %v5254_v46 = vld [vmem:[%s9609_s7 + $0x20] sm:$0xff]  }
 0x66f   :  { %3004 = vmax.xlane.f32.xlu1 %v3003_v6  ;;  %v5258_v42 = vld [vmem:[%s9610_s4] sm:$0xff]   ;;  %v5255_v6 = vld [vmem:[%s9609_s7 + $0x28] sm:$0xff]  }
 0x6fc   :  { %v3005_v55 = vpop.xlane.xlu1 %3004 }
 0x6fd   :  { %v3006_v16 = vsub.f32 %v3001_v33, %v3005_v55  ;;  %v5252_v33 = vld [vmem:[%s9609_s7 + $0x10] sm:$0xff]  }
 0x6fe   :  { %v5256_v55 = vld [vmem:[%s9609_s7 + $0x30] sm:$0xff]  }
 0x6ff   :  { %v3007_v2 = vmul.f32 1.442695, %v3006_v16  ;;  %v5257_v16 = vld [vmem:[%s9609_s7 + $0x38] sm:$0xff]  }
 0x701   :  { %5332 = vpow2.f32 %v3007_v2 }
 0x70b   :  { %v5333_v40 = vpop.eup %5332 }
 0x70c   :  { %v3009_v37 = vsel %vm3002_vm3, %v5333_v40, 0.0 }
 0x70d   :  { %3010 = vadd.xlane.f32.xlu1 %v3009_v37 }
 0x71e   :  { %3064 = vrot.lane.b32.xlu1 %v2949_v19, %s5484_s2 }
 0x79a   :  { %v3011_v10 = vpop.xlane.xlu1 %3010 }
 0x79b   :  { %5334 = vrcp.f32 %v3011_v10 }
 0x79e   :  { %v3065_v47 = vpop.permute.xlu1 %3064 }
 0x79f   :  { %v3070_v58 = vsel %vm2954_vm1, %v3065_v47, 0  ;;  %v4986_v47 = vld [vmem:[%s9607_s15 + $0x4] ss:$0 sm:$0xff] }
 0x7a5   :  { %v5335_v8 = vpop.eup %5334 }
 0x7a6   :  { %v3013_v53 = vmul.f32 %v5335_v8, %v5333_v40  ;;  %v4985_v8 = vld [vmem:[%s9607_s15 + $0x3] ss:$0 sm:$0xff] }
 0x7a8   :  { %v3014_v25 = vpack.c.bf16 %v3013_v53, %v3013_v53 }
 0x7aa   :  { %5087 = vmatmul.mubr.msk.bf16.vlgmr.msra.gmra.mrb[4].mxu1 %vm3002_vm3, %v3014_v25 }
 0x7ab   :  { %5091 = vmatpush3.bf16.xpose.msra.mxu1 %v3070_v58  ;;  %5092 = vmatprep.mubr.msk.bf16.mxu1 %vm5481_vm0, %v5480_v57 }
 0x7ac   :  { %5096 = vmatprep.subr.bf16.mxu1 %v5480_v57 }
 0x7b2   :  { %5093 = vmatmul.mubr.msk.bf16.vlgmr.msra.gmra.mrb[8].mxu1 %vm2954_vm1, %v3063_v41 }
 0x7b3   :  { %5098 = vmatprep.mubr.msk.bf16.mxu1 %vm5481_vm0, %v5480_v57 }
 0x87d   :  { %v3056_v50 = vpop.f32.mrb[4].mxu1 }
 0x87e   :  { %v5088_v17 = vpop.f32.mrb[5].mxu1 }
 0x87f   :  { %v3059_v7 = vpop.f32.mrb[6].mxu1  ;;  %v5260_v17 = vld [vmem:[%s9610_s4 + $0x10] sm:$0xff]  }
 0x880   :  { %v5089_v21 = vpop.f32.mrb[7].mxu1  ;;  %v5261_v7 = vld [vmem:[%s9610_s4 + $0x18] sm:$0xff]  }
 0x881   :  { %v5262_v21 = vld [vmem:[%s9610_s4 + $0x20] sm:$0xff]  }
 0x885   :  { %v3106_v51 = vpop.f32.mrb[8].mxu1 }
 0x886   :  { %v3112_v63 = vmul.f32 0.17677669, %v3106_v51  ;;  %v5094_v49 = vpop.f32.mrb[9].mxu1  ;;  %v5263_v51 = vld [vmem:[%s9610_s4 + $0x28] sm:$0xff]  }
 0x887   :  { %v3109_v11 = vpop.f32.mrb[10].mxu1  ;;  %v3512_v49 = vld [vmem:[%s9611_s22] sm:$0xff] }
 0x888   :  { %v5095_v9 = vpop.f32.mrb[11].mxu1  ;;  %v3113_v43 = vsel %vm3002_vm3, %v3112_v63, -inf  ;;  %v5265_v11 = vld [vmem:[%s9610_s4 + $0x38] sm:$0xff]  }
 0x889   :  { %3114 = vmax.xlane.f32.xlu0 %v3113_v43  ;;  %v3513_v9 = vsel %vm3002_vm3, %v3512_v49, 0.0  ;;  %v4987_v43 = vld [vmem:[%s9607_s15 + $0x5] ss:$0 sm:$0xff] }
 0x89f   :  { %3126 = vrot.lane.b32.xlu0 %v2950_v32, %s5483_s21  ;;  %s9612_s21 = sld [smem:[#allocation120_spill]] }
 0x916   :  { %v3115_v23 = vpop.xlane.xlu0 %3114 }
 0x917   :  { %v3116_v0 = vsub.f32 %v3112_v63, %v3115_v23  ;;  %v5264_v63 = vld [vmem:[%s9610_s4 + $0x30] sm:$0xff]  }
 0x919   :  { %v3117_v62 = vmul.f32 1.442695, %v3116_v0 }
 0x91a   :  { %v3127_v20 = vpop.permute.xlu0 %3126 }
 0x91b   :  { %5336 = vpow2.f32 %v3117_v62  ;;  %v3132_v3 = vsel %vm3018_vm2, %v3127_v20, 0 }
 0x91c   :  { %5097 = vmatpush3.bf16.msra.mxu1 %v3132_v3 }
 0x91d   :  { %5114 = vmatprep.subr.bf16.mxu1 %v5480_v57 }
 0x925   :  { %v5337_v29 = vpop.eup %5336 }
 0x926   :  { %v3119_v12 = vsel %vm3002_vm3, %v5337_v29, 0.0 }
 0x927   :  { %3120 = vadd.xlane.f32.xlu1 %v3119_v12 }
 0x9b4   :  { %v3121_v18 = vpop.xlane.xlu1 %3120 }
 0x9b5   :  { %5338 = vrcp.f32 %v3121_v18 }
 0x9bf   :  { %v5339_v45 = vpop.eup %5338 }
 0x9c0   :  { %v3123_v1 = vmul.f32 %v5339_v45, %v5337_v29 }
 0x9c2   :  { %v3124_v34 = vpack.c.bf16 %v3123_v1, %v3123_v1 }
 0x9c4   :  { %5099 = vmatmul.mubr.msk.bf16.vlgmr.msra.gmra.mrb[12].mxu1 %vm3002_vm3, %v3124_v34 }
 0x9c5   :  { %5130 = vmatprep.mubr.msk.bf16.mxu1 %vm5481_vm0, %v5480_v57  ;;  %5115 = vmatpush3.bf16.msra.mxu1 %v5250_v30 }
 0x9c6   :  { %5116 = vmatprep.subr.bf16.mxu1 %v5480_v57 }
 0x9c9   :  { %5117 = vmatpush3.bf16.msra.mxu1 %v5251_v48  ;;  %v5266_v48 = vld [vmem:[%s9612_s21] sm:$0xff]  }
 0x9ca   :  { %5118 = vmatprep.subr.bf16.mxu1 %v5480_v57 }
 0x9cd   :  { %5119 = vmatpush3.bf16.msra.mxu1 %v5252_v33  ;;  %v5272_v33 = vld [vmem:[%s9612_s21 + $0x30] sm:$0xff]  }
 0x9ce   :  { %5120 = vmatprep.subr.bf16.mxu1 %v5480_v57 }
 0x9d1   :  { %5121 = vmatpush3.bf16.msra.mxu1 %v5253_v39  ;;  %v5273_v39 = vld [vmem:[%s9612_s21 + $0x38] sm:$0xff]  }
 0x9d2   :  { %5122 = vmatprep.subr.bf16.mxu1 %v5480_v57 }
 0x9d5   :  { %5123 = vmatpush3.bf16.msra.mxu1 %v5254_v46 }
 0x9d6   :  { %5124 = vmatprep.subr.bf16.mxu1 %v5480_v57 }
 0x9d9   :  { %5125 = vmatpush3.bf16.msra.mxu1 %v5255_v6 }
 0x9da   :  { %5126 = vmatprep.subr.bf16.mxu1 %v5480_v57 }
 0x9dd   :  { %5127 = vmatpush3.bf16.msra.mxu1 %v5256_v55 }
 0x9de   :  { %5128 = vmatprep.subr.bf16.mxu1 %v5480_v57 }
 0x9e1   :  { %5129 = vmatpush3.bf16.msra.mxu1 %v5257_v16 }
 0x9e2   :  { %5154 = vmatprep.subr.bf16.mxu1 %v5480_v57 }
 0xa97   :  { %v3168_v60 = vpop.f32.mrb[12].mxu1 }
 0xa98   :  { %3175 = vrot.lane.b32.xlu1 %v3168_v60, %s5484_s2  ;;  %v5100_v38 = vpop.f32.mrb[13].mxu1 }
 0xa99   :  { %v3171_v52 = vpop.f32.mrb[14].mxu1 }
 0xa9a   :  { %v5101_v22 = vpop.f32.mrb[15].mxu1 }
 0xa9b   :  { %v5004_v22 = vld [vmem:[%s9607_s15 + $0x6] ss:$0 sm:$0xff] }
 0xb0a   :  { %v3176_v24 = vpop.permute.xlu1 %3175 }
 0xb0b   :  { %v3178_v4 = vsel %vm2954_vm1, %v3056_v50, %v3176_v24  ;;  %v5259_v50 = vld [vmem:[%s9610_s4 + $0x8] sm:$0xff]  }
 0xb0c   :  { %v3179_v36 = vpack.c.bf16 %v3178_v4, %v3178_v4 }
 0xb0e   :  { %5111 = vmatmul.mubr.msk.bf16.vlgmr.msra.gmra.mrb[4].mxu0 %vm3212_vm4, %v3179_v36 }
 0xb0f   :  { %5150 = vmatprep.mubr.msk.bf16.mxu0 %vm5481_vm0, %v5480_v57  ;;  %5135 = vmatpush3.bf16.msra.mxu0 %v5258_v42 }
 0xb10   :  { %5136 = vmatprep.subr.bf16.mxu0 %v5480_v57 }
 0xb13   :  { %5137 = vmatpush3.bf16.msra.mxu0 %v5259_v50  ;;  %v5278_v50 = vld [vmem:[%s9613_s30 + $0x20] sm:$0xff]  }
 0xb14   :  { %5138 = vmatprep.subr.bf16.mxu0 %v5480_v57 }
 0xb17   :  { %5139 = vmatpush3.bf16.msra.mxu0 %v5260_v17  ;;  %v5279_v17 = vld [vmem:[%s9613_s30 + $0x28] sm:$0xff]  }
 0xb18   :  { %5140 = vmatprep.subr.bf16.mxu0 %v5480_v57 }
 0xb1b   :  { %5141 = vmatpush3.bf16.msra.mxu0 %v5261_v7  ;;  %v5280_v7 = vld [vmem:[%s9613_s30 + $0x30] sm:$0xff]  }
 0xb1c   :  { %5142 = vmatprep.subr.bf16.mxu0 %v5480_v57 }
 0xb1f   :  { %5143 = vmatpush3.bf16.msra.mxu0 %v5262_v21 }
 0xb20   :  { %5144 = vmatprep.subr.bf16.mxu0 %v5480_v57 }
 0xb23   :  { %5145 = vmatpush3.bf16.msra.mxu0 %v5263_v51 }
 0xb24   :  { %5146 = vmatprep.subr.bf16.mxu0 %v5480_v57 }
 0xb27   :  { %5147 = vmatpush3.bf16.msra.mxu0 %v5264_v63 }
 0xb28   :  { %5148 = vmatprep.subr.bf16.mxu0 %v5480_v57 }
 0xb2b   :  { %5149 = vmatpush3.bf16.msra.mxu0 %v5265_v11 }
 0xb2c   :  { %5186 = vmatprep.subr.bf16.mxu0 %v5480_v57 }
 0xbe1   :  { %v3250_v59 = vpop.f32.mrb[4].mxu0 }
 0xbe2   :  { %v3256_v14 = vadd.f32 %v3250_v59, %v8390_v15  ;;  %v5112_v19 = vpop.f32.mrb[5].mxu0 }
 0xbe3   :  { %v3253_v26 = vpop.f32.mrb[6].mxu0 }
 0xbe4   :  { %v8506_v31 = vadd.f32 %v4984_v27, %v3256_v14  ;;  %v5113_v44 = vpop.f32.mrb[7].mxu0 }
 0xbe6   :  { %3262 = vadd.xlane.f32.xlu0 %v8506_v31 }
 0xbea   :  { %3514 = vadd.xlane.f32.xlu0 %v3513_v9 }
 0xc73   :  { %v3263_v15 = vpop.xlane.xlu0 %3262 }
 0xc74   :  { %v3264_v32 = vmul.f32 0.0078125, %v3263_v15  ;;  %v5268_v15 = vld [vmem:[%s9612_s21 + $0x10] sm:$0xff]  }
 0xc76   :  { %v3265_v35 = vsub.f32 %v8506_v31, %v3264_v32  ;;  %v5269_v32 = vld [vmem:[%s9612_s21 + $0x18] sm:$0xff]  }
 0xc77   :  { %v3515_v60 = vpop.xlane.xlu0 %3514 }
 0xc78   :  { %v3266_v28 = vmul.f32 %v3265_v35, %v3265_v35  ;;  %v3516_v38 = vmax.f32 %v3515_v60, 1e-12 }
 0xc7a   :  { %3267 = vadd.xlane.f32.xlu1 %v3266_v28  ;;  %v5271_v28 = vld [vmem:[%s9612_s21 + $0x28] sm:$0xff]  }
 0xd07   :  { %v3268_v2 = vpop.xlane.xlu1 %3267 }
 0xd08   :  { %v3269_v40 = vmul.f32 0.0078125, %v3268_v2 }
 0xd0a   :  { %v3270_v37 = vadd.f32 1e-05, %v3269_v40 }
 0xd0c   :  { %5340 = vrsqrt.f32 %v3270_v37 }
 0xd16   :  { %v5341_v10 = vpop.eup %5340 }
 0xd17   :  { %v3272_v53 = vmul.f32 %v5341_v10, %v3265_v35  ;;  %v5270_v35 = vld [vmem:[%s9612_s21 + $0x20] sm:$0xff]  }
 0xd19   :  { %v3277_v25 = vmul.f32 %v4985_v8, %v3272_v53 }
 0xd1b   :  { %v3282_v58 = vadd.f32 %v4986_v47, %v3277_v25  ;;  %v5274_v47 = vld [vmem:[%s9613_s30] sm:$0xff]   ;;  %v5275_v25 = vld [vmem:[%s9613_s30 + $0x8] sm:$0xff]  }
 0xd1d   :  { %v3283_v41 = vpack.c.bf16 %v3282_v58, %v3282_v58  ;;  %v5276_v58 = vld [vmem:[%s9613_s30 + $0x10] sm:$0xff]  }
 0xd1f   :  { %5131 = vmatmul.mubr.bf16.vlgmr.msra.gmra.mrb[16].mxu1 %v3283_v41  ;;  %v5277_v41 = vld [vmem:[%s9613_s30 + $0x18] sm:$0xff]  }
 0xd20   :  { %5156 = vmatprep.mubr.msk.bf16.mxu1 %vm5481_vm0, %v5480_v57 }
 0xdf2   :  { %v3386_v23 = vpop.f32.mrb[16].mxu1 }
 0xdf3   :  { %v3387_v0 = vadd.f32 %v4987_v43, %v3386_v23  ;;  %v5132_v62 = vpop.f32.mrb[17].mxu1  ;;  %v5281_v43 = vld [vmem:[%s9613_s30 + $0x38] sm:$0xff]  }
 0xdf4   :  { %v3389_v20 = vpop.f32.mrb[18].mxu1 }
 0xdf5   :  { %v3393_v3 = vmul.f32 0.044715, %v3387_v0  ;;  %v5133_v29 = vpop.f32.mrb[19].mxu1  ;;  %v3392_v13 = vmul.f32 0.5, %v3387_v0 }
 0xdf7   :  { %v3394_v12 = vmul.f32 %v3393_v3, %v3387_v0 }
 0xdf9   :  { %v3395_v18 = vmul.f32 %v3394_v12, %v3387_v0 }
 0xdfb   :  { %v3396_v45 = vadd.f32 %v3395_v18, %v3387_v0 }
 0xdfd   :  { %v3397_v1 = vmul.f32 0.7978846, %v3396_v45 }
 0xdff   :  { %5342 = vtanh.f32 %v3397_v1 }
 0xe00   :  { %5344 = vrcp.f32 %v3516_v38 }
 0xe09   :  { %v5343_v34 = vpop.eup %5342 }
 0xe0a   :  { %v3399_v5 = vadd.f32 1.0, %v5343_v34  ;;  %v5345_v52 = vpop.eup %5344 }
 0xe0b   :  { %v3518_v59 = vmul.f32 %v5345_v52, %v3512_v49 }
 0xe0c   :  { %v3400_v56 = vmul.f32 %v3399_v5, %v3392_v13 }
 0xe0d   :  { %v8596_v30 = vpack.c.bf16 %v3518_v59, %v3518_v59 }
 0xe0e   :  { %v3401_v54 = vpack.c.bf16 %v3400_v56, %v3400_v56 }
 0xe10   :  { %5151 = vmatmul.mubr.bf16.vlgmr.msra.gmra.mrb[8].mxu0 %v3401_v54 }
 0xe11   :  { %5202 = vmatprep.mubr.msk.bf16.mxu0 %vm5481_vm0, %v5480_v57  ;;  %5187 = vmatpush3.bf16.msra.mxu0 %v5274_v47 }
 0xe12   :  { %5188 = vmatprep.subr.bf16.mxu0 %v5480_v57 }
 0xe15   :  { %5189 = vmatpush3.bf16.msra.mxu0 %v5275_v25 }
 0xe16   :  { %5190 = vmatprep.subr.bf16.mxu0 %v5480_v57 }
 0xe19   :  { %5191 = vmatpush3.bf16.msra.mxu0 %v5276_v58 }
 0xe1a   :  { %5192 = vmatprep.subr.bf16.mxu0 %v5480_v57 }
 0xe1d   :  { %5193 = vmatpush3.bf16.msra.mxu0 %v5277_v41 }
 0xe1e   :  { %5194 = vmatprep.subr.bf16.mxu0 %v5480_v57 }
 0xe21   :  { %5195 = vmatpush3.bf16.msra.mxu0 %v5278_v50 }
 0xe22   :  { %5196 = vmatprep.subr.bf16.mxu0 %v5480_v57 }
 0xe25   :  { %5197 = vmatpush3.bf16.msra.mxu0 %v5279_v17 }
 0xe26   :  { %5198 = vmatprep.subr.bf16.mxu0 %v5480_v57 }
 0xe29   :  { %5199 = vmatpush3.bf16.msra.mxu0 %v5280_v7 }
 0xe2a   :  { %5200 = vmatprep.subr.bf16.mxu0 %v5480_v57 }
 0xe2d   :  { %5201 = vmatpush3.bf16.msra.mxu0 %v5281_v43 }
 0xee3   :  { %v3500_v24 = vpop.f32.mrb[8].mxu0 }
 0xee4   :  { %v3506_v4 = vadd.f32 %v3500_v24, %v8506_v31  ;;  %v5152_v36 = vpop.f32.mrb[9].mxu0  ;;  %v5267_v31 = vld [vmem:[%s9612_s21 + $0x8] sm:$0xff]  }
 0xee5   :  { %v3503_v27 = vpop.f32.mrb[10].mxu0 }
 0xee6   :  { %v3511_v14 = vadd.f32 %v5004_v22, %v3506_v4  ;;  %v5153_v19 = vpop.f32.mrb[11].mxu0 }
 0xee8   :  { %v3520_v26 = vpack.c.bf16 %v3511_v14, %v3511_v14 }
 0xeea   :  { %v3525_v44 = vsel %vm3018_vm2, %v3520_v26, 0 }
 0xeeb   :  { %5155 = vmatpush3.bf16.msra.mxu1 %v3525_v44 }
 0xeec   :  { %5160 = vmatprep.subr.bf16.mxu1 %v5480_v57 }
 0xeee   :  { %5157 = vmatmul.mubr.msk.bf16.vlgmr.msra.gmra.mrb[20].mxu1 %vm3002_vm3, %v8596_v30 }
 0xeef   :  { %5161 = vmatpush3.bf16.msra.mxu1 %v5266_v48  ;;  %5176 = vmatprep.mubr.msk.bf16.mxu1 %vm5481_vm0, %v5480_v57 }
 0xef0   :  { %5162 = vmatprep.subr.bf16.mxu1 %v5480_v57 }
 0xef3   :  { %5163 = vmatpush3.bf16.msra.mxu1 %v5267_v31 }
 0xef4   :  { %5164 = vmatprep.subr.bf16.mxu1 %v5480_v57 }
 0xef7   :  { %5165 = vmatpush3.bf16.msra.mxu1 %v5268_v15 }
 0xef8   :  { %5166 = vmatprep.subr.bf16.mxu1 %v5480_v57 }
 0xefb   :  { %5167 = vmatpush3.bf16.msra.mxu1 %v5269_v32 }
 0xefc   :  { %5168 = vmatprep.subr.bf16.mxu1 %v5480_v57 }
 0xeff   :  { %5169 = vmatpush3.bf16.msra.mxu1 %v5270_v35 }
 0xf00   :  { %5170 = vmatprep.subr.bf16.mxu1 %v5480_v57 }
 0xf03   :  { %5171 = vmatpush3.bf16.msra.mxu1 %v5271_v28 }
 0xf04   :  { %5172 = vmatprep.subr.bf16.mxu1 %v5480_v57 }
 0xf07   :  { %5173 = vmatpush3.bf16.msra.mxu1 %v5272_v33 }
 0xf08   :  { %5174 = vmatprep.subr.bf16.mxu1 %v5480_v57 }
 0xf0b   :  { %5175 = vmatpush3.bf16.msra.mxu1 %v5273_v39 }
 0xf0c   :  { %5180 = vmatprep.subr.bf16.mxu1 %v5480_v57 }
 0xfc1   :  { %v3561_v46 = vpop.f32.mrb[20].mxu1 }
 0xfc2   :  { %v3567_v42 = vpack.c.bf16 %v3561_v46, %v3561_v46  ;;  %v5158_v6 = vpop.f32.mrb[21].mxu1 }
 0xfc3   :  { %v3564_v55 = vpop.f32.mrb[22].mxu1 }
 0xfc4   :  { %v5159_v16 = vpop.f32.mrb[23].mxu1  ;;  %5177 = vmatmul.mubr.bf16.vlgmr.msra.gmra.mrb[24].mxu1 %v3567_v42 }
 0xfc5   :  { %5182 = vmatprep.mubr.msk.bf16.mxu1 %vm5481_vm0, %v5480_v57 }
0x1097   :  { %v3666_v2 = vpop.f32.mrb[24].mxu1 }
0x1098   :  { %v3672_v40 = vmax.f32 %v3666_v2, 0.0  ;;  %v5178_v37 = vpop.f32.mrb[25].mxu1 }
0x1099   :  { %v3669_v10 = vpop.f32.mrb[26].mxu1 }
0x109a   :  { %v3673_v8 = vmul.f32 %v3672_v40, %v3672_v40  ;;  %v5179_v53 = vpop.f32.mrb[27].mxu1 }
0x109c   :  { %3674 = vadd.xlane.f32.xlu0 %v3673_v8 }
0x1129   :  { %v3675_v21 = vpop.xlane.xlu0 %3674 }
0x112a   :  { %v3676_v51 = vmax.f32 %v3675_v21, 1e-24 }
0x112c   :  { %5346 = vrsqrt.f32 %v3676_v51 }
0x1136   :  { %v5347_v63 = vpop.eup %5346 }
0x1137   :  { %v8665_v49 = vmul.f32 %v5347_v63, %v3672_v40 }
0x1139   :  { %v3679_v11 = vpack.c.bf16 %v8665_v49, %v8665_v49 }
0x113b   :  { %v3681_v9 = vsel %vm3018_vm2, %v3679_v11, 0 }
0x113c   :  { %5181 = vmatpush3.bf16.msra.mxu1 %v3681_v9 }
0x113f   :  { %5183 = vmatmul.mubr.msk.bf16.vlgmr.msra.gmra.mrb[28].mxu1 %vm3002_vm3, %v8596_v30 }
0x1212   :  { %v3717_v57 = vpop.f32.mrb[28].mxu1 }
0x1213   :  { %v3723_v23 = vpack.c.bf16 %v3717_v57, %v3717_v57  ;;  %v5184_v0 = vpop.f32.mrb[29].mxu1 }
0x1214   :  { %v3720_v62 = vpop.f32.mrb[30].mxu1 }
0x1215   :  { %v5185_v20 = vpop.f32.mrb[31].mxu1  ;;  %5203 = vmatmul.mubr.bf16.vlgmr.msra.gmra.mrb[12].mxu0 %v3723_v23 }
0x12e8   :  { %v3822_v3 = vpop.f32.mrb[12].mxu0 }
0x12e9   :  { %v3828_v29 = vmax.f32 %v3822_v3, 0.0  ;;  %v5204_v12 = vpop.f32.mrb[13].mxu0 }
0x12ea   :  { %v3825_v18 = vpop.f32.mrb[14].mxu0 }
0x12eb   :  { %v3829_v45 = vmul.f32 %v3828_v29, %v3828_v29  ;;  %v5205_v1 = vpop.f32.mrb[15].mxu0 }
0x12ed   :  { %3830 = vadd.xlane.f32.xlu0 %v3829_v45 }
0x137a   :  { %v3831_v34 = vpop.xlane.xlu0 %3830 }
0x137b   :  { %v3832_v13 = vmax.f32 %v3831_v34, 1e-24 }
0x137d   :  { %5348 = vrsqrt.f32 %v3832_v13 }
0x1387   :  { %v5349_v5 = vpop.eup %5348 }
0x1388   :  { %v8675_v56 = vmul.f32 %v5349_v5, %v3828_v29 }
0x1389   :  { %5466 = dma.done.wait [#allocation3], 16384 }
0x138a   :  { %5467 = vsyncadd [#allocation3], 4294950912  ;;  %4028 = vmatprep.mubr.bf16.mxu1 %v5479_v61  ;;  %4071 = vmatprep.mubr.bf16.mxu0 %v5479_v61  ;;  %v3841_v54 = vld [vmem:[#allocation2 + $0x8] sm:$0xff]  ;;  %v3843_v60 = vld [vmem:[#allocation2 + $0x18] sm:$0xff]  ;;  %v3974_v47 = vpack.c.bf16 %v8675_v56, %v8665_v49  ;;  %s9614_s10 = sld [smem:[#allocation115_spill]]  ;;  %s5485_s3 = smov [#allocation7]  }
0x138b   :  { %v3840_v38 = vld [vmem:[#allocation2] sm:$0xff]  ;;  %3996 = vmatprep.subr.bf16.mxu1 %v3841_v54  ;;  %4039 = vmatprep.subr.bf16.mxu0 %v3843_v60  ;;  %v3842_v52 = vld [vmem:[#allocation2 + $0x10] sm:$0xff]  ;;  %v3845_v22 = vld [vmem:[#allocation2 + $0x28] sm:$0xff]  ;;  %s4642_s18 = sshll.u32 %s5485_s3, 4  ;;  %s4643_s18 = int_to_ptr.vmem [resolvable:$true] %s4642_s18 }
0x138c   :  { %v3847_v24 = vld [vmem:[#allocation2 + $0x38] sm:$0xff]  ;;  %3997 = vmatpush1.bf16.msra.mxu1 %v3840_v38  ;;  %4040 = vmatpush1.bf16.msra.mxu0 %v3842_v52  ;;  %v3844_v4 = vld [vmem:[#allocation2 + $0x20] sm:$0xff]  ;;  %v3846_v36 = vld [vmem:[#allocation2 + $0x30] sm:$0xff]  ;;  %v3976_v38 = vlaneseq  ;;  %s5442_s0 = scalar_lea.vmem %s4643_s18, 128  ;;  %p5447_p6 = scmp.lt.s32.totalorder %s4643_s18, %s4643_s18 }
0x138d   :  { %3998 = vmatprep.subr.bf16.mxu1 %v3845_v22  ;;  %4041 = vmatprep.subr.bf16.mxu0 %v3847_v24  ;;  %v3849_v27 = vld [vmem:[#allocation2 + $0x48] sm:$0xff]  ;;  %v3851_v59 = vld [vmem:[#allocation2 + $0x58] sm:$0xff]  ;;  %v3848_v14 = vld [vmem:[#allocation2 + $0x40] sm:$0xff]  ;;  %p5443_p5 = scmp.ne.s32.totalorder %s4643_s18, %s5442_s0  ;;  %p5448_p7 = scmp.lt.s32.totalorder %s5442_s0, %s5442_s0 }
0x138e   :  { %v3850_v19 = vld [vmem:[#allocation2 + $0x50] sm:$0xff]  ;;  %v3853_v26 = vld [vmem:[#allocation2 + $0x68] sm:$0xff]  ;;  %v3855_v44 = vld [vmem:[#allocation2 + $0x78] sm:$0xff]  ;;  %v8727_v52 = vshrl.u32 %v3976_v38, 7 }
0x138f   :  { %v3852_v30 = vld [vmem:[#allocation2 + $0x60] sm:$0xff]  ;;  %v3854_v48 = vld [vmem:[#allocation2 + $0x70] sm:$0xff]  ;;  %v3857_v31 = vld [vmem:[#allocation2 + $0x88] sm:$0xff]  ;;  %p5449_p8 = por %p5448_p7, %p5447_p6 }
0x1390   :  { %3999 = vmatpush1.bf16.msra.mxu1 %v3844_v4  ;;  %4042 = vmatpush1.bf16.msra.mxu0 %v3846_v36  ;;  %v3859_v15 = vld [vmem:[#allocation2 + $0x98] sm:$0xff]  ;;  %v3856_v32 = vld [vmem:[#allocation2 + $0x80] sm:$0xff]  ;;  %v3858_v35 = vld [vmem:[#allocation2 + $0x90] sm:$0xff]  ;;  %v3978_v22 = vsub.s32 0, %v8727_v52  ;;  %v3986_v24 = vsub.s32 2, %v8727_v52  ;;  %v3990_v36 = vsub.s32 3, %v8727_v52 }
0x1391   :  { %4000 = vmatprep.subr.bf16.mxu1 %v3849_v27  ;;  %4043 = vmatprep.subr.bf16.mxu0 %v3851_v59  ;;  %v3861_v28 = vld [vmem:[#allocation2 + $0xa8] sm:$0xff]  ;;  %v3863_v33 = vld [vmem:[#allocation2 + $0xb8] sm:$0xff]  ;;  %v3860_v39 = vld [vmem:[#allocation2 + $0xa0] sm:$0xff]  ;;  %v3982_v27 = vsub.s32 1, %v8727_v52  ;;  %p5450_p9 = pnand %p5449_p8, %p5443_p5 }
0x1392   :  { %v3862_v46 = vld [vmem:[#allocation2 + $0xb0] sm:$0xff]  ;;  %v3865_v42 = vld [vmem:[#allocation2 + $0xc8] sm:$0xff]  ;;  %v3867_v6 = vld [vmem:[#allocation2 + $0xd8] sm:$0xff] }
0x1393   :  { %v3864_v55 = vld [vmem:[#allocation2 + $0xc0] sm:$0xff]  ;;  %v3866_v16 = vld [vmem:[#allocation2 + $0xd0] sm:$0xff]  ;;  %v3869_v2 = vld [vmem:[#allocation2 + $0xe8] sm:$0xff] }
0x1394   :  { %4001 = vmatpush1.bf16.msra.mxu1 %v3848_v14  ;;  %4044 = vmatpush1.bf16.msra.mxu0 %v3850_v19  ;;  %v3871_v40 = vld [vmem:[#allocation2 + $0xf8] sm:$0xff]  ;;  %v3868_v37 = vld [vmem:[#allocation2 + $0xe0] sm:$0xff]  ;;  %v3870_v10 = vld [vmem:[#allocation2 + $0xf0] sm:$0xff] }
0x1395   :  { %4002 = vmatprep.subr.bf16.mxu1 %v3853_v26  ;;  %4045 = vmatprep.subr.bf16.mxu0 %v3855_v44  ;;  %v8679_v8 = vld [vmem:[#allocation2 + $0x108] sm:$0xff]  ;;  %v8681_v53 = vld [vmem:[#allocation2 + $0x118] sm:$0xff]  ;;  %v8687_v25 = vld [vmem:[#allocation2 + $0x100] sm:$0xff] }
0x1396   :  { %v8689_v58 = vld [vmem:[#allocation2 + $0x110] sm:$0xff]  ;;  %v8691_v41 = vld [vmem:[#allocation2 + $0x128] sm:$0xff]  ;;  %v8693_v50 = vld [vmem:[#allocation2 + $0x138] sm:$0xff] }
0x1397   :  { %v8699_v17 = vld [vmem:[#allocation2 + $0x120] sm:$0xff]  ;;  %v8701_v7 = vld [vmem:[#allocation2 + $0x130] sm:$0xff]  ;;  %v8703_v21 = vld [vmem:[#allocation2 + $0x148] sm:$0xff] }
0x1398   :  { %4003 = vmatpush1.bf16.msra.mxu1 %v3852_v30  ;;  %4046 = vmatpush1.bf16.msra.mxu0 %v3854_v48  ;;  %v8705_v51 = vld [vmem:[#allocation2 + $0x158] sm:$0xff]  ;;  %v3881_v63 = vld [vmem:[#allocation2 + $0x140] sm:$0xff]  ;;  %v3883_v49 = vld [vmem:[#allocation2 + $0x150] sm:$0xff] }
0x1399   :  { %4004 = vmatprep.subr.bf16.mxu1 %v3857_v31  ;;  %4047 = vmatprep.subr.bf16.mxu0 %v3859_v15  ;;  %v3886_v11 = vld [vmem:[#allocation2 + $0x168] sm:$0xff]  ;;  %v3888_v9 = vld [vmem:[#allocation2 + $0x178] sm:$0xff]  ;;  %v3885_v43 = vld [vmem:[#allocation2 + $0x160] sm:$0xff] }
0x139a   :  { %v3887_v57 = vld [vmem:[#allocation2 + $0x170] sm:$0xff]  ;;  %v3890_v23 = vld [vmem:[#allocation2 + $0x188] sm:$0xff]  ;;  %v3892_v0 = vld [vmem:[#allocation2 + $0x198] sm:$0xff] }
0x139b   :  { %v3889_v62 = vld [vmem:[#allocation2 + $0x180] sm:$0xff]  ;;  %v3891_v20 = vld [vmem:[#allocation2 + $0x190] sm:$0xff]  ;;  %v3894_v3 = vld [vmem:[#allocation2 + $0x1a8] sm:$0xff] }
0x139c   :  { %4005 = vmatpush1.bf16.msra.mxu1 %v3856_v32  ;;  %4048 = vmatpush1.bf16.msra.mxu0 %v3858_v35  ;;  %v3896_v29 = vld [vmem:[#allocation2 + $0x1b8] sm:$0xff]  ;;  %v3893_v12 = vld [vmem:[#allocation2 + $0x1a0] sm:$0xff]  ;;  %v3895_v18 = vld [vmem:[#allocation2 + $0x1b0] sm:$0xff] }
0x139d   :  { %4006 = vmatprep.subr.bf16.mxu1 %v3861_v28  ;;  %4049 = vmatprep.subr.bf16.mxu0 %v3863_v33  ;;  %v3898_v45 = vld [vmem:[#allocation2 + $0x1c8] sm:$0xff]  ;;  %v3900_v1 = vld [vmem:[#allocation2 + $0x1d8] sm:$0xff]  ;;  %v3897_v34 = vld [vmem:[#allocation2 + $0x1c0] sm:$0xff] }
0x139e   :  { %v3899_v13 = vld [vmem:[#allocation2 + $0x1d0] sm:$0xff]  ;;  %v3902_v5 = vld [vmem:[#allocation2 + $0x1e8] sm:$0xff]  ;;  %v3904_v56 = vld [vmem:[#allocation2 + $0x1f8] sm:$0xff] }
0x139f   :  { %v3901_v54 = vld [vmem:[#allocation2 + $0x1e0] sm:$0xff]  ;;  %v3903_v60 = vld [vmem:[#allocation2 + $0x1f0] sm:$0xff] }
0x13a0   :  { %4007 = vmatpush1.bf16.msra.mxu1 %v3860_v39  ;;  %4050 = vmatpush1.bf16.msra.mxu0 %v3862_v46  ;;  %v3971_v4 = vld [vmem:[%s9614_s10] ss:$2 sm:$0xf] }
0x13a1   :  { %4008 = vmatprep.subr.bf16.mxu1 %v3865_v42  ;;  %4051 = vmatprep.subr.bf16.mxu0 %v3867_v6  ;;  %v3979_v59 = vrot.slane %v3971_v4, %v3978_v22  ;;  %v3987_v14 = vrot.slane %v3971_v4, %v3986_v24  ;;  %v3991_v44 = vrot.slane %v3971_v4, %v3990_v36  ;;  %v3906_v38 = vld [vmem:[#allocation2 + $0x200] sm:$0xff] }
0x13a2   :  { %v3983_v31 = vrot.slane %v3971_v4, %v3982_v27  ;;  %v3908_v4 = vld [vmem:[#allocation2 + $0x210] sm:$0xff] }
0x13a4   :  { %4009 = vmatpush1.bf16.msra.mxu1 %v3864_v55  ;;  %4052 = vmatpush1.bf16.msra.mxu0 %v3866_v16 }
0x13a5   :  { %4010 = vmatprep.subr.bf16.mxu1 %v3869_v2  ;;  %4053 = vmatprep.subr.bf16.mxu0 %v3871_v40 }
0x13a8   :  { %4011 = vmatpush1.bf16.msra.mxu1 %v3868_v37  ;;  %4054 = vmatpush1.bf16.msra.mxu0 %v3870_v10 }
0x13a9   :  { %4082 = vmatprep.subr.bf16.mxu1 %v8679_v8  ;;  %4123 = vmatprep.subr.bf16.mxu0 %v8681_v53 }
0x13ab   :  { %4029 = vmatmul.mubr.bf16.vlgmr.msra.gmra.mrb[32].mxu1 %v3974_v47  ;;  %4072 = vmatmul.mubr.bf16.vlgmr.msra.gmra.mrb[16].mxu0 %v3974_v47 }
0x13ac   :  { %4083 = vmatpush1.bf16.msra.mxu1 %v8687_v25  ;;  %4124 = vmatpush1.bf16.msra.mxu0 %v8689_v58 }
0x13ad   :  { %4084 = vmatprep.subr.bf16.mxu1 %v8691_v41  ;;  %4125 = vmatprep.subr.bf16.mxu0 %v8693_v50 }
0x13ae   :  { %4114 = vmatprep.mubr.bf16.mxu1 %v5479_v61  ;;  %4155 = vmatprep.mubr.bf16.mxu0 %v5479_v61 }
0x13b0   :  { %4085 = vmatpush1.bf16.msra.mxu1 %v8699_v17  ;;  %4126 = vmatpush1.bf16.msra.mxu0 %v8701_v7 }
0x13b1   :  { %4086 = vmatprep.subr.bf16.mxu1 %v8703_v21  ;;  %4127 = vmatprep.subr.bf16.mxu0 %v8705_v51 }
0x13b4   :  { %4087 = vmatpush1.bf16.msra.mxu1 %v3881_v63  ;;  %4128 = vmatpush1.bf16.msra.mxu0 %v3883_v49 }
0x13b5   :  { %4088 = vmatprep.subr.bf16.mxu1 %v3886_v11  ;;  %4129 = vmatprep.subr.bf16.mxu0 %v3888_v9 }
0x13b8   :  { %4089 = vmatpush1.bf16.msra.mxu1 %v3885_v43  ;;  %4130 = vmatpush1.bf16.msra.mxu0 %v3887_v57 }
0x13b9   :  { %4090 = vmatprep.subr.bf16.mxu1 %v3890_v23  ;;  %4131 = vmatprep.subr.bf16.mxu0 %v3892_v0 }
0x13bc   :  { %4091 = vmatpush1.bf16.msra.mxu1 %v3889_v62  ;;  %4132 = vmatpush1.bf16.msra.mxu0 %v3891_v20 }
0x13bd   :  { %4092 = vmatprep.subr.bf16.mxu1 %v3894_v3  ;;  %4133 = vmatprep.subr.bf16.mxu0 %v3896_v29 }
0x13c0   :  { %4093 = vmatpush1.bf16.msra.mxu1 %v3893_v12  ;;  %4134 = vmatpush1.bf16.msra.mxu0 %v3895_v18 }
0x13c1   :  { %4094 = vmatprep.subr.bf16.mxu1 %v3898_v45  ;;  %4135 = vmatprep.subr.bf16.mxu0 %v3900_v1 }
0x13c4   :  { %4095 = vmatpush1.bf16.msra.mxu1 %v3897_v34  ;;  %4136 = vmatpush1.bf16.msra.mxu0 %v3899_v13 }
0x13c5   :  { %4096 = vmatprep.subr.bf16.mxu1 %v3902_v5  ;;  %4137 = vmatprep.subr.bf16.mxu0 %v3904_v56 }
0x13c8   :  { %4097 = vmatpush1.bf16.msra.mxu1 %v3901_v54  ;;  %4138 = vmatpush1.bf16.msra.mxu0 %v3903_v60 }
0x13c9   :  { %4193 = vmatprep.subr.bf16.mxu1 %v8679_v8  ;;  %4234 = vmatprep.subr.bf16.mxu0 %v8681_v53 }
0x13cb   :  { %4115 = vmatmul.mubr.bf16.vlgmr.msra.gmra.mrb[36].mxu1 %v5479_v61  ;;  %4156 = vmatmul.mubr.bf16.vlgmr.msra.gmra.mrb[20].mxu0 %v5479_v61 }
0x13cc   :  { %4194 = vmatpush1.bf16.msra.mxu1 %v8687_v25  ;;  %4235 = vmatpush1.bf16.msra.mxu0 %v8689_v58 }
0x13cd   :  { %4195 = vmatprep.subr.bf16.mxu1 %v8691_v41  ;;  %4236 = vmatprep.subr.bf16.mxu0 %v8693_v50 }
0x13ce   :  { %4225 = vmatprep.mubr.bf16.mxu1 %v5479_v61  ;;  %4266 = vmatprep.mubr.bf16.mxu0 %v5479_v61 }
0x13d0   :  { %4196 = vmatpush1.bf16.msra.mxu1 %v8699_v17  ;;  %4237 = vmatpush1.bf16.msra.mxu0 %v8701_v7 }
0x13d1   :  { %4197 = vmatprep.subr.bf16.mxu1 %v8703_v21  ;;  %4238 = vmatprep.subr.bf16.mxu0 %v8705_v51 }
0x13d4   :  { %4198 = vmatpush1.bf16.msra.mxu1 %v3881_v63  ;;  %4239 = vmatpush1.bf16.msra.mxu0 %v3883_v49 }
0x13d5   :  { %4199 = vmatprep.subr.bf16.mxu1 %v3886_v11  ;;  %4240 = vmatprep.subr.bf16.mxu0 %v3888_v9 }
0x13d8   :  { %4200 = vmatpush1.bf16.msra.mxu1 %v3885_v43  ;;  %4241 = vmatpush1.bf16.msra.mxu0 %v3887_v57 }
0x13d9   :  { %4201 = vmatprep.subr.bf16.mxu1 %v3890_v23  ;;  %4242 = vmatprep.subr.bf16.mxu0 %v3892_v0 }
0x13dc   :  { %4202 = vmatpush1.bf16.msra.mxu1 %v3889_v62  ;;  %4243 = vmatpush1.bf16.msra.mxu0 %v3891_v20 }
0x13dd   :  { %4203 = vmatprep.subr.bf16.mxu1 %v3894_v3  ;;  %4244 = vmatprep.subr.bf16.mxu0 %v3896_v29 }
0x13e0   :  { %4204 = vmatpush1.bf16.msra.mxu1 %v3893_v12  ;;  %4245 = vmatpush1.bf16.msra.mxu0 %v3895_v18 }
0x13e1   :  { %4205 = vmatprep.subr.bf16.mxu1 %v3898_v45  ;;  %4246 = vmatprep.subr.bf16.mxu0 %v3900_v1 }
0x13e4   :  { %4206 = vmatpush1.bf16.msra.mxu1 %v3897_v34  ;;  %4247 = vmatpush1.bf16.msra.mxu0 %v3899_v13 }
0x13e5   :  { %4207 = vmatprep.subr.bf16.mxu1 %v3902_v5  ;;  %4248 = vmatprep.subr.bf16.mxu0 %v3904_v56 }
0x13e8   :  { %4208 = vmatpush1.bf16.msra.mxu1 %v3901_v54  ;;  %4249 = vmatpush1.bf16.msra.mxu0 %v3903_v60  ;;  %v3907_v54 = vld [vmem:[#allocation2 + $0x208] sm:$0xff]  ;;  %v3909_v60 = vld [vmem:[#allocation2 + $0x218] sm:$0xff] }
0x13e9   :  { %4325 = vmatprep.subr.bf16.mxu1 %v3907_v54  ;;  %4368 = vmatprep.subr.bf16.mxu0 %v3909_v60 }
0x147e   :  { %v4030_v19 = vpop.f32.mrb[32].mxu1  ;;  %v4073_v26 = vpop.f32.mrb[16].mxu0 }
0x147f   :  { %v4032_v30 = vpop.f32.mrb[33].mxu1  ;;  %v4075_v48 = vpop.f32.mrb[17].mxu0  ;;  %v4031_v6 = vadd.f32 %v4030_v19, %v3979_v59  ;;  %v4074_v55 = vadd.f32 %v4073_v26, %v3987_v14  ;;  %v3910_v19 = vld [vmem:[#allocation2 + $0x220] sm:$0xff]  ;;  %v3912_v26 = vld [vmem:[#allocation2 + $0x230] sm:$0xff] }
0x1480   :  { %v4034_v15 = vpop.f32.mrb[34].mxu1  ;;  %v4077_v32 = vpop.f32.mrb[18].mxu0  ;;  %v4033_v16 = vadd.f32 %v4032_v30, %v3983_v31  ;;  %v4076_v2 = vadd.f32 %v4075_v48, %v3991_v44  ;;  %v3917_v30 = vld [vmem:[#allocation2 + $0x258] sm:$0xff]  ;;  %v3914_v48 = vld [vmem:[#allocation2 + $0x240] sm:$0xff] }
0x1481   :  { %v8744_v35 = vadd.f32 %v4034_v15, %v3979_v59  ;;  %v4036_v28 = vpop.f32.mrb[35].mxu1  ;;  %v8746_v33 = vadd.f32 %v4077_v32, %v3987_v14  ;;  %v4079_v39 = vpop.f32.mrb[19].mxu0  ;;  %v3911_v59 = vld [vmem:[#allocation2 + $0x228] sm:$0xff]  ;;  %v3913_v14 = vld [vmem:[#allocation2 + $0x238] sm:$0xff] }
0x1482   :  { %v8748_v46 = vadd.f32 %v4036_v28, %v3983_v31  ;;  %v8750_v42 = vadd.f32 %v4079_v39, %v3991_v44  ;;  %v3915_v44 = vld [vmem:[#allocation2 + $0x248] sm:$0xff]  ;;  %v3916_v31 = vld [vmem:[#allocation2 + $0x250] sm:$0xff]  ;;  %v3921_v32 = vld [vmem:[#allocation2 + $0x278] sm:$0xff] }
0x1483   :  { %v3919_v15 = vld [vmem:[#allocation2 + $0x268] sm:$0xff]  ;;  %v3918_v28 = vld [vmem:[#allocation2 + $0x260] sm:$0xff]  ;;  %v3920_v39 = vld [vmem:[#allocation2 + $0x270] sm:$0xff] }
0x149e   :  { %v4116_v40 = vpop.f32.mrb[36].mxu1  ;;  %v4157_v37 = vpop.f32.mrb[20].mxu0 }
0x149f   :  { %v4164_v10 = vadd.f32 %v4116_v40, %v4031_v6  ;;  %v4166_v8 = vadd.f32 %v4157_v37, %v4074_v55  ;;  %v4118_v53 = vpop.f32.mrb[37].mxu1  ;;  %v4159_v47 = vpop.f32.mrb[21].mxu0  ;;  %v3923_v6 = vld [vmem:[#allocation2 + $0x288] sm:$0xff]  ;;  %v3925_v55 = vld [vmem:[#allocation2 + $0x298] sm:$0xff] }
0x14a0   :  { %v4165_v25 = vadd.f32 %v4118_v53, %v4033_v16  ;;  %v4167_v58 = vadd.f32 %v4159_v47, %v4076_v2  ;;  %v4120_v41 = vpop.f32.mrb[38].mxu1  ;;  %v4161_v50 = vpop.f32.mrb[22].mxu0  ;;  %v3922_v16 = vld [vmem:[#allocation2 + $0x280] sm:$0xff]  ;;  %v3924_v2 = vld [vmem:[#allocation2 + $0x290] sm:$0xff]  ;;  %v3927_v40 = vld [vmem:[#allocation2 + $0x2a8] sm:$0xff] }
0x14a1   :  { %v4168_v17 = vsub.f32 0.0, %v4164_v10  ;;  %v4121_v7 = vpop.f32.mrb[39].mxu1  ;;  %v4162_v21 = vpop.f32.mrb[23].mxu0  ;;  %v3929_v37 = vld [vmem:[#allocation2 + $0x2b8] sm:$0xff]  ;;  %v3926_v10 = vld [vmem:[#allocation2 + $0x2a0] sm:$0xff]  ;;  %v3931_v53 = vld [vmem:[#allocation2 + $0x2c8] sm:$0xff] }
0x14a2   :  { %v4174_v51 = vsub.f32 0.0, %v4165_v25  ;;  %v4181_v11 = vsub.f32 0.0, %v4167_v58  ;;  %v3933_v47 = vld [vmem:[#allocation2 + $0x2d8] sm:$0xff]  ;;  %v3930_v25 = vld [vmem:[#allocation2 + $0x2c0] sm:$0xff]  ;;  %v3932_v58 = vld [vmem:[#allocation2 + $0x2d0] sm:$0xff] }
0x14a3   :  { %v4169_v63 = vmul.f32 1.442695, %v4168_v17  ;;  %v3935_v41 = vld [vmem:[#allocation2 + $0x2e8] sm:$0xff]  ;;  %v3937_v50 = vld [vmem:[#allocation2 + $0x2f8] sm:$0xff]  ;;  %v3934_v17 = vld [vmem:[#allocation2 + $0x2e0] sm:$0xff] }
0x14a4   :  { %v4175_v49 = vmul.f32 1.442695, %v4174_v51  ;;  %v4182_v9 = vmul.f32 1.442695, %v4181_v11  ;;  %v3936_v7 = vld [vmem:[#allocation2 + $0x2f0] sm:$0xff]  ;;  %v8761_v21 = vld [vmem:[#allocation2 + $0x308] sm:$0xff] }
0x14a5   :  { %5366 = vpow2.f32 %v4169_v63  ;;  %v8763_v51 = vld [vmem:[#allocation2 + $0x318] sm:$0xff] }
0x14a6   :  { %5368 = vpow2.f32 %v4175_v49 }
0x14a7   :  { %5370 = vpow2.f32 %v4182_v9 }
0x14a8   :  { %5372 = vtanh.f32 %v4166_v8  ;;  %v3928_v8 = vld [vmem:[#allocation2 + $0x2b0] sm:$0xff] }
0x14af   :  { %v5367_v43 = vpop.eup %5366 }
0x14b0   :  { %v5369_v57 = vpop.eup %5368  ;;  %v4171_v23 = vadd.f32 1.0, %v5367_v43 }
0x14b1   :  { %v4177_v0 = vadd.f32 1.0, %v5369_v57  ;;  %v5371_v62 = vpop.eup %5370 }
0x14b2   :  { %5374 = vrcp.f32 %v4171_v23  ;;  %v5373_v20 = vpop.eup %5372  ;;  %v4184_v18 = vadd.f32 1.0, %v5371_v62 }
0x14b3   :  { %5376 = vrcp.f32 %v4177_v0 }
0x14b4   :  { %5378 = vrcp.f32 %v4184_v18 }
0x14bc   :  { %v5375_v3 = vpop.eup %5374 }
0x14bd   :  { %v5377_v29 = vpop.eup %5376  ;;  %v4188_v12 = vmul.f32 %v5375_v3, %v5373_v20 }
0x14be   :  { %v4187_v45 = vmul.f32 0.0, %v5377_v29  ;;  %v5379_v34 = vpop.eup %5378 }
0x14c0   :  { %v8752_v1 = vadd.f32 %v4188_v12, %v4187_v45 }
0x14c2   :  { %5380 = vtanh.f32 %v8752_v1 }
0x14cc   :  { %v5381_v13 = vpop.eup %5380 }
0x14cd   :  { %v8755_v5 = vmul.f32 %v5381_v13, %v5379_v34 }
0x14cf   :  { %v4192_v56 = vpack.c.bf16 %v8755_v5, %v8755_v5 }
0x14d1   :  { %4226 = vmatmul.mubr.bf16.vlgmr.msra.gmra.mrb[40].mxu1 %v4192_v56  ;;  %4267 = vmatmul.mubr.bf16.vlgmr.msra.gmra.mrb[24].mxu0 %v4192_v56 }
0x14d2   :  { %4357 = vmatprep.mubr.bf16.mxu1 %v5479_v61  ;;  %4400 = vmatprep.mubr.bf16.mxu0 %v5479_v61 }
0x14d3   :  { %4326 = vmatpush1.bf16.msra.mxu1 %v3906_v38  ;;  %4369 = vmatpush1.bf16.msra.mxu0 %v3908_v4 }
0x14d4   :  { %4327 = vmatprep.subr.bf16.mxu1 %v3911_v59  ;;  %4370 = vmatprep.subr.bf16.mxu0 %v3913_v14 }
0x14d7   :  { %4328 = vmatpush1.bf16.msra.mxu1 %v3910_v19  ;;  %4371 = vmatpush1.bf16.msra.mxu0 %v3912_v26 }
0x14d8   :  { %4329 = vmatprep.subr.bf16.mxu1 %v3915_v44  ;;  %4372 = vmatprep.subr.bf16.mxu0 %v3917_v30 }
0x14db   :  { %4330 = vmatpush1.bf16.msra.mxu1 %v3914_v48  ;;  %4373 = vmatpush1.bf16.msra.mxu0 %v3916_v31 }
0x14dc   :  { %4331 = vmatprep.subr.bf16.mxu1 %v3919_v15  ;;  %4374 = vmatprep.subr.bf16.mxu0 %v3921_v32  ;;  %v8773_v15 = vld [vmem:[#allocation2 + $0x300] sm:$0xff]  ;;  %v8775_v32 = vld [vmem:[#allocation2 + $0x310] sm:$0xff] }
0x14df   :  { %4332 = vmatpush1.bf16.msra.mxu1 %v3918_v28  ;;  %4375 = vmatpush1.bf16.msra.mxu0 %v3920_v39  ;;  %v8777_v28 = vld [vmem:[#allocation2 + $0x328] sm:$0xff]  ;;  %v8779_v39 = vld [vmem:[#allocation2 + $0x338] sm:$0xff] }
0x14e0   :  { %4333 = vmatprep.subr.bf16.mxu1 %v3923_v6  ;;  %4376 = vmatprep.subr.bf16.mxu0 %v3925_v55  ;;  %v8789_v6 = vld [vmem:[#allocation2 + $0x348] sm:$0xff]  ;;  %v8791_v55 = vld [vmem:[#allocation2 + $0x358] sm:$0xff] }
0x14e3   :  { %4334 = vmatpush1.bf16.msra.mxu1 %v3922_v16  ;;  %4377 = vmatpush1.bf16.msra.mxu0 %v3924_v2  ;;  %v3947_v16 = vld [vmem:[#allocation2 + $0x340] sm:$0xff]  ;;  %v3949_v2 = vld [vmem:[#allocation2 + $0x350] sm:$0xff] }
0x14e4   :  { %4335 = vmatprep.subr.bf16.mxu1 %v3927_v40  ;;  %4378 = vmatprep.subr.bf16.mxu0 %v3929_v37  ;;  %v3952_v40 = vld [vmem:[#allocation2 + $0x368] sm:$0xff]  ;;  %v3954_v37 = vld [vmem:[#allocation2 + $0x378] sm:$0xff] }
0x14e7   :  { %4336 = vmatpush1.bf16.msra.mxu1 %v3926_v10  ;;  %4379 = vmatpush1.bf16.msra.mxu0 %v3928_v8  ;;  %v3951_v10 = vld [vmem:[#allocation2 + $0x360] sm:$0xff]  ;;  %v3953_v8 = vld [vmem:[#allocation2 + $0x370] sm:$0xff] }
0x14e8   :  { %4337 = vmatprep.subr.bf16.mxu1 %v3931_v53  ;;  %4380 = vmatprep.subr.bf16.mxu0 %v3933_v47  ;;  %v3956_v53 = vld [vmem:[#allocation2 + $0x388] sm:$0xff]  ;;  %v3958_v47 = vld [vmem:[#allocation2 + $0x398] sm:$0xff] }
0x14eb   :  { %4338 = vmatpush1.bf16.msra.mxu1 %v3930_v25  ;;  %4381 = vmatpush1.bf16.msra.mxu0 %v3932_v58  ;;  %v3955_v25 = vld [vmem:[#allocation2 + $0x380] sm:$0xff]  ;;  %v3957_v58 = vld [vmem:[#allocation2 + $0x390] sm:$0xff] }
0x14ec   :  { %4339 = vmatprep.subr.bf16.mxu1 %v3935_v41  ;;  %4382 = vmatprep.subr.bf16.mxu0 %v3937_v50  ;;  %v3960_v41 = vld [vmem:[#allocation2 + $0x3a8] sm:$0xff]  ;;  %v3962_v50 = vld [vmem:[#allocation2 + $0x3b8] sm:$0xff] }
0x14ef   :  { %4340 = vmatpush1.bf16.msra.mxu1 %v3934_v17  ;;  %4383 = vmatpush1.bf16.msra.mxu0 %v3936_v7  ;;  %v3959_v17 = vld [vmem:[#allocation2 + $0x3a0] sm:$0xff]  ;;  %v3961_v7 = vld [vmem:[#allocation2 + $0x3b0] sm:$0xff] }
0x14f0   :  { %4411 = vmatprep.subr.bf16.mxu1 %v8761_v21  ;;  %4452 = vmatprep.subr.bf16.mxu0 %v8763_v51 }
0x15a4   :  { %v4227_v63 = vpop.f32.mrb[40].mxu1  ;;  %v4268_v49 = vpop.f32.mrb[24].mxu0 }
0x15a5   :  { %v4275_v11 = vadd.f32 %v4227_v63, %v8744_v35  ;;  %v4277_v9 = vadd.f32 %v4268_v49, %v8746_v33  ;;  %v4229_v43 = vpop.f32.mrb[41].mxu1  ;;  %v4270_v57 = vpop.f32.mrb[25].mxu0  ;;  %v3964_v63 = vld [vmem:[#allocation2 + $0x3c8] sm:$0xff]  ;;  %v3966_v49 = vld [vmem:[#allocation2 + $0x3d8] sm:$0xff] }
0x15a6   :  { %v4276_v23 = vadd.f32 %v4229_v43, %v8748_v46  ;;  %v4278_v0 = vadd.f32 %v4270_v57, %v8750_v42  ;;  %v4231_v62 = vpop.f32.mrb[42].mxu1  ;;  %v4272_v20 = vpop.f32.mrb[26].mxu0  ;;  %v3968_v43 = vld [vmem:[#allocation2 + $0x3e8] sm:$0xff]  ;;  %v3970_v57 = vld [vmem:[#allocation2 + $0x3f8] sm:$0xff] }
0x15a7   :  { %v4279_v3 = vsub.f32 0.0, %v4275_v11  ;;  %v4232_v29 = vpop.f32.mrb[43].mxu1  ;;  %v4273_v12 = vpop.f32.mrb[27].mxu0  ;;  %v3963_v11 = vld [vmem:[#allocation2 + $0x3c0] sm:$0xff] }
0x15a8   :  { %v4285_v18 = vsub.f32 0.0, %v4276_v23  ;;  %v4292_v13 = vsub.f32 0.0, %v4278_v0  ;;  %v3967_v23 = vld [vmem:[#allocation2 + $0x3e0] sm:$0xff]  ;;  %v3969_v0 = vld [vmem:[#allocation2 + $0x3f0] sm:$0xff] }
0x15a9   :  { %v4280_v45 = vmul.f32 1.442695, %v4279_v3 }
0x15aa   :  { %v4286_v34 = vmul.f32 1.442695, %v4285_v18  ;;  %v4293_v35 = vmul.f32 1.442695, %v4292_v13 }
0x15ab   :  { %5382 = vpow2.f32 %v4280_v45 }
0x15ac   :  { %5384 = vpow2.f32 %v4286_v34 }
0x15ad   :  { %5386 = vpow2.f32 %v4293_v35 }
0x15ae   :  { %5388 = vtanh.f32 %v4277_v9  ;;  %v3965_v9 = vld [vmem:[#allocation2 + $0x3d0] sm:$0xff] }
0x15b5   :  { %v5383_v56 = vpop.eup %5382 }
0x15b6   :  { %v5385_v33 = vpop.eup %5384  ;;  %v4282_v54 = vadd.f32 1.0, %v5383_v56 }
0x15b7   :  { %v4288_v46 = vadd.f32 1.0, %v5385_v33  ;;  %v5387_v42 = vpop.eup %5386 }
0x15b8   :  { %5390 = vrcp.f32 %v4282_v54  ;;  %v5389_v60 = vpop.eup %5388  ;;  %v4295_v14 = vadd.f32 1.0, %v5387_v42 }
0x15b9   :  { %5392 = vrcp.f32 %v4288_v46 }
0x15ba   :  { %5394 = vrcp.f32 %v4295_v14 }
0x15c2   :  { %v5391_v38 = vpop.eup %5390 }
0x15c3   :  { %v5393_v4 = vpop.eup %5392  ;;  %v4299_v59 = vmul.f32 %v5391_v38, %v5389_v60 }
0x15c4   :  { %v4298_v19 = vmul.f32 %v5393_v4, %v8752_v1  ;;  %v5395_v44 = vpop.eup %5394  ;;  %v8785_v1 = vld [vmem:[#allocation2 + $0x320] sm:$0xff] }
0x15c6   :  { %v4300_v26 = vadd.f32 %v4299_v59, %v4298_v19 }
0x15c8   :  { %5396 = vtanh.f32 %v4300_v26 }
0x15d2   :  { %v5397_v30 = vpop.eup %5396 }
0x15d3   :  { %v4302_v48 = vmul.f32 %v5397_v30, %v5395_v44 }
0x15d5   :  { %v4303_v31 = vpack.c.bf16 %v4302_v48, %v8755_v5  ;;  %v8787_v5 = vld [vmem:[#allocation2 + $0x330] sm:$0xff] }
0x15d7   :  { %4358 = vmatmul.mubr.bf16.vlgmr.msra.gmra.mrb[44].mxu1 %v4303_v31  ;;  %4401 = vmatmul.mubr.bf16.vlgmr.msra.gmra.mrb[28].mxu0 %v4303_v31 }
0x15d8   :  { %4412 = vmatpush1.bf16.msra.mxu1 %v8773_v15  ;;  %4453 = vmatpush1.bf16.msra.mxu0 %v8775_v32 }
0x15d9   :  { %4413 = vmatprep.subr.bf16.mxu1 %v8777_v28  ;;  %4454 = vmatprep.subr.bf16.mxu0 %v8779_v39 }
0x15da   :  { %4443 = vmatprep.mubr.bf16.mxu1 %v5479_v61  ;;  %4484 = vmatprep.mubr.bf16.mxu0 %v5479_v61 }
0x15dc   :  { %4414 = vmatpush1.bf16.msra.mxu1 %v8785_v1  ;;  %4455 = vmatpush1.bf16.msra.mxu0 %v8787_v5 }
0x15dd   :  { %4415 = vmatprep.subr.bf16.mxu1 %v8789_v6  ;;  %4456 = vmatprep.subr.bf16.mxu0 %v8791_v55 }
0x15e0   :  { %4416 = vmatpush1.bf16.msra.mxu1 %v3947_v16  ;;  %4457 = vmatpush1.bf16.msra.mxu0 %v3949_v2 }
0x15e1   :  { %4417 = vmatprep.subr.bf16.mxu1 %v3952_v40  ;;  %4458 = vmatprep.subr.bf16.mxu0 %v3954_v37 }
0x15e4   :  { %4418 = vmatpush1.bf16.msra.mxu1 %v3951_v10  ;;  %4459 = vmatpush1.bf16.msra.mxu0 %v3953_v8 }
0x15e5   :  { %4419 = vmatprep.subr.bf16.mxu1 %v3956_v53  ;;  %4460 = vmatprep.subr.bf16.mxu0 %v3958_v47 }
0x15e8   :  { %4420 = vmatpush1.bf16.msra.mxu1 %v3955_v25  ;;  %4461 = vmatpush1.bf16.msra.mxu0 %v3957_v58 }
0x15e9   :  { %4421 = vmatprep.subr.bf16.mxu1 %v3960_v41  ;;  %4462 = vmatprep.subr.bf16.mxu0 %v3962_v50 }
0x15ec   :  { %4422 = vmatpush1.bf16.msra.mxu1 %v3959_v17  ;;  %4463 = vmatpush1.bf16.msra.mxu0 %v3961_v7 }
0x15ed   :  { %4423 = vmatprep.subr.bf16.mxu1 %v3964_v63  ;;  %4464 = vmatprep.subr.bf16.mxu0 %v3966_v49 }
0x15f0   :  { %4424 = vmatpush1.bf16.msra.mxu1 %v3963_v11  ;;  %4465 = vmatpush1.bf16.msra.mxu0 %v3965_v9 }
0x15f1   :  { %4425 = vmatprep.subr.bf16.mxu1 %v3968_v43  ;;  %4466 = vmatprep.subr.bf16.mxu0 %v3970_v57 }
0x15f4   :  { %4426 = vmatpush1.bf16.msra.mxu1 %v3967_v23  ;;  %4467 = vmatpush1.bf16.msra.mxu0 %v3969_v0 }
0x15f5   :  { %4522 = vmatprep.subr.bf16.mxu1 %v8761_v21  ;;  %4563 = vmatprep.subr.bf16.mxu0 %v8763_v51 }
0x15f7   :  { %4444 = vmatmul.mubr.bf16.vlgmr.msra.gmra.mrb[48].mxu1 %v5479_v61  ;;  %4485 = vmatmul.mubr.bf16.vlgmr.msra.gmra.mrb[32].mxu0 %v5479_v61 }
0x15f8   :  { %4523 = vmatpush1.bf16.msra.mxu1 %v8773_v15  ;;  %4564 = vmatpush1.bf16.msra.mxu0 %v8775_v32 }
0x15f9   :  { %4524 = vmatprep.subr.bf16.mxu1 %v8777_v28  ;;  %4565 = vmatprep.subr.bf16.mxu0 %v8779_v39 }
0x15fa   :  { %4554 = vmatprep.mubr.bf16.mxu1 %v5479_v61  ;;  %4595 = vmatprep.mubr.bf16.mxu0 %v5479_v61  ;;  %v5023_v61 = vld [vmem:[%s9614_s10 + $0x1] ss:$2 sm:$0xf] }
0x15fb   :  { %v4308_v62 = vrot.slane %v5023_v61, %v3978_v22  ;;  %v4316_v20 = vrot.slane %v5023_v61, %v3986_v24  ;;  %v4312_v12 = vrot.slane %v5023_v61, %v3982_v27  ;;  %v4320_v18 = vrot.slane %v5023_v61, %v3990_v36 }
0x15fc   :  { %4525 = vmatpush1.bf16.msra.mxu1 %v8785_v1  ;;  %4566 = vmatpush1.bf16.msra.mxu0 %v8787_v5 }
0x15fd   :  { %4526 = vmatprep.subr.bf16.mxu1 %v8789_v6  ;;  %4567 = vmatprep.subr.bf16.mxu0 %v8791_v55 }
0x1600   :  { %4527 = vmatpush1.bf16.msra.mxu1 %v3947_v16  ;;  %4568 = vmatpush1.bf16.msra.mxu0 %v3949_v2 }
0x1601   :  { %4528 = vmatprep.subr.bf16.mxu1 %v3952_v40  ;;  %4569 = vmatprep.subr.bf16.mxu0 %v3954_v37 }
0x1604   :  { %4529 = vmatpush1.bf16.msra.mxu1 %v3951_v10  ;;  %4570 = vmatpush1.bf16.msra.mxu0 %v3953_v8 }
0x1605   :  { %4530 = vmatprep.subr.bf16.mxu1 %v3956_v53  ;;  %4571 = vmatprep.subr.bf16.mxu0 %v3958_v47 }
0x1608   :  { %4531 = vmatpush1.bf16.msra.mxu1 %v3955_v25  ;;  %4572 = vmatpush1.bf16.msra.mxu0 %v3957_v58 }
0x1609   :  { %4532 = vmatprep.subr.bf16.mxu1 %v3960_v41  ;;  %4573 = vmatprep.subr.bf16.mxu0 %v3962_v50 }
0x160c   :  { %4533 = vmatpush1.bf16.msra.mxu1 %v3959_v17  ;;  %4574 = vmatpush1.bf16.msra.mxu0 %v3961_v7 }
0x160d   :  { %4534 = vmatprep.subr.bf16.mxu1 %v3964_v63  ;;  %4575 = vmatprep.subr.bf16.mxu0 %v3966_v49 }
0x1610   :  { %4535 = vmatpush1.bf16.msra.mxu1 %v3963_v11  ;;  %4576 = vmatpush1.bf16.msra.mxu0 %v3965_v9 }
0x1611   :  { %4536 = vmatprep.subr.bf16.mxu1 %v3968_v43  ;;  %4577 = vmatprep.subr.bf16.mxu0 %v3970_v57 }
0x1614   :  { %4537 = vmatpush1.bf16.msra.mxu1 %v3967_v23  ;;  %4578 = vmatpush1.bf16.msra.mxu0 %v3969_v0 }
0x16aa   :  { %v4359_v21 = vpop.f32.mrb[44].mxu1  ;;  %v4402_v51 = vpop.f32.mrb[28].mxu0 }
0x16ab   :  { %v4361_v3 = vpop.f32.mrb[45].mxu1  ;;  %v4404_v29 = vpop.f32.mrb[29].mxu0  ;;  %v4360_v22 = vadd.f32 %v4359_v21, %v4308_v62  ;;  %v4403_v42 = vadd.f32 %v4402_v51, %v4316_v20 }
0x16ac   :  { %v4363_v45 = vpop.f32.mrb[46].mxu1  ;;  %v4406_v34 = vpop.f32.mrb[30].mxu0  ;;  %v4362_v60 = vadd.f32 %v4361_v3, %v4312_v12  ;;  %v4405_v24 = vadd.f32 %v4404_v29, %v4320_v18 }
0x16ad   :  { %v4364_v13 = vadd.f32 %v4363_v45, %v4308_v62  ;;  %v4407_v35 = vadd.f32 %v4406_v34, %v4316_v20  ;;  %v4365_v56 = vpop.f32.mrb[47].mxu1  ;;  %v4408_v33 = vpop.f32.mrb[31].mxu0 }
0x16ae   :  { %v4366_v54 = vadd.f32 %v4365_v56, %v4312_v12  ;;  %v4409_v46 = vadd.f32 %v4408_v33, %v4320_v18 }
0x16ca   :  { %v4445_v38 = vpop.f32.mrb[48].mxu1  ;;  %v4486_v4 = vpop.f32.mrb[32].mxu0 }
0x16cb   :  { %v4493_v59 = vadd.f32 %v4445_v38, %v4360_v22  ;;  %v4495_v14 = vadd.f32 %v4486_v4, %v4403_v42  ;;  %v4447_v27 = vpop.f32.mrb[49].mxu1  ;;  %v4488_v19 = vpop.f32.mrb[33].mxu0 }
0x16cc   :  { %v4494_v52 = vadd.f32 %v4447_v27, %v4362_v60  ;;  %v4496_v36 = vadd.f32 %v4488_v19, %v4405_v24  ;;  %v4449_v26 = vpop.f32.mrb[50].mxu1  ;;  %v4490_v44 = vpop.f32.mrb[34].mxu0 }
0x16cd   :  { %v4497_v30 = vsub.f32 0.0, %v4493_v59  ;;  %v4450_v48 = vpop.f32.mrb[51].mxu1  ;;  %v4491_v31 = vpop.f32.mrb[35].mxu0 }
0x16ce   :  { %v4503_v15 = vsub.f32 0.0, %v4494_v52  ;;  %v4510_v39 = vsub.f32 0.0, %v4496_v36 }
0x16cf   :  { %v4498_v32 = vmul.f32 1.442695, %v4497_v30 }
0x16d0   :  { %v4504_v28 = vmul.f32 1.442695, %v4503_v15  ;;  %v4511_v1 = vmul.f32 1.442695, %v4510_v39 }
0x16d1   :  { %5398 = vpow2.f32 %v4498_v32 }
0x16d2   :  { %5400 = vpow2.f32 %v4504_v28 }
0x16d3   :  { %5402 = vpow2.f32 %v4511_v1 }
0x16d4   :  { %5404 = vtanh.f32 %v4495_v14 }
0x16db   :  { %v5399_v5 = vpop.eup %5398 }
0x16dc   :  { %v5401_v6 = vpop.eup %5400  ;;  %v4500_v55 = vadd.f32 1.0, %v5399_v5 }
0x16dd   :  { %v4506_v16 = vadd.f32 1.0, %v5401_v6  ;;  %v5403_v2 = vpop.eup %5402 }
0x16de   :  { %5406 = vrcp.f32 %v4500_v55  ;;  %v5405_v40 = vpop.eup %5404  ;;  %v4513_v53 = vadd.f32 1.0, %v5403_v2 }
0x16df   :  { %5408 = vrcp.f32 %v4506_v16 }
0x16e0   :  { %5410 = vrcp.f32 %v4513_v53 }
0x16e8   :  { %v5407_v37 = vpop.eup %5406 }
0x16e9   :  { %v5409_v10 = vpop.eup %5408  ;;  %v4517_v8 = vmul.f32 %v5407_v37, %v5405_v40 }
0x16ea   :  { %v4516_v47 = vmul.f32 0.0, %v5409_v10  ;;  %v5411_v58 = vpop.eup %5410 }
0x16ec   :  { %v4518_v25 = vadd.f32 %v4517_v8, %v4516_v47 }
0x16ee   :  { %5412 = vtanh.f32 %v4518_v25 }
0x16f8   :  { %v5413_v41 = vpop.eup %5412 }
0x16f9   :  { %v4520_v50 = vmul.f32 %v5413_v41, %v5411_v58 }
0x16fb   :  { %v4521_v17 = vpack.c.bf16 %v4520_v50, %v4520_v50 }
0x16fd   :  { %4555 = vmatmul.mubr.bf16.vlgmr.msra.gmra.mrb[52].mxu1 %v4521_v17  ;;  %4596 = vmatmul.mubr.bf16.vlgmr.msra.gmra.mrb[36].mxu0 %v4521_v17 }
0x17d0   :  { %v4556_v7 = vpop.f32.mrb[52].mxu1  ;;  %v4597_v63 = vpop.f32.mrb[36].mxu0 }
0x17d1   :  { %v4604_v49 = vadd.f32 %v4556_v7, %v4364_v13  ;;  %v4606_v11 = vadd.f32 %v4597_v63, %v4407_v35  ;;  %v4558_v9 = vpop.f32.mrb[53].mxu1  ;;  %v4599_v43 = vpop.f32.mrb[37].mxu0 }
0x17d2   :  { %v4605_v57 = vadd.f32 %v4558_v9, %v4366_v54  ;;  %v4607_v23 = vadd.f32 %v4599_v43, %v4409_v46  ;;  %v4560_v0 = vpop.f32.mrb[54].mxu1  ;;  %v4601_v61 = vpop.f32.mrb[38].mxu0 }
0x17d3   :  { %v4608_v21 = vsub.f32 0.0, %v4604_v49  ;;  %v4561_v51 = vpop.f32.mrb[55].mxu1  ;;  %v4602_v62 = vpop.f32.mrb[39].mxu0 }
0x17d4   :  { %v4614_v20 = vsub.f32 0.0, %v4605_v57  ;;  %v4621_v12 = vsub.f32 0.0, %v4607_v23 }
0x17d5   :  { %v4609_v3 = vmul.f32 1.442695, %v4608_v21 }
0x17d6   :  { %v4615_v29 = vmul.f32 1.442695, %v4614_v20  ;;  %v4622_v18 = vmul.f32 1.442695, %v4621_v12 }
0x17d7   :  { %5414 = vpow2.f32 %v4609_v3 }
0x17d8   :  { %5416 = vpow2.f32 %v4615_v29 }
0x17d9   :  { %5418 = vpow2.f32 %v4622_v18 }
0x17da   :  { %5420 = vtanh.f32 %v4606_v11 }
0x17e1   :  { %v5415_v45 = vpop.eup %5414 }
0x17e2   :  { %v5417_v34 = vpop.eup %5416  ;;  %v4611_v13 = vadd.f32 1.0, %v5415_v45 }
0x17e3   :  { %v4617_v35 = vadd.f32 1.0, %v5417_v34  ;;  %v5419_v56 = vpop.eup %5418 }
0x17e4   :  { %5422 = vrcp.f32 %v4611_v13  ;;  %v5421_v33 = vpop.eup %5420  ;;  %v4624_v42 = vadd.f32 1.0, %v5419_v56 }
0x17e5   :  { %5424 = vrcp.f32 %v4617_v35 }
0x17e6   :  { %5426 = vrcp.f32 %v4624_v42 }
0x17ee   :  { %v5423_v54 = vpop.eup %5422 }
0x17ef   :  { %v5425_v46 = vpop.eup %5424  ;;  %v4628_v22 = vmul.f32 %v5423_v54, %v5421_v33 }
0x17f0   :  { %v4627_v60 = vmul.f32 %v5425_v46, %v4518_v25  ;;  %v5427_v38 = vpop.eup %5426 }
0x17f2   :  { %v4629_v24 = vadd.f32 %v4628_v22, %v4627_v60 }
0x17f4   :  { %5428 = vtanh.f32 %v4629_v24 }
0x17fe   :  { %v5429_v4 = vpop.eup %5428 }
0x17ff   :  { %v4631_v59 = vmul.f32 %v5429_v4, %v5427_v38 }
0x1801   :  { %v4633_v14 = vadd.f32 %v4631_v59, %v4520_v50 }
0x1803   :  { %v4634_v27 = vmul.f32 0.5, %v4633_v14 }
0x1805   :  { %4635 = vst [vmem:[#allocation7] sm:$0xff] %v4634_v27 }
0x1806   :  { %5453 = shalt.err (!%p5450_p9)
}
0x1807   :  { %s9615_s28 = sld [smem:[#allocation122_spill]] }
0x180d   :  { %s5454_s6 = scalar_lea.hbm %s9615_s28, 128 }
0x180e   :  { %p5455_p10 = scmp.ne.s32.totalorder %s9615_s28, %s5454_s6  ;;  %p5458_p11 = scmp.lt.u32.totalorder %s5454_s6, %s9615_s28 }
0x1810   :  { %p5460_p12 = pnand %p5458_p11, %p5455_p10 }
0x1812   :  { %5463 = shalt.err (!%p5460_p12)
}
0x1813   :  { %4645 = dma.vmem_to_hbm [thread:$0]  %s4643_s18, 128, %s9615_s28, [#allocation5]  }
0x1814   :  { %5468 = dma.done.wait [#allocation5], 128  }
0x1815   :  { %5469 = vsyncadd [#allocation5], 4294967168 }
0x1816   :  { %4649 = vsyncpa [#allocation5], 1 }
0x1817   :  { %4650 = vsyncpa [#allocation6], 1 }
0x1818   :  { %4651 = vsyncmov [#allocation3] }
0x181b   :  { %s4652_s24 = vpop.sfrf %4651 }
0x181c   :  { %p5024_p13 = scmp.ne.s32.totalorder %s4652_s24, 0 }
0x181e   :  { %4656 = shalt.err (%p5024_p13)  }

</bundles_post_ra>
